<compile_context>
chip_gen: v6e
topology: v6e:2x2x1
jax: 0.10.0
libtpu: 0.0.40
codegen_flags: <defaults>
</compile_context>

<pallas_src>
import math
from functools import partial
from math import ceil

import numpy as np
import jax
import jax.numpy as jnp
from jax.experimental import pallas as pl
from jax.experimental.pallas import tpu as pltpu

# ------------------------- configuration (small) -------------------------
INPUT_DIM = 32          # C
WINDOW_SIZE = 2         # W
NUM_FRAME_QUERIES = 8   # fQ
NUM_QUERIES = 8         # Q
NHEADS = 4
DIM_FEEDFORWARD = 64
ENC_LAYERS = 2
DEC_LAYERS = 2
LN_EPS = 1e-5
# PyTorch fills the key-padding mask with -inf; -1e9 underflows to exactly 0
# after exp() in f32, and pad < window_size guarantees no fully-masked row,
# so results match.  (The shifted-window mask keeps the reference's -1000.)
NEG_INF = -1e9


# --------------------------- in-kernel helpers -----------------------------
def _layernorm_rows(y, g, b):
    mu = jnp.mean(y, axis=-1, keepdims=True)
    d = y - mu
    var = jnp.mean(d * d, axis=-1, keepdims=True)
    return d * jax.lax.rsqrt(var + LN_EPS) * g + b


def _mha_accum(q, k, v, wo, bo, mask, nheads):
    """All-head attention, accumulating each head through the out-projection.

    q:(Lq,C) k/v:(Lk,C) wo:(C,C) bo:(1,C) mask:(Lq,Lk)|None.
    The 1/sqrt(d_h) scale is already folded into the Q projection weights.
    """
    lq, c = q.shape
    dh = c // nheads
    acc = jnp.zeros((lq, c), jnp.float32) + bo
    for h in range(nheads):                        # static unroll (4 heads)
        lo, hi = h * dh, (h + 1) * dh
        # contract last dims directly — no explicit k transpose.
        s = jax.lax.dot_general(q[:, lo:hi], k[:, lo:hi],
                                (((1,), (1,)), ((), ())),
                                preferred_element_type=jnp.float32)
        if mask is not None:
            s = s + mask
        s = s - jnp.max(s, axis=-1, keepdims=True)
        p = jnp.exp(s)
        p = p * pl.reciprocal(jnp.sum(p, axis=-1, keepdims=True), approx=False)
        oh = jnp.dot(p, v[:, lo:hi], preferred_element_type=jnp.float32)
        acc = acc + jnp.dot(oh, wo[lo:hi, :], preferred_element_type=jnp.float32)
    return acc


# ----------------------- fully fused MTI kernel ----------------------------
def _mti_kernel(nheads, enc_layers, dec_layers, T, fQ, *refs):
    (x_ref, me_ref, mo_ref, qf_ref, qe_ref, pos_ref) = refs[:6]
    (e_wqkv, e_bqkv, e_wo, e_bo, e_g1, e_bb1,
     e_w1, e_fb1, e_w2, e_fb2, e_g2, e_bb2) = refs[6:18]
    (ca_wq, ca_bq, ca_wk, ca_bk, ca_wv, ca_bv, ca_wo, ca_bo, ca_g, ca_b,
     sa_wqk, sa_bqk, sa_wv, sa_bv, sa_wo, sa_bo, sa_g, sa_b,
     f_w1, f_b1, f_w2, f_b2, f_g, f_b, dn_g, dn_b) = refs[18:44]
    o_ref = refs[44]

    c = x_ref.shape[-1]
    x = x_ref[0].astype(jnp.float32)                     # (_T*fQ, C) slab
    masks = (me_ref[...], mo_ref[...])                   # block-diag additive

    # ------------------------------ encoder ------------------------------
    for i in range(enc_layers):                          # static unroll
        m = masks[i % 2]                                 # even: window, odd: shifted
        qkv = (jnp.dot(x, e_wqkv[i], preferred_element_type=jnp.float32)
               + e_bqkv[i])
        a = _mha_accum(qkv[:, :c], qkv[:, c:2 * c], qkv[:, 2 * c:],
                       e_wo[i], e_bo[i], m, nheads)
        y = _layernorm_rows(x + a, e_g1[i], e_bb1[i])
        h = jnp.maximum(
            jnp.dot(y, e_w1[i], preferred_element_type=jnp.float32) + e_fb1[i],
            0.0)
        x = _layernorm_rows(
            y + jnp.dot(h, e_w2[i], preferred_element_type=jnp.float32) + e_fb2[i],
            e_g2[i], e_bb2[i])

    # ------------------------------ decoder ------------------------------
    src = x[:T * fQ, :]                                  # drop padded frames
    pos = pos_ref[...].astype(jnp.float32)               # (fQ, C)
    kin = src + jnp.concatenate([pos] * T, axis=0)       # memory + fq_pos
    out = qf_ref[...].astype(jnp.float32)                # (Q, C) query_feat
    qe = qe_ref[...].astype(jnp.float32)                 # (Q, C) query_pos

    for i in range(dec_layers):                          # static unroll
        # cross attention: q = out + qe, k = src + pos, v = src
        qx = jnp.dot(out + qe, ca_wq[i], preferred_element_type=jnp.float32) + ca_bq[i]
        kx = jnp.dot(kin, ca_wk[i], preferred_element_type=jnp.float32) + ca_bk[i]
        vx = jnp.dot(src, ca_wv[i], preferred_element_type=jnp.float32) + ca_bv[i]
        a = _mha_accum(qx, kx, vx, ca_wo[i], ca_bo[i], None, nheads)
        out = _layernorm_rows(out + a, ca_g[i], ca_b[i])

        # self attention: q = k = out + qe, v = out (fused QK projection)
        qk = jnp.dot(out + qe, sa_wqk[i], preferred_element_type=jnp.float32) + sa_bqk[i]
        vs = jnp.dot(out, sa_wv[i], preferred_element_type=jnp.float32) + sa_bv[i]
        a = _mha_accum(qk[:, :c], qk[:, c:], vs, sa_wo[i], sa_bo[i], None, nheads)
        out = _layernorm_rows(out + a, sa_g[i], sa_b[i])

        # FFN
        h = jnp.maximum(
            jnp.dot(out, f_w1[i], preferred_element_type=jnp.float32) + f_b1[i],
            0.0)
        out = _layernorm_rows(
            out + jnp.dot(h, f_w2[i], preferred_element_type=jnp.float32) + f_b2[i],
            f_g[i], f_b[i])

    # final decoder LayerNorm (eval: only last layer's output is returned)
    o_ref[0] = _layernorm_rows(out, dn_g[...], dn_b[...]).astype(o_ref.dtype)


_ENC_NAMES = ["wqkv", "bqkv", "wo", "bo", "ln1_g", "ln1_b",
              "w1", "b1", "w2", "b2", "ln2_g", "ln2_b"]
_DEC_NAMES = ["ca_wq", "ca_bq", "ca_wk", "ca_bk", "ca_wv", "ca_bv", "ca_wo",
              "ca_bo", "ca_g", "ca_b",
              "sa_wqk", "sa_bqk", "sa_wv", "sa_bv", "sa_wo", "sa_bo", "sa_g",
              "sa_b",
              "f_w1", "f_b1", "f_w2", "f_b2", "f_g", "f_b", "dn_g", "dn_b"]


def mti_fused(x, m_even, m_odd, packed, T, fQ):
    """x: (LB, _T*fQ, C).  Returns (LB, Q, C)."""
    lb, s_all, c = x.shape
    q = packed["query_feat"].shape[0]
    args = ([m_even, m_odd, packed["query_feat"], packed["query_embed"],
             packed["fq_pos"]]
            + [packed["enc"][n] for n in _ENC_NAMES]
            + [packed["dec"][n] for n in _DEC_NAMES])

    def shared(a):
        nd = a.ndim
        return pl.BlockSpec(a.shape, lambda b, _nd=nd: (0,) * _nd)

    return pl.pallas_call(
        partial(_mti_kernel, NHEADS, ENC_LAYERS, DEC_LAYERS, T, fQ),
        out_shape=jax.ShapeDtypeStruct((lb, q, c), jnp.float32),
        grid=(lb,),
        in_specs=[pl.BlockSpec((1, s_all, c), lambda b: (b, 0, 0))]
                 + [shared(a) for a in args],
        out_specs=pl.BlockSpec((1, q, c), lambda b: (b, 0, 0)),
        compiler_params=pltpu.CompilerParams(dimension_semantics=("parallel",)),
    )(x, *args)


# ------------------------- static mask construction ------------------------
def _build_masks(T, pad, W, fQ):
    """Two (_T*fQ, _T*fQ) additive masks (numpy, trace-time constants).

    Even layers: plain window attention + key-padding.
    Odd layers : shifted-window attention, expressed directly in UN-rolled
    coordinates (equivalent to roll -> window attn -> roll back, since every
    other op is row-wise), so no in-kernel roll is needed.
    """
    _T = T + pad
    S = _T * fQ
    if W == 0:
        z = np.zeros((S, S), np.float32)
        return jnp.asarray(z), jnp.asarray(z)

    Nw = _T // W
    half_W = int(ceil(W / 2))
    t = np.arange(_T)

    # ---- even layers: window-block-diagonal + padded keys masked ----
    win = t // W
    same_win = win[:, None] == win[None, :]
    key_pad = (t >= T)[None, :]
    m_even = np.where(same_win & ~key_pad, 0.0, NEG_INF)

    # ---- odd layers: PyTorch shifted-window mask in un-rolled coordinates ----
    r = (t + half_W) % _T                      # rolled position of time t
    rw, wp = r // W, r % W                     # rolled window id / offset
    qpad = t >= T                              # pad flag of a row (query or key)
    m = np.broadcast_to(qpad[:, None], (_T, _T)).copy()       # query padded
    edge_q = (rw == 0) | (rw == Nw - 1)
    m |= edge_q[:, None] & qpad[None, :]       # edge windows: also mask padded keys
    in0 = rw == 0
    first_half = wp < half_W
    m |= (in0[:, None] & in0[None, :]) & (first_half[:, None] != first_half[None, :])
    same_rw = rw[:, None] == rw[None, :]
    m_odd = np.where(same_rw, m.astype(np.float32) * -1000.0, NEG_INF)

    def expand(mt):                            # time-level -> (t, fq) granularity
        return np.repeat(np.repeat(mt, fQ, axis=0), fQ, axis=1).astype(np.float32)

    return jnp.asarray(expand(m_even)), jnp.asarray(expand(m_odd))


# ------------------------------- MTI forward -------------------------------
def mti_forward(frame_query, packed):
    # frame_query: (L, T, B, NQ, C); eval keeps only the last layer.
    frame_query = frame_query[-1:]
    L, T, B, NQ, C = frame_query.shape
    LB = L * B
    W = WINDOW_SIZE

    fq = frame_query.reshape(LB, T, NQ, C)                 # matches torch reshape
    pad = (int(ceil(T / W)) * W - T) if W > 0 else 0
    assert W == 0 or pad < W                               # no fully-masked key row
    if pad:
        fq = jnp.pad(fq, ((0, 0), (0, pad), (0, 0), (0, 0)))
    _T = T + pad
    x = fq.reshape(LB, _T * NQ, C)                         # rows ordered (t, fq)

    m_even, m_odd = _build_masks(T, pad, W, NQ)            # static constants
    dec_out = mti_fused(x, m_even, m_odd, packed, T, NQ)   # (LB, Q, C)
    return dec_out.reshape(L, B, NUM_QUERIES, C)


# ------------------------------ parameter init -----------------------------
def _uniform(key, shape, scale):
    return jax.random.uniform(key, shape, jnp.float32, -scale, scale)


def init_mha_params(key, c):
    ks = jax.random.split(key, 4)
    s = 1.0 / math.sqrt(c)
    return dict(
        wq=_uniform(ks[0], (c, c), s), bq=jnp.zeros((c,), jnp.float32),
        wk=_uniform(ks[1], (c, c), s), bk=jnp.zeros((c,), jnp.float32),
        wv=_uniform(ks[2], (c, c), s), bv=jnp.zeros((c,), jnp.float32),
        wo=_uniform(ks[3], (c, c), s), bo=jnp.zeros((c,), jnp.float32),
        ln_g=jnp.ones((c,), jnp.float32), ln_b=jnp.zeros((c,), jnp.float32),
    )


def init_ffn_params(key, c, f):
    k1, k2 = jax.random.split(key)
    return dict(
        w1=_uniform(k1, (c, f), 1.0 / math.sqrt(c)),
        b1=jnp.zeros((f,), jnp.float32),
        w2=_uniform(k2, (f, c), 1.0 / math.sqrt(f)),
        b2=jnp.zeros((c,), jnp.float32),
        ln_g=jnp.ones((c,), jnp.float32), ln_b=jnp.zeros((c,), jnp.float32),
    )


def init_params(key):
    c, f = INPUT_DIM, DIM_FEEDFORWARD
    keys = iter(jax.random.split(key, 64))
    return dict(
        fq_pos=jax.random.normal(next(keys), (NUM_FRAME_QUERIES, c), jnp.float32),
        query_embed=jax.random.normal(next(keys), (NUM_QUERIES, c), jnp.float32),
        query_feat=jax.random.normal(next(keys), (NUM_QUERIES, c), jnp.float32),
        dec_norm_g=jnp.ones((c,), jnp.float32),
        dec_norm_b=jnp.zeros((c,), jnp.float32),
        enc_self=[init_mha_params(next(keys), c) for _ in range(ENC_LAYERS)],
        enc_ffn=[init_ffn_params(next(keys), c, f) for _ in range(ENC_LAYERS)],
        dec_self=[init_mha_params(next(keys), c) for _ in range(DEC_LAYERS)],
        dec_cross=[init_mha_params(next(keys), c) for _ in range(DEC_LAYERS)],
        dec_ffn=[init_ffn_params(next(keys), c, f) for _ in range(DEC_LAYERS)],
    )


def pack_params(p):
    """Fuse QKV, fold the attention scale into Q weights, stack per-layer."""
    c = INPUT_DIM
    scale = 1.0 / math.sqrt(c // NHEADS)

    es, ef = p["enc_self"], p["enc_ffn"]
    enc = dict(
        wqkv=jnp.stack([jnp.concatenate([a["wq"] * scale, a["wk"], a["wv"]], axis=1)
                        for a in es]),
        bqkv=jnp.stack([jnp.concatenate([a["bq"] * scale, a["bk"], a["bv"]]
                                        ).reshape(1, 3 * c) for a in es]),
        wo=jnp.stack([a["wo"] for a in es]),
        bo=jnp.stack([a["bo"].reshape(1, c) for a in es]),
        ln1_g=jnp.stack([a["ln_g"].reshape(1, c) for a in es]),
        ln1_b=jnp.stack([a["ln_b"].reshape(1, c) for a in es]),
        w1=jnp.stack([f["w1"] for f in ef]),
        b1=jnp.stack([f["b1"].reshape(1, -1) for f in ef]),
        w2=jnp.stack([f["w2"] for f in ef]),
        b2=jnp.stack([f["b2"].reshape(1, c) for f in ef]),
        ln2_g=jnp.stack([f["ln_g"].reshape(1, c) for f in ef]),
        ln2_b=jnp.stack([f["ln_b"].reshape(1, c) for f in ef]),
    )

    ca, sa, ff = p["dec_cross"], p["dec_self"], p["dec_ffn"]
    dec = dict(
        ca_wq=jnp.stack([a["wq"] * scale for a in ca]),
        ca_bq=jnp.stack([(a["bq"] * scale).reshape(1, c) for a in ca]),
        ca_wk=jnp.stack([a["wk"] for a in ca]),
        ca_bk=jnp.stack([a["bk"].reshape(1, c) for a in ca]),
        ca_wv=jnp.stack([a["wv"] for a in ca]),
        ca_bv=jnp.stack([a["bv"].reshape(1, c) for a in ca]),
        ca_wo=jnp.stack([a["wo"] for a in ca]),
        ca_bo=jnp.stack([a["bo"].reshape(1, c) for a in ca]),
        ca_g=jnp.stack([a["ln_g"].reshape(1, c) for a in ca]),
        ca_b=jnp.stack([a["ln_b"].reshape(1, c) for a in ca]),
        sa_wqk=jnp.stack([jnp.concatenate([a["wq"] * scale, a["wk"]], axis=1)
                          for a in sa]),
        sa_bqk=jnp.stack([jnp.concatenate([a["bq"] * scale, a["bk"]]
                                          ).reshape(1, 2 * c) for a in sa]),
        sa_wv=jnp.stack([a["wv"] for a in sa]),
        sa_bv=jnp.stack([a["bv"].reshape(1, c) for a in sa]),
        sa_wo=jnp.stack([a["wo"] for a in sa]),
        sa_bo=jnp.stack([a["bo"].reshape(1, c) for a in sa]),
        sa_g=jnp.stack([a["ln_g"].reshape(1, c) for a in sa]),
        sa_b=jnp.stack([a["ln_b"].reshape(1, c) for a in sa]),
        f_w1=jnp.stack([f["w1"] for f in ff]),
        f_b1=jnp.stack([f["b1"].reshape(1, -1) for f in ff]),
        f_w2=jnp.stack([f["w2"] for f in ff]),
        f_b2=jnp.stack([f["b2"].reshape(1, c) for f in ff]),
        f_g=jnp.stack([f["ln_g"].reshape(1, c) for f in ff]),
        f_b=jnp.stack([f["ln_b"].reshape(1, c) for f in ff]),
        dn_g=p["dec_norm_g"].reshape(1, c),
        dn_b=p["dec_norm_b"].reshape(1, c),
    )
    return dict(enc=enc, dec=dec, fq_pos=p["fq_pos"],
                query_embed=p["query_embed"], query_feat=p["query_feat"])


# ---------------------------------- main ------------------------------------
if __name__ == "__main__":
    key = jax.random.PRNGKey(0)
    k_in, k_par = jax.random.split(key)

    L, T, B = 2, 3, 1     # T=3 with window_size=2 exercises padding + masks
    frame_query = jax.random.normal(
        k_in, (L, T, B, NUM_FRAME_QUERIES, INPUT_DIM), jnp.float32)

    packed = pack_params(init_params(k_par))

    fwd = jax.jit(mti_forward)
    out = jax.block_until_ready(fwd(frame_query, packed))

    assert out.shape == (1, B, NUM_QUERIES, INPUT_DIM), out.shape
    assert jnp.isfinite(out).all()
    print("KERNEL_OK")
</pallas_src>

<mosaic_0001>
module attributes {stable_mosaic.version = 11 : i64} {
  func.func @_mti_kernel(%arg0: i32, %arg1: memref<1x32x32xf32, #tpu.memory_space<vmem>>, %arg2: memref<32x32xf32, #tpu.memory_space<vmem>>, %arg3: memref<32x32xf32, #tpu.memory_space<vmem>>, %arg4: memref<8x32xf32, #tpu.memory_space<vmem>>, %arg5: memref<8x32xf32, #tpu.memory_space<vmem>>, %arg6: memref<8x32xf32, #tpu.memory_space<vmem>>, %arg7: memref<2x32x96xf32, #tpu.memory_space<vmem>>, %arg8: memref<2x1x96xf32, #tpu.memory_space<vmem>>, %arg9: memref<2x32x32xf32, #tpu.memory_space<vmem>>, %arg10: memref<2x1x32xf32, #tpu.memory_space<vmem>>, %arg11: memref<2x1x32xf32, #tpu.memory_space<vmem>>, %arg12: memref<2x1x32xf32, #tpu.memory_space<vmem>>, %arg13: memref<2x32x64xf32, #tpu.memory_space<vmem>>, %arg14: memref<2x1x64xf32, #tpu.memory_space<vmem>>, %arg15: memref<2x64x32xf32, #tpu.memory_space<vmem>>, %arg16: memref<2x1x32xf32, #tpu.memory_space<vmem>>, %arg17: memref<2x1x32xf32, #tpu.memory_space<vmem>>, %arg18: memref<2x1x32xf32, #tpu.memory_space<vmem>>, %arg19: memref<2x32x32xf32, #tpu.memory_space<vmem>>, %arg20: memref<2x1x32xf32, #tpu.memory_space<vmem>>, %arg21: memref<2x32x32xf32, #tpu.memory_space<vmem>>, %arg22: memref<2x1x32xf32, #tpu.memory_space<vmem>>, %arg23: memref<2x32x32xf32, #tpu.memory_space<vmem>>, %arg24: memref<2x1x32xf32, #tpu.memory_space<vmem>>, %arg25: memref<2x32x32xf32, #tpu.memory_space<vmem>>, %arg26: memref<2x1x32xf32, #tpu.memory_space<vmem>>, %arg27: memref<2x1x32xf32, #tpu.memory_space<vmem>>, %arg28: memref<2x1x32xf32, #tpu.memory_space<vmem>>, %arg29: memref<2x32x64xf32, #tpu.memory_space<vmem>>, %arg30: memref<2x1x64xf32, #tpu.memory_space<vmem>>, %arg31: memref<2x32x32xf32, #tpu.memory_space<vmem>>, %arg32: memref<2x1x32xf32, #tpu.memory_space<vmem>>, %arg33: memref<2x32x32xf32, #tpu.memory_space<vmem>>, %arg34: memref<2x1x32xf32, #tpu.memory_space<vmem>>, %arg35: memref<2x1x32xf32, #tpu.memory_space<vmem>>, %arg36: memref<2x1x32xf32, #tpu.memory_space<vmem>>, %arg37: memref<2x32x64xf32, #tpu.memory_space<vmem>>, %arg38: memref<2x1x64xf32, #tpu.memory_space<vmem>>, %arg39: memref<2x64x32xf32, #tpu.memory_space<vmem>>, %arg40: memref<2x1x32xf32, #tpu.memory_space<vmem>>, %arg41: memref<2x1x32xf32, #tpu.memory_space<vmem>>, %arg42: memref<2x1x32xf32, #tpu.memory_space<vmem>>, %arg43: memref<1x32xf32, #tpu.memory_space<vmem>>, %arg44: memref<1x32xf32, #tpu.memory_space<vmem>>, %arg45: memref<1x8x32xf32, #tpu.memory_space<vmem>>) attributes {dimension_semantics = [#tpu.dimension_semantics<parallel>], iteration_bounds = array<i64: 1>, scalar_prefetch = 0 : i64, scratch_operands = 0 : i64, tpu.core_type = #tpu.core_type<tc>, window_params = [{transform_indices = @transform_0, window_bounds = array<i64: 1, 32, 32>}, {pipeline_mode = #tpu.pipeline_mode<synchronous>, transform_indices = @transform_1, window_bounds = array<i64: 32, 32>}, {pipeline_mode = #tpu.pipeline_mode<synchronous>, transform_indices = @transform_2, window_bounds = array<i64: 32, 32>}, {pipeline_mode = #tpu.pipeline_mode<synchronous>, transform_indices = @transform_3, window_bounds = array<i64: 8, 32>}, {pipeline_mode = #tpu.pipeline_mode<synchronous>, transform_indices = @transform_4, window_bounds = array<i64: 8, 32>}, {pipeline_mode = #tpu.pipeline_mode<synchronous>, transform_indices = @transform_5, window_bounds = array<i64: 8, 32>}, {pipeline_mode = #tpu.pipeline_mode<synchronous>, transform_indices = @transform_6, window_bounds = array<i64: 2, 32, 96>}, {pipeline_mode = #tpu.pipeline_mode<synchronous>, transform_indices = @transform_7, window_bounds = array<i64: 2, 1, 96>}, {pipeline_mode = #tpu.pipeline_mode<synchronous>, transform_indices = @transform_8, window_bounds = array<i64: 2, 32, 32>}, {pipeline_mode = #tpu.pipeline_mode<synchronous>, transform_indices = @transform_9, window_bounds = array<i64: 2, 1, 32>}, {pipeline_mode = #tpu.pipeline_mode<synchronous>, transform_indices = @transform_10, window_bounds = array<i64: 2, 1, 32>}, {pipeline_mode = #tpu.pipeline_mode<synchronous>, transform_indices = @transform_11, window_bounds = array<i64: 2, 1, 32>}, {pipeline_mode = #tpu.pipeline_mode<synchronous>, transform_indices = @transform_12, window_bounds = array<i64: 2, 32, 64>}, {pipeline_mode = #tpu.pipeline_mode<synchronous>, transform_indices = @transform_13, window_bounds = array<i64: 2, 1, 64>}, {pipeline_mode = #tpu.pipeline_mode<synchronous>, transform_indices = @transform_14, window_bounds = array<i64: 2, 64, 32>}, {pipeline_mode = #tpu.pipeline_mode<synchronous>, transform_indices = @transform_15, window_bounds = array<i64: 2, 1, 32>}, {pipeline_mode = #tpu.pipeline_mode<synchronous>, transform_indices = @transform_16, window_bounds = array<i64: 2, 1, 32>}, {pipeline_mode = #tpu.pipeline_mode<synchronous>, transform_indices = @transform_17, window_bounds = array<i64: 2, 1, 32>}, {pipeline_mode = #tpu.pipeline_mode<synchronous>, transform_indices = @transform_18, window_bounds = array<i64: 2, 32, 32>}, {pipeline_mode = #tpu.pipeline_mode<synchronous>, transform_indices = @transform_19, window_bounds = array<i64: 2, 1, 32>}, {pipeline_mode = #tpu.pipeline_mode<synchronous>, transform_indices = @transform_20, window_bounds = array<i64: 2, 32, 32>}, {pipeline_mode = #tpu.pipeline_mode<synchronous>, transform_indices = @transform_21, window_bounds = array<i64: 2, 1, 32>}, {pipeline_mode = #tpu.pipeline_mode<synchronous>, transform_indices = @transform_22, window_bounds = array<i64: 2, 32, 32>}, {pipeline_mode = #tpu.pipeline_mode<synchronous>, transform_indices = @transform_23, window_bounds = array<i64: 2, 1, 32>}, {pipeline_mode = #tpu.pipeline_mode<synchronous>, transform_indices = @transform_24, window_bounds = array<i64: 2, 32, 32>}, {pipeline_mode = #tpu.pipeline_mode<synchronous>, transform_indices = @transform_25, window_bounds = array<i64: 2, 1, 32>}, {pipeline_mode = #tpu.pipeline_mode<synchronous>, transform_indices = @transform_26, window_bounds = array<i64: 2, 1, 32>}, {pipeline_mode = #tpu.pipeline_mode<synchronous>, transform_indices = @transform_27, window_bounds = array<i64: 2, 1, 32>}, {pipeline_mode = #tpu.pipeline_mode<synchronous>, transform_indices = @transform_28, window_bounds = array<i64: 2, 32, 64>}, {pipeline_mode = #tpu.pipeline_mode<synchronous>, transform_indices = @transform_29, window_bounds = array<i64: 2, 1, 64>}, {pipeline_mode = #tpu.pipeline_mode<synchronous>, transform_indices = @transform_30, window_bounds = array<i64: 2, 32, 32>}, {pipeline_mode = #tpu.pipeline_mode<synchronous>, transform_indices = @transform_31, window_bounds = array<i64: 2, 1, 32>}, {pipeline_mode = #tpu.pipeline_mode<synchronous>, transform_indices = @transform_32, window_bounds = array<i64: 2, 32, 32>}, {pipeline_mode = #tpu.pipeline_mode<synchronous>, transform_indices = @transform_33, window_bounds = array<i64: 2, 1, 32>}, {pipeline_mode = #tpu.pipeline_mode<synchronous>, transform_indices = @transform_34, window_bounds = array<i64: 2, 1, 32>}, {pipeline_mode = #tpu.pipeline_mode<synchronous>, transform_indices = @transform_35, window_bounds = array<i64: 2, 1, 32>}, {pipeline_mode = #tpu.pipeline_mode<synchronous>, transform_indices = @transform_36, window_bounds = array<i64: 2, 32, 64>}, {pipeline_mode = #tpu.pipeline_mode<synchronous>, transform_indices = @transform_37, window_bounds = array<i64: 2, 1, 64>}, {pipeline_mode = #tpu.pipeline_mode<synchronous>, transform_indices = @transform_38, window_bounds = array<i64: 2, 64, 32>}, {pipeline_mode = #tpu.pipeline_mode<synchronous>, transform_indices = @transform_39, window_bounds = array<i64: 2, 1, 32>}, {pipeline_mode = #tpu.pipeline_mode<synchronous>, transform_indices = @transform_40, window_bounds = array<i64: 2, 1, 32>}, {pipeline_mode = #tpu.pipeline_mode<synchronous>, transform_indices = @transform_41, window_bounds = array<i64: 2, 1, 32>}, {pipeline_mode = #tpu.pipeline_mode<synchronous>, transform_indices = @transform_42, window_bounds = array<i64: 1, 32>}, {pipeline_mode = #tpu.pipeline_mode<synchronous>, transform_indices = @transform_43, window_bounds = array<i64: 1, 32>}, {transform_indices = @transform_44, window_bounds = array<i64: 1, 8, 32>}]} {
    %c0 = arith.constant 0 : index
    %c0_0 = arith.constant 0 : index
    %c0_1 = arith.constant 0 : index
    %0 = vector.load %arg1[%c0, %c0_0, %c0_1] : memref<1x32x32xf32, #tpu.memory_space<vmem>>, vector<1x32x32xf32>
    %1 = vector.shape_cast %0 : vector<1x32x32xf32> to vector<32x32xf32>
    %c0_2 = arith.constant 0 : index
    %c0_3 = arith.constant 0 : index
    %2 = vector.load %arg2[%c0_2, %c0_3] : memref<32x32xf32, #tpu.memory_space<vmem>>, vector<32x32xf32>
    %c0_4 = arith.constant 0 : index
    %c0_5 = arith.constant 0 : index
    %3 = vector.load %arg3[%c0_4, %c0_5] : memref<32x32xf32, #tpu.memory_space<vmem>>, vector<32x32xf32>
    %c0_6 = arith.constant 0 : index
    %c0_7 = arith.constant 0 : index
    %c0_8 = arith.constant 0 : index
    %4 = vector.load %arg7[%c0_6, %c0_7, %c0_8] : memref<2x32x96xf32, #tpu.memory_space<vmem>>, vector<1x32x96xf32>
    %5 = vector.shape_cast %4 : vector<1x32x96xf32> to vector<32x96xf32>
    %cst = arith.constant dense<0.000000e+00> : vector<32x96xf32>
    %6 = tpu.matmul %1, %5, %cst {dimension_numbers = #tpu.dot_dimension_numbers<[1], [0], [0], [1], [0, 0, 1, 1], [], []>} : vector<32x32xf32>, vector<32x96xf32>, vector<32x96xf32> -> vector<32x96xf32>
    %c0_9 = arith.constant 0 : index
    %c0_10 = arith.constant 0 : index
    %c0_11 = arith.constant 0 : index
    %7 = vector.load %arg8[%c0_9, %c0_10, %c0_11] : memref<2x1x96xf32, #tpu.memory_space<vmem>>, vector<1x1x96xf32>
    %8 = vector.shape_cast %7 : vector<1x1x96xf32> to vector<1x96xf32>
    %9 = vector.broadcast %8 : vector<1x96xf32> to vector<32x96xf32>
    %10 = arith.addf %6, %9 : vector<32x96xf32>
    %11 = vector.extract_strided_slice %10 {offsets = [0, 0], sizes = [32, 32], strides = [1, 1]} : vector<32x96xf32> to vector<32x32xf32>
    %12 = vector.extract_strided_slice %10 {offsets = [0, 32], sizes = [32, 32], strides = [1, 1]} : vector<32x96xf32> to vector<32x32xf32>
    %13 = vector.extract_strided_slice %10 {offsets = [0, 64], sizes = [32, 32], strides = [1, 1]} : vector<32x96xf32> to vector<32x32xf32>
    %c0_12 = arith.constant 0 : index
    %c0_13 = arith.constant 0 : index
    %c0_14 = arith.constant 0 : index
    %14 = vector.load %arg9[%c0_12, %c0_13, %c0_14] : memref<2x32x32xf32, #tpu.memory_space<vmem>>, vector<1x32x32xf32>
    %15 = vector.shape_cast %14 : vector<1x32x32xf32> to vector<32x32xf32>
    %c0_15 = arith.constant 0 : index
    %c0_16 = arith.constant 0 : index
    %c0_17 = arith.constant 0 : index
    %16 = vector.load %arg10[%c0_15, %c0_16, %c0_17] : memref<2x1x32xf32, #tpu.memory_space<vmem>>, vector<1x1x32xf32>
    %17 = vector.shape_cast %16 : vector<1x1x32xf32> to vector<1x32xf32>
    %cst_18 = arith.constant 0.000000e+00 : f32
    %18 = vector.broadcast %cst_18 : f32 to vector<32x32xf32>
    %19 = vector.broadcast %17 : vector<1x32xf32> to vector<32x32xf32>
    %20 = arith.addf %18, %19 : vector<32x32xf32>
    %21 = vector.extract_strided_slice %11 {offsets = [0, 0], sizes = [32, 8], strides = [1, 1]} : vector<32x32xf32> to vector<32x8xf32>
    %22 = vector.extract_strided_slice %12 {offsets = [0, 0], sizes = [32, 8], strides = [1, 1]} : vector<32x32xf32> to vector<32x8xf32>
    %cst_19 = arith.constant dense<0.000000e+00> : vector<32x32xf32>
    %23 = tpu.matmul %21, %22, %cst_19 {dimension_numbers = #tpu.dot_dimension_numbers<[1], [1], [0], [0], [0, 0, 1, 0], [], []>} : vector<32x8xf32>, vector<32x8xf32>, vector<32x32xf32> -> vector<32x32xf32>
    %24 = arith.addf %23, %2 : vector<32x32xf32>
    %cst_20 = arith.constant dense<0xFF800000> : vector<32xf32>
    %25 = vector.multi_reduction <maximumf>, %24, %cst_20 [1] : vector<32x32xf32> to vector<32xf32>
    %26 = vector.shape_cast %25 : vector<32xf32> to vector<32x1xf32>
    %27 = vector.broadcast %26 : vector<32x1xf32> to vector<32x32xf32>
    %28 = arith.subf %24, %27 : vector<32x32xf32>
    %29 = math.exp %28 : vector<32x32xf32>
    %cst_21 = arith.constant dense<0.000000e+00> : vector<32xf32>
    %30 = vector.multi_reduction <add>, %29, %cst_21 [1] : vector<32x32xf32> to vector<32xf32>
    %31 = vector.shape_cast %30 : vector<32xf32> to vector<32x1xf32>
    %32 = tpu.reciprocal %31 : vector<32x1xf32> -> vector<32x1xf32>
    %33 = vector.broadcast %32 : vector<32x1xf32> to vector<32x32xf32>
    %34 = arith.mulf %29, %33 : vector<32x32xf32>
    %35 = vector.extract_strided_slice %13 {offsets = [0, 0], sizes = [32, 8], strides = [1, 1]} : vector<32x32xf32> to vector<32x8xf32>
    %cst_22 = arith.constant dense<0.000000e+00> : vector<32x8xf32>
    %36 = tpu.matmul %34, %35, %cst_22 {dimension_numbers = #tpu.dot_dimension_numbers<[1], [0], [0], [1], [0, 0, 1, 1], [], []>} : vector<32x32xf32>, vector<32x8xf32>, vector<32x8xf32> -> vector<32x8xf32>
    %37 = vector.extract_strided_slice %15 {offsets = [0, 0], sizes = [8, 32], strides = [1, 1]} : vector<32x32xf32> to vector<8x32xf32>
    %cst_23 = arith.constant dense<0.000000e+00> : vector<32x32xf32>
    %38 = tpu.matmul %36, %37, %cst_23 {dimension_numbers = #tpu.dot_dimension_numbers<[1], [0], [0], [1], [0, 0, 1, 1], [], []>} : vector<32x8xf32>, vector<8x32xf32>, vector<32x32xf32> -> vector<32x32xf32>
    %39 = arith.addf %20, %38 : vector<32x32xf32>
    %40 = vector.extract_strided_slice %11 {offsets = [0, 8], sizes = [32, 8], strides = [1, 1]} : vector<32x32xf32> to vector<32x8xf32>
    %41 = vector.extract_strided_slice %12 {offsets = [0, 8], sizes = [32, 8], strides = [1, 1]} : vector<32x32xf32> to vector<32x8xf32>
    %cst_24 = arith.constant dense<0.000000e+00> : vector<32x32xf32>
    %42 = tpu.matmul %40, %41, %cst_24 {dimension_numbers = #tpu.dot_dimension_numbers<[1], [1], [0], [0], [0, 0, 1, 0], [], []>} : vector<32x8xf32>, vector<32x8xf32>, vector<32x32xf32> -> vector<32x32xf32>
    %43 = arith.addf %42, %2 : vector<32x32xf32>
    %cst_25 = arith.constant dense<0xFF800000> : vector<32xf32>
    %44 = vector.multi_reduction <maximumf>, %43, %cst_25 [1] : vector<32x32xf32> to vector<32xf32>
    %45 = vector.shape_cast %44 : vector<32xf32> to vector<32x1xf32>
    %46 = vector.broadcast %45 : vector<32x1xf32> to vector<32x32xf32>
    %47 = arith.subf %43, %46 : vector<32x32xf32>
    %48 = math.exp %47 : vector<32x32xf32>
    %cst_26 = arith.constant dense<0.000000e+00> : vector<32xf32>
    %49 = vector.multi_reduction <add>, %48, %cst_26 [1] : vector<32x32xf32> to vector<32xf32>
    %50 = vector.shape_cast %49 : vector<32xf32> to vector<32x1xf32>
    %51 = tpu.reciprocal %50 : vector<32x1xf32> -> vector<32x1xf32>
    %52 = vector.broadcast %51 : vector<32x1xf32> to vector<32x32xf32>
    %53 = arith.mulf %48, %52 : vector<32x32xf32>
    %54 = vector.extract_strided_slice %13 {offsets = [0, 8], sizes = [32, 8], strides = [1, 1]} : vector<32x32xf32> to vector<32x8xf32>
    %cst_27 = arith.constant dense<0.000000e+00> : vector<32x8xf32>
    %55 = tpu.matmul %53, %54, %cst_27 {dimension_numbers = #tpu.dot_dimension_numbers<[1], [0], [0], [1], [0, 0, 1, 1], [], []>} : vector<32x32xf32>, vector<32x8xf32>, vector<32x8xf32> -> vector<32x8xf32>
    %56 = vector.extract_strided_slice %15 {offsets = [8, 0], sizes = [8, 32], strides = [1, 1]} : vector<32x32xf32> to vector<8x32xf32>
    %cst_28 = arith.constant dense<0.000000e+00> : vector<32x32xf32>
    %57 = tpu.matmul %55, %56, %cst_28 {dimension_numbers = #tpu.dot_dimension_numbers<[1], [0], [0], [1], [0, 0, 1, 1], [], []>} : vector<32x8xf32>, vector<8x32xf32>, vector<32x32xf32> -> vector<32x32xf32>
    %58 = arith.addf %39, %57 : vector<32x32xf32>
    %59 = vector.extract_strided_slice %11 {offsets = [0, 16], sizes = [32, 8], strides = [1, 1]} : vector<32x32xf32> to vector<32x8xf32>
    %60 = vector.extract_strided_slice %12 {offsets = [0, 16], sizes = [32, 8], strides = [1, 1]} : vector<32x32xf32> to vector<32x8xf32>
    %cst_29 = arith.constant dense<0.000000e+00> : vector<32x32xf32>
    %61 = tpu.matmul %59, %60, %cst_29 {dimension_numbers = #tpu.dot_dimension_numbers<[1], [1], [0], [0], [0, 0, 1, 0], [], []>} : vector<32x8xf32>, vector<32x8xf32>, vector<32x32xf32> -> vector<32x32xf32>
    %62 = arith.addf %61, %2 : vector<32x32xf32>
    %cst_30 = arith.constant dense<0xFF800000> : vector<32xf32>
    %63 = vector.multi_reduction <maximumf>, %62, %cst_30 [1] : vector<32x32xf32> to vector<32xf32>
    %64 = vector.shape_cast %63 : vector<32xf32> to vector<32x1xf32>
    %65 = vector.broadcast %64 : vector<32x1xf32> to vector<32x32xf32>
    %66 = arith.subf %62, %65 : vector<32x32xf32>
    %67 = math.exp %66 : vector<32x32xf32>
    %cst_31 = arith.constant dense<0.000000e+00> : vector<32xf32>
    %68 = vector.multi_reduction <add>, %67, %cst_31 [1] : vector<32x32xf32> to vector<32xf32>
    %69 = vector.shape_cast %68 : vector<32xf32> to vector<32x1xf32>
    %70 = tpu.reciprocal %69 : vector<32x1xf32> -> vector<32x1xf32>
    %71 = vector.broadcast %70 : vector<32x1xf32> to vector<32x32xf32>
    %72 = arith.mulf %67, %71 : vector<32x32xf32>
    %73 = vector.extract_strided_slice %13 {offsets = [0, 16], sizes = [32, 8], strides = [1, 1]} : vector<32x32xf32> to vector<32x8xf32>
    %cst_32 = arith.constant dense<0.000000e+00> : vector<32x8xf32>
    %74 = tpu.matmul %72, %73, %cst_32 {dimension_numbers = #tpu.dot_dimension_numbers<[1], [0], [0], [1], [0, 0, 1, 1], [], []>} : vector<32x32xf32>, vector<32x8xf32>, vector<32x8xf32> -> vector<32x8xf32>
    %75 = vector.extract_strided_slice %15 {offsets = [16, 0], sizes = [8, 32], strides = [1, 1]} : vector<32x32xf32> to vector<8x32xf32>
    %cst_33 = arith.constant dense<0.000000e+00> : vector<32x32xf32>
    %76 = tpu.matmul %74, %75, %cst_33 {dimension_numbers = #tpu.dot_dimension_numbers<[1], [0], [0], [1], [0, 0, 1, 1], [], []>} : vector<32x8xf32>, vector<8x32xf32>, vector<32x32xf32> -> vector<32x32xf32>
    %77 = arith.addf %58, %76 : vector<32x32xf32>
    %78 = vector.extract_strided_slice %11 {offsets = [0, 24], sizes = [32, 8], strides = [1, 1]} : vector<32x32xf32> to vector<32x8xf32>
    %79 = vector.extract_strided_slice %12 {offsets = [0, 24], sizes = [32, 8], strides = [1, 1]} : vector<32x32xf32> to vector<32x8xf32>
    %cst_34 = arith.constant dense<0.000000e+00> : vector<32x32xf32>
    %80 = tpu.matmul %78, %79, %cst_34 {dimension_numbers = #tpu.dot_dimension_numbers<[1], [1], [0], [0], [0, 0, 1, 0], [], []>} : vector<32x8xf32>, vector<32x8xf32>, vector<32x32xf32> -> vector<32x32xf32>
    %81 = arith.addf %80, %2 : vector<32x32xf32>
    %cst_35 = arith.constant dense<0xFF800000> : vector<32xf32>
    %82 = vector.multi_reduction <maximumf>, %81, %cst_35 [1] : vector<32x32xf32> to vector<32xf32>
    %83 = vector.shape_cast %82 : vector<32xf32> to vector<32x1xf32>
    %84 = vector.broadcast %83 : vector<32x1xf32> to vector<32x32xf32>
    %85 = arith.subf %81, %84 : vector<32x32xf32>
    %86 = math.exp %85 : vector<32x32xf32>
    %cst_36 = arith.constant dense<0.000000e+00> : vector<32xf32>
    %87 = vector.multi_reduction <add>, %86, %cst_36 [1] : vector<32x32xf32> to vector<32xf32>
    %88 = vector.shape_cast %87 : vector<32xf32> to vector<32x1xf32>
    %89 = tpu.reciprocal %88 : vector<32x1xf32> -> vector<32x1xf32>
    %90 = vector.broadcast %89 : vector<32x1xf32> to vector<32x32xf32>
    %91 = arith.mulf %86, %90 : vector<32x32xf32>
    %92 = vector.extract_strided_slice %13 {offsets = [0, 24], sizes = [32, 8], strides = [1, 1]} : vector<32x32xf32> to vector<32x8xf32>
    %cst_37 = arith.constant dense<0.000000e+00> : vector<32x8xf32>
    %93 = tpu.matmul %91, %92, %cst_37 {dimension_numbers = #tpu.dot_dimension_numbers<[1], [0], [0], [1], [0, 0, 1, 1], [], []>} : vector<32x32xf32>, vector<32x8xf32>, vector<32x8xf32> -> vector<32x8xf32>
    %94 = vector.extract_strided_slice %15 {offsets = [24, 0], sizes = [8, 32], strides = [1, 1]} : vector<32x32xf32> to vector<8x32xf32>
    %cst_38 = arith.constant dense<0.000000e+00> : vector<32x32xf32>
    %95 = tpu.matmul %93, %94, %cst_38 {dimension_numbers = #tpu.dot_dimension_numbers<[1], [0], [0], [1], [0, 0, 1, 1], [], []>} : vector<32x8xf32>, vector<8x32xf32>, vector<32x32xf32> -> vector<32x32xf32>
    %96 = arith.addf %77, %95 : vector<32x32xf32>
    %97 = arith.addf %1, %96 : vector<32x32xf32>
    %c0_39 = arith.constant 0 : index
    %c0_40 = arith.constant 0 : index
    %c0_41 = arith.constant 0 : index
    %98 = vector.load %arg11[%c0_39, %c0_40, %c0_41] : memref<2x1x32xf32, #tpu.memory_space<vmem>>, vector<1x1x32xf32>
    %99 = vector.shape_cast %98 : vector<1x1x32xf32> to vector<1x32xf32>
    %c0_42 = arith.constant 0 : index
    %c0_43 = arith.constant 0 : index
    %c0_44 = arith.constant 0 : index
    %100 = vector.load %arg12[%c0_42, %c0_43, %c0_44] : memref<2x1x32xf32, #tpu.memory_space<vmem>>, vector<1x1x32xf32>
    %101 = vector.shape_cast %100 : vector<1x1x32xf32> to vector<1x32xf32>
    %cst_45 = arith.constant dense<0.000000e+00> : vector<32xf32>
    %102 = vector.multi_reduction <add>, %97, %cst_45 [1] : vector<32x32xf32> to vector<32xf32>
    %103 = vector.shape_cast %102 : vector<32xf32> to vector<32x1xf32>
    %cst_46 = arith.constant 3.200000e+01 : f32
    %104 = vector.broadcast %cst_46 : f32 to vector<32x1xf32>
    %105 = arith.divf %103, %104 : vector<32x1xf32>
    %106 = vector.broadcast %105 : vector<32x1xf32> to vector<32x32xf32>
    %107 = arith.subf %97, %106 : vector<32x32xf32>
    %108 = arith.mulf %107, %107 : vector<32x32xf32>
    %cst_47 = arith.constant dense<0.000000e+00> : vector<32xf32>
    %109 = vector.multi_reduction <add>, %108, %cst_47 [1] : vector<32x32xf32> to vector<32xf32>
    %110 = vector.shape_cast %109 : vector<32xf32> to vector<32x1xf32>
    %cst_48 = arith.constant 3.200000e+01 : f32
    %111 = vector.broadcast %cst_48 : f32 to vector<32x1xf32>
    %112 = arith.divf %110, %111 : vector<32x1xf32>
    %cst_49 = arith.constant 9.99999974E-6 : f32
    %113 = vector.broadcast %cst_49 : f32 to vector<32x1xf32>
    %114 = arith.addf %112, %113 : vector<32x1xf32>
    %115 = math.rsqrt %114 : vector<32x1xf32>
    %116 = vector.broadcast %115 : vector<32x1xf32> to vector<32x32xf32>
    %117 = arith.mulf %107, %116 : vector<32x32xf32>
    %118 = vector.broadcast %99 : vector<1x32xf32> to vector<32x32xf32>
    %119 = arith.mulf %117, %118 : vector<32x32xf32>
    %120 = vector.broadcast %101 : vector<1x32xf32> to vector<32x32xf32>
    %121 = arith.addf %119, %120 : vector<32x32xf32>
    %c0_50 = arith.constant 0 : index
    %c0_51 = arith.constant 0 : index
    %c0_52 = arith.constant 0 : index
    %122 = vector.load %arg13[%c0_50, %c0_51, %c0_52] : memref<2x32x64xf32, #tpu.memory_space<vmem>>, vector<1x32x64xf32>
    %123 = vector.shape_cast %122 : vector<1x32x64xf32> to vector<32x64xf32>
    %cst_53 = arith.constant dense<0.000000e+00> : vector<32x64xf32>
    %124 = tpu.matmul %121, %123, %cst_53 {dimension_numbers = #tpu.dot_dimension_numbers<[1], [0], [0], [1], [0, 0, 1, 1], [], []>} : vector<32x32xf32>, vector<32x64xf32>, vector<32x64xf32> -> vector<32x64xf32>
    %c0_54 = arith.constant 0 : index
    %c0_55 = arith.constant 0 : index
    %c0_56 = arith.constant 0 : index
    %125 = vector.load %arg14[%c0_54, %c0_55, %c0_56] : memref<2x1x64xf32, #tpu.memory_space<vmem>>, vector<1x1x64xf32>
    %126 = vector.shape_cast %125 : vector<1x1x64xf32> to vector<1x64xf32>
    %127 = vector.broadcast %126 : vector<1x64xf32> to vector<32x64xf32>
    %128 = arith.addf %124, %127 : vector<32x64xf32>
    %cst_57 = arith.constant 0.000000e+00 : f32
    %129 = vector.broadcast %cst_57 : f32 to vector<32x64xf32>
    %130 = arith.maximumf %128, %129 : vector<32x64xf32>
    %c0_58 = arith.constant 0 : index
    %c0_59 = arith.constant 0 : index
    %c0_60 = arith.constant 0 : index
    %131 = vector.load %arg15[%c0_58, %c0_59, %c0_60] : memref<2x64x32xf32, #tpu.memory_space<vmem>>, vector<1x64x32xf32>
    %132 = vector.shape_cast %131 : vector<1x64x32xf32> to vector<64x32xf32>
    %cst_61 = arith.constant dense<0.000000e+00> : vector<32x32xf32>
    %133 = tpu.matmul %130, %132, %cst_61 {dimension_numbers = #tpu.dot_dimension_numbers<[1], [0], [0], [1], [0, 0, 1, 1], [], []>} : vector<32x64xf32>, vector<64x32xf32>, vector<32x32xf32> -> vector<32x32xf32>
    %134 = arith.addf %121, %133 : vector<32x32xf32>
    %c0_62 = arith.constant 0 : index
    %c0_63 = arith.constant 0 : index
    %c0_64 = arith.constant 0 : index
    %135 = vector.load %arg16[%c0_62, %c0_63, %c0_64] : memref<2x1x32xf32, #tpu.memory_space<vmem>>, vector<1x1x32xf32>
    %136 = vector.shape_cast %135 : vector<1x1x32xf32> to vector<1x32xf32>
    %137 = vector.broadcast %136 : vector<1x32xf32> to vector<32x32xf32>
    %138 = arith.addf %134, %137 : vector<32x32xf32>
    %c0_65 = arith.constant 0 : index
    %c0_66 = arith.constant 0 : index
    %c0_67 = arith.constant 0 : index
    %139 = vector.load %arg17[%c0_65, %c0_66, %c0_67] : memref<2x1x32xf32, #tpu.memory_space<vmem>>, vector<1x1x32xf32>
    %140 = vector.shape_cast %139 : vector<1x1x32xf32> to vector<1x32xf32>
    %c0_68 = arith.constant 0 : index
    %c0_69 = arith.constant 0 : index
    %c0_70 = arith.constant 0 : index
    %141 = vector.load %arg18[%c0_68, %c0_69, %c0_70] : memref<2x1x32xf32, #tpu.memory_space<vmem>>, vector<1x1x32xf32>
    %142 = vector.shape_cast %141 : vector<1x1x32xf32> to vector<1x32xf32>
    %cst_71 = arith.constant dense<0.000000e+00> : vector<32xf32>
    %143 = vector.multi_reduction <add>, %138, %cst_71 [1] : vector<32x32xf32> to vector<32xf32>
    %144 = vector.shape_cast %143 : vector<32xf32> to vector<32x1xf32>
    %cst_72 = arith.constant 3.200000e+01 : f32
    %145 = vector.broadcast %cst_72 : f32 to vector<32x1xf32>
    %146 = arith.divf %144, %145 : vector<32x1xf32>
    %147 = vector.broadcast %146 : vector<32x1xf32> to vector<32x32xf32>
    %148 = arith.subf %138, %147 : vector<32x32xf32>
    %149 = arith.mulf %148, %148 : vector<32x32xf32>
    %cst_73 = arith.constant dense<0.000000e+00> : vector<32xf32>
    %150 = vector.multi_reduction <add>, %149, %cst_73 [1] : vector<32x32xf32> to vector<32xf32>
    %151 = vector.shape_cast %150 : vector<32xf32> to vector<32x1xf32>
    %cst_74 = arith.constant 3.200000e+01 : f32
    %152 = vector.broadcast %cst_74 : f32 to vector<32x1xf32>
    %153 = arith.divf %151, %152 : vector<32x1xf32>
    %cst_75 = arith.constant 9.99999974E-6 : f32
    %154 = vector.broadcast %cst_75 : f32 to vector<32x1xf32>
    %155 = arith.addf %153, %154 : vector<32x1xf32>
    %156 = math.rsqrt %155 : vector<32x1xf32>
    %157 = vector.broadcast %156 : vector<32x1xf32> to vector<32x32xf32>
    %158 = arith.mulf %148, %157 : vector<32x32xf32>
    %159 = vector.broadcast %140 : vector<1x32xf32> to vector<32x32xf32>
    %160 = arith.mulf %158, %159 : vector<32x32xf32>
    %161 = vector.broadcast %142 : vector<1x32xf32> to vector<32x32xf32>
    %162 = arith.addf %160, %161 : vector<32x32xf32>
    %c1 = arith.constant 1 : index
    %c0_76 = arith.constant 0 : index
    %c0_77 = arith.constant 0 : index
    %163 = vector.load %arg7[%c1, %c0_76, %c0_77] : memref<2x32x96xf32, #tpu.memory_space<vmem>>, vector<1x32x96xf32>
    %164 = vector.shape_cast %163 : vector<1x32x96xf32> to vector<32x96xf32>
    %cst_78 = arith.constant dense<0.000000e+00> : vector<32x96xf32>
    %165 = tpu.matmul %162, %164, %cst_78 {dimension_numbers = #tpu.dot_dimension_numbers<[1], [0], [0], [1], [0, 0, 1, 1], [], []>} : vector<32x32xf32>, vector<32x96xf32>, vector<32x96xf32> -> vector<32x96xf32>
    %c1_79 = arith.constant 1 : index
    %c0_80 = arith.constant 0 : index
    %c0_81 = arith.constant 0 : index
    %166 = vector.load %arg8[%c1_79, %c0_80, %c0_81] : memref<2x1x96xf32, #tpu.memory_space<vmem>>, vector<1x1x96xf32>
    %167 = vector.shape_cast %166 : vector<1x1x96xf32> to vector<1x96xf32>
    %168 = vector.broadcast %167 : vector<1x96xf32> to vector<32x96xf32>
    %169 = arith.addf %165, %168 : vector<32x96xf32>
    %170 = vector.extract_strided_slice %169 {offsets = [0, 0], sizes = [32, 32], strides = [1, 1]} : vector<32x96xf32> to vector<32x32xf32>
    %171 = vector.extract_strided_slice %169 {offsets = [0, 32], sizes = [32, 32], strides = [1, 1]} : vector<32x96xf32> to vector<32x32xf32>
    %172 = vector.extract_strided_slice %169 {offsets = [0, 64], sizes = [32, 32], strides = [1, 1]} : vector<32x96xf32> to vector<32x32xf32>
    %c1_82 = arith.constant 1 : index
    %c0_83 = arith.constant 0 : index
    %c0_84 = arith.constant 0 : index
    %173 = vector.load %arg9[%c1_82, %c0_83, %c0_84] : memref<2x32x32xf32, #tpu.memory_space<vmem>>, vector<1x32x32xf32>
    %174 = vector.shape_cast %173 : vector<1x32x32xf32> to vector<32x32xf32>
    %c1_85 = arith.constant 1 : index
    %c0_86 = arith.constant 0 : index
    %c0_87 = arith.constant 0 : index
    %175 = vector.load %arg10[%c1_85, %c0_86, %c0_87] : memref<2x1x32xf32, #tpu.memory_space<vmem>>, vector<1x1x32xf32>
    %176 = vector.shape_cast %175 : vector<1x1x32xf32> to vector<1x32xf32>
    %cst_88 = arith.constant 0.000000e+00 : f32
    %177 = vector.broadcast %cst_88 : f32 to vector<32x32xf32>
    %178 = vector.broadcast %176 : vector<1x32xf32> to vector<32x32xf32>
    %179 = arith.addf %177, %178 : vector<32x32xf32>
    %180 = vector.extract_strided_slice %170 {offsets = [0, 0], sizes = [32, 8], strides = [1, 1]} : vector<32x32xf32> to vector<32x8xf32>
    %181 = vector.extract_strided_slice %171 {offsets = [0, 0], sizes = [32, 8], strides = [1, 1]} : vector<32x32xf32> to vector<32x8xf32>
    %cst_89 = arith.constant dense<0.000000e+00> : vector<32x32xf32>
    %182 = tpu.matmul %180, %181, %cst_89 {dimension_numbers = #tpu.dot_dimension_numbers<[1], [1], [0], [0], [0, 0, 1, 0], [], []>} : vector<32x8xf32>, vector<32x8xf32>, vector<32x32xf32> -> vector<32x32xf32>
    %183 = arith.addf %182, %3 : vector<32x32xf32>
    %cst_90 = arith.constant dense<0xFF800000> : vector<32xf32>
    %184 = vector.multi_reduction <maximumf>, %183, %cst_90 [1] : vector<32x32xf32> to vector<32xf32>
    %185 = vector.shape_cast %184 : vector<32xf32> to vector<32x1xf32>
    %186 = vector.broadcast %185 : vector<32x1xf32> to vector<32x32xf32>
    %187 = arith.subf %183, %186 : vector<32x32xf32>
    %188 = math.exp %187 : vector<32x32xf32>
    %cst_91 = arith.constant dense<0.000000e+00> : vector<32xf32>
    %189 = vector.multi_reduction <add>, %188, %cst_91 [1] : vector<32x32xf32> to vector<32xf32>
    %190 = vector.shape_cast %189 : vector<32xf32> to vector<32x1xf32>
    %191 = tpu.reciprocal %190 : vector<32x1xf32> -> vector<32x1xf32>
    %192 = vector.broadcast %191 : vector<32x1xf32> to vector<32x32xf32>
    %193 = arith.mulf %188, %192 : vector<32x32xf32>
    %194 = vector.extract_strided_slice %172 {offsets = [0, 0], sizes = [32, 8], strides = [1, 1]} : vector<32x32xf32> to vector<32x8xf32>
    %cst_92 = arith.constant dense<0.000000e+00> : vector<32x8xf32>
    %195 = tpu.matmul %193, %194, %cst_92 {dimension_numbers = #tpu.dot_dimension_numbers<[1], [0], [0], [1], [0, 0, 1, 1], [], []>} : vector<32x32xf32>, vector<32x8xf32>, vector<32x8xf32> -> vector<32x8xf32>
    %196 = vector.extract_strided_slice %174 {offsets = [0, 0], sizes = [8, 32], strides = [1, 1]} : vector<32x32xf32> to vector<8x32xf32>
    %cst_93 = arith.constant dense<0.000000e+00> : vector<32x32xf32>
    %197 = tpu.matmul %195, %196, %cst_93 {dimension_numbers = #tpu.dot_dimension_numbers<[1], [0], [0], [1], [0, 0, 1, 1], [], []>} : vector<32x8xf32>, vector<8x32xf32>, vector<32x32xf32> -> vector<32x32xf32>
    %198 = arith.addf %179, %197 : vector<32x32xf32>
    %199 = vector.extract_strided_slice %170 {offsets = [0, 8], sizes = [32, 8], strides = [1, 1]} : vector<32x32xf32> to vector<32x8xf32>
    %200 = vector.extract_strided_slice %171 {offsets = [0, 8], sizes = [32, 8], strides = [1, 1]} : vector<32x32xf32> to vector<32x8xf32>
    %cst_94 = arith.constant dense<0.000000e+00> : vector<32x32xf32>
    %201 = tpu.matmul %199, %200, %cst_94 {dimension_numbers = #tpu.dot_dimension_numbers<[1], [1], [0], [0], [0, 0, 1, 0], [], []>} : vector<32x8xf32>, vector<32x8xf32>, vector<32x32xf32> -> vector<32x32xf32>
    %202 = arith.addf %201, %3 : vector<32x32xf32>
    %cst_95 = arith.constant dense<0xFF800000> : vector<32xf32>
    %203 = vector.multi_reduction <maximumf>, %202, %cst_95 [1] : vector<32x32xf32> to vector<32xf32>
    %204 = vector.shape_cast %203 : vector<32xf32> to vector<32x1xf32>
    %205 = vector.broadcast %204 : vector<32x1xf32> to vector<32x32xf32>
    %206 = arith.subf %202, %205 : vector<32x32xf32>
    %207 = math.exp %206 : vector<32x32xf32>
    %cst_96 = arith.constant dense<0.000000e+00> : vector<32xf32>
    %208 = vector.multi_reduction <add>, %207, %cst_96 [1] : vector<32x32xf32> to vector<32xf32>
    %209 = vector.shape_cast %208 : vector<32xf32> to vector<32x1xf32>
    %210 = tpu.reciprocal %209 : vector<32x1xf32> -> vector<32x1xf32>
    %211 = vector.broadcast %210 : vector<32x1xf32> to vector<32x32xf32>
    %212 = arith.mulf %207, %211 : vector<32x32xf32>
    %213 = vector.extract_strided_slice %172 {offsets = [0, 8], sizes = [32, 8], strides = [1, 1]} : vector<32x32xf32> to vector<32x8xf32>
    %cst_97 = arith.constant dense<0.000000e+00> : vector<32x8xf32>
    %214 = tpu.matmul %212, %213, %cst_97 {dimension_numbers = #tpu.dot_dimension_numbers<[1], [0], [0], [1], [0, 0, 1, 1], [], []>} : vector<32x32xf32>, vector<32x8xf32>, vector<32x8xf32> -> vector<32x8xf32>
    %215 = vector.extract_strided_slice %174 {offsets = [8, 0], sizes = [8, 32], strides = [1, 1]} : vector<32x32xf32> to vector<8x32xf32>
    %cst_98 = arith.constant dense<0.000000e+00> : vector<32x32xf32>
    %216 = tpu.matmul %214, %215, %cst_98 {dimension_numbers = #tpu.dot_dimension_numbers<[1], [0], [0], [1], [0, 0, 1, 1], [], []>} : vector<32x8xf32>, vector<8x32xf32>, vector<32x32xf32> -> vector<32x32xf32>
    %217 = arith.addf %198, %216 : vector<32x32xf32>
    %218 = vector.extract_strided_slice %170 {offsets = [0, 16], sizes = [32, 8], strides = [1, 1]} : vector<32x32xf32> to vector<32x8xf32>
    %219 = vector.extract_strided_slice %171 {offsets = [0, 16], sizes = [32, 8], strides = [1, 1]} : vector<32x32xf32> to vector<32x8xf32>
    %cst_99 = arith.constant dense<0.000000e+00> : vector<32x32xf32>
    %220 = tpu.matmul %218, %219, %cst_99 {dimension_numbers = #tpu.dot_dimension_numbers<[1], [1], [0], [0], [0, 0, 1, 0], [], []>} : vector<32x8xf32>, vector<32x8xf32>, vector<32x32xf32> -> vector<32x32xf32>
    %221 = arith.addf %220, %3 : vector<32x32xf32>
    %cst_100 = arith.constant dense<0xFF800000> : vector<32xf32>
    %222 = vector.multi_reduction <maximumf>, %221, %cst_100 [1] : vector<32x32xf32> to vector<32xf32>
    %223 = vector.shape_cast %222 : vector<32xf32> to vector<32x1xf32>
    %224 = vector.broadcast %223 : vector<32x1xf32> to vector<32x32xf32>
    %225 = arith.subf %221, %224 : vector<32x32xf32>
    %226 = math.exp %225 : vector<32x32xf32>
    %cst_101 = arith.constant dense<0.000000e+00> : vector<32xf32>
    %227 = vector.multi_reduction <add>, %226, %cst_101 [1] : vector<32x32xf32> to vector<32xf32>
    %228 = vector.shape_cast %227 : vector<32xf32> to vector<32x1xf32>
    %229 = tpu.reciprocal %228 : vector<32x1xf32> -> vector<32x1xf32>
    %230 = vector.broadcast %229 : vector<32x1xf32> to vector<32x32xf32>
    %231 = arith.mulf %226, %230 : vector<32x32xf32>
    %232 = vector.extract_strided_slice %172 {offsets = [0, 16], sizes = [32, 8], strides = [1, 1]} : vector<32x32xf32> to vector<32x8xf32>
    %cst_102 = arith.constant dense<0.000000e+00> : vector<32x8xf32>
    %233 = tpu.matmul %231, %232, %cst_102 {dimension_numbers = #tpu.dot_dimension_numbers<[1], [0], [0], [1], [0, 0, 1, 1], [], []>} : vector<32x32xf32>, vector<32x8xf32>, vector<32x8xf32> -> vector<32x8xf32>
    %234 = vector.extract_strided_slice %174 {offsets = [16, 0], sizes = [8, 32], strides = [1, 1]} : vector<32x32xf32> to vector<8x32xf32>
    %cst_103 = arith.constant dense<0.000000e+00> : vector<32x32xf32>
    %235 = tpu.matmul %233, %234, %cst_103 {dimension_numbers = #tpu.dot_dimension_numbers<[1], [0], [0], [1], [0, 0, 1, 1], [], []>} : vector<32x8xf32>, vector<8x32xf32>, vector<32x32xf32> -> vector<32x32xf32>
    %236 = arith.addf %217, %235 : vector<32x32xf32>
    %237 = vector.extract_strided_slice %170 {offsets = [0, 24], sizes = [32, 8], strides = [1, 1]} : vector<32x32xf32> to vector<32x8xf32>
    %238 = vector.extract_strided_slice %171 {offsets = [0, 24], sizes = [32, 8], strides = [1, 1]} : vector<32x32xf32> to vector<32x8xf32>
    %cst_104 = arith.constant dense<0.000000e+00> : vector<32x32xf32>
    %239 = tpu.matmul %237, %238, %cst_104 {dimension_numbers = #tpu.dot_dimension_numbers<[1], [1], [0], [0], [0, 0, 1, 0], [], []>} : vector<32x8xf32>, vector<32x8xf32>, vector<32x32xf32> -> vector<32x32xf32>
    %240 = arith.addf %239, %3 : vector<32x32xf32>
    %cst_105 = arith.constant dense<0xFF800000> : vector<32xf32>
    %241 = vector.multi_reduction <maximumf>, %240, %cst_105 [1] : vector<32x32xf32> to vector<32xf32>
    %242 = vector.shape_cast %241 : vector<32xf32> to vector<32x1xf32>
    %243 = vector.broadcast %242 : vector<32x1xf32> to vector<32x32xf32>
    %244 = arith.subf %240, %243 : vector<32x32xf32>
    %245 = math.exp %244 : vector<32x32xf32>
    %cst_106 = arith.constant dense<0.000000e+00> : vector<32xf32>
    %246 = vector.multi_reduction <add>, %245, %cst_106 [1] : vector<32x32xf32> to vector<32xf32>
    %247 = vector.shape_cast %246 : vector<32xf32> to vector<32x1xf32>
    %248 = tpu.reciprocal %247 : vector<32x1xf32> -> vector<32x1xf32>
    %249 = vector.broadcast %248 : vector<32x1xf32> to vector<32x32xf32>
    %250 = arith.mulf %245, %249 : vector<32x32xf32>
    %251 = vector.extract_strided_slice %172 {offsets = [0, 24], sizes = [32, 8], strides = [1, 1]} : vector<32x32xf32> to vector<32x8xf32>
    %cst_107 = arith.constant dense<0.000000e+00> : vector<32x8xf32>
    %252 = tpu.matmul %250, %251, %cst_107 {dimension_numbers = #tpu.dot_dimension_numbers<[1], [0], [0], [1], [0, 0, 1, 1], [], []>} : vector<32x32xf32>, vector<32x8xf32>, vector<32x8xf32> -> vector<32x8xf32>
    %253 = vector.extract_strided_slice %174 {offsets = [24, 0], sizes = [8, 32], strides = [1, 1]} : vector<32x32xf32> to vector<8x32xf32>
    %cst_108 = arith.constant dense<0.000000e+00> : vector<32x32xf32>
    %254 = tpu.matmul %252, %253, %cst_108 {dimension_numbers = #tpu.dot_dimension_numbers<[1], [0], [0], [1], [0, 0, 1, 1], [], []>} : vector<32x8xf32>, vector<8x32xf32>, vector<32x32xf32> -> vector<32x32xf32>
    %255 = arith.addf %236, %254 : vector<32x32xf32>
    %256 = arith.addf %162, %255 : vector<32x32xf32>
    %c1_109 = arith.constant 1 : index
    %c0_110 = arith.constant 0 : index
    %c0_111 = arith.constant 0 : index
    %257 = vector.load %arg11[%c1_109, %c0_110, %c0_111] : memref<2x1x32xf32, #tpu.memory_space<vmem>>, vector<1x1x32xf32>
    %258 = vector.shape_cast %257 : vector<1x1x32xf32> to vector<1x32xf32>
    %c1_112 = arith.constant 1 : index
    %c0_113 = arith.constant 0 : index
    %c0_114 = arith.constant 0 : index
    %259 = vector.load %arg12[%c1_112, %c0_113, %c0_114] : memref<2x1x32xf32, #tpu.memory_space<vmem>>, vector<1x1x32xf32>
    %260 = vector.shape_cast %259 : vector<1x1x32xf32> to vector<1x32xf32>
    %cst_115 = arith.constant dense<0.000000e+00> : vector<32xf32>
    %261 = vector.multi_reduction <add>, %256, %cst_115 [1] : vector<32x32xf32> to vector<32xf32>
    %262 = vector.shape_cast %261 : vector<32xf32> to vector<32x1xf32>
    %cst_116 = arith.constant 3.200000e+01 : f32
    %263 = vector.broadcast %cst_116 : f32 to vector<32x1xf32>
    %264 = arith.divf %262, %263 : vector<32x1xf32>
    %265 = vector.broadcast %264 : vector<32x1xf32> to vector<32x32xf32>
    %266 = arith.subf %256, %265 : vector<32x32xf32>
    %267 = arith.mulf %266, %266 : vector<32x32xf32>
    %cst_117 = arith.constant dense<0.000000e+00> : vector<32xf32>
    %268 = vector.multi_reduction <add>, %267, %cst_117 [1] : vector<32x32xf32> to vector<32xf32>
    %269 = vector.shape_cast %268 : vector<32xf32> to vector<32x1xf32>
    %cst_118 = arith.constant 3.200000e+01 : f32
    %270 = vector.broadcast %cst_118 : f32 to vector<32x1xf32>
    %271 = arith.divf %269, %270 : vector<32x1xf32>
    %cst_119 = arith.constant 9.99999974E-6 : f32
    %272 = vector.broadcast %cst_119 : f32 to vector<32x1xf32>
    %273 = arith.addf %271, %272 : vector<32x1xf32>
    %274 = math.rsqrt %273 : vector<32x1xf32>
    %275 = vector.broadcast %274 : vector<32x1xf32> to vector<32x32xf32>
    %276 = arith.mulf %266, %275 : vector<32x32xf32>
    %277 = vector.broadcast %258 : vector<1x32xf32> to vector<32x32xf32>
    %278 = arith.mulf %276, %277 : vector<32x32xf32>
    %279 = vector.broadcast %260 : vector<1x32xf32> to vector<32x32xf32>
    %280 = arith.addf %278, %279 : vector<32x32xf32>
    %c1_120 = arith.constant 1 : index
    %c0_121 = arith.constant 0 : index
    %c0_122 = arith.constant 0 : index
    %281 = vector.load %arg13[%c1_120, %c0_121, %c0_122] : memref<2x32x64xf32, #tpu.memory_space<vmem>>, vector<1x32x64xf32>
    %282 = vector.shape_cast %281 : vector<1x32x64xf32> to vector<32x64xf32>
    %cst_123 = arith.constant dense<0.000000e+00> : vector<32x64xf32>
    %283 = tpu.matmul %280, %282, %cst_123 {dimension_numbers = #tpu.dot_dimension_numbers<[1], [0], [0], [1], [0, 0, 1, 1], [], []>} : vector<32x32xf32>, vector<32x64xf32>, vector<32x64xf32> -> vector<32x64xf32>
    %c1_124 = arith.constant 1 : index
    %c0_125 = arith.constant 0 : index
    %c0_126 = arith.constant 0 : index
    %284 = vector.load %arg14[%c1_124, %c0_125, %c0_126] : memref<2x1x64xf32, #tpu.memory_space<vmem>>, vector<1x1x64xf32>
    %285 = vector.shape_cast %284 : vector<1x1x64xf32> to vector<1x64xf32>
    %286 = vector.broadcast %285 : vector<1x64xf32> to vector<32x64xf32>
    %287 = arith.addf %283, %286 : vector<32x64xf32>
    %cst_127 = arith.constant 0.000000e+00 : f32
    %288 = vector.broadcast %cst_127 : f32 to vector<32x64xf32>
    %289 = arith.maximumf %287, %288 : vector<32x64xf32>
    %c1_128 = arith.constant 1 : index
    %c0_129 = arith.constant 0 : index
    %c0_130 = arith.constant 0 : index
    %290 = vector.load %arg15[%c1_128, %c0_129, %c0_130] : memref<2x64x32xf32, #tpu.memory_space<vmem>>, vector<1x64x32xf32>
    %291 = vector.shape_cast %290 : vector<1x64x32xf32> to vector<64x32xf32>
    %cst_131 = arith.constant dense<0.000000e+00> : vector<32x32xf32>
    %292 = tpu.matmul %289, %291, %cst_131 {dimension_numbers = #tpu.dot_dimension_numbers<[1], [0], [0], [1], [0, 0, 1, 1], [], []>} : vector<32x64xf32>, vector<64x32xf32>, vector<32x32xf32> -> vector<32x32xf32>
    %293 = arith.addf %280, %292 : vector<32x32xf32>
    %c1_132 = arith.constant 1 : index
    %c0_133 = arith.constant 0 : index
    %c0_134 = arith.constant 0 : index
    %294 = vector.load %arg16[%c1_132, %c0_133, %c0_134] : memref<2x1x32xf32, #tpu.memory_space<vmem>>, vector<1x1x32xf32>
    %295 = vector.shape_cast %294 : vector<1x1x32xf32> to vector<1x32xf32>
    %296 = vector.broadcast %295 : vector<1x32xf32> to vector<32x32xf32>
    %297 = arith.addf %293, %296 : vector<32x32xf32>
    %c1_135 = arith.constant 1 : index
    %c0_136 = arith.constant 0 : index
    %c0_137 = arith.constant 0 : index
    %298 = vector.load %arg17[%c1_135, %c0_136, %c0_137] : memref<2x1x32xf32, #tpu.memory_space<vmem>>, vector<1x1x32xf32>
    %299 = vector.shape_cast %298 : vector<1x1x32xf32> to vector<1x32xf32>
    %c1_138 = arith.constant 1 : index
    %c0_139 = arith.constant 0 : index
    %c0_140 = arith.constant 0 : index
    %300 = vector.load %arg18[%c1_138, %c0_139, %c0_140] : memref<2x1x32xf32, #tpu.memory_space<vmem>>, vector<1x1x32xf32>
    %301 = vector.shape_cast %300 : vector<1x1x32xf32> to vector<1x32xf32>
    %cst_141 = arith.constant dense<0.000000e+00> : vector<32xf32>
    %302 = vector.multi_reduction <add>, %297, %cst_141 [1] : vector<32x32xf32> to vector<32xf32>
    %303 = vector.shape_cast %302 : vector<32xf32> to vector<32x1xf32>
    %cst_142 = arith.constant 3.200000e+01 : f32
    %304 = vector.broadcast %cst_142 : f32 to vector<32x1xf32>
    %305 = arith.divf %303, %304 : vector<32x1xf32>
    %306 = vector.broadcast %305 : vector<32x1xf32> to vector<32x32xf32>
    %307 = arith.subf %297, %306 : vector<32x32xf32>
    %308 = arith.mulf %307, %307 : vector<32x32xf32>
    %cst_143 = arith.constant dense<0.000000e+00> : vector<32xf32>
    %309 = vector.multi_reduction <add>, %308, %cst_143 [1] : vector<32x32xf32> to vector<32xf32>
    %310 = vector.shape_cast %309 : vector<32xf32> to vector<32x1xf32>
    %cst_144 = arith.constant 3.200000e+01 : f32
    %311 = vector.broadcast %cst_144 : f32 to vector<32x1xf32>
    %312 = arith.divf %310, %311 : vector<32x1xf32>
    %cst_145 = arith.constant 9.99999974E-6 : f32
    %313 = vector.broadcast %cst_145 : f32 to vector<32x1xf32>
    %314 = arith.addf %312, %313 : vector<32x1xf32>
    %315 = math.rsqrt %314 : vector<32x1xf32>
    %316 = vector.broadcast %315 : vector<32x1xf32> to vector<32x32xf32>
    %317 = arith.mulf %307, %316 : vector<32x32xf32>
    %318 = vector.broadcast %299 : vector<1x32xf32> to vector<32x32xf32>
    %319 = arith.mulf %317, %318 : vector<32x32xf32>
    %320 = vector.broadcast %301 : vector<1x32xf32> to vector<32x32xf32>
    %321 = arith.addf %319, %320 : vector<32x32xf32>
    %322 = vector.extract_strided_slice %321 {offsets = [0, 0], sizes = [24, 32], strides = [1, 1]} : vector<32x32xf32> to vector<24x32xf32>
    %c0_146 = arith.constant 0 : index
    %c0_147 = arith.constant 0 : index
    %323 = vector.load %arg6[%c0_146, %c0_147] : memref<8x32xf32, #tpu.memory_space<vmem>>, vector<8x32xf32>
    %324 = tpu.concatenate %323, %323, %323 in 0 : vector<8x32xf32>, vector<8x32xf32>, vector<8x32xf32> -> vector<24x32xf32>
    %325 = arith.addf %322, %324 : vector<24x32xf32>
    %c0_148 = arith.constant 0 : index
    %c0_149 = arith.constant 0 : index
    %326 = vector.load %arg4[%c0_148, %c0_149] : memref<8x32xf32, #tpu.memory_space<vmem>>, vector<8x32xf32>
    %c0_150 = arith.constant 0 : index
    %c0_151 = arith.constant 0 : index
    %327 = vector.load %arg5[%c0_150, %c0_151] : memref<8x32xf32, #tpu.memory_space<vmem>>, vector<8x32xf32>
    %328 = arith.addf %326, %327 : vector<8x32xf32>
    %c0_152 = arith.constant 0 : index
    %c0_153 = arith.constant 0 : index
    %c0_154 = arith.constant 0 : index
    %329 = vector.load %arg19[%c0_152, %c0_153, %c0_154] : memref<2x32x32xf32, #tpu.memory_space<vmem>>, vector<1x32x32xf32>
    %330 = vector.shape_cast %329 : vector<1x32x32xf32> to vector<32x32xf32>
    %cst_155 = arith.constant dense<0.000000e+00> : vector<8x32xf32>
    %331 = tpu.matmul %328, %330, %cst_155 {dimension_numbers = #tpu.dot_dimension_numbers<[1], [0], [0], [1], [0, 0, 1, 1], [], []>} : vector<8x32xf32>, vector<32x32xf32>, vector<8x32xf32> -> vector<8x32xf32>
    %c0_156 = arith.constant 0 : index
    %c0_157 = arith.constant 0 : index
    %c0_158 = arith.constant 0 : index
    %332 = vector.load %arg20[%c0_156, %c0_157, %c0_158] : memref<2x1x32xf32, #tpu.memory_space<vmem>>, vector<1x1x32xf32>
    %333 = vector.shape_cast %332 : vector<1x1x32xf32> to vector<1x32xf32>
    %334 = vector.broadcast %333 : vector<1x32xf32> to vector<8x32xf32>
    %335 = arith.addf %331, %334 : vector<8x32xf32>
    %c0_159 = arith.constant 0 : index
    %c0_160 = arith.constant 0 : index
    %c0_161 = arith.constant 0 : index
    %336 = vector.load %arg21[%c0_159, %c0_160, %c0_161] : memref<2x32x32xf32, #tpu.memory_space<vmem>>, vector<1x32x32xf32>
    %337 = vector.shape_cast %336 : vector<1x32x32xf32> to vector<32x32xf32>
    %cst_162 = arith.constant dense<0.000000e+00> : vector<24x32xf32>
    %338 = tpu.matmul %325, %337, %cst_162 {dimension_numbers = #tpu.dot_dimension_numbers<[1], [0], [0], [1], [0, 0, 1, 1], [], []>} : vector<24x32xf32>, vector<32x32xf32>, vector<24x32xf32> -> vector<24x32xf32>
    %c0_163 = arith.constant 0 : index
    %c0_164 = arith.constant 0 : index
    %c0_165 = arith.constant 0 : index
    %339 = vector.load %arg22[%c0_163, %c0_164, %c0_165] : memref<2x1x32xf32, #tpu.memory_space<vmem>>, vector<1x1x32xf32>
    %340 = vector.shape_cast %339 : vector<1x1x32xf32> to vector<1x32xf32>
    %341 = vector.broadcast %340 : vector<1x32xf32> to vector<24x32xf32>
    %342 = arith.addf %338, %341 : vector<24x32xf32>
    %c0_166 = arith.constant 0 : index
    %c0_167 = arith.constant 0 : index
    %c0_168 = arith.constant 0 : index
    %343 = vector.load %arg23[%c0_166, %c0_167, %c0_168] : memref<2x32x32xf32, #tpu.memory_space<vmem>>, vector<1x32x32xf32>
    %344 = vector.shape_cast %343 : vector<1x32x32xf32> to vector<32x32xf32>
    %cst_169 = arith.constant dense<0.000000e+00> : vector<24x32xf32>
    %345 = tpu.matmul %322, %344, %cst_169 {dimension_numbers = #tpu.dot_dimension_numbers<[1], [0], [0], [1], [0, 0, 1, 1], [], []>} : vector<24x32xf32>, vector<32x32xf32>, vector<24x32xf32> -> vector<24x32xf32>
    %c0_170 = arith.constant 0 : index
    %c0_171 = arith.constant 0 : index
    %c0_172 = arith.constant 0 : index
    %346 = vector.load %arg24[%c0_170, %c0_171, %c0_172] : memref<2x1x32xf32, #tpu.memory_space<vmem>>, vector<1x1x32xf32>
    %347 = vector.shape_cast %346 : vector<1x1x32xf32> to vector<1x32xf32>
    %348 = vector.broadcast %347 : vector<1x32xf32> to vector<24x32xf32>
    %349 = arith.addf %345, %348 : vector<24x32xf32>
    %c0_173 = arith.constant 0 : index
    %c0_174 = arith.constant 0 : index
    %c0_175 = arith.constant 0 : index
    %350 = vector.load %arg25[%c0_173, %c0_174, %c0_175] : memref<2x32x32xf32, #tpu.memory_space<vmem>>, vector<1x32x32xf32>
    %351 = vector.shape_cast %350 : vector<1x32x32xf32> to vector<32x32xf32>
    %c0_176 = arith.constant 0 : index
    %c0_177 = arith.constant 0 : index
    %c0_178 = arith.constant 0 : index
    %352 = vector.load %arg26[%c0_176, %c0_177, %c0_178] : memref<2x1x32xf32, #tpu.memory_space<vmem>>, vector<1x1x32xf32>
    %353 = vector.shape_cast %352 : vector<1x1x32xf32> to vector<1x32xf32>
    %cst_179 = arith.constant 0.000000e+00 : f32
    %354 = vector.broadcast %cst_179 : f32 to vector<8x32xf32>
    %355 = vector.broadcast %353 : vector<1x32xf32> to vector<8x32xf32>
    %356 = arith.addf %354, %355 : vector<8x32xf32>
    %357 = vector.extract_strided_slice %335 {offsets = [0, 0], sizes = [8, 8], strides = [1, 1]} : vector<8x32xf32> to vector<8x8xf32>
    %358 = vector.extract_strided_slice %342 {offsets = [0, 0], sizes = [24, 8], strides = [1, 1]} : vector<24x32xf32> to vector<24x8xf32>
    %cst_180 = arith.constant dense<0.000000e+00> : vector<8x24xf32>
    %359 = tpu.matmul %357, %358, %cst_180 {dimension_numbers = #tpu.dot_dimension_numbers<[1], [1], [0], [0], [0, 0, 1, 0], [], []>} : vector<8x8xf32>, vector<24x8xf32>, vector<8x24xf32> -> vector<8x24xf32>
    %cst_181 = arith.constant dense<0xFF800000> : vector<8xf32>
    %360 = vector.multi_reduction <maximumf>, %359, %cst_181 [1] : vector<8x24xf32> to vector<8xf32>
    %361 = vector.shape_cast %360 : vector<8xf32> to vector<8x1xf32>
    %362 = vector.broadcast %361 : vector<8x1xf32> to vector<8x24xf32>
    %363 = arith.subf %359, %362 : vector<8x24xf32>
    %364 = math.exp %363 : vector<8x24xf32>
    %cst_182 = arith.constant dense<0.000000e+00> : vector<8xf32>
    %365 = vector.multi_reduction <add>, %364, %cst_182 [1] : vector<8x24xf32> to vector<8xf32>
    %366 = vector.shape_cast %365 : vector<8xf32> to vector<8x1xf32>
    %367 = tpu.reciprocal %366 : vector<8x1xf32> -> vector<8x1xf32>
    %368 = vector.broadcast %367 : vector<8x1xf32> to vector<8x24xf32>
    %369 = arith.mulf %364, %368 : vector<8x24xf32>
    %370 = vector.extract_strided_slice %349 {offsets = [0, 0], sizes = [24, 8], strides = [1, 1]} : vector<24x32xf32> to vector<24x8xf32>
    %cst_183 = arith.constant dense<0.000000e+00> : vector<8x8xf32>
    %371 = tpu.matmul %369, %370, %cst_183 {dimension_numbers = #tpu.dot_dimension_numbers<[1], [0], [0], [1], [0, 0, 1, 1], [], []>} : vector<8x24xf32>, vector<24x8xf32>, vector<8x8xf32> -> vector<8x8xf32>
    %372 = vector.extract_strided_slice %351 {offsets = [0, 0], sizes = [8, 32], strides = [1, 1]} : vector<32x32xf32> to vector<8x32xf32>
    %cst_184 = arith.constant dense<0.000000e+00> : vector<8x32xf32>
    %373 = tpu.matmul %371, %372, %cst_184 {dimension_numbers = #tpu.dot_dimension_numbers<[1], [0], [0], [1], [0, 0, 1, 1], [], []>} : vector<8x8xf32>, vector<8x32xf32>, vector<8x32xf32> -> vector<8x32xf32>
    %374 = arith.addf %356, %373 : vector<8x32xf32>
    %375 = vector.extract_strided_slice %335 {offsets = [0, 8], sizes = [8, 8], strides = [1, 1]} : vector<8x32xf32> to vector<8x8xf32>
    %376 = vector.extract_strided_slice %342 {offsets = [0, 8], sizes = [24, 8], strides = [1, 1]} : vector<24x32xf32> to vector<24x8xf32>
    %cst_185 = arith.constant dense<0.000000e+00> : vector<8x24xf32>
    %377 = tpu.matmul %375, %376, %cst_185 {dimension_numbers = #tpu.dot_dimension_numbers<[1], [1], [0], [0], [0, 0, 1, 0], [], []>} : vector<8x8xf32>, vector<24x8xf32>, vector<8x24xf32> -> vector<8x24xf32>
    %cst_186 = arith.constant dense<0xFF800000> : vector<8xf32>
    %378 = vector.multi_reduction <maximumf>, %377, %cst_186 [1] : vector<8x24xf32> to vector<8xf32>
    %379 = vector.shape_cast %378 : vector<8xf32> to vector<8x1xf32>
    %380 = vector.broadcast %379 : vector<8x1xf32> to vector<8x24xf32>
    %381 = arith.subf %377, %380 : vector<8x24xf32>
    %382 = math.exp %381 : vector<8x24xf32>
    %cst_187 = arith.constant dense<0.000000e+00> : vector<8xf32>
    %383 = vector.multi_reduction <add>, %382, %cst_187 [1] : vector<8x24xf32> to vector<8xf32>
    %384 = vector.shape_cast %383 : vector<8xf32> to vector<8x1xf32>
    %385 = tpu.reciprocal %384 : vector<8x1xf32> -> vector<8x1xf32>
    %386 = vector.broadcast %385 : vector<8x1xf32> to vector<8x24xf32>
    %387 = arith.mulf %382, %386 : vector<8x24xf32>
    %388 = vector.extract_strided_slice %349 {offsets = [0, 8], sizes = [24, 8], strides = [1, 1]} : vector<24x32xf32> to vector<24x8xf32>
    %cst_188 = arith.constant dense<0.000000e+00> : vector<8x8xf32>
    %389 = tpu.matmul %387, %388, %cst_188 {dimension_numbers = #tpu.dot_dimension_numbers<[1], [0], [0], [1], [0, 0, 1, 1], [], []>} : vector<8x24xf32>, vector<24x8xf32>, vector<8x8xf32> -> vector<8x8xf32>
    %390 = vector.extract_strided_slice %351 {offsets = [8, 0], sizes = [8, 32], strides = [1, 1]} : vector<32x32xf32> to vector<8x32xf32>
    %cst_189 = arith.constant dense<0.000000e+00> : vector<8x32xf32>
    %391 = tpu.matmul %389, %390, %cst_189 {dimension_numbers = #tpu.dot_dimension_numbers<[1], [0], [0], [1], [0, 0, 1, 1], [], []>} : vector<8x8xf32>, vector<8x32xf32>, vector<8x32xf32> -> vector<8x32xf32>
    %392 = arith.addf %374, %391 : vector<8x32xf32>
    %393 = vector.extract_strided_slice %335 {offsets = [0, 16], sizes = [8, 8], strides = [1, 1]} : vector<8x32xf32> to vector<8x8xf32>
    %394 = vector.extract_strided_slice %342 {offsets = [0, 16], sizes = [24, 8], strides = [1, 1]} : vector<24x32xf32> to vector<24x8xf32>
    %cst_190 = arith.constant dense<0.000000e+00> : vector<8x24xf32>
    %395 = tpu.matmul %393, %394, %cst_190 {dimension_numbers = #tpu.dot_dimension_numbers<[1], [1], [0], [0], [0, 0, 1, 0], [], []>} : vector<8x8xf32>, vector<24x8xf32>, vector<8x24xf32> -> vector<8x24xf32>
    %cst_191 = arith.constant dense<0xFF800000> : vector<8xf32>
    %396 = vector.multi_reduction <maximumf>, %395, %cst_191 [1] : vector<8x24xf32> to vector<8xf32>
    %397 = vector.shape_cast %396 : vector<8xf32> to vector<8x1xf32>
    %398 = vector.broadcast %397 : vector<8x1xf32> to vector<8x24xf32>
    %399 = arith.subf %395, %398 : vector<8x24xf32>
    %400 = math.exp %399 : vector<8x24xf32>
    %cst_192 = arith.constant dense<0.000000e+00> : vector<8xf32>
    %401 = vector.multi_reduction <add>, %400, %cst_192 [1] : vector<8x24xf32> to vector<8xf32>
    %402 = vector.shape_cast %401 : vector<8xf32> to vector<8x1xf32>
    %403 = tpu.reciprocal %402 : vector<8x1xf32> -> vector<8x1xf32>
    %404 = vector.broadcast %403 : vector<8x1xf32> to vector<8x24xf32>
    %405 = arith.mulf %400, %404 : vector<8x24xf32>
    %406 = vector.extract_strided_slice %349 {offsets = [0, 16], sizes = [24, 8], strides = [1, 1]} : vector<24x32xf32> to vector<24x8xf32>
    %cst_193 = arith.constant dense<0.000000e+00> : vector<8x8xf32>
    %407 = tpu.matmul %405, %406, %cst_193 {dimension_numbers = #tpu.dot_dimension_numbers<[1], [0], [0], [1], [0, 0, 1, 1], [], []>} : vector<8x24xf32>, vector<24x8xf32>, vector<8x8xf32> -> vector<8x8xf32>
    %408 = vector.extract_strided_slice %351 {offsets = [16, 0], sizes = [8, 32], strides = [1, 1]} : vector<32x32xf32> to vector<8x32xf32>
    %cst_194 = arith.constant dense<0.000000e+00> : vector<8x32xf32>
    %409 = tpu.matmul %407, %408, %cst_194 {dimension_numbers = #tpu.dot_dimension_numbers<[1], [0], [0], [1], [0, 0, 1, 1], [], []>} : vector<8x8xf32>, vector<8x32xf32>, vector<8x32xf32> -> vector<8x32xf32>
    %410 = arith.addf %392, %409 : vector<8x32xf32>
    %411 = vector.extract_strided_slice %335 {offsets = [0, 24], sizes = [8, 8], strides = [1, 1]} : vector<8x32xf32> to vector<8x8xf32>
    %412 = vector.extract_strided_slice %342 {offsets = [0, 24], sizes = [24, 8], strides = [1, 1]} : vector<24x32xf32> to vector<24x8xf32>
    %cst_195 = arith.constant dense<0.000000e+00> : vector<8x24xf32>
    %413 = tpu.matmul %411, %412, %cst_195 {dimension_numbers = #tpu.dot_dimension_numbers<[1], [1], [0], [0], [0, 0, 1, 0], [], []>} : vector<8x8xf32>, vector<24x8xf32>, vector<8x24xf32> -> vector<8x24xf32>
    %cst_196 = arith.constant dense<0xFF800000> : vector<8xf32>
    %414 = vector.multi_reduction <maximumf>, %413, %cst_196 [1] : vector<8x24xf32> to vector<8xf32>
    %415 = vector.shape_cast %414 : vector<8xf32> to vector<8x1xf32>
    %416 = vector.broadcast %415 : vector<8x1xf32> to vector<8x24xf32>
    %417 = arith.subf %413, %416 : vector<8x24xf32>
    %418 = math.exp %417 : vector<8x24xf32>
    %cst_197 = arith.constant dense<0.000000e+00> : vector<8xf32>
    %419 = vector.multi_reduction <add>, %418, %cst_197 [1] : vector<8x24xf32> to vector<8xf32>
    %420 = vector.shape_cast %419 : vector<8xf32> to vector<8x1xf32>
    %421 = tpu.reciprocal %420 : vector<8x1xf32> -> vector<8x1xf32>
    %422 = vector.broadcast %421 : vector<8x1xf32> to vector<8x24xf32>
    %423 = arith.mulf %418, %422 : vector<8x24xf32>
    %424 = vector.extract_strided_slice %349 {offsets = [0, 24], sizes = [24, 8], strides = [1, 1]} : vector<24x32xf32> to vector<24x8xf32>
    %cst_198 = arith.constant dense<0.000000e+00> : vector<8x8xf32>
    %425 = tpu.matmul %423, %424, %cst_198 {dimension_numbers = #tpu.dot_dimension_numbers<[1], [0], [0], [1], [0, 0, 1, 1], [], []>} : vector<8x24xf32>, vector<24x8xf32>, vector<8x8xf32> -> vector<8x8xf32>
    %426 = vector.extract_strided_slice %351 {offsets = [24, 0], sizes = [8, 32], strides = [1, 1]} : vector<32x32xf32> to vector<8x32xf32>
    %cst_199 = arith.constant dense<0.000000e+00> : vector<8x32xf32>
    %427 = tpu.matmul %425, %426, %cst_199 {dimension_numbers = #tpu.dot_dimension_numbers<[1], [0], [0], [1], [0, 0, 1, 1], [], []>} : vector<8x8xf32>, vector<8x32xf32>, vector<8x32xf32> -> vector<8x32xf32>
    %428 = arith.addf %410, %427 : vector<8x32xf32>
    %429 = arith.addf %326, %428 : vector<8x32xf32>
    %c0_200 = arith.constant 0 : index
    %c0_201 = arith.constant 0 : index
    %c0_202 = arith.constant 0 : index
    %430 = vector.load %arg27[%c0_200, %c0_201, %c0_202] : memref<2x1x32xf32, #tpu.memory_space<vmem>>, vector<1x1x32xf32>
    %431 = vector.shape_cast %430 : vector<1x1x32xf32> to vector<1x32xf32>
    %c0_203 = arith.constant 0 : index
    %c0_204 = arith.constant 0 : index
    %c0_205 = arith.constant 0 : index
    %432 = vector.load %arg28[%c0_203, %c0_204, %c0_205] : memref<2x1x32xf32, #tpu.memory_space<vmem>>, vector<1x1x32xf32>
    %433 = vector.shape_cast %432 : vector<1x1x32xf32> to vector<1x32xf32>
    %cst_206 = arith.constant dense<0.000000e+00> : vector<8xf32>
    %434 = vector.multi_reduction <add>, %429, %cst_206 [1] : vector<8x32xf32> to vector<8xf32>
    %435 = vector.shape_cast %434 : vector<8xf32> to vector<8x1xf32>
    %cst_207 = arith.constant 3.200000e+01 : f32
    %436 = vector.broadcast %cst_207 : f32 to vector<8x1xf32>
    %437 = arith.divf %435, %436 : vector<8x1xf32>
    %438 = vector.broadcast %437 : vector<8x1xf32> to vector<8x32xf32>
    %439 = arith.subf %429, %438 : vector<8x32xf32>
    %440 = arith.mulf %439, %439 : vector<8x32xf32>
    %cst_208 = arith.constant dense<0.000000e+00> : vector<8xf32>
    %441 = vector.multi_reduction <add>, %440, %cst_208 [1] : vector<8x32xf32> to vector<8xf32>
    %442 = vector.shape_cast %441 : vector<8xf32> to vector<8x1xf32>
    %cst_209 = arith.constant 3.200000e+01 : f32
    %443 = vector.broadcast %cst_209 : f32 to vector<8x1xf32>
    %444 = arith.divf %442, %443 : vector<8x1xf32>
    %cst_210 = arith.constant 9.99999974E-6 : f32
    %445 = vector.broadcast %cst_210 : f32 to vector<8x1xf32>
    %446 = arith.addf %444, %445 : vector<8x1xf32>
    %447 = math.rsqrt %446 : vector<8x1xf32>
    %448 = vector.broadcast %447 : vector<8x1xf32> to vector<8x32xf32>
    %449 = arith.mulf %439, %448 : vector<8x32xf32>
    %450 = vector.broadcast %431 : vector<1x32xf32> to vector<8x32xf32>
    %451 = arith.mulf %449, %450 : vector<8x32xf32>
    %452 = vector.broadcast %433 : vector<1x32xf32> to vector<8x32xf32>
    %453 = arith.addf %451, %452 : vector<8x32xf32>
    %454 = arith.addf %453, %327 : vector<8x32xf32>
    %c0_211 = arith.constant 0 : index
    %c0_212 = arith.constant 0 : index
    %c0_213 = arith.constant 0 : index
    %455 = vector.load %arg29[%c0_211, %c0_212, %c0_213] : memref<2x32x64xf32, #tpu.memory_space<vmem>>, vector<1x32x64xf32>
    %456 = vector.shape_cast %455 : vector<1x32x64xf32> to vector<32x64xf32>
    %cst_214 = arith.constant dense<0.000000e+00> : vector<8x64xf32>
    %457 = tpu.matmul %454, %456, %cst_214 {dimension_numbers = #tpu.dot_dimension_numbers<[1], [0], [0], [1], [0, 0, 1, 1], [], []>} : vector<8x32xf32>, vector<32x64xf32>, vector<8x64xf32> -> vector<8x64xf32>
    %c0_215 = arith.constant 0 : index
    %c0_216 = arith.constant 0 : index
    %c0_217 = arith.constant 0 : index
    %458 = vector.load %arg30[%c0_215, %c0_216, %c0_217] : memref<2x1x64xf32, #tpu.memory_space<vmem>>, vector<1x1x64xf32>
    %459 = vector.shape_cast %458 : vector<1x1x64xf32> to vector<1x64xf32>
    %460 = vector.broadcast %459 : vector<1x64xf32> to vector<8x64xf32>
    %461 = arith.addf %457, %460 : vector<8x64xf32>
    %c0_218 = arith.constant 0 : index
    %c0_219 = arith.constant 0 : index
    %c0_220 = arith.constant 0 : index
    %462 = vector.load %arg31[%c0_218, %c0_219, %c0_220] : memref<2x32x32xf32, #tpu.memory_space<vmem>>, vector<1x32x32xf32>
    %463 = vector.shape_cast %462 : vector<1x32x32xf32> to vector<32x32xf32>
    %cst_221 = arith.constant dense<0.000000e+00> : vector<8x32xf32>
    %464 = tpu.matmul %453, %463, %cst_221 {dimension_numbers = #tpu.dot_dimension_numbers<[1], [0], [0], [1], [0, 0, 1, 1], [], []>} : vector<8x32xf32>, vector<32x32xf32>, vector<8x32xf32> -> vector<8x32xf32>
    %c0_222 = arith.constant 0 : index
    %c0_223 = arith.constant 0 : index
    %c0_224 = arith.constant 0 : index
    %465 = vector.load %arg32[%c0_222, %c0_223, %c0_224] : memref<2x1x32xf32, #tpu.memory_space<vmem>>, vector<1x1x32xf32>
    %466 = vector.shape_cast %465 : vector<1x1x32xf32> to vector<1x32xf32>
    %467 = vector.broadcast %466 : vector<1x32xf32> to vector<8x32xf32>
    %468 = arith.addf %464, %467 : vector<8x32xf32>
    %469 = vector.extract_strided_slice %461 {offsets = [0, 0], sizes = [8, 32], strides = [1, 1]} : vector<8x64xf32> to vector<8x32xf32>
    %470 = vector.extract_strided_slice %461 {offsets = [0, 32], sizes = [8, 32], strides = [1, 1]} : vector<8x64xf32> to vector<8x32xf32>
    %c0_225 = arith.constant 0 : index
    %c0_226 = arith.constant 0 : index
    %c0_227 = arith.constant 0 : index
    %471 = vector.load %arg33[%c0_225, %c0_226, %c0_227] : memref<2x32x32xf32, #tpu.memory_space<vmem>>, vector<1x32x32xf32>
    %472 = vector.shape_cast %471 : vector<1x32x32xf32> to vector<32x32xf32>
    %c0_228 = arith.constant 0 : index
    %c0_229 = arith.constant 0 : index
    %c0_230 = arith.constant 0 : index
    %473 = vector.load %arg34[%c0_228, %c0_229, %c0_230] : memref<2x1x32xf32, #tpu.memory_space<vmem>>, vector<1x1x32xf32>
    %474 = vector.shape_cast %473 : vector<1x1x32xf32> to vector<1x32xf32>
    %cst_231 = arith.constant 0.000000e+00 : f32
    %475 = vector.broadcast %cst_231 : f32 to vector<8x32xf32>
    %476 = vector.broadcast %474 : vector<1x32xf32> to vector<8x32xf32>
    %477 = arith.addf %475, %476 : vector<8x32xf32>
    %478 = vector.extract_strided_slice %469 {offsets = [0, 0], sizes = [8, 8], strides = [1, 1]} : vector<8x32xf32> to vector<8x8xf32>
    %479 = vector.extract_strided_slice %470 {offsets = [0, 0], sizes = [8, 8], strides = [1, 1]} : vector<8x32xf32> to vector<8x8xf32>
    %cst_232 = arith.constant dense<0.000000e+00> : vector<8x8xf32>
    %480 = tpu.matmul %478, %479, %cst_232 {dimension_numbers = #tpu.dot_dimension_numbers<[1], [1], [0], [0], [0, 0, 1, 0], [], []>} : vector<8x8xf32>, vector<8x8xf32>, vector<8x8xf32> -> vector<8x8xf32>
    %cst_233 = arith.constant dense<0xFF800000> : vector<8xf32>
    %481 = vector.multi_reduction <maximumf>, %480, %cst_233 [1] : vector<8x8xf32> to vector<8xf32>
    %482 = vector.shape_cast %481 : vector<8xf32> to vector<8x1xf32>
    %483 = vector.broadcast %482 : vector<8x1xf32> to vector<8x8xf32>
    %484 = arith.subf %480, %483 : vector<8x8xf32>
    %485 = math.exp %484 : vector<8x8xf32>
    %cst_234 = arith.constant dense<0.000000e+00> : vector<8xf32>
    %486 = vector.multi_reduction <add>, %485, %cst_234 [1] : vector<8x8xf32> to vector<8xf32>
    %487 = vector.shape_cast %486 : vector<8xf32> to vector<8x1xf32>
    %488 = tpu.reciprocal %487 : vector<8x1xf32> -> vector<8x1xf32>
    %489 = vector.broadcast %488 : vector<8x1xf32> to vector<8x8xf32>
    %490 = arith.mulf %485, %489 : vector<8x8xf32>
    %491 = vector.extract_strided_slice %468 {offsets = [0, 0], sizes = [8, 8], strides = [1, 1]} : vector<8x32xf32> to vector<8x8xf32>
    %cst_235 = arith.constant dense<0.000000e+00> : vector<8x8xf32>
    %492 = tpu.matmul %490, %491, %cst_235 {dimension_numbers = #tpu.dot_dimension_numbers<[1], [0], [0], [1], [0, 0, 1, 1], [], []>} : vector<8x8xf32>, vector<8x8xf32>, vector<8x8xf32> -> vector<8x8xf32>
    %493 = vector.extract_strided_slice %472 {offsets = [0, 0], sizes = [8, 32], strides = [1, 1]} : vector<32x32xf32> to vector<8x32xf32>
    %cst_236 = arith.constant dense<0.000000e+00> : vector<8x32xf32>
    %494 = tpu.matmul %492, %493, %cst_236 {dimension_numbers = #tpu.dot_dimension_numbers<[1], [0], [0], [1], [0, 0, 1, 1], [], []>} : vector<8x8xf32>, vector<8x32xf32>, vector<8x32xf32> -> vector<8x32xf32>
    %495 = arith.addf %477, %494 : vector<8x32xf32>
    %496 = vector.extract_strided_slice %469 {offsets = [0, 8], sizes = [8, 8], strides = [1, 1]} : vector<8x32xf32> to vector<8x8xf32>
    %497 = vector.extract_strided_slice %470 {offsets = [0, 8], sizes = [8, 8], strides = [1, 1]} : vector<8x32xf32> to vector<8x8xf32>
    %cst_237 = arith.constant dense<0.000000e+00> : vector<8x8xf32>
    %498 = tpu.matmul %496, %497, %cst_237 {dimension_numbers = #tpu.dot_dimension_numbers<[1], [1], [0], [0], [0, 0, 1, 0], [], []>} : vector<8x8xf32>, vector<8x8xf32>, vector<8x8xf32> -> vector<8x8xf32>
    %cst_238 = arith.constant dense<0xFF800000> : vector<8xf32>
    %499 = vector.multi_reduction <maximumf>, %498, %cst_238 [1] : vector<8x8xf32> to vector<8xf32>
    %500 = vector.shape_cast %499 : vector<8xf32> to vector<8x1xf32>
    %501 = vector.broadcast %500 : vector<8x1xf32> to vector<8x8xf32>
    %502 = arith.subf %498, %501 : vector<8x8xf32>
    %503 = math.exp %502 : vector<8x8xf32>
    %cst_239 = arith.constant dense<0.000000e+00> : vector<8xf32>
    %504 = vector.multi_reduction <add>, %503, %cst_239 [1] : vector<8x8xf32> to vector<8xf32>
    %505 = vector.shape_cast %504 : vector<8xf32> to vector<8x1xf32>
    %506 = tpu.reciprocal %505 : vector<8x1xf32> -> vector<8x1xf32>
    %507 = vector.broadcast %506 : vector<8x1xf32> to vector<8x8xf32>
    %508 = arith.mulf %503, %507 : vector<8x8xf32>
    %509 = vector.extract_strided_slice %468 {offsets = [0, 8], sizes = [8, 8], strides = [1, 1]} : vector<8x32xf32> to vector<8x8xf32>
    %cst_240 = arith.constant dense<0.000000e+00> : vector<8x8xf32>
    %510 = tpu.matmul %508, %509, %cst_240 {dimension_numbers = #tpu.dot_dimension_numbers<[1], [0], [0], [1], [0, 0, 1, 1], [], []>} : vector<8x8xf32>, vector<8x8xf32>, vector<8x8xf32> -> vector<8x8xf32>
    %511 = vector.extract_strided_slice %472 {offsets = [8, 0], sizes = [8, 32], strides = [1, 1]} : vector<32x32xf32> to vector<8x32xf32>
    %cst_241 = arith.constant dense<0.000000e+00> : vector<8x32xf32>
    %512 = tpu.matmul %510, %511, %cst_241 {dimension_numbers = #tpu.dot_dimension_numbers<[1], [0], [0], [1], [0, 0, 1, 1], [], []>} : vector<8x8xf32>, vector<8x32xf32>, vector<8x32xf32> -> vector<8x32xf32>
    %513 = arith.addf %495, %512 : vector<8x32xf32>
    %514 = vector.extract_strided_slice %469 {offsets = [0, 16], sizes = [8, 8], strides = [1, 1]} : vector<8x32xf32> to vector<8x8xf32>
    %515 = vector.extract_strided_slice %470 {offsets = [0, 16], sizes = [8, 8], strides = [1, 1]} : vector<8x32xf32> to vector<8x8xf32>
    %cst_242 = arith.constant dense<0.000000e+00> : vector<8x8xf32>
    %516 = tpu.matmul %514, %515, %cst_242 {dimension_numbers = #tpu.dot_dimension_numbers<[1], [1], [0], [0], [0, 0, 1, 0], [], []>} : vector<8x8xf32>, vector<8x8xf32>, vector<8x8xf32> -> vector<8x8xf32>
    %cst_243 = arith.constant dense<0xFF800000> : vector<8xf32>
    %517 = vector.multi_reduction <maximumf>, %516, %cst_243 [1] : vector<8x8xf32> to vector<8xf32>
    %518 = vector.shape_cast %517 : vector<8xf32> to vector<8x1xf32>
    %519 = vector.broadcast %518 : vector<8x1xf32> to vector<8x8xf32>
    %520 = arith.subf %516, %519 : vector<8x8xf32>
    %521 = math.exp %520 : vector<8x8xf32>
    %cst_244 = arith.constant dense<0.000000e+00> : vector<8xf32>
    %522 = vector.multi_reduction <add>, %521, %cst_244 [1] : vector<8x8xf32> to vector<8xf32>
    %523 = vector.shape_cast %522 : vector<8xf32> to vector<8x1xf32>
    %524 = tpu.reciprocal %523 : vector<8x1xf32> -> vector<8x1xf32>
    %525 = vector.broadcast %524 : vector<8x1xf32> to vector<8x8xf32>
    %526 = arith.mulf %521, %525 : vector<8x8xf32>
    %527 = vector.extract_strided_slice %468 {offsets = [0, 16], sizes = [8, 8], strides = [1, 1]} : vector<8x32xf32> to vector<8x8xf32>
    %cst_245 = arith.constant dense<0.000000e+00> : vector<8x8xf32>
    %528 = tpu.matmul %526, %527, %cst_245 {dimension_numbers = #tpu.dot_dimension_numbers<[1], [0], [0], [1], [0, 0, 1, 1], [], []>} : vector<8x8xf32>, vector<8x8xf32>, vector<8x8xf32> -> vector<8x8xf32>
    %529 = vector.extract_strided_slice %472 {offsets = [16, 0], sizes = [8, 32], strides = [1, 1]} : vector<32x32xf32> to vector<8x32xf32>
    %cst_246 = arith.constant dense<0.000000e+00> : vector<8x32xf32>
    %530 = tpu.matmul %528, %529, %cst_246 {dimension_numbers = #tpu.dot_dimension_numbers<[1], [0], [0], [1], [0, 0, 1, 1], [], []>} : vector<8x8xf32>, vector<8x32xf32>, vector<8x32xf32> -> vector<8x32xf32>
    %531 = arith.addf %513, %530 : vector<8x32xf32>
    %532 = vector.extract_strided_slice %469 {offsets = [0, 24], sizes = [8, 8], strides = [1, 1]} : vector<8x32xf32> to vector<8x8xf32>
    %533 = vector.extract_strided_slice %470 {offsets = [0, 24], sizes = [8, 8], strides = [1, 1]} : vector<8x32xf32> to vector<8x8xf32>
    %cst_247 = arith.constant dense<0.000000e+00> : vector<8x8xf32>
    %534 = tpu.matmul %532, %533, %cst_247 {dimension_numbers = #tpu.dot_dimension_numbers<[1], [1], [0], [0], [0, 0, 1, 0], [], []>} : vector<8x8xf32>, vector<8x8xf32>, vector<8x8xf32> -> vector<8x8xf32>
    %cst_248 = arith.constant dense<0xFF800000> : vector<8xf32>
    %535 = vector.multi_reduction <maximumf>, %534, %cst_248 [1] : vector<8x8xf32> to vector<8xf32>
    %536 = vector.shape_cast %535 : vector<8xf32> to vector<8x1xf32>
    %537 = vector.broadcast %536 : vector<8x1xf32> to vector<8x8xf32>
    %538 = arith.subf %534, %537 : vector<8x8xf32>
    %539 = math.exp %538 : vector<8x8xf32>
    %cst_249 = arith.constant dense<0.000000e+00> : vector<8xf32>
    %540 = vector.multi_reduction <add>, %539, %cst_249 [1] : vector<8x8xf32> to vector<8xf32>
    %541 = vector.shape_cast %540 : vector<8xf32> to vector<8x1xf32>
    %542 = tpu.reciprocal %541 : vector<8x1xf32> -> vector<8x1xf32>
    %543 = vector.broadcast %542 : vector<8x1xf32> to vector<8x8xf32>
    %544 = arith.mulf %539, %543 : vector<8x8xf32>
    %545 = vector.extract_strided_slice %468 {offsets = [0, 24], sizes = [8, 8], strides = [1, 1]} : vector<8x32xf32> to vector<8x8xf32>
    %cst_250 = arith.constant dense<0.000000e+00> : vector<8x8xf32>
    %546 = tpu.matmul %544, %545, %cst_250 {dimension_numbers = #tpu.dot_dimension_numbers<[1], [0], [0], [1], [0, 0, 1, 1], [], []>} : vector<8x8xf32>, vector<8x8xf32>, vector<8x8xf32> -> vector<8x8xf32>
    %547 = vector.extract_strided_slice %472 {offsets = [24, 0], sizes = [8, 32], strides = [1, 1]} : vector<32x32xf32> to vector<8x32xf32>
    %cst_251 = arith.constant dense<0.000000e+00> : vector<8x32xf32>
    %548 = tpu.matmul %546, %547, %cst_251 {dimension_numbers = #tpu.dot_dimension_numbers<[1], [0], [0], [1], [0, 0, 1, 1], [], []>} : vector<8x8xf32>, vector<8x32xf32>, vector<8x32xf32> -> vector<8x32xf32>
    %549 = arith.addf %531, %548 : vector<8x32xf32>
    %550 = arith.addf %453, %549 : vector<8x32xf32>
    %c0_252 = arith.constant 0 : index
    %c0_253 = arith.constant 0 : index
    %c0_254 = arith.constant 0 : index
    %551 = vector.load %arg35[%c0_252, %c0_253, %c0_254] : memref<2x1x32xf32, #tpu.memory_space<vmem>>, vector<1x1x32xf32>
    %552 = vector.shape_cast %551 : vector<1x1x32xf32> to vector<1x32xf32>
    %c0_255 = arith.constant 0 : index
    %c0_256 = arith.constant 0 : index
    %c0_257 = arith.constant 0 : index
    %553 = vector.load %arg36[%c0_255, %c0_256, %c0_257] : memref<2x1x32xf32, #tpu.memory_space<vmem>>, vector<1x1x32xf32>
    %554 = vector.shape_cast %553 : vector<1x1x32xf32> to vector<1x32xf32>
    %cst_258 = arith.constant dense<0.000000e+00> : vector<8xf32>
    %555 = vector.multi_reduction <add>, %550, %cst_258 [1] : vector<8x32xf32> to vector<8xf32>
    %556 = vector.shape_cast %555 : vector<8xf32> to vector<8x1xf32>
    %cst_259 = arith.constant 3.200000e+01 : f32
    %557 = vector.broadcast %cst_259 : f32 to vector<8x1xf32>
    %558 = arith.divf %556, %557 : vector<8x1xf32>
    %559 = vector.broadcast %558 : vector<8x1xf32> to vector<8x32xf32>
    %560 = arith.subf %550, %559 : vector<8x32xf32>
    %561 = arith.mulf %560, %560 : vector<8x32xf32>
    %cst_260 = arith.constant dense<0.000000e+00> : vector<8xf32>
    %562 = vector.multi_reduction <add>, %561, %cst_260 [1] : vector<8x32xf32> to vector<8xf32>
    %563 = vector.shape_cast %562 : vector<8xf32> to vector<8x1xf32>
    %cst_261 = arith.constant 3.200000e+01 : f32
    %564 = vector.broadcast %cst_261 : f32 to vector<8x1xf32>
    %565 = arith.divf %563, %564 : vector<8x1xf32>
    %cst_262 = arith.constant 9.99999974E-6 : f32
    %566 = vector.broadcast %cst_262 : f32 to vector<8x1xf32>
    %567 = arith.addf %565, %566 : vector<8x1xf32>
    %568 = math.rsqrt %567 : vector<8x1xf32>
    %569 = vector.broadcast %568 : vector<8x1xf32> to vector<8x32xf32>
    %570 = arith.mulf %560, %569 : vector<8x32xf32>
    %571 = vector.broadcast %552 : vector<1x32xf32> to vector<8x32xf32>
    %572 = arith.mulf %570, %571 : vector<8x32xf32>
    %573 = vector.broadcast %554 : vector<1x32xf32> to vector<8x32xf32>
    %574 = arith.addf %572, %573 : vector<8x32xf32>
    %c0_263 = arith.constant 0 : index
    %c0_264 = arith.constant 0 : index
    %c0_265 = arith.constant 0 : index
    %575 = vector.load %arg37[%c0_263, %c0_264, %c0_265] : memref<2x32x64xf32, #tpu.memory_space<vmem>>, vector<1x32x64xf32>
    %576 = vector.shape_cast %575 : vector<1x32x64xf32> to vector<32x64xf32>
    %cst_266 = arith.constant dense<0.000000e+00> : vector<8x64xf32>
    %577 = tpu.matmul %574, %576, %cst_266 {dimension_numbers = #tpu.dot_dimension_numbers<[1], [0], [0], [1], [0, 0, 1, 1], [], []>} : vector<8x32xf32>, vector<32x64xf32>, vector<8x64xf32> -> vector<8x64xf32>
    %c0_267 = arith.constant 0 : index
    %c0_268 = arith.constant 0 : index
    %c0_269 = arith.constant 0 : index
    %578 = vector.load %arg38[%c0_267, %c0_268, %c0_269] : memref<2x1x64xf32, #tpu.memory_space<vmem>>, vector<1x1x64xf32>
    %579 = vector.shape_cast %578 : vector<1x1x64xf32> to vector<1x64xf32>
    %580 = vector.broadcast %579 : vector<1x64xf32> to vector<8x64xf32>
    %581 = arith.addf %577, %580 : vector<8x64xf32>
    %cst_270 = arith.constant 0.000000e+00 : f32
    %582 = vector.broadcast %cst_270 : f32 to vector<8x64xf32>
    %583 = arith.maximumf %581, %582 : vector<8x64xf32>
    %c0_271 = arith.constant 0 : index
    %c0_272 = arith.constant 0 : index
    %c0_273 = arith.constant 0 : index
    %584 = vector.load %arg39[%c0_271, %c0_272, %c0_273] : memref<2x64x32xf32, #tpu.memory_space<vmem>>, vector<1x64x32xf32>
    %585 = vector.shape_cast %584 : vector<1x64x32xf32> to vector<64x32xf32>
    %cst_274 = arith.constant dense<0.000000e+00> : vector<8x32xf32>
    %586 = tpu.matmul %583, %585, %cst_274 {dimension_numbers = #tpu.dot_dimension_numbers<[1], [0], [0], [1], [0, 0, 1, 1], [], []>} : vector<8x64xf32>, vector<64x32xf32>, vector<8x32xf32> -> vector<8x32xf32>
    %587 = arith.addf %574, %586 : vector<8x32xf32>
    %c0_275 = arith.constant 0 : index
    %c0_276 = arith.constant 0 : index
    %c0_277 = arith.constant 0 : index
    %588 = vector.load %arg40[%c0_275, %c0_276, %c0_277] : memref<2x1x32xf32, #tpu.memory_space<vmem>>, vector<1x1x32xf32>
    %589 = vector.shape_cast %588 : vector<1x1x32xf32> to vector<1x32xf32>
    %590 = vector.broadcast %589 : vector<1x32xf32> to vector<8x32xf32>
    %591 = arith.addf %587, %590 : vector<8x32xf32>
    %c0_278 = arith.constant 0 : index
    %c0_279 = arith.constant 0 : index
    %c0_280 = arith.constant 0 : index
    %592 = vector.load %arg41[%c0_278, %c0_279, %c0_280] : memref<2x1x32xf32, #tpu.memory_space<vmem>>, vector<1x1x32xf32>
    %593 = vector.shape_cast %592 : vector<1x1x32xf32> to vector<1x32xf32>
    %c0_281 = arith.constant 0 : index
    %c0_282 = arith.constant 0 : index
    %c0_283 = arith.constant 0 : index
    %594 = vector.load %arg42[%c0_281, %c0_282, %c0_283] : memref<2x1x32xf32, #tpu.memory_space<vmem>>, vector<1x1x32xf32>
    %595 = vector.shape_cast %594 : vector<1x1x32xf32> to vector<1x32xf32>
    %cst_284 = arith.constant dense<0.000000e+00> : vector<8xf32>
    %596 = vector.multi_reduction <add>, %591, %cst_284 [1] : vector<8x32xf32> to vector<8xf32>
    %597 = vector.shape_cast %596 : vector<8xf32> to vector<8x1xf32>
    %cst_285 = arith.constant 3.200000e+01 : f32
    %598 = vector.broadcast %cst_285 : f32 to vector<8x1xf32>
    %599 = arith.divf %597, %598 : vector<8x1xf32>
    %600 = vector.broadcast %599 : vector<8x1xf32> to vector<8x32xf32>
    %601 = arith.subf %591, %600 : vector<8x32xf32>
    %602 = arith.mulf %601, %601 : vector<8x32xf32>
    %cst_286 = arith.constant dense<0.000000e+00> : vector<8xf32>
    %603 = vector.multi_reduction <add>, %602, %cst_286 [1] : vector<8x32xf32> to vector<8xf32>
    %604 = vector.shape_cast %603 : vector<8xf32> to vector<8x1xf32>
    %cst_287 = arith.constant 3.200000e+01 : f32
    %605 = vector.broadcast %cst_287 : f32 to vector<8x1xf32>
    %606 = arith.divf %604, %605 : vector<8x1xf32>
    %cst_288 = arith.constant 9.99999974E-6 : f32
    %607 = vector.broadcast %cst_288 : f32 to vector<8x1xf32>
    %608 = arith.addf %606, %607 : vector<8x1xf32>
    %609 = math.rsqrt %608 : vector<8x1xf32>
    %610 = vector.broadcast %609 : vector<8x1xf32> to vector<8x32xf32>
    %611 = arith.mulf %601, %610 : vector<8x32xf32>
    %612 = vector.broadcast %593 : vector<1x32xf32> to vector<8x32xf32>
    %613 = arith.mulf %611, %612 : vector<8x32xf32>
    %614 = vector.broadcast %595 : vector<1x32xf32> to vector<8x32xf32>
    %615 = arith.addf %613, %614 : vector<8x32xf32>
    %616 = arith.addf %615, %327 : vector<8x32xf32>
    %c1_289 = arith.constant 1 : index
    %c0_290 = arith.constant 0 : index
    %c0_291 = arith.constant 0 : index
    %617 = vector.load %arg19[%c1_289, %c0_290, %c0_291] : memref<2x32x32xf32, #tpu.memory_space<vmem>>, vector<1x32x32xf32>
    %618 = vector.shape_cast %617 : vector<1x32x32xf32> to vector<32x32xf32>
    %cst_292 = arith.constant dense<0.000000e+00> : vector<8x32xf32>
    %619 = tpu.matmul %616, %618, %cst_292 {dimension_numbers = #tpu.dot_dimension_numbers<[1], [0], [0], [1], [0, 0, 1, 1], [], []>} : vector<8x32xf32>, vector<32x32xf32>, vector<8x32xf32> -> vector<8x32xf32>
    %c1_293 = arith.constant 1 : index
    %c0_294 = arith.constant 0 : index
    %c0_295 = arith.constant 0 : index
    %620 = vector.load %arg20[%c1_293, %c0_294, %c0_295] : memref<2x1x32xf32, #tpu.memory_space<vmem>>, vector<1x1x32xf32>
    %621 = vector.shape_cast %620 : vector<1x1x32xf32> to vector<1x32xf32>
    %622 = vector.broadcast %621 : vector<1x32xf32> to vector<8x32xf32>
    %623 = arith.addf %619, %622 : vector<8x32xf32>
    %c1_296 = arith.constant 1 : index
    %c0_297 = arith.constant 0 : index
    %c0_298 = arith.constant 0 : index
    %624 = vector.load %arg21[%c1_296, %c0_297, %c0_298] : memref<2x32x32xf32, #tpu.memory_space<vmem>>, vector<1x32x32xf32>
    %625 = vector.shape_cast %624 : vector<1x32x32xf32> to vector<32x32xf32>
    %cst_299 = arith.constant dense<0.000000e+00> : vector<24x32xf32>
    %626 = tpu.matmul %325, %625, %cst_299 {dimension_numbers = #tpu.dot_dimension_numbers<[1], [0], [0], [1], [0, 0, 1, 1], [], []>} : vector<24x32xf32>, vector<32x32xf32>, vector<24x32xf32> -> vector<24x32xf32>
    %c1_300 = arith.constant 1 : index
    %c0_301 = arith.constant 0 : index
    %c0_302 = arith.constant 0 : index
    %627 = vector.load %arg22[%c1_300, %c0_301, %c0_302] : memref<2x1x32xf32, #tpu.memory_space<vmem>>, vector<1x1x32xf32>
    %628 = vector.shape_cast %627 : vector<1x1x32xf32> to vector<1x32xf32>
    %629 = vector.broadcast %628 : vector<1x32xf32> to vector<24x32xf32>
    %630 = arith.addf %626, %629 : vector<24x32xf32>
    %c1_303 = arith.constant 1 : index
    %c0_304 = arith.constant 0 : index
    %c0_305 = arith.constant 0 : index
    %631 = vector.load %arg23[%c1_303, %c0_304, %c0_305] : memref<2x32x32xf32, #tpu.memory_space<vmem>>, vector<1x32x32xf32>
    %632 = vector.shape_cast %631 : vector<1x32x32xf32> to vector<32x32xf32>
    %cst_306 = arith.constant dense<0.000000e+00> : vector<24x32xf32>
    %633 = tpu.matmul %322, %632, %cst_306 {dimension_numbers = #tpu.dot_dimension_numbers<[1], [0], [0], [1], [0, 0, 1, 1], [], []>} : vector<24x32xf32>, vector<32x32xf32>, vector<24x32xf32> -> vector<24x32xf32>
    %c1_307 = arith.constant 1 : index
    %c0_308 = arith.constant 0 : index
    %c0_309 = arith.constant 0 : index
    %634 = vector.load %arg24[%c1_307, %c0_308, %c0_309] : memref<2x1x32xf32, #tpu.memory_space<vmem>>, vector<1x1x32xf32>
    %635 = vector.shape_cast %634 : vector<1x1x32xf32> to vector<1x32xf32>
    %636 = vector.broadcast %635 : vector<1x32xf32> to vector<24x32xf32>
    %637 = arith.addf %633, %636 : vector<24x32xf32>
    %c1_310 = arith.constant 1 : index
    %c0_311 = arith.constant 0 : index
    %c0_312 = arith.constant 0 : index
    %638 = vector.load %arg25[%c1_310, %c0_311, %c0_312] : memref<2x32x32xf32, #tpu.memory_space<vmem>>, vector<1x32x32xf32>
    %639 = vector.shape_cast %638 : vector<1x32x32xf32> to vector<32x32xf32>
    %c1_313 = arith.constant 1 : index
    %c0_314 = arith.constant 0 : index
    %c0_315 = arith.constant 0 : index
    %640 = vector.load %arg26[%c1_313, %c0_314, %c0_315] : memref<2x1x32xf32, #tpu.memory_space<vmem>>, vector<1x1x32xf32>
    %641 = vector.shape_cast %640 : vector<1x1x32xf32> to vector<1x32xf32>
    %cst_316 = arith.constant 0.000000e+00 : f32
    %642 = vector.broadcast %cst_316 : f32 to vector<8x32xf32>
    %643 = vector.broadcast %641 : vector<1x32xf32> to vector<8x32xf32>
    %644 = arith.addf %642, %643 : vector<8x32xf32>
    %645 = vector.extract_strided_slice %623 {offsets = [0, 0], sizes = [8, 8], strides = [1, 1]} : vector<8x32xf32> to vector<8x8xf32>
    %646 = vector.extract_strided_slice %630 {offsets = [0, 0], sizes = [24, 8], strides = [1, 1]} : vector<24x32xf32> to vector<24x8xf32>
    %cst_317 = arith.constant dense<0.000000e+00> : vector<8x24xf32>
    %647 = tpu.matmul %645, %646, %cst_317 {dimension_numbers = #tpu.dot_dimension_numbers<[1], [1], [0], [0], [0, 0, 1, 0], [], []>} : vector<8x8xf32>, vector<24x8xf32>, vector<8x24xf32> -> vector<8x24xf32>
    %cst_318 = arith.constant dense<0xFF800000> : vector<8xf32>
    %648 = vector.multi_reduction <maximumf>, %647, %cst_318 [1] : vector<8x24xf32> to vector<8xf32>
    %649 = vector.shape_cast %648 : vector<8xf32> to vector<8x1xf32>
    %650 = vector.broadcast %649 : vector<8x1xf32> to vector<8x24xf32>
    %651 = arith.subf %647, %650 : vector<8x24xf32>
    %652 = math.exp %651 : vector<8x24xf32>
    %cst_319 = arith.constant dense<0.000000e+00> : vector<8xf32>
    %653 = vector.multi_reduction <add>, %652, %cst_319 [1] : vector<8x24xf32> to vector<8xf32>
    %654 = vector.shape_cast %653 : vector<8xf32> to vector<8x1xf32>
    %655 = tpu.reciprocal %654 : vector<8x1xf32> -> vector<8x1xf32>
    %656 = vector.broadcast %655 : vector<8x1xf32> to vector<8x24xf32>
    %657 = arith.mulf %652, %656 : vector<8x24xf32>
    %658 = vector.extract_strided_slice %637 {offsets = [0, 0], sizes = [24, 8], strides = [1, 1]} : vector<24x32xf32> to vector<24x8xf32>
    %cst_320 = arith.constant dense<0.000000e+00> : vector<8x8xf32>
    %659 = tpu.matmul %657, %658, %cst_320 {dimension_numbers = #tpu.dot_dimension_numbers<[1], [0], [0], [1], [0, 0, 1, 1], [], []>} : vector<8x24xf32>, vector<24x8xf32>, vector<8x8xf32> -> vector<8x8xf32>
    %660 = vector.extract_strided_slice %639 {offsets = [0, 0], sizes = [8, 32], strides = [1, 1]} : vector<32x32xf32> to vector<8x32xf32>
    %cst_321 = arith.constant dense<0.000000e+00> : vector<8x32xf32>
    %661 = tpu.matmul %659, %660, %cst_321 {dimension_numbers = #tpu.dot_dimension_numbers<[1], [0], [0], [1], [0, 0, 1, 1], [], []>} : vector<8x8xf32>, vector<8x32xf32>, vector<8x32xf32> -> vector<8x32xf32>
    %662 = arith.addf %644, %661 : vector<8x32xf32>
    %663 = vector.extract_strided_slice %623 {offsets = [0, 8], sizes = [8, 8], strides = [1, 1]} : vector<8x32xf32> to vector<8x8xf32>
    %664 = vector.extract_strided_slice %630 {offsets = [0, 8], sizes = [24, 8], strides = [1, 1]} : vector<24x32xf32> to vector<24x8xf32>
    %cst_322 = arith.constant dense<0.000000e+00> : vector<8x24xf32>
    %665 = tpu.matmul %663, %664, %cst_322 {dimension_numbers = #tpu.dot_dimension_numbers<[1], [1], [0], [0], [0, 0, 1, 0], [], []>} : vector<8x8xf32>, vector<24x8xf32>, vector<8x24xf32> -> vector<8x24xf32>
    %cst_323 = arith.constant dense<0xFF800000> : vector<8xf32>
    %666 = vector.multi_reduction <maximumf>, %665, %cst_323 [1] : vector<8x24xf32> to vector<8xf32>
    %667 = vector.shape_cast %666 : vector<8xf32> to vector<8x1xf32>
    %668 = vector.broadcast %667 : vector<8x1xf32> to vector<8x24xf32>
    %669 = arith.subf %665, %668 : vector<8x24xf32>
    %670 = math.exp %669 : vector<8x24xf32>
    %cst_324 = arith.constant dense<0.000000e+00> : vector<8xf32>
    %671 = vector.multi_reduction <add>, %670, %cst_324 [1] : vector<8x24xf32> to vector<8xf32>
    %672 = vector.shape_cast %671 : vector<8xf32> to vector<8x1xf32>
    %673 = tpu.reciprocal %672 : vector<8x1xf32> -> vector<8x1xf32>
    %674 = vector.broadcast %673 : vector<8x1xf32> to vector<8x24xf32>
    %675 = arith.mulf %670, %674 : vector<8x24xf32>
    %676 = vector.extract_strided_slice %637 {offsets = [0, 8], sizes = [24, 8], strides = [1, 1]} : vector<24x32xf32> to vector<24x8xf32>
    %cst_325 = arith.constant dense<0.000000e+00> : vector<8x8xf32>
    %677 = tpu.matmul %675, %676, %cst_325 {dimension_numbers = #tpu.dot_dimension_numbers<[1], [0], [0], [1], [0, 0, 1, 1], [], []>} : vector<8x24xf32>, vector<24x8xf32>, vector<8x8xf32> -> vector<8x8xf32>
    %678 = vector.extract_strided_slice %639 {offsets = [8, 0], sizes = [8, 32], strides = [1, 1]} : vector<32x32xf32> to vector<8x32xf32>
    %cst_326 = arith.constant dense<0.000000e+00> : vector<8x32xf32>
    %679 = tpu.matmul %677, %678, %cst_326 {dimension_numbers = #tpu.dot_dimension_numbers<[1], [0], [0], [1], [0, 0, 1, 1], [], []>} : vector<8x8xf32>, vector<8x32xf32>, vector<8x32xf32> -> vector<8x32xf32>
    %680 = arith.addf %662, %679 : vector<8x32xf32>
    %681 = vector.extract_strided_slice %623 {offsets = [0, 16], sizes = [8, 8], strides = [1, 1]} : vector<8x32xf32> to vector<8x8xf32>
    %682 = vector.extract_strided_slice %630 {offsets = [0, 16], sizes = [24, 8], strides = [1, 1]} : vector<24x32xf32> to vector<24x8xf32>
    %cst_327 = arith.constant dense<0.000000e+00> : vector<8x24xf32>
    %683 = tpu.matmul %681, %682, %cst_327 {dimension_numbers = #tpu.dot_dimension_numbers<[1], [1], [0], [0], [0, 0, 1, 0], [], []>} : vector<8x8xf32>, vector<24x8xf32>, vector<8x24xf32> -> vector<8x24xf32>
    %cst_328 = arith.constant dense<0xFF800000> : vector<8xf32>
    %684 = vector.multi_reduction <maximumf>, %683, %cst_328 [1] : vector<8x24xf32> to vector<8xf32>
    %685 = vector.shape_cast %684 : vector<8xf32> to vector<8x1xf32>
    %686 = vector.broadcast %685 : vector<8x1xf32> to vector<8x24xf32>
    %687 = arith.subf %683, %686 : vector<8x24xf32>
    %688 = math.exp %687 : vector<8x24xf32>
    %cst_329 = arith.constant dense<0.000000e+00> : vector<8xf32>
    %689 = vector.multi_reduction <add>, %688, %cst_329 [1] : vector<8x24xf32> to vector<8xf32>
    %690 = vector.shape_cast %689 : vector<8xf32> to vector<8x1xf32>
    %691 = tpu.reciprocal %690 : vector<8x1xf32> -> vector<8x1xf32>
    %692 = vector.broadcast %691 : vector<8x1xf32> to vector<8x24xf32>
    %693 = arith.mulf %688, %692 : vector<8x24xf32>
    %694 = vector.extract_strided_slice %637 {offsets = [0, 16], sizes = [24, 8], strides = [1, 1]} : vector<24x32xf32> to vector<24x8xf32>
    %cst_330 = arith.constant dense<0.000000e+00> : vector<8x8xf32>
    %695 = tpu.matmul %693, %694, %cst_330 {dimension_numbers = #tpu.dot_dimension_numbers<[1], [0], [0], [1], [0, 0, 1, 1], [], []>} : vector<8x24xf32>, vector<24x8xf32>, vector<8x8xf32> -> vector<8x8xf32>
    %696 = vector.extract_strided_slice %639 {offsets = [16, 0], sizes = [8, 32], strides = [1, 1]} : vector<32x32xf32> to vector<8x32xf32>
    %cst_331 = arith.constant dense<0.000000e+00> : vector<8x32xf32>
    %697 = tpu.matmul %695, %696, %cst_331 {dimension_numbers = #tpu.dot_dimension_numbers<[1], [0], [0], [1], [0, 0, 1, 1], [], []>} : vector<8x8xf32>, vector<8x32xf32>, vector<8x32xf32> -> vector<8x32xf32>
    %698 = arith.addf %680, %697 : vector<8x32xf32>
    %699 = vector.extract_strided_slice %623 {offsets = [0, 24], sizes = [8, 8], strides = [1, 1]} : vector<8x32xf32> to vector<8x8xf32>
    %700 = vector.extract_strided_slice %630 {offsets = [0, 24], sizes = [24, 8], strides = [1, 1]} : vector<24x32xf32> to vector<24x8xf32>
    %cst_332 = arith.constant dense<0.000000e+00> : vector<8x24xf32>
    %701 = tpu.matmul %699, %700, %cst_332 {dimension_numbers = #tpu.dot_dimension_numbers<[1], [1], [0], [0], [0, 0, 1, 0], [], []>} : vector<8x8xf32>, vector<24x8xf32>, vector<8x24xf32> -> vector<8x24xf32>
    %cst_333 = arith.constant dense<0xFF800000> : vector<8xf32>
    %702 = vector.multi_reduction <maximumf>, %701, %cst_333 [1] : vector<8x24xf32> to vector<8xf32>
    %703 = vector.shape_cast %702 : vector<8xf32> to vector<8x1xf32>
    %704 = vector.broadcast %703 : vector<8x1xf32> to vector<8x24xf32>
    %705 = arith.subf %701, %704 : vector<8x24xf32>
    %706 = math.exp %705 : vector<8x24xf32>
    %cst_334 = arith.constant dense<0.000000e+00> : vector<8xf32>
    %707 = vector.multi_reduction <add>, %706, %cst_334 [1] : vector<8x24xf32> to vector<8xf32>
    %708 = vector.shape_cast %707 : vector<8xf32> to vector<8x1xf32>
    %709 = tpu.reciprocal %708 : vector<8x1xf32> -> vector<8x1xf32>
    %710 = vector.broadcast %709 : vector<8x1xf32> to vector<8x24xf32>
    %711 = arith.mulf %706, %710 : vector<8x24xf32>
    %712 = vector.extract_strided_slice %637 {offsets = [0, 24], sizes = [24, 8], strides = [1, 1]} : vector<24x32xf32> to vector<24x8xf32>
    %cst_335 = arith.constant dense<0.000000e+00> : vector<8x8xf32>
    %713 = tpu.matmul %711, %712, %cst_335 {dimension_numbers = #tpu.dot_dimension_numbers<[1], [0], [0], [1], [0, 0, 1, 1], [], []>} : vector<8x24xf32>, vector<24x8xf32>, vector<8x8xf32> -> vector<8x8xf32>
    %714 = vector.extract_strided_slice %639 {offsets = [24, 0], sizes = [8, 32], strides = [1, 1]} : vector<32x32xf32> to vector<8x32xf32>
    %cst_336 = arith.constant dense<0.000000e+00> : vector<8x32xf32>
    %715 = tpu.matmul %713, %714, %cst_336 {dimension_numbers = #tpu.dot_dimension_numbers<[1], [0], [0], [1], [0, 0, 1, 1], [], []>} : vector<8x8xf32>, vector<8x32xf32>, vector<8x32xf32> -> vector<8x32xf32>
    %716 = arith.addf %698, %715 : vector<8x32xf32>
    %717 = arith.addf %615, %716 : vector<8x32xf32>
    %c1_337 = arith.constant 1 : index
    %c0_338 = arith.constant 0 : index
    %c0_339 = arith.constant 0 : index
    %718 = vector.load %arg27[%c1_337, %c0_338, %c0_339] : memref<2x1x32xf32, #tpu.memory_space<vmem>>, vector<1x1x32xf32>
    %719 = vector.shape_cast %718 : vector<1x1x32xf32> to vector<1x32xf32>
    %c1_340 = arith.constant 1 : index
    %c0_341 = arith.constant 0 : index
    %c0_342 = arith.constant 0 : index
    %720 = vector.load %arg28[%c1_340, %c0_341, %c0_342] : memref<2x1x32xf32, #tpu.memory_space<vmem>>, vector<1x1x32xf32>
    %721 = vector.shape_cast %720 : vector<1x1x32xf32> to vector<1x32xf32>
    %cst_343 = arith.constant dense<0.000000e+00> : vector<8xf32>
    %722 = vector.multi_reduction <add>, %717, %cst_343 [1] : vector<8x32xf32> to vector<8xf32>
    %723 = vector.shape_cast %722 : vector<8xf32> to vector<8x1xf32>
    %cst_344 = arith.constant 3.200000e+01 : f32
    %724 = vector.broadcast %cst_344 : f32 to vector<8x1xf32>
    %725 = arith.divf %723, %724 : vector<8x1xf32>
    %726 = vector.broadcast %725 : vector<8x1xf32> to vector<8x32xf32>
    %727 = arith.subf %717, %726 : vector<8x32xf32>
    %728 = arith.mulf %727, %727 : vector<8x32xf32>
    %cst_345 = arith.constant dense<0.000000e+00> : vector<8xf32>
    %729 = vector.multi_reduction <add>, %728, %cst_345 [1] : vector<8x32xf32> to vector<8xf32>
    %730 = vector.shape_cast %729 : vector<8xf32> to vector<8x1xf32>
    %cst_346 = arith.constant 3.200000e+01 : f32
    %731 = vector.broadcast %cst_346 : f32 to vector<8x1xf32>
    %732 = arith.divf %730, %731 : vector<8x1xf32>
    %cst_347 = arith.constant 9.99999974E-6 : f32
    %733 = vector.broadcast %cst_347 : f32 to vector<8x1xf32>
    %734 = arith.addf %732, %733 : vector<8x1xf32>
    %735 = math.rsqrt %734 : vector<8x1xf32>
    %736 = vector.broadcast %735 : vector<8x1xf32> to vector<8x32xf32>
    %737 = arith.mulf %727, %736 : vector<8x32xf32>
    %738 = vector.broadcast %719 : vector<1x32xf32> to vector<8x32xf32>
    %739 = arith.mulf %737, %738 : vector<8x32xf32>
    %740 = vector.broadcast %721 : vector<1x32xf32> to vector<8x32xf32>
    %741 = arith.addf %739, %740 : vector<8x32xf32>
    %742 = arith.addf %741, %327 : vector<8x32xf32>
    %c1_348 = arith.constant 1 : index
    %c0_349 = arith.constant 0 : index
    %c0_350 = arith.constant 0 : index
    %743 = vector.load %arg29[%c1_348, %c0_349, %c0_350] : memref<2x32x64xf32, #tpu.memory_space<vmem>>, vector<1x32x64xf32>
    %744 = vector.shape_cast %743 : vector<1x32x64xf32> to vector<32x64xf32>
    %cst_351 = arith.constant dense<0.000000e+00> : vector<8x64xf32>
    %745 = tpu.matmul %742, %744, %cst_351 {dimension_numbers = #tpu.dot_dimension_numbers<[1], [0], [0], [1], [0, 0, 1, 1], [], []>} : vector<8x32xf32>, vector<32x64xf32>, vector<8x64xf32> -> vector<8x64xf32>
    %c1_352 = arith.constant 1 : index
    %c0_353 = arith.constant 0 : index
    %c0_354 = arith.constant 0 : index
    %746 = vector.load %arg30[%c1_352, %c0_353, %c0_354] : memref<2x1x64xf32, #tpu.memory_space<vmem>>, vector<1x1x64xf32>
    %747 = vector.shape_cast %746 : vector<1x1x64xf32> to vector<1x64xf32>
    %748 = vector.broadcast %747 : vector<1x64xf32> to vector<8x64xf32>
    %749 = arith.addf %745, %748 : vector<8x64xf32>
    %c1_355 = arith.constant 1 : index
    %c0_356 = arith.constant 0 : index
    %c0_357 = arith.constant 0 : index
    %750 = vector.load %arg31[%c1_355, %c0_356, %c0_357] : memref<2x32x32xf32, #tpu.memory_space<vmem>>, vector<1x32x32xf32>
    %751 = vector.shape_cast %750 : vector<1x32x32xf32> to vector<32x32xf32>
    %cst_358 = arith.constant dense<0.000000e+00> : vector<8x32xf32>
    %752 = tpu.matmul %741, %751, %cst_358 {dimension_numbers = #tpu.dot_dimension_numbers<[1], [0], [0], [1], [0, 0, 1, 1], [], []>} : vector<8x32xf32>, vector<32x32xf32>, vector<8x32xf32> -> vector<8x32xf32>
    %c1_359 = arith.constant 1 : index
    %c0_360 = arith.constant 0 : index
    %c0_361 = arith.constant 0 : index
    %753 = vector.load %arg32[%c1_359, %c0_360, %c0_361] : memref<2x1x32xf32, #tpu.memory_space<vmem>>, vector<1x1x32xf32>
    %754 = vector.shape_cast %753 : vector<1x1x32xf32> to vector<1x32xf32>
    %755 = vector.broadcast %754 : vector<1x32xf32> to vector<8x32xf32>
    %756 = arith.addf %752, %755 : vector<8x32xf32>
    %757 = vector.extract_strided_slice %749 {offsets = [0, 0], sizes = [8, 32], strides = [1, 1]} : vector<8x64xf32> to vector<8x32xf32>
    %758 = vector.extract_strided_slice %749 {offsets = [0, 32], sizes = [8, 32], strides = [1, 1]} : vector<8x64xf32> to vector<8x32xf32>
    %c1_362 = arith.constant 1 : index
    %c0_363 = arith.constant 0 : index
    %c0_364 = arith.constant 0 : index
    %759 = vector.load %arg33[%c1_362, %c0_363, %c0_364] : memref<2x32x32xf32, #tpu.memory_space<vmem>>, vector<1x32x32xf32>
    %760 = vector.shape_cast %759 : vector<1x32x32xf32> to vector<32x32xf32>
    %c1_365 = arith.constant 1 : index
    %c0_366 = arith.constant 0 : index
    %c0_367 = arith.constant 0 : index
    %761 = vector.load %arg34[%c1_365, %c0_366, %c0_367] : memref<2x1x32xf32, #tpu.memory_space<vmem>>, vector<1x1x32xf32>
    %762 = vector.shape_cast %761 : vector<1x1x32xf32> to vector<1x32xf32>
    %cst_368 = arith.constant 0.000000e+00 : f32
    %763 = vector.broadcast %cst_368 : f32 to vector<8x32xf32>
    %764 = vector.broadcast %762 : vector<1x32xf32> to vector<8x32xf32>
    %765 = arith.addf %763, %764 : vector<8x32xf32>
    %766 = vector.extract_strided_slice %757 {offsets = [0, 0], sizes = [8, 8], strides = [1, 1]} : vector<8x32xf32> to vector<8x8xf32>
    %767 = vector.extract_strided_slice %758 {offsets = [0, 0], sizes = [8, 8], strides = [1, 1]} : vector<8x32xf32> to vector<8x8xf32>
    %cst_369 = arith.constant dense<0.000000e+00> : vector<8x8xf32>
    %768 = tpu.matmul %766, %767, %cst_369 {dimension_numbers = #tpu.dot_dimension_numbers<[1], [1], [0], [0], [0, 0, 1, 0], [], []>} : vector<8x8xf32>, vector<8x8xf32>, vector<8x8xf32> -> vector<8x8xf32>
    %cst_370 = arith.constant dense<0xFF800000> : vector<8xf32>
    %769 = vector.multi_reduction <maximumf>, %768, %cst_370 [1] : vector<8x8xf32> to vector<8xf32>
    %770 = vector.shape_cast %769 : vector<8xf32> to vector<8x1xf32>
    %771 = vector.broadcast %770 : vector<8x1xf32> to vector<8x8xf32>
    %772 = arith.subf %768, %771 : vector<8x8xf32>
    %773 = math.exp %772 : vector<8x8xf32>
    %cst_371 = arith.constant dense<0.000000e+00> : vector<8xf32>
    %774 = vector.multi_reduction <add>, %773, %cst_371 [1] : vector<8x8xf32> to vector<8xf32>
    %775 = vector.shape_cast %774 : vector<8xf32> to vector<8x1xf32>
    %776 = tpu.reciprocal %775 : vector<8x1xf32> -> vector<8x1xf32>
    %777 = vector.broadcast %776 : vector<8x1xf32> to vector<8x8xf32>
    %778 = arith.mulf %773, %777 : vector<8x8xf32>
    %779 = vector.extract_strided_slice %756 {offsets = [0, 0], sizes = [8, 8], strides = [1, 1]} : vector<8x32xf32> to vector<8x8xf32>
    %cst_372 = arith.constant dense<0.000000e+00> : vector<8x8xf32>
    %780 = tpu.matmul %778, %779, %cst_372 {dimension_numbers = #tpu.dot_dimension_numbers<[1], [0], [0], [1], [0, 0, 1, 1], [], []>} : vector<8x8xf32>, vector<8x8xf32>, vector<8x8xf32> -> vector<8x8xf32>
    %781 = vector.extract_strided_slice %760 {offsets = [0, 0], sizes = [8, 32], strides = [1, 1]} : vector<32x32xf32> to vector<8x32xf32>
    %cst_373 = arith.constant dense<0.000000e+00> : vector<8x32xf32>
    %782 = tpu.matmul %780, %781, %cst_373 {dimension_numbers = #tpu.dot_dimension_numbers<[1], [0], [0], [1], [0, 0, 1, 1], [], []>} : vector<8x8xf32>, vector<8x32xf32>, vector<8x32xf32> -> vector<8x32xf32>
    %783 = arith.addf %765, %782 : vector<8x32xf32>
    %784 = vector.extract_strided_slice %757 {offsets = [0, 8], sizes = [8, 8], strides = [1, 1]} : vector<8x32xf32> to vector<8x8xf32>
    %785 = vector.extract_strided_slice %758 {offsets = [0, 8], sizes = [8, 8], strides = [1, 1]} : vector<8x32xf32> to vector<8x8xf32>
    %cst_374 = arith.constant dense<0.000000e+00> : vector<8x8xf32>
    %786 = tpu.matmul %784, %785, %cst_374 {dimension_numbers = #tpu.dot_dimension_numbers<[1], [1], [0], [0], [0, 0, 1, 0], [], []>} : vector<8x8xf32>, vector<8x8xf32>, vector<8x8xf32> -> vector<8x8xf32>
    %cst_375 = arith.constant dense<0xFF800000> : vector<8xf32>
    %787 = vector.multi_reduction <maximumf>, %786, %cst_375 [1] : vector<8x8xf32> to vector<8xf32>
    %788 = vector.shape_cast %787 : vector<8xf32> to vector<8x1xf32>
    %789 = vector.broadcast %788 : vector<8x1xf32> to vector<8x8xf32>
    %790 = arith.subf %786, %789 : vector<8x8xf32>
    %791 = math.exp %790 : vector<8x8xf32>
    %cst_376 = arith.constant dense<0.000000e+00> : vector<8xf32>
    %792 = vector.multi_reduction <add>, %791, %cst_376 [1] : vector<8x8xf32> to vector<8xf32>
    %793 = vector.shape_cast %792 : vector<8xf32> to vector<8x1xf32>
    %794 = tpu.reciprocal %793 : vector<8x1xf32> -> vector<8x1xf32>
    %795 = vector.broadcast %794 : vector<8x1xf32> to vector<8x8xf32>
    %796 = arith.mulf %791, %795 : vector<8x8xf32>
    %797 = vector.extract_strided_slice %756 {offsets = [0, 8], sizes = [8, 8], strides = [1, 1]} : vector<8x32xf32> to vector<8x8xf32>
    %cst_377 = arith.constant dense<0.000000e+00> : vector<8x8xf32>
    %798 = tpu.matmul %796, %797, %cst_377 {dimension_numbers = #tpu.dot_dimension_numbers<[1], [0], [0], [1], [0, 0, 1, 1], [], []>} : vector<8x8xf32>, vector<8x8xf32>, vector<8x8xf32> -> vector<8x8xf32>
    %799 = vector.extract_strided_slice %760 {offsets = [8, 0], sizes = [8, 32], strides = [1, 1]} : vector<32x32xf32> to vector<8x32xf32>
    %cst_378 = arith.constant dense<0.000000e+00> : vector<8x32xf32>
    %800 = tpu.matmul %798, %799, %cst_378 {dimension_numbers = #tpu.dot_dimension_numbers<[1], [0], [0], [1], [0, 0, 1, 1], [], []>} : vector<8x8xf32>, vector<8x32xf32>, vector<8x32xf32> -> vector<8x32xf32>
    %801 = arith.addf %783, %800 : vector<8x32xf32>
    %802 = vector.extract_strided_slice %757 {offsets = [0, 16], sizes = [8, 8], strides = [1, 1]} : vector<8x32xf32> to vector<8x8xf32>
    %803 = vector.extract_strided_slice %758 {offsets = [0, 16], sizes = [8, 8], strides = [1, 1]} : vector<8x32xf32> to vector<8x8xf32>
    %cst_379 = arith.constant dense<0.000000e+00> : vector<8x8xf32>
    %804 = tpu.matmul %802, %803, %cst_379 {dimension_numbers = #tpu.dot_dimension_numbers<[1], [1], [0], [0], [0, 0, 1, 0], [], []>} : vector<8x8xf32>, vector<8x8xf32>, vector<8x8xf32> -> vector<8x8xf32>
    %cst_380 = arith.constant dense<0xFF800000> : vector<8xf32>
    %805 = vector.multi_reduction <maximumf>, %804, %cst_380 [1] : vector<8x8xf32> to vector<8xf32>
    %806 = vector.shape_cast %805 : vector<8xf32> to vector<8x1xf32>
    %807 = vector.broadcast %806 : vector<8x1xf32> to vector<8x8xf32>
    %808 = arith.subf %804, %807 : vector<8x8xf32>
    %809 = math.exp %808 : vector<8x8xf32>
    %cst_381 = arith.constant dense<0.000000e+00> : vector<8xf32>
    %810 = vector.multi_reduction <add>, %809, %cst_381 [1] : vector<8x8xf32> to vector<8xf32>
    %811 = vector.shape_cast %810 : vector<8xf32> to vector<8x1xf32>
    %812 = tpu.reciprocal %811 : vector<8x1xf32> -> vector<8x1xf32>
    %813 = vector.broadcast %812 : vector<8x1xf32> to vector<8x8xf32>
    %814 = arith.mulf %809, %813 : vector<8x8xf32>
    %815 = vector.extract_strided_slice %756 {offsets = [0, 16], sizes = [8, 8], strides = [1, 1]} : vector<8x32xf32> to vector<8x8xf32>
    %cst_382 = arith.constant dense<0.000000e+00> : vector<8x8xf32>
    %816 = tpu.matmul %814, %815, %cst_382 {dimension_numbers = #tpu.dot_dimension_numbers<[1], [0], [0], [1], [0, 0, 1, 1], [], []>} : vector<8x8xf32>, vector<8x8xf32>, vector<8x8xf32> -> vector<8x8xf32>
    %817 = vector.extract_strided_slice %760 {offsets = [16, 0], sizes = [8, 32], strides = [1, 1]} : vector<32x32xf32> to vector<8x32xf32>
    %cst_383 = arith.constant dense<0.000000e+00> : vector<8x32xf32>
    %818 = tpu.matmul %816, %817, %cst_383 {dimension_numbers = #tpu.dot_dimension_numbers<[1], [0], [0], [1], [0, 0, 1, 1], [], []>} : vector<8x8xf32>, vector<8x32xf32>, vector<8x32xf32> -> vector<8x32xf32>
    %819 = arith.addf %801, %818 : vector<8x32xf32>
    %820 = vector.extract_strided_slice %757 {offsets = [0, 24], sizes = [8, 8], strides = [1, 1]} : vector<8x32xf32> to vector<8x8xf32>
    %821 = vector.extract_strided_slice %758 {offsets = [0, 24], sizes = [8, 8], strides = [1, 1]} : vector<8x32xf32> to vector<8x8xf32>
    %cst_384 = arith.constant dense<0.000000e+00> : vector<8x8xf32>
    %822 = tpu.matmul %820, %821, %cst_384 {dimension_numbers = #tpu.dot_dimension_numbers<[1], [1], [0], [0], [0, 0, 1, 0], [], []>} : vector<8x8xf32>, vector<8x8xf32>, vector<8x8xf32> -> vector<8x8xf32>
    %cst_385 = arith.constant dense<0xFF800000> : vector<8xf32>
    %823 = vector.multi_reduction <maximumf>, %822, %cst_385 [1] : vector<8x8xf32> to vector<8xf32>
    %824 = vector.shape_cast %823 : vector<8xf32> to vector<8x1xf32>
    %825 = vector.broadcast %824 : vector<8x1xf32> to vector<8x8xf32>
    %826 = arith.subf %822, %825 : vector<8x8xf32>
    %827 = math.exp %826 : vector<8x8xf32>
    %cst_386 = arith.constant dense<0.000000e+00> : vector<8xf32>
    %828 = vector.multi_reduction <add>, %827, %cst_386 [1] : vector<8x8xf32> to vector<8xf32>
    %829 = vector.shape_cast %828 : vector<8xf32> to vector<8x1xf32>
    %830 = tpu.reciprocal %829 : vector<8x1xf32> -> vector<8x1xf32>
    %831 = vector.broadcast %830 : vector<8x1xf32> to vector<8x8xf32>
    %832 = arith.mulf %827, %831 : vector<8x8xf32>
    %833 = vector.extract_strided_slice %756 {offsets = [0, 24], sizes = [8, 8], strides = [1, 1]} : vector<8x32xf32> to vector<8x8xf32>
    %cst_387 = arith.constant dense<0.000000e+00> : vector<8x8xf32>
    %834 = tpu.matmul %832, %833, %cst_387 {dimension_numbers = #tpu.dot_dimension_numbers<[1], [0], [0], [1], [0, 0, 1, 1], [], []>} : vector<8x8xf32>, vector<8x8xf32>, vector<8x8xf32> -> vector<8x8xf32>
    %835 = vector.extract_strided_slice %760 {offsets = [24, 0], sizes = [8, 32], strides = [1, 1]} : vector<32x32xf32> to vector<8x32xf32>
    %cst_388 = arith.constant dense<0.000000e+00> : vector<8x32xf32>
    %836 = tpu.matmul %834, %835, %cst_388 {dimension_numbers = #tpu.dot_dimension_numbers<[1], [0], [0], [1], [0, 0, 1, 1], [], []>} : vector<8x8xf32>, vector<8x32xf32>, vector<8x32xf32> -> vector<8x32xf32>
    %837 = arith.addf %819, %836 : vector<8x32xf32>
    %838 = arith.addf %741, %837 : vector<8x32xf32>
    %c1_389 = arith.constant 1 : index
    %c0_390 = arith.constant 0 : index
    %c0_391 = arith.constant 0 : index
    %839 = vector.load %arg35[%c1_389, %c0_390, %c0_391] : memref<2x1x32xf32, #tpu.memory_space<vmem>>, vector<1x1x32xf32>
    %840 = vector.shape_cast %839 : vector<1x1x32xf32> to vector<1x32xf32>
    %c1_392 = arith.constant 1 : index
    %c0_393 = arith.constant 0 : index
    %c0_394 = arith.constant 0 : index
    %841 = vector.load %arg36[%c1_392, %c0_393, %c0_394] : memref<2x1x32xf32, #tpu.memory_space<vmem>>, vector<1x1x32xf32>
    %842 = vector.shape_cast %841 : vector<1x1x32xf32> to vector<1x32xf32>
    %cst_395 = arith.constant dense<0.000000e+00> : vector<8xf32>
    %843 = vector.multi_reduction <add>, %838, %cst_395 [1] : vector<8x32xf32> to vector<8xf32>
    %844 = vector.shape_cast %843 : vector<8xf32> to vector<8x1xf32>
    %cst_396 = arith.constant 3.200000e+01 : f32
    %845 = vector.broadcast %cst_396 : f32 to vector<8x1xf32>
    %846 = arith.divf %844, %845 : vector<8x1xf32>
    %847 = vector.broadcast %846 : vector<8x1xf32> to vector<8x32xf32>
    %848 = arith.subf %838, %847 : vector<8x32xf32>
    %849 = arith.mulf %848, %848 : vector<8x32xf32>
    %cst_397 = arith.constant dense<0.000000e+00> : vector<8xf32>
    %850 = vector.multi_reduction <add>, %849, %cst_397 [1] : vector<8x32xf32> to vector<8xf32>
    %851 = vector.shape_cast %850 : vector<8xf32> to vector<8x1xf32>
    %cst_398 = arith.constant 3.200000e+01 : f32
    %852 = vector.broadcast %cst_398 : f32 to vector<8x1xf32>
    %853 = arith.divf %851, %852 : vector<8x1xf32>
    %cst_399 = arith.constant 9.99999974E-6 : f32
    %854 = vector.broadcast %cst_399 : f32 to vector<8x1xf32>
    %855 = arith.addf %853, %854 : vector<8x1xf32>
    %856 = math.rsqrt %855 : vector<8x1xf32>
    %857 = vector.broadcast %856 : vector<8x1xf32> to vector<8x32xf32>
    %858 = arith.mulf %848, %857 : vector<8x32xf32>
    %859 = vector.broadcast %840 : vector<1x32xf32> to vector<8x32xf32>
    %860 = arith.mulf %858, %859 : vector<8x32xf32>
    %861 = vector.broadcast %842 : vector<1x32xf32> to vector<8x32xf32>
    %862 = arith.addf %860, %861 : vector<8x32xf32>
    %c1_400 = arith.constant 1 : index
    %c0_401 = arith.constant 0 : index
    %c0_402 = arith.constant 0 : index
    %863 = vector.load %arg37[%c1_400, %c0_401, %c0_402] : memref<2x32x64xf32, #tpu.memory_space<vmem>>, vector<1x32x64xf32>
    %864 = vector.shape_cast %863 : vector<1x32x64xf32> to vector<32x64xf32>
    %cst_403 = arith.constant dense<0.000000e+00> : vector<8x64xf32>
    %865 = tpu.matmul %862, %864, %cst_403 {dimension_numbers = #tpu.dot_dimension_numbers<[1], [0], [0], [1], [0, 0, 1, 1], [], []>} : vector<8x32xf32>, vector<32x64xf32>, vector<8x64xf32> -> vector<8x64xf32>
    %c1_404 = arith.constant 1 : index
    %c0_405 = arith.constant 0 : index
    %c0_406 = arith.constant 0 : index
    %866 = vector.load %arg38[%c1_404, %c0_405, %c0_406] : memref<2x1x64xf32, #tpu.memory_space<vmem>>, vector<1x1x64xf32>
    %867 = vector.shape_cast %866 : vector<1x1x64xf32> to vector<1x64xf32>
    %868 = vector.broadcast %867 : vector<1x64xf32> to vector<8x64xf32>
    %869 = arith.addf %865, %868 : vector<8x64xf32>
    %cst_407 = arith.constant 0.000000e+00 : f32
    %870 = vector.broadcast %cst_407 : f32 to vector<8x64xf32>
    %871 = arith.maximumf %869, %870 : vector<8x64xf32>
    %c1_408 = arith.constant 1 : index
    %c0_409 = arith.constant 0 : index
    %c0_410 = arith.constant 0 : index
    %872 = vector.load %arg39[%c1_408, %c0_409, %c0_410] : memref<2x64x32xf32, #tpu.memory_space<vmem>>, vector<1x64x32xf32>
    %873 = vector.shape_cast %872 : vector<1x64x32xf32> to vector<64x32xf32>
    %cst_411 = arith.constant dense<0.000000e+00> : vector<8x32xf32>
    %874 = tpu.matmul %871, %873, %cst_411 {dimension_numbers = #tpu.dot_dimension_numbers<[1], [0], [0], [1], [0, 0, 1, 1], [], []>} : vector<8x64xf32>, vector<64x32xf32>, vector<8x32xf32> -> vector<8x32xf32>
    %875 = arith.addf %862, %874 : vector<8x32xf32>
    %c1_412 = arith.constant 1 : index
    %c0_413 = arith.constant 0 : index
    %c0_414 = arith.constant 0 : index
    %876 = vector.load %arg40[%c1_412, %c0_413, %c0_414] : memref<2x1x32xf32, #tpu.memory_space<vmem>>, vector<1x1x32xf32>
    %877 = vector.shape_cast %876 : vector<1x1x32xf32> to vector<1x32xf32>
    %878 = vector.broadcast %877 : vector<1x32xf32> to vector<8x32xf32>
    %879 = arith.addf %875, %878 : vector<8x32xf32>
    %c1_415 = arith.constant 1 : index
    %c0_416 = arith.constant 0 : index
    %c0_417 = arith.constant 0 : index
    %880 = vector.load %arg41[%c1_415, %c0_416, %c0_417] : memref<2x1x32xf32, #tpu.memory_space<vmem>>, vector<1x1x32xf32>
    %881 = vector.shape_cast %880 : vector<1x1x32xf32> to vector<1x32xf32>
    %c1_418 = arith.constant 1 : index
    %c0_419 = arith.constant 0 : index
    %c0_420 = arith.constant 0 : index
    %882 = vector.load %arg42[%c1_418, %c0_419, %c0_420] : memref<2x1x32xf32, #tpu.memory_space<vmem>>, vector<1x1x32xf32>
    %883 = vector.shape_cast %882 : vector<1x1x32xf32> to vector<1x32xf32>
    %cst_421 = arith.constant dense<0.000000e+00> : vector<8xf32>
    %884 = vector.multi_reduction <add>, %879, %cst_421 [1] : vector<8x32xf32> to vector<8xf32>
    %885 = vector.shape_cast %884 : vector<8xf32> to vector<8x1xf32>
    %cst_422 = arith.constant 3.200000e+01 : f32
    %886 = vector.broadcast %cst_422 : f32 to vector<8x1xf32>
    %887 = arith.divf %885, %886 : vector<8x1xf32>
    %888 = vector.broadcast %887 : vector<8x1xf32> to vector<8x32xf32>
    %889 = arith.subf %879, %888 : vector<8x32xf32>
    %890 = arith.mulf %889, %889 : vector<8x32xf32>
    %cst_423 = arith.constant dense<0.000000e+00> : vector<8xf32>
    %891 = vector.multi_reduction <add>, %890, %cst_423 [1] : vector<8x32xf32> to vector<8xf32>
    %892 = vector.shape_cast %891 : vector<8xf32> to vector<8x1xf32>
    %cst_424 = arith.constant 3.200000e+01 : f32
    %893 = vector.broadcast %cst_424 : f32 to vector<8x1xf32>
    %894 = arith.divf %892, %893 : vector<8x1xf32>
    %cst_425 = arith.constant 9.99999974E-6 : f32
    %895 = vector.broadcast %cst_425 : f32 to vector<8x1xf32>
    %896 = arith.addf %894, %895 : vector<8x1xf32>
    %897 = math.rsqrt %896 : vector<8x1xf32>
    %898 = vector.broadcast %897 : vector<8x1xf32> to vector<8x32xf32>
    %899 = arith.mulf %889, %898 : vector<8x32xf32>
    %900 = vector.broadcast %881 : vector<1x32xf32> to vector<8x32xf32>
    %901 = arith.mulf %899, %900 : vector<8x32xf32>
    %902 = vector.broadcast %883 : vector<1x32xf32> to vector<8x32xf32>
    %903 = arith.addf %901, %902 : vector<8x32xf32>
    %c0_426 = arith.constant 0 : index
    %c0_427 = arith.constant 0 : index
    %904 = vector.load %arg43[%c0_426, %c0_427] : memref<1x32xf32, #tpu.memory_space<vmem>>, vector<1x32xf32>
    %c0_428 = arith.constant 0 : index
    %c0_429 = arith.constant 0 : index
    %905 = vector.load %arg44[%c0_428, %c0_429] : memref<1x32xf32, #tpu.memory_space<vmem>>, vector<1x32xf32>
    %cst_430 = arith.constant dense<0.000000e+00> : vector<8xf32>
    %906 = vector.multi_reduction <add>, %903, %cst_430 [1] : vector<8x32xf32> to vector<8xf32>
    %907 = vector.shape_cast %906 : vector<8xf32> to vector<8x1xf32>
    %cst_431 = arith.constant 3.200000e+01 : f32
    %908 = vector.broadcast %cst_431 : f32 to vector<8x1xf32>
    %909 = arith.divf %907, %908 : vector<8x1xf32>
    %910 = vector.broadcast %909 : vector<8x1xf32> to vector<8x32xf32>
    %911 = arith.subf %903, %910 : vector<8x32xf32>
    %912 = arith.mulf %911, %911 : vector<8x32xf32>
    %cst_432 = arith.constant dense<0.000000e+00> : vector<8xf32>
    %913 = vector.multi_reduction <add>, %912, %cst_432 [1] : vector<8x32xf32> to vector<8xf32>
    %914 = vector.shape_cast %913 : vector<8xf32> to vector<8x1xf32>
    %cst_433 = arith.constant 3.200000e+01 : f32
    %915 = vector.broadcast %cst_433 : f32 to vector<8x1xf32>
    %916 = arith.divf %914, %915 : vector<8x1xf32>
    %cst_434 = arith.constant 9.99999974E-6 : f32
    %917 = vector.broadcast %cst_434 : f32 to vector<8x1xf32>
    %918 = arith.addf %916, %917 : vector<8x1xf32>
    %919 = math.rsqrt %918 : vector<8x1xf32>
    %920 = vector.broadcast %919 : vector<8x1xf32> to vector<8x32xf32>
    %921 = arith.mulf %911, %920 : vector<8x32xf32>
    %922 = vector.broadcast %904 : vector<1x32xf32> to vector<8x32xf32>
    %923 = arith.mulf %921, %922 : vector<8x32xf32>
    %924 = vector.broadcast %905 : vector<1x32xf32> to vector<8x32xf32>
    %925 = arith.addf %923, %924 : vector<8x32xf32>
    %c0_435 = arith.constant 0 : index
    %c0_436 = arith.constant 0 : index
    %c0_437 = arith.constant 0 : index
    %926 = vector.load %arg45[%c0_435, %c0_436, %c0_437] : memref<1x8x32xf32, #tpu.memory_space<vmem>>, vector<1x8x32xf32>
    %927 = vector.shape_cast %926 : vector<1x8x32xf32> to vector<8x32xf32>
    %928 = vector.shape_cast %925 : vector<8x32xf32> to vector<1x8x32xf32>
    tpu.vector_store %arg45[%c0_435, %c0_436, %c0_437], %928 {strides = array<i32>} : memref<1x8x32xf32, #tpu.memory_space<vmem>>, vector<1x8x32xf32>,
    return
  }
  func.func @transform_0(%arg0: i32) -> (i32, i32, i32) {
    %c0_i32 = arith.constant 0 : i32
    %c0_i32_0 = arith.constant 0 : i32
    %c0_i32_1 = arith.constant 0 : i32
    return %arg0, %c0_i32, %c0_i32_0 : i32, i32, i32
  }
  func.func @transform_1(%arg0: i32) -> (i32, i32) {
    %c0_i32 = arith.constant 0 : i32
    %c0_i32_0 = arith.constant 0 : i32
    %c0_i32_1 = arith.constant 0 : i32
    return %c0_i32, %c0_i32_0 : i32, i32
  }
  func.func @transform_2(%arg0: i32) -> (i32, i32) {
    %c0_i32 = arith.constant 0 : i32
    %c0_i32_0 = arith.constant 0 : i32
    %c0_i32_1 = arith.constant 0 : i32
    return %c0_i32, %c0_i32_0 : i32, i32
  }
  func.func @transform_3(%arg0: i32) -> (i32, i32) {
    %c0_i32 = arith.constant 0 : i32
    %c0_i32_0 = arith.constant 0 : i32
    %c0_i32_1 = arith.constant 0 : i32
    return %c0_i32, %c0_i32_0 : i32, i32
  }
  func.func @transform_4(%arg0: i32) -> (i32, i32) {
    %c0_i32 = arith.constant 0 : i32
    %c0_i32_0 = arith.constant 0 : i32
    %c0_i32_1 = arith.constant 0 : i32
    return %c0_i32, %c0_i32_0 : i32, i32
  }
  func.func @transform_5(%arg0: i32) -> (i32, i32) {
    %c0_i32 = arith.constant 0 : i32
    %c0_i32_0 = arith.constant 0 : i32
    %c0_i32_1 = arith.constant 0 : i32
    return %c0_i32, %c0_i32_0 : i32, i32
  }
  func.func @transform_6(%arg0: i32) -> (i32, i32, i32) {
    %c0_i32 = arith.constant 0 : i32
    %c0_i32_0 = arith.constant 0 : i32
    %c0_i32_1 = arith.constant 0 : i32
    %c0_i32_2 = arith.constant 0 : i32
    return %c0_i32, %c0_i32_0, %c0_i32_1 : i32, i32, i32
  }
  func.func @transform_7(%arg0: i32) -> (i32, i32, i32) {
    %c0_i32 = arith.constant 0 : i32
    %c0_i32_0 = arith.constant 0 : i32
    %c0_i32_1 = arith.constant 0 : i32
    %c0_i32_2 = arith.constant 0 : i32
    return %c0_i32, %c0_i32_0, %c0_i32_1 : i32, i32, i32
  }
  func.func @transform_8(%arg0: i32) -> (i32, i32, i32) {
    %c0_i32 = arith.constant 0 : i32
    %c0_i32_0 = arith.constant 0 : i32
    %c0_i32_1 = arith.constant 0 : i32
    %c0_i32_2 = arith.constant 0 : i32
    return %c0_i32, %c0_i32_0, %c0_i32_1 : i32, i32, i32
  }
  func.func @transform_9(%arg0: i32) -> (i32, i32, i32) {
    %c0_i32 = arith.constant 0 : i32
    %c0_i32_0 = arith.constant 0 : i32
    %c0_i32_1 = arith.constant 0 : i32
    %c0_i32_2 = arith.constant 0 : i32
    return %c0_i32, %c0_i32_0, %c0_i32_1 : i32, i32, i32
  }
  func.func @transform_10(%arg0: i32) -> (i32, i32, i32) {
    %c0_i32 = arith.constant 0 : i32
    %c0_i32_0 = arith.constant 0 : i32
    %c0_i32_1 = arith.constant 0 : i32
    %c0_i32_2 = arith.constant 0 : i32
    return %c0_i32, %c0_i32_0, %c0_i32_1 : i32, i32, i32
  }
  func.func @transform_11(%arg0: i32) -> (i32, i32, i32) {
    %c0_i32 = arith.constant 0 : i32
    %c0_i32_0 = arith.constant 0 : i32
    %c0_i32_1 = arith.constant 0 : i32
    %c0_i32_2 = arith.constant 0 : i32
    return %c0_i32, %c0_i32_0, %c0_i32_1 : i32, i32, i32
  }
  func.func @transform_12(%arg0: i32) -> (i32, i32, i32) {
    %c0_i32 = arith.constant 0 : i32
    %c0_i32_0 = arith.constant 0 : i32
    %c0_i32_1 = arith.constant 0 : i32
    %c0_i32_2 = arith.constant 0 : i32
    return %c0_i32, %c0_i32_0, %c0_i32_1 : i32, i32, i32
  }
  func.func @transform_13(%arg0: i32) -> (i32, i32, i32) {
    %c0_i32 = arith.constant 0 : i32
    %c0_i32_0 = arith.constant 0 : i32
    %c0_i32_1 = arith.constant 0 : i32
    %c0_i32_2 = arith.constant 0 : i32
    return %c0_i32, %c0_i32_0, %c0_i32_1 : i32, i32, i32
  }
  func.func @transform_14(%arg0: i32) -> (i32, i32, i32) {
    %c0_i32 = arith.constant 0 : i32
    %c0_i32_0 = arith.constant 0 : i32
    %c0_i32_1 = arith.constant 0 : i32
    %c0_i32_2 = arith.constant 0 : i32
    return %c0_i32, %c0_i32_0, %c0_i32_1 : i32, i32, i32
  }
  func.func @transform_15(%arg0: i32) -> (i32, i32, i32) {
    %c0_i32 = arith.constant 0 : i32
    %c0_i32_0 = arith.constant 0 : i32
    %c0_i32_1 = arith.constant 0 : i32
    %c0_i32_2 = arith.constant 0 : i32
    return %c0_i32, %c0_i32_0, %c0_i32_1 : i32, i32, i32
  }
  func.func @transform_16(%arg0: i32) -> (i32, i32, i32) {
    %c0_i32 = arith.constant 0 : i32
    %c0_i32_0 = arith.constant 0 : i32
    %c0_i32_1 = arith.constant 0 : i32
    %c0_i32_2 = arith.constant 0 : i32
    return %c0_i32, %c0_i32_0, %c0_i32_1 : i32, i32, i32
  }
  func.func @transform_17(%arg0: i32) -> (i32, i32, i32) {
    %c0_i32 = arith.constant 0 : i32
    %c0_i32_0 = arith.constant 0 : i32
    %c0_i32_1 = arith.constant 0 : i32
    %c0_i32_2 = arith.constant 0 : i32
    return %c0_i32, %c0_i32_0, %c0_i32_1 : i32, i32, i32
  }
  func.func @transform_18(%arg0: i32) -> (i32, i32, i32) {
    %c0_i32 = arith.constant 0 : i32
    %c0_i32_0 = arith.constant 0 : i32
    %c0_i32_1 = arith.constant 0 : i32
    %c0_i32_2 = arith.constant 0 : i32
    return %c0_i32, %c0_i32_0, %c0_i32_1 : i32, i32, i32
  }
  func.func @transform_19(%arg0: i32) -> (i32, i32, i32) {
    %c0_i32 = arith.constant 0 : i32
    %c0_i32_0 = arith.constant 0 : i32
    %c0_i32_1 = arith.constant 0 : i32
    %c0_i32_2 = arith.constant 0 : i32
    return %c0_i32, %c0_i32_0, %c0_i32_1 : i32, i32, i32
  }
  func.func @transform_20(%arg0: i32) -> (i32, i32, i32) {
    %c0_i32 = arith.constant 0 : i32
    %c0_i32_0 = arith.constant 0 : i32
    %c0_i32_1 = arith.constant 0 : i32
    %c0_i32_2 = arith.constant 0 : i32
    return %c0_i32, %c0_i32_0, %c0_i32_1 : i32, i32, i32
  }
  func.func @transform_21(%arg0: i32) -> (i32, i32, i32) {
    %c0_i32 = arith.constant 0 : i32
    %c0_i32_0 = arith.constant 0 : i32
    %c0_i32_1 = arith.constant 0 : i32
    %c0_i32_2 = arith.constant 0 : i32
    return %c0_i32, %c0_i32_0, %c0_i32_1 : i32, i32, i32
  }
  func.func @transform_22(%arg0: i32) -> (i32, i32, i32) {
    %c0_i32 = arith.constant 0 : i32
    %c0_i32_0 = arith.constant 0 : i32
    %c0_i32_1 = arith.constant 0 : i32
    %c0_i32_2 = arith.constant 0 : i32
    return %c0_i32, %c0_i32_0, %c0_i32_1 : i32, i32, i32
  }
  func.func @transform_23(%arg0: i32) -> (i32, i32, i32) {
    %c0_i32 = arith.constant 0 : i32
    %c0_i32_0 = arith.constant 0 : i32
    %c0_i32_1 = arith.constant 0 : i32
    %c0_i32_2 = arith.constant 0 : i32
    return %c0_i32, %c0_i32_0, %c0_i32_1 : i32, i32, i32
  }
  func.func @transform_24(%arg0: i32) -> (i32, i32, i32) {
    %c0_i32 = arith.constant 0 : i32
    %c0_i32_0 = arith.constant 0 : i32
    %c0_i32_1 = arith.constant 0 : i32
    %c0_i32_2 = arith.constant 0 : i32
    return %c0_i32, %c0_i32_0, %c0_i32_1 : i32, i32, i32
  }
  func.func @transform_25(%arg0: i32) -> (i32, i32, i32) {
    %c0_i32 = arith.constant 0 : i32
    %c0_i32_0 = arith.constant 0 : i32
    %c0_i32_1 = arith.constant 0 : i32
    %c0_i32_2 = arith.constant 0 : i32
    return %c0_i32, %c0_i32_0, %c0_i32_1 : i32, i32, i32
  }
  func.func @transform_26(%arg0: i32) -> (i32, i32, i32) {
    %c0_i32 = arith.constant 0 : i32
    %c0_i32_0 = arith.constant 0 : i32
    %c0_i32_1 = arith.constant 0 : i32
    %c0_i32_2 = arith.constant 0 : i32
    return %c0_i32, %c0_i32_0, %c0_i32_1 : i32, i32, i32
  }
  func.func @transform_27(%arg0: i32) -> (i32, i32, i32) {
    %c0_i32 = arith.constant 0 : i32
    %c0_i32_0 = arith.constant 0 : i32
    %c0_i32_1 = arith.constant 0 : i32
    %c0_i32_2 = arith.constant 0 : i32
    return %c0_i32, %c0_i32_0, %c0_i32_1 : i32, i32, i32
  }
  func.func @transform_28(%arg0: i32) -> (i32, i32, i32) {
    %c0_i32 = arith.constant 0 : i32
    %c0_i32_0 = arith.constant 0 : i32
    %c0_i32_1 = arith.constant 0 : i32
    %c0_i32_2 = arith.constant 0 : i32
    return %c0_i32, %c0_i32_0, %c0_i32_1 : i32, i32, i32
  }
  func.func @transform_29(%arg0: i32) -> (i32, i32, i32) {
    %c0_i32 = arith.constant 0 : i32
    %c0_i32_0 = arith.constant 0 : i32
    %c0_i32_1 = arith.constant 0 : i32
    %c0_i32_2 = arith.constant 0 : i32
    return %c0_i32, %c0_i32_0, %c0_i32_1 : i32, i32, i32
  }
  func.func @transform_30(%arg0: i32) -> (i32, i32, i32) {
    %c0_i32 = arith.constant 0 : i32
    %c0_i32_0 = arith.constant 0 : i32
    %c0_i32_1 = arith.constant 0 : i32
    %c0_i32_2 = arith.constant 0 : i32
    return %c0_i32, %c0_i32_0, %c0_i32_1 : i32, i32, i32
  }
  func.func @transform_31(%arg0: i32) -> (i32, i32, i32) {
    %c0_i32 = arith.constant 0 : i32
    %c0_i32_0 = arith.constant 0 : i32
    %c0_i32_1 = arith.constant 0 : i32
    %c0_i32_2 = arith.constant 0 : i32
    return %c0_i32, %c0_i32_0, %c0_i32_1 : i32, i32, i32
  }
  func.func @transform_32(%arg0: i32) -> (i32, i32, i32) {
    %c0_i32 = arith.constant 0 : i32
    %c0_i32_0 = arith.constant 0 : i32
    %c0_i32_1 = arith.constant 0 : i32
    %c0_i32_2 = arith.constant 0 : i32
    return %c0_i32, %c0_i32_0, %c0_i32_1 : i32, i32, i32
  }
  func.func @transform_33(%arg0: i32) -> (i32, i32, i32) {
    %c0_i32 = arith.constant 0 : i32
    %c0_i32_0 = arith.constant 0 : i32
    %c0_i32_1 = arith.constant 0 : i32
    %c0_i32_2 = arith.constant 0 : i32
    return %c0_i32, %c0_i32_0, %c0_i32_1 : i32, i32, i32
  }
  func.func @transform_34(%arg0: i32) -> (i32, i32, i32) {
    %c0_i32 = arith.constant 0 : i32
    %c0_i32_0 = arith.constant 0 : i32
    %c0_i32_1 = arith.constant 0 : i32
    %c0_i32_2 = arith.constant 0 : i32
    return %c0_i32, %c0_i32_0, %c0_i32_1 : i32, i32, i32
  }
  func.func @transform_35(%arg0: i32) -> (i32, i32, i32) {
    %c0_i32 = arith.constant 0 : i32
    %c0_i32_0 = arith.constant 0 : i32
    %c0_i32_1 = arith.constant 0 : i32
    %c0_i32_2 = arith.constant 0 : i32
    return %c0_i32, %c0_i32_0, %c0_i32_1 : i32, i32, i32
  }
  func.func @transform_36(%arg0: i32) -> (i32, i32, i32) {
    %c0_i32 = arith.constant 0 : i32
    %c0_i32_0 = arith.constant 0 : i32
    %c0_i32_1 = arith.constant 0 : i32
    %c0_i32_2 = arith.constant 0 : i32
    return %c0_i32, %c0_i32_0, %c0_i32_1 : i32, i32, i32
  }
  func.func @transform_37(%arg0: i32) -> (i32, i32, i32) {
    %c0_i32 = arith.constant 0 : i32
    %c0_i32_0 = arith.constant 0 : i32
    %c0_i32_1 = arith.constant 0 : i32
    %c0_i32_2 = arith.constant 0 : i32
    return %c0_i32, %c0_i32_0, %c0_i32_1 : i32, i32, i32
  }
  func.func @transform_38(%arg0: i32) -> (i32, i32, i32) {
    %c0_i32 = arith.constant 0 : i32
    %c0_i32_0 = arith.constant 0 : i32
    %c0_i32_1 = arith.constant 0 : i32
    %c0_i32_2 = arith.constant 0 : i32
    return %c0_i32, %c0_i32_0, %c0_i32_1 : i32, i32, i32
  }
  func.func @transform_39(%arg0: i32) -> (i32, i32, i32) {
    %c0_i32 = arith.constant 0 : i32
    %c0_i32_0 = arith.constant 0 : i32
    %c0_i32_1 = arith.constant 0 : i32
    %c0_i32_2 = arith.constant 0 : i32
    return %c0_i32, %c0_i32_0, %c0_i32_1 : i32, i32, i32
  }
  func.func @transform_40(%arg0: i32) -> (i32, i32, i32) {
    %c0_i32 = arith.constant 0 : i32
    %c0_i32_0 = arith.constant 0 : i32
    %c0_i32_1 = arith.constant 0 : i32
    %c0_i32_2 = arith.constant 0 : i32
    return %c0_i32, %c0_i32_0, %c0_i32_1 : i32, i32, i32
  }
  func.func @transform_41(%arg0: i32) -> (i32, i32, i32) {
    %c0_i32 = arith.constant 0 : i32
    %c0_i32_0 = arith.constant 0 : i32
    %c0_i32_1 = arith.constant 0 : i32
    %c0_i32_2 = arith.constant 0 : i32
    return %c0_i32, %c0_i32_0, %c0_i32_1 : i32, i32, i32
  }
  func.func @transform_42(%arg0: i32) -> (i32, i32) {
    %c0_i32 = arith.constant 0 : i32
    %c0_i32_0 = arith.constant 0 : i32
    %c0_i32_1 = arith.constant 0 : i32
    return %c0_i32, %c0_i32_0 : i32, i32
  }
  func.func @transform_43(%arg0: i32) -> (i32, i32) {
    %c0_i32 = arith.constant 0 : i32
    %c0_i32_0 = arith.constant 0 : i32
    %c0_i32_1 = arith.constant 0 : i32
    return %c0_i32, %c0_i32_0 : i32, i32
  }
  func.func @transform_44(%arg0: i32) -> (i32, i32, i32) {
    %c0_i32 = arith.constant 0 : i32
    %c0_i32_0 = arith.constant 0 : i32
    %c0_i32_1 = arith.constant 0 : i32
    return %arg0, %c0_i32, %c0_i32_0 : i32, i32, i32
  }
}

</mosaic_0001>

<bundles_post_ra>
// kernel: mti_forward.1
= control target key start
LH: loop header
LB: loop body
LE: loop exit
PB: predicated region body
PF: predicated region fallthrough
CT: control target
= control target key end

     0   :  { %s12761_s6 = smov 1   ;;  %s12762_s10 = smov 2   ;;  %s14724_s0 = inlined_call_operand.smem [shape: u32[45], index: -1, kind: input, shape index: {}] }
   0x1   :  { %s12862_s5 = sld [smem:[%s14724_s0]]   ;;  %s12763_s14 = smov 3  }
   0x2   :  { %s12867_s9 = sld [smem:[%s14724_s0 + %s12761_s6]]   ;;  %s12764_s18 = smov 4  }
   0x3   :  { %s12872_s13 = sld [smem:[%s14724_s0 + %s12762_s10]]   ;;  %s12765_s22 = smov 5  }
   0x4   :  { %s12877_s17 = sld [smem:[%s14724_s0 + %s12763_s14]]   ;;  %s12766_s26 = smov 6  }
   0x5   :  { %s12882_s21 = sld [smem:[%s14724_s0 + %s12764_s18]]   ;;  %s12767_s30 = smov 7  }
   0x6   :  { %s12887_s25 = sld [smem:[%s14724_s0 + %s12765_s22]]   ;;  %s12768_s4 = smov 8  }
   0x7   :  { %14736 = sst [smem:[#allocation68_spill]] %s12862_s5  ;;  %s12769_s10 = smov 9  }
   0x8   :  { %14737 = sst [smem:[#allocation69_spill]] %s12867_s9  ;;  %s12770_s15 = smov 10  }
   0x9   :  { %14738 = sst [smem:[#allocation70_spill]] %s12872_s13  ;;  %s12771_s20 = smov 11  }
   0xa   :  { %14739 = sst [smem:[#allocation71_spill]] %s12877_s17  ;;  %s12773_s1 = smov 13  }
   0xb   :  { %14740 = sst [smem:[#allocation72_spill]] %s12882_s21  ;;  %s12774_s7 = smov 14  }
   0xc   :  { %s12892_s29 = sld [smem:[%s14724_s0 + %s12766_s26]]   ;;  %s12772_s26 = smov 12  }
   0xd   :  { %s12897_s3 = sld [smem:[%s14724_s0 + %s12767_s30]]   ;;  %s12776_s22 = smov 16  }
   0xe   :  { %s12902_s8 = sld [smem:[%s14724_s0 + %s12768_s4]]   ;;  %s12777_s28 = smov 17  }
   0xf   :  { %s12907_s14 = sld [smem:[%s14724_s0 + %s12769_s10]]  }
  0x10   :  { %s12912_s19 = sld [smem:[%s14724_s0 + %s12770_s15]]   ;;  %s12775_s15 = smov 15  }
  0x11   :  { %s12917_s24 = sld [smem:[%s14724_s0 + %s12771_s20]]  }
  0x12   :  { %14741 = sst [smem:[#allocation73_spill]] %s12892_s29 }
  0x13   :  { %14742 = sst [smem:[#allocation74_spill]] %s12897_s3 }
  0x14   :  { %14743 = sst [smem:[#allocation75_spill]] %s12902_s8 }
  0x15   :  { %s12922_s30 = sld [smem:[%s14724_s0 + %s12772_s26]]  }
  0x16   :  { %14744 = sst [smem:[#allocation76_spill]] %s12912_s19 }
  0x17   :  { %s12927_s6 = sld [smem:[%s14724_s0 + %s12773_s1]]  }
  0x18   :  { %s12932_s12 = sld [smem:[%s14724_s0 + %s12774_s7]]   ;;  %s12778_s7 = smov 18  }
  0x19   :  { %s12937_s20 = sld [smem:[%s14724_s0 + %s12775_s15]]   ;;  %s12779_s15 = smov 19  }
  0x1a   :  { %s12942_s27 = sld [smem:[%s14724_s0 + %s12776_s22]]   ;;  %s12780_s22 = smov 20  }
  0x1b   :  { %14745 = sst [smem:[#allocation77_spill]] %s12922_s30 }
  0x1c   :  { %s12947_s4 = sld [smem:[%s14724_s0 + %s12777_s28]]   ;;  %s12781_s28 = smov 21  }
  0x1d   :  { %14746 = sst [smem:[#allocation78_spill]] %s12927_s6 }
  0x1e   :  { %14747 = sst [smem:[#allocation79_spill]] %s12932_s12 }
  0x1f   :  { %s12952_s21 = sld [smem:[%s14724_s0 + %s12778_s7]]   ;;  %s12782_s7 = smov 22  }
  0x20   :  { %14748 = sst [smem:[#allocation80_spill]] %s12942_s27 }
  0x21   :  { %s12957_s17 = sld [smem:[%s14724_s0 + %s12779_s15]]   ;;  %s12783_s15 = smov 23  }
  0x22   :  { %s12962_s13 = sld [smem:[%s14724_s0 + %s12780_s22]]   ;;  %s12784_s22 = smov 24  }
  0x23   :  { %s12967_s12 = sld [smem:[%s14724_s0 + %s12781_s28]]   ;;  %s12785_s28 = smov 25  }
  0x24   :  { %s12977_s30 = sld [smem:[%s14724_s0 + %s12783_s15]]   ;;  %s12787_s15 = smov 27  }
  0x25   :  { %14749 = sst [smem:[#allocation81_spill]] %s12952_s21 }
  0x26   :  { %s12972_s21 = sld [smem:[%s14724_s0 + %s12782_s7]]   ;;  %s12786_s7 = smov 26  }
  0x27   :  { %14750 = sst [smem:[#allocation82_spill]] %s12957_s17 }
  0x28   :  { %14751 = sst [smem:[#allocation83_spill]] %s12962_s13 }
  0x29   :  { %s12982_s13 = sld [smem:[%s14724_s0 + %s12784_s22]]   ;;  %s12788_s22 = smov 28  }
  0x2a   :  { %s12987_s8 = sld [smem:[%s14724_s0 + %s12785_s28]]   ;;  %s12789_s28 = smov 29  }
  0x2b   :  { %s12992_s5 = sld [smem:[%s14724_s0 + %s12786_s7]]   ;;  %s12790_s7 = smov 30  }
  0x2c   :  { %14752 = sst [smem:[#allocation84_spill]] %s12972_s21 }
  0x2d   :  { %s12997_s29 = sld [smem:[%s14724_s0 + %s12787_s15]]   ;;  %s12791_s15 = smov 31  }
  0x2e   :  { %s13007_s21 = sld [smem:[%s14724_s0 + %s12789_s28]]   ;;  %s12793_s28 = smov 33  }
  0x2f   :  { %14753 = sst [smem:[#allocation85_spill]] %s12982_s13 }
  0x30   :  { %s13002_s13 = sld [smem:[%s14724_s0 + %s12788_s22]]   ;;  %s12792_s22 = smov 32  }
  0x31   :  { %14754 = sst [smem:[#allocation86_spill]] %s12992_s5 }
  0x32   :  { %s13012_s5 = sld [smem:[%s14724_s0 + %s12790_s7]]   ;;  %s12794_s7 = smov 34  }
  0x33   :  { %s13017_s17 = sld [smem:[%s14724_s0 + %s12791_s15]]   ;;  %s12795_s15 = smov 35  }
  0x34   :  { %14756 = sst [smem:[#allocation88_spill]] %s13007_s21 }
  0x35   :  { %s13027_s21 = sld [smem:[%s14724_s0 + %s12793_s28]]   ;;  %s12797_s28 = smov 37  }
  0x36   :  { %14755 = sst [smem:[#allocation87_spill]] %s13002_s13 }
  0x37   :  { %s13022_s13 = sld [smem:[%s14724_s0 + %s12792_s22]]   ;;  %s12796_s22 = smov 36  }
  0x38   :  { %s13032_s27 = sld [smem:[%s14724_s0 + %s12794_s7]]   ;;  %s12798_s7 = smov 38  }
  0x39   :  { %14757 = sst [smem:[#allocation89_spill]] %s13017_s17 }
  0x3a   :  { %s13037_s17 = sld [smem:[%s14724_s0 + %s12795_s15]]   ;;  %s12799_s15 = smov 39  }
  0x3b   :  { %14758 = sst [smem:[#allocation90_spill]] %s13027_s21 }
  0x3c   :  { %s13042_s6 = sld [smem:[%s14724_s0 + %s12796_s22]]   ;;  %s12800_s22 = smov 40  }
  0x3d   :  { %s13047_s21 = sld [smem:[%s14724_s0 + %s12797_s28]]   ;;  %s12801_s28 = smov 41  }
  0x3e   :  { %s13052_s19 = sld [smem:[%s14724_s0 + %s12798_s7]]   ;;  %s12802_s7 = smov 42  }
  0x3f   :  { %s13062_s3 = sld [smem:[%s14724_s0 + %s12800_s22]]   ;;  %s12804_s22 = smov 44  }
  0x40   :  { %14759 = sst [smem:[#allocation91_spill]] %s13037_s17 }
  0x41   :  { %s13057_s17 = sld [smem:[%s14724_s0 + %s12799_s15]]   ;;  %s12803_s15 = smov 43  }
  0x42   :  { %s13077_s9 = sld [smem:[%s14724_s0 + %s12803_s15]]  }
  0x43   :  { %14760 = sst [smem:[#allocation92_spill]] %s13047_s21 }
  0x44   :  { %14761 = sst [smem:[#allocation93_spill]] %s13052_s19 }
  0x45   :  { %14762 = sst [smem:[#allocation94_spill]] %s13062_s3 }
  0x46   :  { %s13067_s21 = sld [smem:[%s14724_s0 + %s12801_s28]]  }
  0x47   :  { %s13072_s19 = sld [smem:[%s14724_s0 + %s12802_s7]]  }
  0x48   :  { %s13082_s3 = sld [smem:[%s14724_s0 + %s12804_s22]]  }
  0x49   :  { %94 = vsyncpa [#allocation3], 0 }
  0x4a   :  { %95 = vsyncpa [#allocation6], 0 }
  0x4b   :  { %96 = vsyncpa [#allocation9], 0 }
  0x4c   :  { %97 = vsyncpa [#allocation12], 0 }
  0x4d   :  { %98 = vsyncpa [#allocation15], 0 }
  0x4e   :  { %99 = vsyncpa [#allocation18], 0 }
  0x4f   :  { %100 = vsyncpa [#allocation21], 0 }
  0x50   :  { %101 = vsyncpa [#allocation24], 0 }
  0x51   :  { %102 = vsyncpa [#allocation27], 0 }
  0x52   :  { %103 = vsyncpa [#allocation30], 0 }
  0x53   :  { %104 = vsyncpa [#allocation33], 0 }
  0x54   :  { %105 = vsyncpa [#allocation36], 0 }
  0x55   :  { %106 = vsyncpa [#allocation39], 0 }
  0x56   :  { %107 = vsyncpa [#allocation42], 0 }
  0x57   :  { %108 = vsyncpa [#allocation45], 0 }
  0x58   :  { %109 = vsyncpa [#allocation48], 0 }
  0x59   :  { %110 = vsyncpa [#allocation4], 0  ;;  %s12805_s28 = smov [#allocation5]  }
  0x5a   :  { %s137_s0 = sshll.u32 %s12805_s28, 4  ;;  %s138_s0 = int_to_ptr.vmem [resolvable:$true] %s137_s0 }
  0x5b   :  { %s12095_s1 = scalar_lea.vmem %s138_s0, 128  ;;  %p12100_p1 = scmp.lt.s32.totalorder %s138_s0, %s138_s0 }
  0x5c   :  { %p12096_p0 = scmp.ne.s32.totalorder %s138_s0, %s12095_s1  ;;  %p12101_p2 = scmp.lt.s32.totalorder %s12095_s1, %s12095_s1 }
  0x5e   :  { %p12102_p3 = por %p12101_p2, %p12100_p1 }
  0x60   :  { %p12103_p4 = pnand %p12102_p3, %p12096_p0 }
  0x62   :  { %12106 = shalt.err (!%p12103_p4)
}
  0x63   :  { %140 = dma.hbm_to_vmem [thread:$0]  %s12887_s25, 128, %s138_s0, [#allocation6]  }
  0x64   :  { %s12806_s2 = smov [#allocation8]   ;;  %s12807_s10 = smov [#allocation11]  }
  0x65   :  { %s162_s7 = sshll.u32 %s12806_s2, 4  ;;  %s186_s11 = sshll.u32 %s12807_s10, 4  ;;  %s163_s7 = int_to_ptr.vmem [resolvable:$true] %s162_s7  ;;  %s187_s11 = int_to_ptr.vmem [resolvable:$true] %s186_s11 }
  0x66   :  { %s12115_s15 = scalar_lea.vmem %s163_s7, 32  ;;  %p12120_p6 = scmp.lt.s32.totalorder %s163_s7, %s163_s7 }
  0x67   :  { %p12116_p5 = scmp.ne.s32.totalorder %s163_s7, %s12115_s15  ;;  %p12121_p7 = scmp.lt.s32.totalorder %s12115_s15, %s12115_s15 }
  0x69   :  { %p12122_p8 = por %p12121_p7, %p12120_p6 }
  0x6b   :  { %p12123_p9 = pnand %p12122_p8, %p12116_p5 }
  0x6d   :  { %12126 = shalt.err (!%p12123_p9)
}
  0x6e   :  { %s12808_s16 = smov 16   ;;  %s12809_s18 = smov 1  }
  0x6f   :  { %168 = dma.hbm_to_vmem [thread:$0]  %s12907_s14, 32, %s163_s7, [#allocation9], %s12808_s16, %s12808_s16, %s12809_s18  }
  0x70   :  { %s12135_s25 = scalar_lea.vmem %s187_s11, 32  ;;  %p12140_p11 = scmp.lt.s32.totalorder %s187_s11, %s187_s11 }
  0x71   :  { %p12136_p10 = scmp.ne.s32.totalorder %s187_s11, %s12135_s25  ;;  %p12141_p12 = scmp.lt.s32.totalorder %s12135_s25, %s12135_s25 }
  0x73   :  { %p12142_p13 = por %p12141_p12, %p12140_p11 }
  0x75   :  { %p12143_p0 = pnand %p12142_p13, %p12136_p10 }
  0x77   :  { %12146 = shalt.err (!%p12143_p0)
}
  0x78   :  { %192 = dma.hbm_to_vmem [thread:$0]  %s12917_s24, 32, %s187_s11, [#allocation12], %s12808_s16, %s12808_s16, %s12809_s18  }
  0x79   :  { %s12810_s22 = smov [#allocation14]   ;;  %s12811_s26 = smov [#allocation17]  }
  0x7a   :  { %s214_s23 = sshll.u32 %s12810_s22, 4  ;;  %s238_s28 = sshll.u32 %s12811_s26, 4  ;;  %s215_s23 = int_to_ptr.vmem [resolvable:$true] %s214_s23  ;;  %s239_s28 = int_to_ptr.vmem [resolvable:$true] %s238_s28 }
  0x7b   :  { %s12155_s0 = scalar_lea.vmem %s215_s23, 32  ;;  %p12160_p2 = scmp.lt.s32.totalorder %s215_s23, %s215_s23 }
  0x7c   :  { %p12156_p1 = scmp.ne.s32.totalorder %s215_s23, %s12155_s0  ;;  %p12161_p3 = scmp.lt.s32.totalorder %s12155_s0, %s12155_s0 }
  0x7e   :  { %p12162_p4 = por %p12161_p3, %p12160_p2 }
  0x80   :  { %p12163_p5 = pnand %p12162_p4, %p12156_p1 }
  0x82   :  { %12166 = shalt.err (!%p12163_p5)
}
  0x83   :  { %220 = dma.hbm_to_vmem [thread:$0]  %s12937_s20, 32, %s215_s23, [#allocation15], %s12808_s16, %s12808_s16, %s12809_s18  }
  0x84   :  { %s12175_s14 = scalar_lea.vmem %s239_s28, 32  ;;  %p12180_p7 = scmp.lt.s32.totalorder %s239_s28, %s239_s28 }
  0x85   :  { %p12176_p6 = scmp.ne.s32.totalorder %s239_s28, %s12175_s14  ;;  %p12181_p8 = scmp.lt.s32.totalorder %s12175_s14, %s12175_s14 }
  0x87   :  { %p12182_p9 = por %p12181_p8, %p12180_p7 }
  0x89   :  { %p12183_p10 = pnand %p12182_p9, %p12176_p6 }
  0x8b   :  { %12186 = shalt.err (!%p12183_p10)
}
  0x8c   :  { %244 = dma.hbm_to_vmem [thread:$0]  %s12947_s4, 32, %s239_s28, [#allocation18], %s12808_s16, %s12808_s16, %s12809_s18  }
  0x8d   :  { %s12812_s24 = smov [#allocation20]   ;;  %s12813_s2 = smov [#allocation23]  }
  0x8e   :  { %s266_s1 = sshll.u32 %s12812_s24, 4  ;;  %s290_s7 = sshll.u32 %s12813_s2, 4  ;;  %s267_s1 = int_to_ptr.vmem [resolvable:$true] %s266_s1  ;;  %s291_s7 = int_to_ptr.vmem [resolvable:$true] %s290_s7 }
  0x8f   :  { %s12195_s10 = scalar_lea.vmem %s267_s1, 32  ;;  %p12200_p12 = scmp.lt.s32.totalorder %s267_s1, %s267_s1 }
  0x90   :  { %p12196_p11 = scmp.ne.s32.totalorder %s267_s1, %s12195_s10  ;;  %p12201_p13 = scmp.lt.s32.totalorder %s12195_s10, %s12195_s10 }
  0x92   :  { %p12202_p0 = por %p12201_p13, %p12200_p12 }
  0x94   :  { %p12203_p1 = pnand %p12202_p0, %p12196_p11 }
  0x96   :  { %12206 = shalt.err (!%p12203_p1)
}
  0x97   :  { %272 = dma.hbm_to_vmem [thread:$0]  %s12967_s12, 32, %s267_s1, [#allocation21], %s12808_s16, %s12808_s16, %s12809_s18  }
  0x98   :  { %s12215_s20 = scalar_lea.vmem %s291_s7, 32  ;;  %p12220_p3 = scmp.lt.s32.totalorder %s291_s7, %s291_s7 }
  0x99   :  { %p12216_p2 = scmp.ne.s32.totalorder %s291_s7, %s12215_s20  ;;  %p12221_p4 = scmp.lt.s32.totalorder %s12215_s20, %s12215_s20 }
  0x9b   :  { %p12222_p5 = por %p12221_p4, %p12220_p3 }
  0x9d   :  { %p12223_p6 = pnand %p12222_p5, %p12216_p2 }
  0x9f   :  { %12226 = shalt.err (!%p12223_p6)
}
  0xa0   :  { %296 = dma.hbm_to_vmem [thread:$0]  %s12977_s30, 32, %s291_s7, [#allocation24], %s12808_s16, %s12808_s16, %s12809_s18  }
  0xa1   :  { %s12814_s4 = smov [#allocation26]   ;;  %s12815_s15 = smov [#allocation29]  }
  0xa2   :  { %s314_s11 = sshll.u32 %s12814_s4, 4  ;;  %s338_s25 = sshll.u32 %s12815_s15, 4  ;;  %s315_s11 = int_to_ptr.vmem [resolvable:$true] %s314_s11  ;;  %s339_s25 = int_to_ptr.vmem [resolvable:$true] %s338_s25 }
  0xa3   :  { %s12235_s22 = scalar_lea.vmem %s315_s11, 32  ;;  %p12240_p8 = scmp.lt.s32.totalorder %s315_s11, %s315_s11 }
  0xa4   :  { %p12236_p7 = scmp.ne.s32.totalorder %s315_s11, %s12235_s22  ;;  %p12241_p9 = scmp.lt.s32.totalorder %s12235_s22, %s12235_s22 }
  0xa6   :  { %p12242_p10 = por %p12241_p9, %p12240_p8 }
  0xa8   :  { %p12243_p11 = pnand %p12242_p10, %p12236_p7 }
  0xaa   :  { %12246 = shalt.err (!%p12243_p11)
}
  0xab   :  { %320 = dma.hbm_to_vmem [thread:$0]  %s12987_s8, 32, %s315_s11, [#allocation27], %s12808_s16, %s12808_s16, %s12809_s18  }
  0xac   :  { %s12255_s12 = scalar_lea.vmem %s339_s25, 32  ;;  %p12260_p13 = scmp.lt.s32.totalorder %s339_s25, %s339_s25 }
  0xad   :  { %p12256_p12 = scmp.ne.s32.totalorder %s339_s25, %s12255_s12  ;;  %p12261_p0 = scmp.lt.s32.totalorder %s12255_s12, %s12255_s12 }
  0xaf   :  { %p12262_p1 = por %p12261_p0, %p12260_p13 }
  0xb1   :  { %p12263_p2 = pnand %p12262_p1, %p12256_p12 }
  0xb3   :  { %12266 = shalt.err (!%p12263_p2)
}
  0xb4   :  { %344 = dma.hbm_to_vmem [thread:$0]  %s12997_s29, 32, %s339_s25, [#allocation30], %s12808_s16, %s12808_s16, %s12809_s18  }
  0xb5   :  { %s12816_s30 = smov [#allocation32]   ;;  %s12817_s26 = smov [#allocation35]  }
  0xb6   :  { %s364_s23 = sshll.u32 %s12816_s30, 4  ;;  %s388_s28 = sshll.u32 %s12817_s26, 4  ;;  %s365_s23 = int_to_ptr.vmem [resolvable:$true] %s364_s23  ;;  %s389_s28 = int_to_ptr.vmem [resolvable:$true] %s388_s28 }
  0xb7   :  { %s12275_s0 = scalar_lea.vmem %s365_s23, 1024  ;;  %p12280_p4 = scmp.lt.s32.totalorder %s365_s23, %s365_s23 }
  0xb8   :  { %p12276_p3 = scmp.ne.s32.totalorder %s365_s23, %s12275_s0  ;;  %p12281_p5 = scmp.lt.s32.totalorder %s12275_s0, %s12275_s0 }
  0xba   :  { %p12282_p6 = por %p12281_p5, %p12280_p4 }
  0xbc   :  { %p12283_p7 = pnand %p12282_p6, %p12276_p3 }
  0xbe   :  { %12286 = shalt.err (!%p12283_p7)
}
  0xbf   :  { %s12818_s8 = smov 128   ;;  %s12819_s14 = smov 8  }
  0xc0   :  { %370 = dma.hbm_to_vmem [thread:$0]  %s13012_s5, 1024, %s365_s23, [#allocation33], %s12818_s8, %s12818_s8, %s12819_s14  }
  0xc1   :  { %s12295_s29 = scalar_lea.vmem %s389_s28, 1024  ;;  %p12300_p9 = scmp.lt.s32.totalorder %s389_s28, %s389_s28 }
  0xc2   :  { %p12296_p8 = scmp.ne.s32.totalorder %s389_s28, %s12295_s29  ;;  %p12301_p10 = scmp.lt.s32.totalorder %s12295_s29, %s12295_s29 }
  0xc4   :  { %p12302_p11 = por %p12301_p10, %p12300_p9 }
  0xc6   :  { %p12303_p12 = pnand %p12302_p11, %p12296_p8 }
  0xc8   :  { %12306 = shalt.err (!%p12303_p12)
}
  0xc9   :  { %394 = dma.hbm_to_vmem [thread:$0]  %s13022_s13, 1024, %s389_s28, [#allocation36], %s12818_s8, %s12818_s8, %s12819_s14  }
  0xca   :  { %s12820_s24 = smov [#allocation38]   ;;  %s12821_s2 = smov [#allocation41]  }
  0xcb   :  { %s412_s1 = sshll.u32 %s12820_s24, 4  ;;  %s436_s7 = sshll.u32 %s12821_s2, 4  ;;  %s413_s1 = int_to_ptr.vmem [resolvable:$true] %s412_s1  ;;  %s437_s7 = int_to_ptr.vmem [resolvable:$true] %s436_s7 }
  0xcc   :  { %s12315_s10 = scalar_lea.vmem %s413_s1, 32  ;;  %p12320_p0 = scmp.lt.s32.totalorder %s413_s1, %s413_s1 }
  0xcd   :  { %p12316_p13 = scmp.ne.s32.totalorder %s413_s1, %s12315_s10  ;;  %p12321_p1 = scmp.lt.s32.totalorder %s12315_s10, %s12315_s10 }
  0xcf   :  { %p12322_p2 = por %p12321_p1, %p12320_p0 }
  0xd1   :  { %p12323_p3 = pnand %p12322_p2, %p12316_p13 }
  0xd3   :  { %12326 = shalt.err (!%p12323_p3)
}
  0xd4   :  { %418 = dma.hbm_to_vmem [thread:$0]  %s13032_s27, 32, %s413_s1, [#allocation39], %s12808_s16, %s12808_s16, %s12809_s18  }
  0xd5   :  { %s12335_s5 = scalar_lea.vmem %s437_s7, 1024  ;;  %p12340_p5 = scmp.lt.s32.totalorder %s437_s7, %s437_s7 }
  0xd6   :  { %p12336_p4 = scmp.ne.s32.totalorder %s437_s7, %s12335_s5  ;;  %p12341_p6 = scmp.lt.s32.totalorder %s12335_s5, %s12335_s5 }
  0xd8   :  { %p12342_p7 = por %p12341_p6, %p12340_p5 }
  0xda   :  { %p12343_p8 = pnand %p12342_p7, %p12336_p4 }
  0xdc   :  { %12346 = shalt.err (!%p12343_p8)
}
  0xdd   :  { %442 = dma.hbm_to_vmem [thread:$0]  %s13042_s6, 1024, %s437_s7, [#allocation42], %s12818_s8, %s12818_s8, %s12819_s14  }
  0xde   :  { %s12822_s13 = smov [#allocation44]   ;;  %s12823_s4 = smov [#allocation47]  }
  0xdf   :  { %s462_s20 = sshll.u32 %s12822_s13, 4  ;;  %s486_s11 = sshll.u32 %s12823_s4, 4  ;;  %s463_s20 = int_to_ptr.vmem [resolvable:$true] %s462_s20  ;;  %s487_s11 = int_to_ptr.vmem [resolvable:$true] %s486_s11 }
  0xe0   :  { %s12355_s15 = scalar_lea.vmem %s463_s20, 32  ;;  %p12360_p10 = scmp.lt.s32.totalorder %s463_s20, %s463_s20 }
  0xe1   :  { %p12356_p9 = scmp.ne.s32.totalorder %s463_s20, %s12355_s15  ;;  %p12361_p11 = scmp.lt.s32.totalorder %s12355_s15, %s12355_s15 }
  0xe3   :  { %p12362_p12 = por %p12361_p11, %p12360_p10 }
  0xe5   :  { %p12363_p13 = pnand %p12362_p12, %p12356_p9 }
  0xe7   :  { %12366 = shalt.err (!%p12363_p13)
}
  0xe8   :  { %468 = dma.hbm_to_vmem [thread:$0]  %s13057_s17, 32, %s463_s20, [#allocation45], %s12808_s16, %s12808_s16, %s12809_s18  }
  0xe9   :  { %s12375_s27 = scalar_lea.vmem %s487_s11, 32  ;;  %p12380_p1 = scmp.lt.s32.totalorder %s487_s11, %s487_s11 }
  0xea   :  { %p12376_p0 = scmp.ne.s32.totalorder %s487_s11, %s12375_s27  ;;  %p12381_p2 = scmp.lt.s32.totalorder %s12375_s27, %s12375_s27 }
  0xec   :  { %p12382_p3 = por %p12381_p2, %p12380_p1 }
  0xee   :  { %p12383_p4 = pnand %p12382_p3, %p12376_p0 }
  0xf0   :  { %12386 = shalt.err (!%p12383_p4)
}
  0xf1   :  { %492 = dma.hbm_to_vmem [thread:$0]  %s13067_s21, 32, %s487_s11, [#allocation48], %s12808_s16, %s12808_s16, %s12809_s18  }
  0xf2   :  { %s12824_s6 = smov [#allocation2]   ;;  %s12825_s22 = smov [#allocation7]  }
  0xf3   :  { %s118_s25 = sshll.u32 %s12824_s6, 4  ;;  %s148_s12 = sshll.u32 %s12825_s22, 4  ;;  %s119_s25 = int_to_ptr.vmem [resolvable:$true] %s118_s25  ;;  %s149_s12 = int_to_ptr.vmem [resolvable:$true] %s148_s12 }
  0xf4   :  { %s12395_s30 = scalar_lea.vmem %s119_s25, 512  ;;  %p12400_p6 = scmp.lt.s32.totalorder %s119_s25, %s119_s25 }
  0xf5   :  { %p12396_p5 = scmp.ne.s32.totalorder %s119_s25, %s12395_s30  ;;  %p12401_p7 = scmp.lt.s32.totalorder %s12395_s30, %s12395_s30 }
  0xf7   :  { %p12402_p8 = por %p12401_p7, %p12400_p6 }
  0xf9   :  { %p12403_p9 = pnand %p12402_p8, %p12396_p5 }
  0xfb   :  { %12406 = shalt.err (!%p12403_p9)
}
  0xfc   :  { %s14763_s17 = sld [smem:[#allocation69_spill]]  ;;  %s12415_s23 = scalar_lea.vmem %s149_s12, 32 }
  0xfd   :  { %p12416_p10 = scmp.ne.s32.totalorder %s149_s12, %s12415_s23  ;;  %p12420_p11 = scmp.lt.s32.totalorder %s149_s12, %s149_s12 }
  0xfe   :  { %p12421_p12 = scmp.lt.s32.totalorder %s12415_s23, %s12415_s23 }
 0x100   :  { %p12422_p13 = por %p12421_p12, %p12420_p11 }
 0x102   :  { %124 = dma.hbm_to_vmem [thread:$0]  %s14763_s17, 512, %s119_s25, [#allocation3], %s12818_s8, %s12818_s8, %s12819_s14  }
 0x103   :  { %p12423_p0 = pnand %p12422_p13, %p12416_p10 }
 0x105   :  { %12426 = shalt.err (!%p12423_p0)
}
 0x106   :  { %s14764_s21 = sld [smem:[#allocation74_spill]]  ;;  %s12826_s26 = smov [#allocation10]  }
 0x107   :  { %s174_s28 = sshll.u32 %s12826_s26, 4  ;;  %s12827_s0 = smov [#allocation13]   ;;  %s175_s28 = int_to_ptr.vmem [resolvable:$true] %s174_s28 }
 0x108   :  { %s200_s29 = sshll.u32 %s12827_s0, 4  ;;  %s12435_s24 = scalar_lea.vmem %s175_s28, 32  ;;  %s201_s29 = int_to_ptr.vmem [resolvable:$true] %s200_s29 }
 0x109   :  { %p12436_p1 = scmp.ne.s32.totalorder %s175_s28, %s12435_s24  ;;  %p12440_p2 = scmp.lt.s32.totalorder %s175_s28, %s175_s28 }
 0x10a   :  { %p12441_p3 = scmp.lt.s32.totalorder %s12435_s24, %s12435_s24 }
 0x10c   :  { %154 = dma.hbm_to_vmem [thread:$0]  %s14764_s21, 32, %s149_s12, [#allocation6], %s12808_s16, %s12808_s16, %s12809_s18  }
 0x10d   :  { %p12442_p4 = por %p12441_p3, %p12440_p2 }
 0x10f   :  { %p12443_p5 = pnand %p12442_p4, %p12436_p1 }
 0x111   :  { %12446 = shalt.err (!%p12443_p5)
}
 0x112   :  { %s14765_s1 = sld [smem:[#allocation76_spill]]  ;;  %s12455_s2 = scalar_lea.vmem %s201_s29, 32 }
 0x113   :  { %p12456_p6 = scmp.ne.s32.totalorder %s201_s29, %s12455_s2  ;;  %p12460_p7 = scmp.lt.s32.totalorder %s201_s29, %s201_s29 }
 0x114   :  { %p12461_p8 = scmp.lt.s32.totalorder %s12455_s2, %s12455_s2 }
 0x116   :  { %p12462_p9 = por %p12461_p8, %p12460_p7 }
 0x118   :  { %180 = dma.hbm_to_vmem [thread:$0]  %s14765_s1, 32, %s175_s28, [#allocation9], %s12808_s16, %s12808_s16, %s12809_s18  }
 0x119   :  { %p12463_p10 = pnand %p12462_p9, %p12456_p6 }
 0x11b   :  { %12466 = shalt.err (!%p12463_p10)
}
 0x11c   :  { %s14766_s7 = sld [smem:[#allocation78_spill]]  ;;  %s12828_s10 = smov [#allocation16]  }
 0x11d   :  { %s226_s5 = sshll.u32 %s12828_s10, 4  ;;  %s12829_s13 = smov [#allocation19]   ;;  %s227_s5 = int_to_ptr.vmem [resolvable:$true] %s226_s5 }
 0x11e   :  { %s252_s20 = sshll.u32 %s12829_s13, 4  ;;  %s12475_s4 = scalar_lea.vmem %s227_s5, 32  ;;  %s253_s20 = int_to_ptr.vmem [resolvable:$true] %s252_s20 }
 0x11f   :  { %p12476_p11 = scmp.ne.s32.totalorder %s227_s5, %s12475_s4  ;;  %p12480_p12 = scmp.lt.s32.totalorder %s227_s5, %s227_s5 }
 0x120   :  { %p12481_p13 = scmp.lt.s32.totalorder %s12475_s4, %s12475_s4 }
 0x122   :  { %206 = dma.hbm_to_vmem [thread:$0]  %s14766_s7, 32, %s201_s29, [#allocation12], %s12808_s16, %s12808_s16, %s12809_s18  }
 0x123   :  { %p12482_p0 = por %p12481_p13, %p12480_p12 }
 0x125   :  { %p12483_p1 = pnand %p12482_p0, %p12476_p11 }
 0x127   :  { %12486 = shalt.err (!%p12483_p1)
}
 0x128   :  { %s14767_s11 = sld [smem:[#allocation80_spill]]  ;;  %s12495_s15 = scalar_lea.vmem %s253_s20, 32 }
 0x129   :  { %p12496_p2 = scmp.ne.s32.totalorder %s253_s20, %s12495_s15  ;;  %p12500_p3 = scmp.lt.s32.totalorder %s253_s20, %s253_s20 }
 0x12a   :  { %p12501_p4 = scmp.lt.s32.totalorder %s12495_s15, %s12495_s15 }
 0x12c   :  { %p12502_p5 = por %p12501_p4, %p12500_p3 }
 0x12e   :  { %232 = dma.hbm_to_vmem [thread:$0]  %s14767_s11, 32, %s227_s5, [#allocation15], %s12808_s16, %s12808_s16, %s12809_s18  }
 0x12f   :  { %p12503_p6 = pnand %p12502_p5, %p12496_p2 }
 0x131   :  { %12506 = shalt.err (!%p12503_p6)
}
 0x132   :  { %s14768_s27 = sld [smem:[#allocation82_spill]]  ;;  %s12830_s6 = smov [#allocation22]  }
 0x133   :  { %s278_s25 = sshll.u32 %s12830_s6, 4  ;;  %s12831_s22 = smov [#allocation25]   ;;  %s279_s25 = int_to_ptr.vmem [resolvable:$true] %s278_s25 }
 0x134   :  { %s302_s12 = sshll.u32 %s12831_s22, 4  ;;  %s12515_s30 = scalar_lea.vmem %s279_s25, 1024  ;;  %s303_s12 = int_to_ptr.vmem [resolvable:$true] %s302_s12 }
 0x135   :  { %p12516_p7 = scmp.ne.s32.totalorder %s279_s25, %s12515_s30  ;;  %p12520_p8 = scmp.lt.s32.totalorder %s279_s25, %s279_s25 }
 0x136   :  { %p12521_p9 = scmp.lt.s32.totalorder %s12515_s30, %s12515_s30 }
 0x138   :  { %258 = dma.hbm_to_vmem [thread:$0]  %s14768_s27, 32, %s253_s20, [#allocation18], %s12808_s16, %s12808_s16, %s12809_s18  }
 0x139   :  { %p12522_p10 = por %p12521_p9, %p12520_p8 }
 0x13b   :  { %p12523_p11 = pnand %p12522_p10, %p12516_p7 }
 0x13d   :  { %12526 = shalt.err (!%p12523_p11)
}
 0x13e   :  { %s14769_s17 = sld [smem:[#allocation84_spill]]  ;;  %s12535_s23 = scalar_lea.vmem %s303_s12, 1024 }
 0x13f   :  { %p12536_p12 = scmp.ne.s32.totalorder %s303_s12, %s12535_s23  ;;  %p12540_p13 = scmp.lt.s32.totalorder %s303_s12, %s303_s12 }
 0x140   :  { %p12541_p0 = scmp.lt.s32.totalorder %s12535_s23, %s12535_s23 }
 0x142   :  { %p12542_p1 = por %p12541_p0, %p12540_p13 }
 0x144   :  { %284 = dma.hbm_to_vmem [thread:$0]  %s14769_s17, 1024, %s279_s25, [#allocation21], %s12818_s8, %s12818_s8, %s12819_s14  }
 0x145   :  { %p12543_p2 = pnand %p12542_p1, %p12536_p12 }
 0x147   :  { %12546 = shalt.err (!%p12543_p2)
}
 0x148   :  { %s14770_s21 = sld [smem:[#allocation85_spill]]  ;;  %s12832_s26 = smov [#allocation28]  }
 0x149   :  { %s326_s28 = sshll.u32 %s12832_s26, 4  ;;  %s12833_s0 = smov [#allocation31]   ;;  %s327_s28 = int_to_ptr.vmem [resolvable:$true] %s326_s28 }
 0x14a   :  { %s352_s29 = sshll.u32 %s12833_s0, 4  ;;  %s12555_s24 = scalar_lea.vmem %s327_s28, 32  ;;  %s353_s29 = int_to_ptr.vmem [resolvable:$true] %s352_s29 }
 0x14b   :  { %p12556_p3 = scmp.ne.s32.totalorder %s327_s28, %s12555_s24  ;;  %p12560_p4 = scmp.lt.s32.totalorder %s327_s28, %s327_s28 }
 0x14c   :  { %p12561_p5 = scmp.lt.s32.totalorder %s12555_s24, %s12555_s24 }
 0x14e   :  { %308 = dma.hbm_to_vmem [thread:$0]  %s14770_s21, 1024, %s303_s12, [#allocation24], %s12818_s8, %s12818_s8, %s12819_s14  }
 0x14f   :  { %p12562_p6 = por %p12561_p5, %p12560_p4 }
 0x151   :  { %p12563_p7 = pnand %p12562_p6, %p12556_p3 }
 0x153   :  { %12566 = shalt.err (!%p12563_p7)
}
 0x154   :  { %s14771_s1 = sld [smem:[#allocation86_spill]]  ;;  %s12575_s2 = scalar_lea.vmem %s353_s29, 32 }
 0x155   :  { %p12576_p8 = scmp.ne.s32.totalorder %s353_s29, %s12575_s2  ;;  %p12580_p9 = scmp.lt.s32.totalorder %s353_s29, %s353_s29 }
 0x156   :  { %p12581_p10 = scmp.lt.s32.totalorder %s12575_s2, %s12575_s2 }
 0x158   :  { %p12582_p11 = por %p12581_p10, %p12580_p9 }
 0x15a   :  { %332 = dma.hbm_to_vmem [thread:$0]  %s14771_s1, 32, %s327_s28, [#allocation27], %s12808_s16, %s12808_s16, %s12809_s18  }
 0x15b   :  { %p12583_p12 = pnand %p12582_p11, %p12576_p8 }
 0x15d   :  { %12586 = shalt.err (!%p12583_p12)
}
 0x15e   :  { %s14772_s8 = sld [smem:[#allocation88_spill]]  ;;  %s12834_s14 = smov [#allocation34]  }
 0x15f   :  { %s376_s7 = sshll.u32 %s12834_s14, 4  ;;  %s12835_s10 = smov [#allocation37]   ;;  %s377_s7 = int_to_ptr.vmem [resolvable:$true] %s376_s7 }
 0x160   :  { %s400_s5 = sshll.u32 %s12835_s10, 4  ;;  %s12595_s13 = scalar_lea.vmem %s377_s7, 32  ;;  %s401_s5 = int_to_ptr.vmem [resolvable:$true] %s400_s5 }
 0x161   :  { %p12596_p13 = scmp.ne.s32.totalorder %s377_s7, %s12595_s13  ;;  %p12600_p0 = scmp.lt.s32.totalorder %s377_s7, %s377_s7 }
 0x162   :  { %p12601_p1 = scmp.lt.s32.totalorder %s12595_s13, %s12595_s13 }
 0x164   :  { %358 = dma.hbm_to_vmem [thread:$0]  %s14772_s8, 32, %s353_s29, [#allocation30], %s12808_s16, %s12808_s16, %s12809_s18  }
 0x165   :  { %p12602_p2 = por %p12601_p1, %p12600_p0 }
 0x167   :  { %p12603_p3 = pnand %p12602_p2, %p12596_p13 }
 0x169   :  { %12606 = shalt.err (!%p12603_p3)
}
 0x16a   :  { %s14773_s20 = sld [smem:[#allocation89_spill]]  ;;  %s12615_s4 = scalar_lea.vmem %s401_s5, 32 }
 0x16b   :  { %p12616_p4 = scmp.ne.s32.totalorder %s401_s5, %s12615_s4  ;;  %p12620_p5 = scmp.lt.s32.totalorder %s401_s5, %s401_s5 }
 0x16c   :  { %p12621_p6 = scmp.lt.s32.totalorder %s12615_s4, %s12615_s4 }
 0x16e   :  { %p12622_p7 = por %p12621_p6, %p12620_p5 }
 0x170   :  { %382 = dma.hbm_to_vmem [thread:$0]  %s14773_s20, 32, %s377_s7, [#allocation33], %s12808_s16, %s12808_s16, %s12809_s18  }
 0x171   :  { %p12623_p8 = pnand %p12622_p7, %p12616_p4 }
 0x173   :  { %12626 = shalt.err (!%p12623_p8)
}
 0x174   :  { %s14774_s11 = sld [smem:[#allocation90_spill]]  ;;  %s12836_s15 = smov [#allocation40]  }
 0x175   :  { %s424_s27 = sshll.u32 %s12836_s15, 4  ;;  %s12837_s6 = smov [#allocation43]   ;;  %s425_s27 = int_to_ptr.vmem [resolvable:$true] %s424_s27 }
 0x176   :  { %s448_s25 = sshll.u32 %s12837_s6, 4  ;;  %s12635_s22 = scalar_lea.vmem %s425_s27, 32  ;;  %s449_s25 = int_to_ptr.vmem [resolvable:$true] %s448_s25 }
 0x177   :  { %p12636_p9 = scmp.ne.s32.totalorder %s425_s27, %s12635_s22  ;;  %p12640_p10 = scmp.lt.s32.totalorder %s425_s27, %s425_s27 }
 0x178   :  { %p12641_p11 = scmp.lt.s32.totalorder %s12635_s22, %s12635_s22 }
 0x17a   :  { %406 = dma.hbm_to_vmem [thread:$0]  %s14774_s11, 32, %s401_s5, [#allocation36], %s12808_s16, %s12808_s16, %s12809_s18  }
 0x17b   :  { %p12642_p12 = por %p12641_p11, %p12640_p10 }
 0x17d   :  { %p12643_p13 = pnand %p12642_p12, %p12636_p9 }
 0x17f   :  { %12646 = shalt.err (!%p12643_p13)
}
 0x180   :  { %s14775_s12 = sld [smem:[#allocation91_spill]]  ;;  %s12655_s30 = scalar_lea.vmem %s449_s25, 32 }
 0x181   :  { %p12656_p0 = scmp.ne.s32.totalorder %s449_s25, %s12655_s30  ;;  %p12660_p1 = scmp.lt.s32.totalorder %s449_s25, %s449_s25 }
 0x182   :  { %p12661_p2 = scmp.lt.s32.totalorder %s12655_s30, %s12655_s30 }
 0x184   :  { %p12662_p3 = por %p12661_p2, %p12660_p1 }
 0x186   :  { %430 = dma.hbm_to_vmem [thread:$0]  %s14775_s12, 32, %s425_s27, [#allocation39], %s12808_s16, %s12808_s16, %s12809_s18  }
 0x187   :  { %p12663_p4 = pnand %p12662_p3, %p12656_p0 }
 0x189   :  { %12666 = shalt.err (!%p12663_p4)
}
 0x18a   :  { %s14776_s17 = sld [smem:[#allocation92_spill]]  ;;  %s12838_s23 = smov [#allocation46]  }
 0x18b   :  { %s474_s21 = sshll.u32 %s12838_s23, 4  ;;  %s12839_s26 = smov [#allocation49]   ;;  %s475_s21 = int_to_ptr.vmem [resolvable:$true] %s474_s21 }
 0x18c   :  { %s501_s28 = sshll.u32 %s12839_s26, 4  ;;  %s12675_s0 = scalar_lea.vmem %s475_s21, 32  ;;  %s502_s28 = int_to_ptr.vmem [resolvable:$true] %s501_s28 }
 0x18d   :  { %p12676_p5 = scmp.ne.s32.totalorder %s475_s21, %s12675_s0  ;;  %p12680_p6 = scmp.lt.s32.totalorder %s475_s21, %s475_s21 }
 0x18e   :  { %p12681_p7 = scmp.lt.s32.totalorder %s12675_s0, %s12675_s0 }
 0x190   :  { %454 = dma.hbm_to_vmem [thread:$0]  %s14776_s17, 32, %s449_s25, [#allocation42], %s12808_s16, %s12808_s16, %s12809_s18  }
 0x191   :  { %p12682_p8 = por %p12681_p7, %p12680_p6 }
 0x193   :  { %p12683_p9 = pnand %p12682_p8, %p12676_p5 }
 0x195   :  { %12686 = shalt.err (!%p12683_p9)
}
 0x196   :  { %s14777_s29 = sld [smem:[#allocation94_spill]]  ;;  %s12695_s24 = scalar_lea.vmem %s502_s28, 16 }
 0x197   :  { %p12696_p10 = scmp.ne.s32.totalorder %s502_s28, %s12695_s24  ;;  %s12699_s1 = scalar_lea.vmem %s502_s28, 32 }
 0x198   :  { %p12700_p11 = scmp.lt.s32.totalorder %s502_s28, %s502_s28  ;;  %p12701_p12 = scmp.lt.s32.totalorder %s12699_s1, %s12695_s24 }
 0x19a   :  { %p12702_p13 = por %p12701_p12, %p12700_p11 }
 0x19c   :  { %480 = dma.hbm_to_vmem [thread:$0]  %s14777_s29, 32, %s475_s21, [#allocation45], %s12808_s16, %s12808_s16, %s12809_s18  }
 0x19d   :  { %p12703_p0 = pnand %p12702_p13, %p12696_p10 }
 0x19f   :  { %12706 = shalt.err (!%p12703_p0)
}
 0x1a0   :  { %504 = dma.hbm_to_vmem [thread:$0]  %s13077_s9, 16, %s502_s28, [#allocation48]  }
 0x1a1   :  { %12727 = dma.done.wait [#allocation3], 512  }
 0x1a2   :  { %12728 = vsyncadd [#allocation3], 4294966784 }
 0x1a3   :  { %12729 = dma.done.wait [#allocation6], 160  }
 0x1a4   :  { %12730 = vsyncadd [#allocation6], 4294967136 }
 0x1a5   :  { %12731 = dma.done.wait [#allocation9], 64  }
 0x1a6   :  { %12732 = vsyncadd [#allocation9], 4294967232 }
 0x1a7   :  { %12733 = dma.done.wait [#allocation12], 64  }
 0x1a8   :  { %12734 = vsyncadd [#allocation12], 4294967232 }
 0x1a9   :  { %12735 = dma.done.wait [#allocation15], 64  }
 0x1aa   :  { %12736 = vsyncadd [#allocation15], 4294967232 }
 0x1ab   :  { %12737 = dma.done.wait [#allocation18], 64  }
 0x1ac   :  { %12738 = vsyncadd [#allocation18], 4294967232 }
 0x1ad   :  { %12739 = dma.done.wait [#allocation21], 1056  }
 0x1ae   :  { %12740 = vsyncadd [#allocation21], 4294966240 }
 0x1af   :  { %12741 = dma.done.wait [#allocation24], 1056  }
 0x1b0   :  { %12742 = vsyncadd [#allocation24], 4294966240 }
 0x1b1   :  { %12743 = dma.done.wait [#allocation27], 64  }
 0x1b2   :  { %12744 = vsyncadd [#allocation27], 4294967232 }
 0x1b3   :  { %12745 = dma.done.wait [#allocation30], 64  }
 0x1b4   :  { %12746 = vsyncadd [#allocation30], 4294967232 }
 0x1b5   :  { %12747 = dma.done.wait [#allocation33], 1056  }
 0x1b6   :  { %12748 = vsyncadd [#allocation33], 4294966240 }
 0x1b7   :  { %12749 = dma.done.wait [#allocation36], 1056  }
 0x1b8   :  { %12750 = vsyncadd [#allocation36], 4294966240 }
 0x1b9   :  { %12751 = dma.done.wait [#allocation39], 64  }
 0x1ba   :  { %12752 = vsyncadd [#allocation39], 4294967232 }
 0x1bb   :  { %12753 = dma.done.wait [#allocation42], 1056  }
 0x1bc   :  { %12754 = vsyncadd [#allocation42], 4294966240 }
 0x1bd   :  { %12755 = dma.done.wait [#allocation45], 64  }
 0x1be   :  { %12756 = vsyncadd [#allocation45], 4294967232 }
 0x1bf   :  { %12757 = dma.done.wait [#allocation48], 48  }
 0x1c0   :  { %12758 = vsyncadd [#allocation48], 4294967248  ;;  %s14778_s9 = sld [smem:[#allocation73_spill]]  ;;  %vm621_vm0 = vcmask 261120   ;;  %v10087_v8 = vld [vmem:[#allocation7] ss:$0 sm:$0xff] }
 0x1c1   :  { %s14779_s16 = sld [smem:[#allocation68_spill]]  ;;  %vm743_vm1 = vcmask 64512   ;;  %s12840_s18 = smov 96   ;;  %v13274_v29 = vld [vmem:[#allocation2 + $0x8] sm:$0xff]  ;;  %v13276_v31 = vld [vmem:[#allocation2] sm:$0xff]  ;;  %v13281_v37 = vld [vmem:[#allocation2 + $0x10] sm:$0xff] }
 0x1c2   :  { %s12841_s2 = smov 88   ;;  %s12842_s8 = smov 120   ;;  %v13284_v39 = vld [vmem:[#allocation2 + $0x18] sm:$0xff]  ;;  %vm2411_vm2 = vcmask 523264   ;;  %vm12852_vm3 = vmmov 0   ;;  %vm4961_vm4 = vcmask 195584  }
 0x1c3   :  { %s12843_s14 = smov 64   ;;  %s12844_s7 = smov 80  }
 0x1c4   :  { %s12845_s10 = smov 112   ;;  %s12846_s5 = smov 56  }
 0x1c5   :  { %s14780_s13 = sld [smem:[#allocation75_spill]]  ;;  %s12847_s20 = smov 72  }
 0x1c6   :  { %v613_v0 = vld [vmem:[%s14778_s9 + $0x18] sm:$0xff]  ;;  %v612_v1 = vld [vmem:[%s14778_s9 + $0x10] sm:$0xff]  ;;  %v611_v3 = vld [vmem:[%s14778_s9 + $0x8] sm:$0xff]  ;;  %s12848_s4 = smov 104   ;;  %s12849_s11 = smov 48  }
 0x1c7   :  { %10867 = vmatprep.subr.mxu0 %v613_v0  ;;  %v598_v2 = vld [vmem:[%s14779_s16] sm:$0xff]  ;;  %v599_v5 = vld [vmem:[%s14779_s16 + $0x8] sm:$0xff]  ;;  %v600_v6 = vld [vmem:[%s14779_s16 + $0x10] sm:$0xff]  ;;  %s12850_s15 = smov 40   ;;  %s14781_s27 = sld [smem:[#allocation77_spill]] }
 0x1c8   :  { %10868 = vmatpush3.msra.mxu0 %v613_v0  ;;  %10875 = vmatprep.mubr.msk.f32.mxu0 %vm621_vm0, %v598_v2  ;;  %v610_v4 = vld [vmem:[%s14778_s9] sm:$0xff]  ;;  %v601_v7 = vld [vmem:[%s14779_s16 + $0x18] sm:$0xff]  ;;  %s14782_s6 = sld [smem:[#allocation79_spill]]  ;;  %s12853_s26 = smov [#allocation50]  }
 0x1c9   :  { %10869 = vmatprep.subr.mxu0 %v612_v1  ;;  %s14783_s25 = sld [smem:[#allocation70_spill]]  ;;  %s10019_s28 = sshll.u32 %s12853_s26, 4  ;;  %s10020_s28 = int_to_ptr.vmem [resolvable:$true] %s10019_s28 }
 0x1ca   :  { %10870 = vmatpush3.msra.mxu0 %v612_v1  ;;  %s14784_s22 = sld [smem:[#allocation81_spill]]  ;;  %s12707_s0 = scalar_lea.vmem %s10020_s28, 128 }
 0x1cb   :  { %10871 = vmatprep.subr.mxu0 %v611_v3  ;;  %s14785_s12 = sld [smem:[#allocation71_spill]]  ;;  %p12708_p1 = scmp.ne.s32.totalorder %s10020_s28, %s12707_s0 }
 0x1cc   :  { %10872 = vmatpush3.msra.mxu0 %v611_v3  ;;  %s14786_s30 = sld [smem:[#allocation72_spill]]  ;;  %p12712_p2 = scmp.lt.s32.totalorder %s10020_s28, %s10020_s28 }
 0x1cd   :  { %10873 = vmatprep.subr.mxu0 %v610_v4  ;;  %s14787_s17 = sld [smem:[#allocation83_spill]]  ;;  %p12713_p3 = scmp.lt.s32.totalorder %s12707_s0, %s12707_s0 }
 0x1ce   :  { %10874 = vmatpush3.msra.mxu0 %v610_v4  ;;  %s14788_s23 = sld [smem:[#allocation87_spill]] }
 0x1cf   :  { %10876 = vmatmul.mubr.msk.f32.vlgmr.msra.gmra.mxu0 %vm621_vm0, %v599_v5  ;;  %s14789_s21 = sld [smem:[#allocation93_spill]]  ;;  %p12714_p4 = por %p12713_p3, %p12712_p2 }
 0x1d0   :  { %10878 = vmatprep.mubr.msk.f32.mxu0 %vm621_vm0, %v600_v6 }
 0x1d1   :  { %p12715_p5 = pnand %p12714_p4, %p12708_p1 }
 0x1d3   :  { %10879 = vmatmul.mubr.msk.f32.gmra.mxu0 %vm621_vm0, %v601_v7 }
 0x28f   :  { %v10877_v9 = vpop.f32.mrf.mxu0 }
 0x290   :  { %v13214_v10 = vadd.f32 %v10877_v9, %v10087_v8 }
 0x291   :  { %v700_v11 = vpop.f32.mrf.mxu0 }
 0x292   :  { %v13216_v12 = vadd.f32 %v10087_v8, %v700_v11  ;;  %737 = vrot.lane.b32.xlu1 %v13214_v10, %s12840_s18 }
 0x293   :  { %v10880_v13 = vpop.f32.mrf.mxu0 }
 0x294   :  { %v13220_v14 = vadd.f32 %v10880_v13, %v10087_v8  ;;  %10889 = vmatprep.mubr.msk.f32.mxu1 %vm743_vm1, %v13216_v12 }
 0x295   :  { %v710_v15 = vpop.f32.mrf.mxu0 }
 0x296   :  { %741 = vrot.lane.b32.xlu0 %v13220_v14, %s12840_s18  ;;  %735 = vrot.lane.b32.xlu1 %v13216_v12, %s12840_s18  ;;  %v13228_v16 = vadd.f32 %v10087_v8, %v710_v15 }
 0x29a   :  { %739 = vrot.lane.b32.xlu0 %v13228_v16, %s12840_s18  ;;  %1111 = vrot.lane.b32.xlu1 %v13228_v16, %s12841_s2 }
 0x29e   :  { %1113 = vrot.lane.b32.xlu0 %v13220_v14, %s12841_s2  ;;  %1107 = vrot.lane.b32.xlu1 %v13216_v12, %s12841_s2 }
 0x2a2   :  { %1109 = vrot.lane.b32.xlu0 %v13214_v10, %s12841_s2  ;;  %1101 = vrot.lane.b32.xlu1 %v13214_v10, %s12842_s8 }
 0x2a6   :  { %1099 = vrot.lane.b32.xlu0 %v13216_v12, %s12842_s8  ;;  %1105 = vrot.lane.b32.xlu1 %v13220_v14, %s12842_s8 }
 0x2aa   :  { %1103 = vrot.lane.b32.xlu0 %v13228_v16, %s12842_s8 }
 0x304   :  { %v738_v18 = vpop.permute.xlu1 %737 }
 0x308   :  { %v742_v17 = vpop.permute.xlu0 %741  ;;  %v736_v21 = vpop.permute.xlu1 %735 }
 0x309   :  { %10881 = vmatprep.subr.msk.mxu1 %vm743_vm1, %v742_v17 }
 0x30a   :  { %10882 = vmatpush3.xpose.msk.msra.mxu1 %vm743_vm1, %v742_v17 }
 0x30c   :  { %v740_v19 = vpop.permute.xlu0 %739  ;;  %v1112_v23 = vpop.permute.xlu1 %1111 }
 0x30d   :  { %10883 = vmatprep.subr.msk.mxu1 %vm743_vm1, %v740_v19 }
 0x30e   :  { %10884 = vmatpush3.xpose.msk.msra.mxu1 %vm743_vm1, %v740_v19 }
 0x30f   :  { %10885 = vmatprep.subr.msk.mxu1 %vm743_vm1, %v738_v18 }
 0x310   :  { %v1114_v20 = vpop.permute.xlu0 %1113  ;;  %v1108_v25 = vpop.permute.xlu1 %1107 }
 0x312   :  { %10886 = vmatpush3.xpose.msk.msra.mxu1 %vm743_vm1, %v738_v18 }
 0x313   :  { %10887 = vmatprep.subr.msk.mxu1 %vm743_vm1, %v736_v21 }
 0x314   :  { %v1110_v22 = vpop.permute.xlu0 %1109  ;;  %v1102_v26 = vpop.permute.xlu1 %1101 }
 0x316   :  { %10888 = vmatpush3.xpose.msk.msra.mxu1 %vm743_vm1, %v736_v21 }
 0x317   :  { %10917 = vmatprep.subr.msk.mxu1 %vm743_vm1, %v1114_v20 }
 0x318   :  { %v1100_v24 = vpop.permute.xlu0 %1099  ;;  %v1106_v28 = vpop.permute.xlu1 %1105 }
 0x319   :  { %10890 = vmatmul.mubr.msk.f32.vlgmr.msra.gmra.mxu1 %vm743_vm1, %v13214_v10 }
 0x31a   :  { %10892 = vmatprep.mubr.msk.f32.mxu1 %vm743_vm1, %v13228_v16  ;;  %10918 = vmatpush3.xpose.msk.msra.mxu1 %vm743_vm1, %v1114_v20 }
 0x31b   :  { %10919 = vmatprep.subr.msk.mxu1 %vm743_vm1, %v1112_v23 }
 0x31c   :  { %v1104_v27 = vpop.permute.xlu0 %1103 }
 0x31d   :  { %10893 = vmatmul.mubr.msk.f32.gmra.mxu1 %vm743_vm1, %v13220_v14 }
 0x31e   :  { %10920 = vmatpush3.xpose.msk.msra.mxu1 %vm743_vm1, %v1112_v23  ;;  %10925 = vmatprep.mubr.msk.f32.mxu1 %vm743_vm1, %v1100_v24 }
 0x31f   :  { %10921 = vmatprep.subr.msk.mxu1 %vm743_vm1, %v1110_v22 }
 0x322   :  { %10922 = vmatpush3.xpose.msk.msra.mxu1 %vm743_vm1, %v1110_v22 }
 0x323   :  { %10923 = vmatprep.subr.msk.mxu1 %vm743_vm1, %v1108_v25 }
 0x326   :  { %10924 = vmatpush3.xpose.msk.msra.mxu1 %vm743_vm1, %v1108_v25 }
 0x329   :  { %10926 = vmatmul.mubr.msk.f32.vlgmr.msra.gmra.mxu1 %vm743_vm1, %v1102_v26 }
 0x32a   :  { %10928 = vmatprep.mubr.msk.f32.mxu1 %vm743_vm1, %v1104_v27 }
 0x32d   :  { %10929 = vmatmul.mubr.msk.f32.gmra.mxu1 %vm743_vm1, %v1106_v28 }
 0x3d9   :  { %v10891_v30 = vpop.f32.mrf.mxu1 }
 0x3da   :  { %v832_v32 = vadd.f32 %v10891_v30, %v13274_v29 }
 0x3db   :  { %v826_v33 = vpop.f32.mrf.mxu1 }
 0x3dc   :  { %v827_v34 = vadd.f32 %v826_v33, %v13276_v31  ;;  %v848_v35 = vsel %vm621_vm0, %v832_v32, -inf  ;;  %v719_v33 = vld [vmem:[%s14780_s13] sm:$0xff] }
 0x3dd   :  { %849 = vmax.xlane.f32.xlu1 %v848_v35  ;;  %v10894_v36 = vpop.f32.mrf.mxu1 }
 0x3de   :  { %v845_v38 = vsel %vm621_vm0, %v827_v34, -inf  ;;  %v842_v42 = vadd.f32 %v10894_v36, %v13284_v39 }
 0x3df   :  { %v836_v40 = vpop.f32.mrf.mxu1  ;;  %846 = vmax.xlane.f32.xlu0 %v845_v38 }
 0x3e0   :  { %v837_v41 = vadd.f32 %v836_v40, %v13281_v37  ;;  %v854_v44 = vsel %vm621_vm0, %v842_v42, -inf }
 0x3e2   :  { %v851_v43 = vsel %vm621_vm0, %v837_v41, -inf }
 0x3e3   :  { %852 = vmax.xlane.f32.xlu0 %v851_v43 }
 0x3e7   :  { %855 = vmax.xlane.f32.xlu0 %v854_v44 }
 0x3e9   :  { %v10927_v2 = vpop.f32.mrf.mxu1 }
 0x3ea   :  { %v13343_v15 = vadd.f32 %v10927_v2, %v13274_v29 }
 0x3eb   :  { %v1197_v3 = vpop.f32.mrf.mxu1 }
 0x3ec   :  { %v13320_v5 = vadd.f32 %v1197_v3, %v13276_v31  ;;  %v1219_v17 = vsel %vm621_vm0, %v13343_v15, -inf }
 0x3ed   :  { %v10930_v4 = vpop.f32.mrf.mxu1 }
 0x3ee   :  { %895 = vrot.lane.b32.xlu1 %v13220_v14, %s12843_s14  ;;  %v1216_v8 = vsel %vm621_vm0, %v13320_v5, -inf  ;;  %v13332_v9 = vadd.f32 %v10930_v4, %v13284_v39 }
 0x3ef   :  { %v1207_v6 = vpop.f32.mrf.mxu1 }
 0x3f0   :  { %v13325_v7 = vadd.f32 %v1207_v6, %v13281_v37  ;;  %v1225_v13 = vsel %vm621_vm0, %v13332_v9, -inf }
 0x3f2   :  { %v1222_v11 = vsel %vm621_vm0, %v13325_v7, -inf }
 0x466   :  { %v850_v45 = vpop.xlane.xlu1 %849 }
 0x467   :  { %v858_v46 = vsub.f32 %v832_v32, %v850_v45 }
 0x468   :  { %v847_v47 = vpop.xlane.xlu0 %846 }
 0x469   :  { %v863_v48 = vmul.f32 1.442695, %v858_v46  ;;  %v857_v49 = vsub.f32 %v827_v34, %v847_v47 }
 0x46a   :  { %v896_v50 = vpop.permute.xlu1 %895 }
 0x46b   :  { %11846 = vpow2.f32 %v863_v48  ;;  %v861_v51 = vmul.f32 1.442695, %v857_v49  ;;  %10895 = vmatprep.subr.mxu0 %v896_v50 }
 0x46c   :  { %10896 = vmatpush3.msra.mxu0 %v896_v50  ;;  %v853_v52 = vpop.xlane.xlu0 %852 }
 0x46d   :  { %11848 = vpow2.f32 %v861_v51  ;;  %v859_v62 = vsub.f32 %v837_v41, %v853_v52 }
 0x46f   :  { %v865_v63 = vmul.f32 1.442695, %v859_v62 }
 0x470   :  { %v856_v53 = vpop.xlane.xlu0 %855 }
 0x471   :  { %v860_v54 = vsub.f32 %v842_v42, %v856_v53 }
 0x473   :  { %v867_v55 = vmul.f32 1.442695, %v860_v54 }
 0x475   :  { %11850 = vpow2.f32 %v867_v55 }
 0x476   :  { %11852 = vpow2.f32 %v865_v63 }
 0x478   :  { %v13292_v56 = vpop.eup %11846 }
 0x479   :  { %v872_v57 = vsel %vm621_vm0, %v13292_v56, 0.0 }
 0x47a   :  { %v11849_v58 = vpop.eup %11848  ;;  %873 = vadd.xlane.f32.xlu0 %v872_v57 }
 0x47b   :  { %v869_v59 = vsel %vm621_vm0, %v11849_v58, 0.0 }
 0x47c   :  { %870 = vadd.xlane.f32.xlu1 %v869_v59 }
 0x482   :  { %v13297_v60 = vpop.eup %11850 }
 0x483   :  { %v878_v61 = vsel %vm621_vm0, %v13297_v60, 0.0  ;;  %v13313_v0 = vpop.eup %11852 }
 0x484   :  { %879 = vadd.xlane.f32.xlu0 %v878_v61  ;;  %v875_v1 = vsel %vm621_vm0, %v13313_v0, 0.0 }
 0x48d   :  { %891 = vrot.lane.b32.xlu1 %v13214_v10, %s12843_s14 }
 0x49a   :  { %893 = vrot.lane.b32.xlu0 %v13228_v16, %s12843_s14 }
 0x49e   :  { %1484 = vrot.lane.b32.xlu0 %v13220_v14, %s12844_s7 }
 0x4a2   :  { %1480 = vrot.lane.b32.xlu0 %v13214_v10, %s12844_s7 }
 0x4a6   :  { %1470 = vrot.lane.b32.xlu0 %v13216_v12, %s12845_s10 }
 0x4aa   :  { %1474 = vrot.lane.b32.xlu0 %v13228_v16, %s12845_s10 }
 0x4b1   :  { %876 = vadd.xlane.f32.xlu1 %v875_v1 }
 0x4c2   :  { %889 = vrot.lane.b32.xlu1 %v13216_v12, %s12843_s14 }
 0x4c6   :  { %1482 = vrot.lane.b32.xlu1 %v13228_v16, %s12844_s7 }
 0x4c9   :  { %1217 = vmax.xlane.f32.xlu0 %v1216_v8 }
 0x4ca   :  { %1478 = vrot.lane.b32.xlu1 %v13216_v12, %s12844_s7 }
 0x4cd   :  { %1223 = vmax.xlane.f32.xlu0 %v1222_v11 }
 0x4ce   :  { %1472 = vrot.lane.b32.xlu1 %v13214_v10, %s12845_s10 }
 0x4d1   :  { %1226 = vmax.xlane.f32.xlu0 %v1225_v13 }
 0x4d2   :  { %1476 = vrot.lane.b32.xlu1 %v13220_v14, %s12845_s10 }
 0x4f6   :  { %1220 = vmax.xlane.f32.xlu1 %v1219_v17 }
 0x503   :  { %v874_v19 = vpop.xlane.xlu0 %873 }
 0x505   :  { %v871_v18 = vpop.xlane.xlu1 %870 }
 0x506   :  { %11854 = vrcp.f32 %v871_v18 }
 0x507   :  { %1266 = vrot.lane.b32.xlu1 %v13220_v14, %s12846_s5  ;;  %11856 = vrcp.f32 %v874_v19 }
 0x509   :  { %v892_v23 = vpop.permute.xlu1 %891 }
 0x50d   :  { %v880_v20 = vpop.xlane.xlu0 %879 }
 0x50e   :  { %11858 = vrcp.f32 %v880_v20 }
 0x511   :  { %v894_v21 = vpop.permute.xlu0 %893 }
 0x512   :  { %10897 = vmatprep.subr.mxu0 %v894_v21 }
 0x513   :  { %v11855_v22 = vpop.eup %11854  ;;  %10898 = vmatpush3.msra.mxu0 %v894_v21 }
 0x514   :  { %10899 = vmatprep.subr.mxu0 %v892_v23  ;;  %v885_v24 = vmul.f32 %v11855_v22, %v11849_v58  ;;  %v11857_v30 = vpop.eup %11856 }
 0x515   :  { %10900 = vmatpush3.msra.mxu0 %v892_v23  ;;  %v1485_v25 = vpop.permute.xlu0 %1484  ;;  %v886_v34 = vmul.f32 %v11857_v30, %v13292_v56 }
 0x516   :  { %10903 = vmatprep.mubr.msk.f32.mxu0 %vm621_vm0, %v885_v24  ;;  %10953 = vmatprep.subr.msk.mxu1 %vm743_vm1, %v1485_v25 }
 0x517   :  { %10954 = vmatpush3.xpose.msk.msra.mxu1 %vm743_vm1, %v1485_v25 }
 0x519   :  { %v1481_v26 = vpop.permute.xlu0 %1480 }
 0x51b   :  { %v11859_v38 = vpop.eup %11858 }
 0x51c   :  { %v888_v42 = vmul.f32 %v11859_v38, %v13297_v60 }
 0x51d   :  { %v1471_v27 = vpop.permute.xlu0 %1470 }
 0x51e   :  { %10961 = vmatprep.mubr.msk.f32.mxu1 %vm743_vm1, %v1471_v27 }
 0x521   :  { %v1475_v44 = vpop.permute.xlu0 %1474 }
 0x53a   :  { %v877_v28 = vpop.xlane.xlu1 %876 }
 0x53b   :  { %11860 = vrcp.f32 %v877_v28 }
 0x53e   :  { %v890_v32 = vpop.permute.xlu1 %889 }
 0x53f   :  { %10901 = vmatprep.subr.mxu0 %v890_v32 }
 0x540   :  { %10902 = vmatpush3.msra.mxu0 %v890_v32 }
 0x541   :  { %10904 = vmatmul.mubr.msk.f32.vlgmr.msra.gmra.mxu0 %vm621_vm0, %v886_v34  ;;  %10909 = vmatprep.subr.mxu0 %v719_v33 }
 0x542   :  { %v1483_v35 = vpop.permute.xlu1 %1482  ;;  %10910 = vmatpush3.msra.mxu0 %v719_v33 }
 0x543   :  { %10955 = vmatprep.subr.msk.mxu1 %vm743_vm1, %v1483_v35 }
 0x544   :  { %10956 = vmatpush3.xpose.msk.msra.mxu1 %vm743_vm1, %v1483_v35  ;;  %v720_v35 = vld [vmem:[%s14780_s13 + $0x8] sm:$0xff] }
 0x545   :  { %10957 = vmatprep.subr.msk.mxu1 %vm743_vm1, %v1481_v26 }
 0x546   :  { %v1479_v36 = vpop.permute.xlu1 %1478 }
 0x548   :  { %v11861_v40 = vpop.eup %11860  ;;  %10958 = vmatpush3.xpose.msk.msra.mxu1 %vm743_vm1, %v1481_v26 }
 0x549   :  { %10959 = vmatprep.subr.msk.mxu1 %vm743_vm1, %v1479_v36  ;;  %v887_v41 = vmul.f32 %v11861_v40, %v13313_v0 }
 0x54a   :  { %v1473_v43 = vpop.permute.xlu1 %1472 }
 0x54b   :  { %10906 = vmatprep.mubr.msk.f32.mxu0 %vm621_vm0, %v887_v41 }
 0x54c   :  { %10907 = vmatmul.mubr.msk.f32.gmra.mxu0 %vm621_vm0, %v888_v42  ;;  %10960 = vmatpush3.xpose.msk.msra.mxu1 %vm743_vm1, %v1479_v36 }
 0x54e   :  { %v1477_v45 = vpop.permute.xlu1 %1476 }
 0x54f   :  { %10962 = vmatmul.mubr.msk.f32.vlgmr.msra.gmra.mxu1 %vm743_vm1, %v1473_v43 }
 0x550   :  { %10964 = vmatprep.mubr.msk.f32.mxu1 %vm743_vm1, %v1475_v44 }
 0x552   :  { %v1218_v46 = vpop.xlane.xlu0 %1217 }
 0x553   :  { %v1228_v47 = vsub.f32 %v13320_v5, %v1218_v46  ;;  %10965 = vmatmul.mubr.msk.f32.gmra.mxu1 %vm743_vm1, %v1477_v45 }
 0x555   :  { %v1232_v48 = vmul.f32 1.442695, %v1228_v47 }
 0x556   :  { %v1224_v51 = vpop.xlane.xlu0 %1223 }
 0x557   :  { %11862 = vpow2.f32 %v1232_v48  ;;  %v1230_v56 = vsub.f32 %v13325_v7, %v1224_v51 }
 0x559   :  { %v1236_v60 = vmul.f32 1.442695, %v1230_v56 }
 0x55a   :  { %v1227_v52 = vpop.xlane.xlu0 %1226 }
 0x55b   :  { %v1231_v53 = vsub.f32 %v13332_v9, %v1227_v52 }
 0x55d   :  { %v1238_v57 = vmul.f32 1.442695, %v1231_v53 }
 0x564   :  { %v11863_v49 = vpop.eup %11862 }
 0x565   :  { %v1240_v50 = vsel %vm621_vm0, %v11863_v49, 0.0 }
 0x566   :  { %1241 = vadd.xlane.f32.xlu1 %v1240_v50 }
 0x577   :  { %1262 = vrot.lane.b32.xlu1 %v13214_v10, %s12846_s5 }
 0x57f   :  { %v1221_v54 = vpop.xlane.xlu1 %1220 }
 0x580   :  { %v1229_v55 = vsub.f32 %v13343_v15, %v1221_v54 }
 0x582   :  { %v1234_v58 = vmul.f32 1.442695, %v1229_v55 }
 0x583   :  { %v1267_v59 = vpop.permute.xlu1 %1266 }
 0x584   :  { %11864 = vpow2.f32 %v1234_v58  ;;  %10931 = vmatprep.subr.mxu0 %v1267_v59 }
 0x585   :  { %11866 = vpow2.f32 %v1238_v57 }
 0x586   :  { %11868 = vpow2.f32 %v1236_v60 }
 0x591   :  { %v13376_v61 = vpop.eup %11864 }
 0x592   :  { %v1243_v62 = vsel %vm621_vm0, %v13376_v61, 0.0  ;;  %v13380_v63 = vpop.eup %11866 }
 0x593   :  { %1244 = vadd.xlane.f32.xlu0 %v1243_v62  ;;  %v1249_v0 = vsel %vm621_vm0, %v13380_v63, 0.0  ;;  %v13384_v1 = vpop.eup %11868 }
 0x594   :  { %v1246_v2 = vsel %vm621_vm0, %v13384_v1, 0.0 }
 0x597   :  { %1250 = vadd.xlane.f32.xlu0 %v1249_v0 }
 0x59b   :  { %1247 = vadd.xlane.f32.xlu1 %v1246_v2 }
 0x5ac   :  { %1260 = vrot.lane.b32.xlu1 %v13216_v12, %s12846_s5 }
 0x5ad   :  { %1264 = vrot.lane.b32.xlu0 %v13228_v16, %s12846_s5 }
 0x5b0   :  { %1853 = vrot.lane.b32.xlu1 %v13228_v16, %s12847_s20 }
 0x5b1   :  { %1855 = vrot.lane.b32.xlu0 %v13220_v14, %s12847_s20 }
 0x5b4   :  { %1849 = vrot.lane.b32.xlu1 %v13216_v12, %s12847_s20 }
 0x5b5   :  { %1851 = vrot.lane.b32.xlu0 %v13214_v10, %s12847_s20 }
 0x5b8   :  { %1843 = vrot.lane.b32.xlu1 %v13214_v10, %s12848_s4 }
 0x5b9   :  { %1841 = vrot.lane.b32.xlu0 %v13216_v12, %s12848_s4 }
 0x5bc   :  { %1847 = vrot.lane.b32.xlu1 %v13220_v14, %s12848_s4 }
 0x5bd   :  { %1845 = vrot.lane.b32.xlu0 %v13228_v16, %s12848_s4 }
 0x5ef   :  { %v1242_v3 = vpop.xlane.xlu1 %1241 }
 0x5f0   :  { %11870 = vrcp.f32 %v1242_v3 }
 0x5f3   :  { %v1263_v27 = vpop.permute.xlu1 %1262 }
 0x5fd   :  { %v11871_v6 = vpop.eup %11870 }
 0x5fe   :  { %v1256_v11 = vmul.f32 %v11871_v6, %v11863_v49 }
 0x601   :  { %v10905_v4 = vpop.f32.mrf.mxu0 }
 0x603   :  { %v979_v5 = vpop.f32.mrf.mxu0 }
 0x604   :  { %10911 = vmatprep.mubr.msk.f32.mxu0 %vm743_vm1, %v979_v5 }
 0x605   :  { %10912 = vmatmul.mubr.msk.f32.vlgmr.msra.gmra.mxu0 %vm743_vm1, %v10905_v4 }
 0x606   :  { %10932 = vmatpush3.msra.mxu0 %v1267_v59 }
 0x60c   :  { %v10908_v7 = vpop.f32.mrf.mxu0 }
 0x60e   :  { %v989_v8 = vpop.f32.mrf.mxu0 }
 0x60f   :  { %10914 = vmatprep.mubr.msk.f32.mxu0 %vm743_vm1, %v989_v8  ;;  %v10963_v9 = vpop.f32.mrf.mxu1 }
 0x610   :  { %v13412_v13 = vadd.f32 %v10963_v9, %v13274_v29  ;;  %10915 = vmatmul.mubr.msk.f32.gmra.mxu0 %vm743_vm1, %v10908_v7 }
 0x611   :  { %10939 = vmatprep.mubr.msk.f32.mxu0 %vm621_vm0, %v1256_v11  ;;  %v1568_v15 = vpop.f32.mrf.mxu1 }
 0x612   :  { %v13417_v17 = vadd.f32 %v1568_v15, %v13276_v31  ;;  %v1590_v18 = vsel %vm621_vm0, %v13412_v13, -inf }
 0x613   :  { %v10966_v19 = vpop.f32.mrf.mxu1  ;;  %1591 = vmax.xlane.f32.xlu1 %v1590_v18 }
 0x614   :  { %v1587_v20 = vsel %vm621_vm0, %v13417_v17, -inf  ;;  %v13427_v23 = vadd.f32 %v10966_v19, %v13284_v39 }
 0x615   :  { %v1578_v21 = vpop.f32.mrf.mxu1  ;;  %1588 = vmax.xlane.f32.xlu0 %v1587_v20 }
 0x616   :  { %v13424_v22 = vadd.f32 %v1578_v21, %v13281_v37  ;;  %v1596_v26 = vsel %vm621_vm0, %v13427_v23, -inf }
 0x618   :  { %v1593_v24 = vsel %vm621_vm0, %v13424_v22, -inf }
 0x619   :  { %1594 = vmax.xlane.f32.xlu0 %v1593_v24 }
 0x61c   :  { %v1245_v25 = vpop.xlane.xlu0 %1244 }
 0x61d   :  { %11872 = vrcp.f32 %v1245_v25  ;;  %1597 = vmax.xlane.f32.xlu0 %v1596_v26 }
 0x620   :  { %v1251_v28 = vpop.xlane.xlu0 %1250 }
 0x621   :  { %11874 = vrcp.f32 %v1251_v28 }
 0x624   :  { %1637 = vrot.lane.b32.xlu1 %v13220_v14, %s12849_s11  ;;  %v1248_v30 = vpop.xlane.xlu1 %1247  ;;  %v1265_v32 = vpop.permute.xlu0 %1264 }
 0x625   :  { %11876 = vrcp.f32 %v1248_v30  ;;  %10933 = vmatprep.subr.mxu0 %v1265_v32 }
 0x626   :  { %10934 = vmatpush3.msra.mxu0 %v1265_v32 }
 0x627   :  { %10935 = vmatprep.subr.mxu0 %v1263_v27 }
 0x628   :  { %v1261_v33 = vpop.permute.xlu1 %1260  ;;  %10936 = vmatpush3.msra.mxu0 %v1263_v27  ;;  %v1856_v34 = vpop.permute.xlu0 %1855 }
 0x629   :  { %10937 = vmatprep.subr.mxu0 %v1261_v33  ;;  %10989 = vmatprep.subr.msk.mxu1 %vm743_vm1, %v1856_v34 }
 0x62a   :  { %v11873_v36 = vpop.eup %11872  ;;  %10938 = vmatpush3.msra.mxu0 %v1261_v33  ;;  %10990 = vmatpush3.xpose.msk.msra.mxu1 %vm743_vm1, %v1856_v34 }
 0x62b   :  { %v1257_v38 = vmul.f32 %v11873_v36, %v13376_v61  ;;  %10945 = vmatprep.subr.mxu0 %v720_v35 }
 0x62c   :  { %v1854_v40 = vpop.permute.xlu1 %1853  ;;  %v1852_v41 = vpop.permute.xlu0 %1851 }
 0x62d   :  { %10940 = vmatmul.mubr.msk.f32.vlgmr.msra.gmra.mxu0 %vm621_vm0, %v1257_v38  ;;  %10991 = vmatprep.subr.msk.mxu1 %vm743_vm1, %v1854_v40 }
 0x62e   :  { %10992 = vmatpush3.xpose.msk.msra.mxu1 %vm743_vm1, %v1854_v40  ;;  %10946 = vmatpush3.msra.mxu0 %v720_v35  ;;  %v11875_v44 = vpop.eup %11874 }
 0x62f   :  { %10993 = vmatprep.subr.msk.mxu1 %vm743_vm1, %v1852_v41  ;;  %v1259_v47 = vmul.f32 %v11875_v44, %v13380_v63 }
 0x630   :  { %v1850_v42 = vpop.permute.xlu1 %1849  ;;  %v1842_v43 = vpop.permute.xlu0 %1841 }
 0x631   :  { %10997 = vmatprep.mubr.msk.f32.mxu1 %vm743_vm1, %v1842_v43 }
 0x632   :  { %v11877_v45 = vpop.eup %11876  ;;  %10994 = vmatpush3.xpose.msk.msra.mxu1 %vm743_vm1, %v1852_v41  ;;  %v721_v41 = vld [vmem:[%s14780_s13 + $0x10] sm:$0xff] }
 0x633   :  { %10995 = vmatprep.subr.msk.mxu1 %vm743_vm1, %v1850_v42  ;;  %v1258_v46 = vmul.f32 %v11877_v45, %v13384_v1 }
 0x634   :  { %v1844_v48 = vpop.permute.xlu1 %1843  ;;  %v1846_v49 = vpop.permute.xlu0 %1845 }
 0x635   :  { %10942 = vmatprep.mubr.msk.f32.mxu0 %vm621_vm0, %v1258_v46 }
 0x636   :  { %10943 = vmatmul.mubr.msk.f32.gmra.mxu0 %vm621_vm0, %v1259_v47  ;;  %10996 = vmatpush3.xpose.msk.msra.mxu1 %vm743_vm1, %v1850_v42 }
 0x638   :  { %v1848_v50 = vpop.permute.xlu1 %1847 }
 0x639   :  { %10998 = vmatmul.mubr.msk.f32.vlgmr.msra.gmra.mxu1 %vm743_vm1, %v1844_v48 }
 0x63a   :  { %11000 = vmatprep.mubr.msk.f32.mxu1 %vm743_vm1, %v1846_v49 }
 0x63d   :  { %11001 = vmatmul.mubr.msk.f32.gmra.mxu1 %vm743_vm1, %v1848_v50 }
 0x69c   :  { %v1592_v51 = vpop.xlane.xlu1 %1591 }
 0x69d   :  { %v1600_v52 = vsub.f32 %v13412_v13, %v1592_v51 }
 0x69e   :  { %v1589_v53 = vpop.xlane.xlu0 %1588 }
 0x69f   :  { %v1605_v54 = vmul.f32 1.442695, %v1600_v52  ;;  %v1599_v55 = vsub.f32 %v13417_v17, %v1589_v53 }
 0x6a0   :  { %v1638_v56 = vpop.permute.xlu1 %1637 }
 0x6a1   :  { %11878 = vpow2.f32 %v1605_v54  ;;  %v1603_v57 = vmul.f32 1.442695, %v1599_v55  ;;  %10967 = vmatprep.subr.mxu0 %v1638_v56 }
 0x6a2   :  { %v1595_v58 = vpop.xlane.xlu0 %1594 }
 0x6a3   :  { %11880 = vpow2.f32 %v1603_v57  ;;  %v1601_v4 = vsub.f32 %v13424_v22, %v1595_v58 }
 0x6a5   :  { %v1607_v5 = vmul.f32 1.442695, %v1601_v4 }
 0x6a6   :  { %v1598_v59 = vpop.xlane.xlu0 %1597 }
 0x6a7   :  { %v1602_v60 = vsub.f32 %v13427_v23, %v1598_v59 }
 0x6a9   :  { %v1609_v61 = vmul.f32 1.442695, %v1602_v60  ;;  %v13507_v60 = vld [vmem:[#allocation8] ss:$0 sm:$0xff] }
 0x6ab   :  { %11882 = vpow2.f32 %v1609_v61 }
 0x6ac   :  { %11884 = vpow2.f32 %v1607_v5 }
 0x6ae   :  { %v13457_v62 = vpop.eup %11878 }
 0x6af   :  { %v1614_v63 = vsel %vm621_vm0, %v13457_v62, 0.0 }
 0x6b0   :  { %v11881_v0 = vpop.eup %11880  ;;  %1615 = vadd.xlane.f32.xlu0 %v1614_v63 }
 0x6b1   :  { %v1611_v1 = vsel %vm621_vm0, %v11881_v0, 0.0 }
 0x6b2   :  { %1612 = vadd.xlane.f32.xlu1 %v1611_v1 }
 0x6b8   :  { %v13462_v2 = vpop.eup %11882 }
 0x6b9   :  { %v1620_v3 = vsel %vm621_vm0, %v13462_v2, 0.0  ;;  %v11885_v7 = vpop.eup %11884 }
 0x6ba   :  { %1621 = vadd.xlane.f32.xlu0 %v1620_v3  ;;  %v1617_v9 = vsel %vm621_vm0, %v11885_v7, 0.0 }
 0x6c3   :  { %1633 = vrot.lane.b32.xlu1 %v13214_v10, %s12849_s11 }
 0x6c5   :  { %v13471_v6 = vpop.f32.mrf.mxu0 }
 0x6c6   :  { %v1096_v61 = vadd.f32 %v13471_v6, %v13507_v60 }
 0x6c7   :  { %v13473_v8 = vpop.f32.mrf.mxu0 }
 0x6d0   :  { %1635 = vrot.lane.b32.xlu0 %v13228_v16, %s12849_s11  ;;  %v13476_v11 = vpop.f32.mrf.mxu0 }
 0x6d1   :  { %v1098_v5 = vadd.f32 %v13476_v11, %v13507_v60 }
 0x6d2   :  { %v13478_v13 = vpop.f32.mrf.mxu0 }
 0x6e7   :  { %1618 = vadd.xlane.f32.xlu1 %v1617_v9 }
 0x6ed   :  { %v10941_v15 = vpop.f32.mrf.mxu0 }
 0x6ef   :  { %v1350_v17 = vpop.f32.mrf.mxu0 }
 0x6f0   :  { %10947 = vmatprep.mubr.msk.f32.mxu0 %vm743_vm1, %v1350_v17 }
 0x6f1   :  { %10948 = vmatmul.mubr.msk.f32.vlgmr.msra.gmra.mxu0 %vm743_vm1, %v10941_v15 }
 0x6f2   :  { %10968 = vmatpush3.msra.mxu0 %v1638_v56 }
 0x6f6   :  { %v10944_v18 = vpop.f32.mrf.mxu0 }
 0x6f8   :  { %v1360_v19 = vpop.f32.mrf.mxu0  ;;  %1631 = vrot.lane.b32.xlu1 %v13216_v12, %s12849_s11 }
 0x6f9   :  { %10950 = vmatprep.mubr.msk.f32.mxu0 %vm743_vm1, %v1360_v19  ;;  %v10999_v20 = vpop.f32.mrf.mxu1 }
 0x6fa   :  { %10951 = vmatmul.mubr.msk.f32.gmra.mxu0 %vm743_vm1, %v10944_v18  ;;  %v1945_v32 = vadd.f32 %v10999_v20, %v13274_v29 }
 0x6fb   :  { %v1939_v21 = vpop.f32.mrf.mxu1 }
 0x6fc   :  { %v1940_v22 = vadd.f32 %v1939_v21, %v13276_v31  ;;  %v1961_v31 = vsel %vm621_vm0, %v1945_v32, -inf }
 0x6fd   :  { %v11002_v23 = vpop.f32.mrf.mxu1 }
 0x6fe   :  { %v1958_v24 = vsel %vm621_vm0, %v1940_v22, -inf  ;;  %v1955_v27 = vadd.f32 %v11002_v23, %v13284_v39 }
 0x6ff   :  { %v1949_v25 = vpop.f32.mrf.mxu1  ;;  %1959 = vmax.xlane.f32.xlu0 %v1958_v24 }
 0x700   :  { %v13489_v26 = vadd.f32 %v1949_v25, %v13281_v37  ;;  %v1967_v30 = vsel %vm621_vm0, %v1955_v27, -inf }
 0x702   :  { %v1964_v28 = vsel %vm621_vm0, %v13489_v26, -inf }
 0x703   :  { %1965 = vmax.xlane.f32.xlu0 %v1964_v28 }
 0x707   :  { %1968 = vmax.xlane.f32.xlu0 %v1967_v30 }
 0x71c   :  { %1962 = vmax.xlane.f32.xlu1 %v1961_v31 }
 0x72d   :  { %2008 = vrot.lane.b32.xlu1 %v13220_v14, %s12850_s15 }
 0x739   :  { %v1616_v33 = vpop.xlane.xlu0 %1615 }
 0x73b   :  { %v1613_v37 = vpop.xlane.xlu1 %1612 }
 0x73c   :  { %11886 = vrcp.f32 %v1613_v37 }
 0x73d   :  { %11888 = vrcp.f32 %v1616_v33 }
 0x73f   :  { %v1634_v36 = vpop.permute.xlu1 %1633 }
 0x743   :  { %v1622_v39 = vpop.xlane.xlu0 %1621 }
 0x744   :  { %11890 = vrcp.f32 %v1622_v39 }
 0x747   :  { %v1636_v34 = vpop.permute.xlu0 %1635 }
 0x748   :  { %10969 = vmatprep.subr.mxu0 %v1636_v34 }
 0x749   :  { %v11887_v35 = vpop.eup %11886  ;;  %10970 = vmatpush3.msra.mxu0 %v1636_v34  ;;  %v722_v34 = vld [vmem:[%s14780_s13 + $0x18] sm:$0xff] }
 0x74a   :  { %10971 = vmatprep.subr.mxu0 %v1634_v36  ;;  %v1627_v38 = vmul.f32 %v11887_v35, %v11881_v0  ;;  %v11889_v14 = vpop.eup %11888 }
 0x74b   :  { %10972 = vmatpush3.msra.mxu0 %v1634_v36  ;;  %v1628_v42 = vmul.f32 %v11889_v14, %v13457_v62 }
 0x74c   :  { %10975 = vmatprep.mubr.msk.f32.mxu0 %vm621_vm0, %v1627_v38 }
 0x751   :  { %v11891_v43 = vpop.eup %11890 }
 0x752   :  { %v1630_v46 = vmul.f32 %v11891_v43, %v13462_v2 }
 0x770   :  { %v1619_v29 = vpop.xlane.xlu1 %1618 }
 0x771   :  { %11892 = vrcp.f32 %v1619_v29 }
 0x774   :  { %v1632_v40 = vpop.permute.xlu1 %1631 }
 0x775   :  { %10973 = vmatprep.subr.mxu0 %v1632_v40 }
 0x776   :  { %10974 = vmatpush3.msra.mxu0 %v1632_v40 }
 0x777   :  { %10976 = vmatmul.mubr.msk.f32.vlgmr.msra.gmra.mxu0 %vm621_vm0, %v1628_v42  ;;  %10981 = vmatprep.subr.mxu0 %v721_v41 }
 0x778   :  { %10982 = vmatpush3.msra.mxu0 %v721_v41 }
 0x77e   :  { %v11893_v44 = vpop.eup %11892 }
 0x77f   :  { %v1629_v45 = vmul.f32 %v11893_v44, %v11885_v7 }
 0x781   :  { %10978 = vmatprep.mubr.msk.f32.mxu0 %vm621_vm0, %v1629_v45  ;;  %v1095_v45 = vadd.f32 %v13507_v60, %v13473_v8  ;;  %v1097_v8 = vadd.f32 %v13507_v60, %v13478_v13 }
 0x782   :  { %10979 = vmatmul.mubr.msk.f32.gmra.mxu0 %vm621_vm0, %v1630_v46 }
 0x788   :  { %v1960_v47 = vpop.xlane.xlu0 %1959 }
 0x789   :  { %v1970_v48 = vsub.f32 %v1940_v22, %v1960_v47 }
 0x78b   :  { %v1974_v49 = vmul.f32 1.442695, %v1970_v48 }
 0x78c   :  { %v1966_v51 = vpop.xlane.xlu0 %1965 }
 0x78d   :  { %11894 = vpow2.f32 %v1974_v49  ;;  %v1972_v1 = vsub.f32 %v13489_v26, %v1966_v51 }
 0x790   :  { %v1969_v53 = vpop.xlane.xlu0 %1968 }
 0x791   :  { %v1973_v54 = vsub.f32 %v1955_v27, %v1969_v53 }
 0x793   :  { %v1980_v57 = vmul.f32 1.442695, %v1973_v54 }
 0x79a   :  { %v11895_v50 = vpop.eup %11894 }
 0x79b   :  { %v1982_v52 = vsel %vm621_vm0, %v11895_v50, 0.0 }
 0x79c   :  { %1983 = vadd.xlane.f32.xlu1 %v1982_v52  ;;  %v12082_v52 = vld [vmem:[%s14779_s16 + $0x8] sm:$0xff] }
 0x7a5   :  { %v1963_v55 = vpop.xlane.xlu1 %1962 }
 0x7a6   :  { %v1971_v56 = vsub.f32 %v1945_v32, %v1963_v55  ;;  %v12083_v55 = vld [vmem:[%s14779_s16] sm:$0xff] }
 0x7a8   :  { %v1976_v58 = vmul.f32 1.442695, %v1971_v56 }
 0x7a9   :  { %v2009_v59 = vpop.permute.xlu1 %2008 }
 0x7aa   :  { %11896 = vpow2.f32 %v1976_v58  ;;  %11003 = vmatprep.subr.mxu0 %v2009_v59 }
 0x7ab   :  { %11898 = vpow2.f32 %v1980_v57 }
 0x7ad   :  { %2004 = vrot.lane.b32.xlu1 %v13214_v10, %s12850_s15  ;;  %v1978_v10 = vmul.f32 1.442695, %v1972_v1  ;;  %v12084_v1 = vld [vmem:[%s14779_s16 + $0x10] sm:$0xff] }
 0x7af   :  { %11900 = vpow2.f32 %v1978_v10 }
 0x7b1   :  { %v10949_v62 = vpop.f32.mrf.mxu0 }
 0x7b2   :  { %v1467_v63 = vadd.f32 %v10949_v62, %v1096_v61 }
 0x7b3   :  { %v13514_v2 = vpop.f32.mrf.mxu0 }
 0x7b4   :  { %v1466_v46 = vadd.f32 %v13514_v2, %v1095_v45 }
 0x7b7   :  { %v11897_v0 = vpop.eup %11896 }
 0x7b8   :  { %v1985_v3 = vsel %vm621_vm0, %v11897_v0, 0.0  ;;  %v11899_v4 = vpop.eup %11898 }
 0x7b9   :  { %1986 = vadd.xlane.f32.xlu0 %v1985_v3  ;;  %v1991_v15 = vsel %vm621_vm0, %v11899_v4, 0.0 }
 0x7ba   :  { %v10952_v7 = vpop.f32.mrf.mxu0 }
 0x7bb   :  { %v1469_v9 = vadd.f32 %v10952_v7, %v1098_v5 }
 0x7bc   :  { %v11901_v6 = vpop.eup %11900  ;;  %v13525_v11 = vpop.f32.mrf.mxu0 }
 0x7bd   :  { %1992 = vadd.xlane.f32.xlu0 %v1991_v15  ;;  %v1988_v17 = vsel %vm621_vm0, %v11901_v6, 0.0  ;;  %v1468_v58 = vadd.f32 %v13525_v11, %v1097_v8 }
 0x7d1   :  { %1989 = vadd.xlane.f32.xlu1 %v1988_v17 }
 0x7d3   :  { %2006 = vrot.lane.b32.xlu0 %v13228_v16, %s12850_s15 }
 0x7e2   :  { %2002 = vrot.lane.b32.xlu1 %v13216_v12, %s12850_s15 }
 0x825   :  { %v1984_v18 = vpop.xlane.xlu1 %1983 }
 0x826   :  { %11902 = vrcp.f32 %v1984_v18 }
 0x829   :  { %v2005_v26 = vpop.permute.xlu1 %2004 }
 0x833   :  { %v11903_v21 = vpop.eup %11902 }
 0x834   :  { %v1998_v16 = vmul.f32 %v11903_v21, %v11895_v50 }
 0x837   :  { %v10977_v19 = vpop.f32.mrf.mxu0 }
 0x839   :  { %v1721_v20 = vpop.f32.mrf.mxu0 }
 0x83a   :  { %10983 = vmatprep.mubr.msk.f32.mxu0 %vm743_vm1, %v1721_v20 }
 0x83b   :  { %10984 = vmatmul.mubr.msk.f32.vlgmr.msra.gmra.mxu0 %vm743_vm1, %v10977_v19 }
 0x83c   :  { %11004 = vmatpush3.msra.mxu0 %v2009_v59 }
 0x842   :  { %v10980_v22 = vpop.f32.mrf.mxu0  ;;  %v1987_v23 = vpop.xlane.xlu0 %1986 }
 0x843   :  { %11904 = vrcp.f32 %v1987_v23 }
 0x844   :  { %v1731_v24 = vpop.f32.mrf.mxu0 }
 0x845   :  { %10986 = vmatprep.mubr.msk.f32.mxu0 %vm743_vm1, %v1731_v24 }
 0x846   :  { %10987 = vmatmul.mubr.msk.f32.gmra.mxu0 %vm743_vm1, %v10980_v22  ;;  %v1993_v12 = vpop.xlane.xlu0 %1992 }
 0x847   :  { %11011 = vmatprep.mubr.msk.f32.mxu0 %vm621_vm0, %v1998_v16  ;;  %11906 = vrcp.f32 %v1993_v12 }
 0x84a   :  { %v2007_v25 = vpop.permute.xlu0 %2006 }
 0x84b   :  { %11005 = vmatprep.subr.mxu0 %v2007_v25 }
 0x84c   :  { %11006 = vmatpush3.msra.mxu0 %v2007_v25 }
 0x84d   :  { %11007 = vmatprep.subr.mxu0 %v2005_v26 }
 0x84e   :  { %11008 = vmatpush3.msra.mxu0 %v2005_v26 }
 0x850   :  { %v11905_v28 = vpop.eup %11904 }
 0x851   :  { %v1999_v32 = vmul.f32 %v11905_v28, %v11897_v0  ;;  %v2294_v28 = vld [vmem:[%s14781_s27 + $0x18] sm:$0xff] }
 0x852   :  { %11025 = vmatprep.subr.mxu1 %v2294_v28 }
 0x853   :  { %11026 = vmatpush3.msra.mxu1 %v2294_v28 }
 0x854   :  { %v11907_v31 = vpop.eup %11906 }
 0x855   :  { %v2001_v39 = vmul.f32 %v11907_v31, %v11899_v4  ;;  %v12085_v4 = vld [vmem:[%s14779_s16 + $0x18] sm:$0xff]  ;;  %v2291_v31 = vld [vmem:[%s14781_s27] sm:$0xff] }
 0x85a   :  { %v1990_v27 = vpop.xlane.xlu1 %1989 }
 0x85b   :  { %11908 = vrcp.f32 %v1990_v27 }
 0x85e   :  { %v2003_v30 = vpop.permute.xlu1 %2002 }
 0x85f   :  { %11009 = vmatprep.subr.mxu0 %v2003_v30 }
 0x860   :  { %11010 = vmatpush3.msra.mxu0 %v2003_v30  ;;  %v2293_v30 = vld [vmem:[%s14781_s27 + $0x10] sm:$0xff] }
 0x861   :  { %11012 = vmatmul.mubr.msk.f32.vlgmr.msra.gmra.mxu0 %vm621_vm0, %v1999_v32  ;;  %11017 = vmatprep.subr.mxu0 %v722_v34  ;;  %v2292_v32 = vld [vmem:[%s14781_s27 + $0x8] sm:$0xff] }
 0x862   :  { %11018 = vmatpush3.msra.mxu0 %v722_v34  ;;  %11027 = vmatprep.subr.mxu1 %v2293_v30  ;;  %v2407_v34 = vld [vmem:[%s14782_s6 + $0x20] sm:$0xff] }
 0x863   :  { %11028 = vmatpush3.msra.mxu1 %v2293_v30 }
 0x864   :  { %11029 = vmatprep.subr.mxu1 %v2292_v32 }
 0x865   :  { %11030 = vmatpush3.msra.mxu1 %v2292_v32 }
 0x866   :  { %11031 = vmatprep.subr.mxu1 %v2291_v31 }
 0x867   :  { %11032 = vmatpush3.msra.mxu1 %v2291_v31 }
 0x868   :  { %v11909_v37 = vpop.eup %11908 }
 0x869   :  { %v2000_v33 = vmul.f32 %v11909_v37, %v11901_v6  ;;  %v2410_v37 = vld [vmem:[%s14782_s6 + $0x38] sm:$0xff] }
 0x86a   :  { %11039 = vmatprep.subr.mxu0 %v2410_v37 }
 0x86b   :  { %11014 = vmatprep.mubr.msk.f32.mxu0 %vm621_vm0, %v2000_v33  ;;  %v2409_v33 = vld [vmem:[%s14782_s6 + $0x30] sm:$0xff] }
 0x86c   :  { %11015 = vmatmul.mubr.msk.f32.gmra.mxu0 %vm621_vm0, %v2001_v39  ;;  %v2408_v39 = vld [vmem:[%s14782_s6 + $0x28] sm:$0xff] }
 0x8fb   :  { %v10985_v35 = vpop.f32.mrf.mxu0 }
 0x8fc   :  { %v1838_v36 = vadd.f32 %v10985_v35, %v1467_v63 }
 0x8fd   :  { %v1818_v38 = vpop.f32.mrf.mxu0 }
 0x8fe   :  { %v1837_v48 = vadd.f32 %v1818_v38, %v1466_v46 }
 0x906   :  { %v10988_v29 = vpop.f32.mrf.mxu0 }
 0x907   :  { %v1840_v14 = vadd.f32 %v10988_v29, %v1469_v9 }
 0x908   :  { %v1828_v40 = vpop.f32.mrf.mxu0 }
 0x909   :  { %v1839_v61 = vadd.f32 %v1828_v40, %v1468_v58 }
 0x921   :  { %v11013_v41 = vpop.f32.mrf.mxu0 }
 0x923   :  { %v2092_v42 = vpop.f32.mrf.mxu0 }
 0x924   :  { %11019 = vmatprep.mubr.msk.f32.mxu0 %vm743_vm1, %v2092_v42 }
 0x925   :  { %11020 = vmatmul.mubr.msk.f32.vlgmr.msra.gmra.mxu0 %vm743_vm1, %v11013_v41 }
 0x926   :  { %11040 = vmatpush3.msra.mxu0 %v2410_v37 }
 0x927   :  { %11041 = vmatprep.subr.mxu0 %v2409_v33 }
 0x928   :  { %11042 = vmatpush3.msra.mxu0 %v2409_v33 }
 0x929   :  { %11043 = vmatprep.subr.mxu0 %v2408_v39 }
 0x92a   :  { %11044 = vmatpush3.msra.mxu0 %v2408_v39 }
 0x92b   :  { %11045 = vmatprep.subr.mxu0 %v2407_v34 }
 0x92c   :  { %v11016_v43 = vpop.f32.mrf.mxu0  ;;  %11046 = vmatpush3.msra.mxu0 %v2407_v34 }
 0x92e   :  { %v2102_v44 = vpop.f32.mrf.mxu0 }
 0x92f   :  { %11022 = vmatprep.mubr.msk.f32.mxu0 %vm743_vm1, %v2102_v44 }
 0x930   :  { %11023 = vmatmul.mubr.msk.f32.gmra.mxu0 %vm743_vm1, %v11016_v43 }
 0x9e5   :  { %v11021_v47 = vpop.f32.mrf.mxu0 }
 0x9e6   :  { %v2209_v49 = vadd.f32 %v11021_v47, %v1838_v36 }
 0x9e7   :  { %v2189_v50 = vpop.f32.mrf.mxu0 }
 0x9e8   :  { %v2208_v51 = vadd.f32 %v2189_v50, %v1837_v48  ;;  %v2213_v53 = vadd.f32 %v12082_v52, %v2209_v49  ;;  %v10157_v48 = vld [vmem:[#allocation10] ss:$0 sm:$0xff] }
 0x9ea   :  { %v2221_v54 = vsel %vm621_vm0, %v2213_v53, 0.0  ;;  %v2212_v56 = vadd.f32 %v12083_v55, %v2208_v51 }
 0x9eb   :  { %2222 = vadd.xlane.f32.xlu1 %v2221_v54 }
 0x9ec   :  { %v2218_v57 = vsel %vm621_vm0, %v2212_v56, 0.0 }
 0x9ed   :  { %2219 = vadd.xlane.f32.xlu0 %v2218_v57 }
 0x9f0   :  { %v11024_v59 = vpop.f32.mrf.mxu0 }
 0x9f1   :  { %v2211_v63 = vadd.f32 %v11024_v59, %v1840_v14 }
 0x9f2   :  { %v2199_v62 = vpop.f32.mrf.mxu0 }
 0x9f3   :  { %v2210_v0 = vadd.f32 %v2199_v62, %v1839_v61  ;;  %v2215_v5 = vadd.f32 %v12085_v4, %v2211_v63  ;;  %v2403_v4 = vld [vmem:[%s14782_s6] sm:$0xff] }
 0x9f5   :  { %v2214_v2 = vadd.f32 %v12084_v1, %v2210_v0  ;;  %v2227_v7 = vsel %vm621_vm0, %v2215_v5, 0.0  ;;  %v2406_v1 = vld [vmem:[%s14782_s6 + $0x18] sm:$0xff] }
 0x9f6   :  { %11047 = vmatprep.subr.mxu0 %v2406_v1 }
 0x9f7   :  { %v2224_v3 = vsel %vm621_vm0, %v2214_v2, 0.0  ;;  %11048 = vmatpush3.msra.mxu0 %v2406_v1 }
 0x9f8   :  { %2225 = vadd.xlane.f32.xlu0 %v2224_v3  ;;  %v2404_v3 = vld [vmem:[%s14782_s6 + $0x8] sm:$0xff] }
 0x9fc   :  { %2228 = vadd.xlane.f32.xlu0 %v2227_v7 }
 0xa74   :  { %v2223_v9 = vpop.xlane.xlu1 %2222 }
 0xa75   :  { %v2232_v13 = vmul.f32 0.03125, %v2223_v9 }
 0xa76   :  { %v2220_v60 = vpop.xlane.xlu0 %2219 }
 0xa77   :  { %v2236_v10 = vsub.f32 %v2213_v53, %v2232_v13  ;;  %v2231_v15 = vmul.f32 0.03125, %v2220_v60  ;;  %v10158_v53 = vld [vmem:[#allocation11] ss:$0 sm:$0xff] }
 0xa79   :  { %v2235_v6 = vsub.f32 %v2212_v56, %v2231_v15  ;;  %v2240_v17 = vmul.f32 %v2236_v10, %v2236_v10 }
 0xa7b   :  { %v2246_v18 = vsel %vm621_vm0, %v2240_v17, 0.0  ;;  %v2239_v11 = vmul.f32 %v2235_v6, %v2235_v6 }
 0xa7c   :  { %2247 = vadd.xlane.f32.xlu0 %v2246_v18 }
 0xa7d   :  { %v2243_v19 = vsel %vm621_vm0, %v2239_v11, 0.0 }
 0xa7e   :  { %2244 = vadd.xlane.f32.xlu1 %v2243_v19 }
 0xa81   :  { %v2226_v20 = vpop.xlane.xlu0 %2225 }
 0xa82   :  { %v2233_v21 = vmul.f32 0.03125, %v2226_v20 }
 0xa84   :  { %v13556_v22 = vsub.f32 %v2214_v2, %v2233_v21  ;;  %v2405_v2 = vld [vmem:[%s14782_s6 + $0x10] sm:$0xff] }
 0xa85   :  { %v2229_v23 = vpop.xlane.xlu0 %2228  ;;  %11049 = vmatprep.subr.mxu0 %v2405_v2 }
 0xa86   :  { %v2234_v24 = vmul.f32 0.03125, %v2229_v23  ;;  %v2241_v16 = vmul.f32 %v13556_v22, %v13556_v22  ;;  %11050 = vmatpush3.msra.mxu0 %v2405_v2 }
 0xa87   :  { %11051 = vmatprep.subr.mxu0 %v2404_v3 }
 0xa88   :  { %v13560_v12 = vsub.f32 %v2215_v5, %v2234_v24  ;;  %v2249_v25 = vsel %vm621_vm0, %v2241_v16, 0.0  ;;  %11052 = vmatpush3.msra.mxu0 %v2404_v3  ;;  %v10159_v5 = vld [vmem:[#allocation13] ss:$0 sm:$0xff] }
 0xa89   :  { %2250 = vadd.xlane.f32.xlu1 %v2249_v25  ;;  %11053 = vmatprep.subr.mxu0 %v2403_v4 }
 0xa8a   :  { %v2242_v26 = vmul.f32 %v13560_v12, %v13560_v12  ;;  %11054 = vmatpush3.msra.mxu0 %v2403_v4 }
 0xa8c   :  { %v2252_v27 = vsel %vm621_vm0, %v2242_v26, 0.0 }
 0xa8d   :  { %2253 = vadd.xlane.f32.xlu0 %v2252_v27 }
 0xb05   :  { %v2248_v35 = vpop.xlane.xlu0 %2247 }
 0xb06   :  { %v2256_v36 = vmul.f32 0.03125, %v2248_v35 }
 0xb07   :  { %v2245_v38 = vpop.xlane.xlu1 %2244 }
 0xb08   :  { %v2260_v29 = vadd.f32 1e-05, %v2256_v36  ;;  %v2255_v14 = vmul.f32 0.03125, %v2245_v38 }
 0xb0a   :  { %11910 = vrsqrt.f32 %v2260_v29  ;;  %v2259_v40 = vadd.f32 1e-05, %v2255_v14 }
 0xb0c   :  { %11912 = vrsqrt.f32 %v2259_v40 }
 0xb12   :  { %v2251_v41 = vpop.xlane.xlu1 %2250 }
 0xb13   :  { %v2257_v42 = vmul.f32 0.03125, %v2251_v41 }
 0xb15   :  { %v2261_v43 = vadd.f32 1e-05, %v2257_v42 }
 0xb16   :  { %v2254_v44 = vpop.xlane.xlu0 %2253 }
 0xb17   :  { %v11911_v45 = vpop.eup %11910  ;;  %11914 = vrsqrt.f32 %v2261_v43  ;;  %v2258_v46 = vmul.f32 0.03125, %v2254_v44 }
 0xb18   :  { %v2268_v47 = vmul.f32 %v11911_v45, %v2236_v10 }
 0xb19   :  { %v11913_v49 = vpop.eup %11912  ;;  %v2262_v50 = vadd.f32 1e-05, %v2258_v46 }
 0xb1a   :  { %v2267_v51 = vmul.f32 %v11913_v49, %v2235_v6  ;;  %v2278_v52 = vmul.f32 %v10157_v48, %v2268_v47 }
 0xb1b   :  { %11916 = vrsqrt.f32 %v2262_v50 }
 0xb1c   :  { %v2277_v54 = vmul.f32 %v10157_v48, %v2267_v51  ;;  %v2288_v56 = vadd.f32 %v10158_v53, %v2278_v52 }
 0xb1e   :  { %v2287_v55 = vadd.f32 %v10158_v53, %v2277_v54 }
 0xb20   :  { %11033 = vmatprep.mubr.msk.f32.mxu1 %vm621_vm0, %v2287_v55 }
 0xb21   :  { %11034 = vmatmul.mubr.msk.f32.vlgmr.msra.gmra.mxu1 %vm621_vm0, %v2288_v56 }
 0xb24   :  { %v11915_v57 = vpop.eup %11914 }
 0xb25   :  { %v2269_v8 = vmul.f32 %v11915_v57, %v13556_v22  ;;  %v10168_v22 = vld [vmem:[#allocation14] ss:$0 sm:$0xff]  ;;  %v10172_v57 = vld [vmem:[%s14778_s9 + $0x28] sm:$0xff] }
 0xb27   :  { %v2279_v58 = vmul.f32 %v10157_v48, %v2269_v8  ;;  %v10171_v8 = vld [vmem:[%s14778_s9 + $0x20] sm:$0xff] }
 0xb28   :  { %v11917_v59 = vpop.eup %11916 }
 0xb29   :  { %v2289_v61 = vadd.f32 %v10158_v53, %v2279_v58  ;;  %v2270_v62 = vmul.f32 %v11917_v59, %v13560_v12 }
 0xb2b   :  { %11036 = vmatprep.mubr.msk.f32.mxu1 %vm621_vm0, %v2289_v61  ;;  %v2280_v63 = vmul.f32 %v10157_v48, %v2270_v62 }
 0xb2d   :  { %v2290_v0 = vadd.f32 %v10158_v53, %v2280_v63 }
 0xb2f   :  { %11037 = vmatmul.mubr.msk.f32.gmra.mxu1 %vm621_vm0, %v2290_v0 }
 0xbe1   :  { %v11035_v7 = vpop.f32.mrf.mxu1 }
 0xbe2   :  { %v2386_v9 = vadd.f32 %v11035_v7, %v10159_v5 }
 0xbe3   :  { %v2380_v13 = vpop.f32.mrf.mxu1 }
 0xbe4   :  { %v2381_v60 = vadd.f32 %v10159_v5, %v2380_v13  ;;  %v2400_v15 = vmax.f32 %v2386_v9, 0.0 }
 0xbe6   :  { %v2399_v10 = vmax.f32 %v2381_v60, 0.0  ;;  %v10169_v60 = vld [vmem:[#allocation16] ss:$0 sm:$0xff] }
 0xbe8   :  { %11055 = vmatprep.mubr.msk.f32.mxu0 %vm2411_vm2, %v2399_v10 }
 0xbe9   :  { %11056 = vmatmul.mubr.msk.f32.vlgmr.msra.gmra.mxu0 %vm2411_vm2, %v2400_v15 }
 0xbef   :  { %v11038_v6 = vpop.f32.mrf.mxu1 }
 0xbf0   :  { %v2396_v17 = vadd.f32 %v11038_v6, %v10159_v5 }
 0xbf1   :  { %v2390_v18 = vpop.f32.mrf.mxu1 }
 0xbf2   :  { %v2391_v11 = vadd.f32 %v10159_v5, %v2390_v18  ;;  %v2402_v20 = vmax.f32 %v2396_v17, 0.0  ;;  %v10170_v17 = vld [vmem:[#allocation17] ss:$0 sm:$0xff] }
 0xbf4   :  { %v2401_v19 = vmax.f32 %v2391_v11, 0.0 }
 0xbf6   :  { %11058 = vmatprep.mubr.msk.f32.mxu0 %vm2411_vm2, %v2401_v19 }
 0xbf7   :  { %11059 = vmatmul.mubr.msk.f32.gmra.mxu0 %vm2411_vm2, %v2402_v20 }
 0xca9   :  { %v11057_v21 = vpop.f32.mrf.mxu0 }
 0xcaa   :  { %v2510_v23 = vadd.f32 %v11057_v21, %v2288_v56  ;;  %v10173_v56 = vld [vmem:[%s14778_s9 + $0x30] sm:$0xff] }
 0xcab   :  { %v2490_v24 = vpop.f32.mrf.mxu0 }
 0xcac   :  { %v2509_v16 = vadd.f32 %v2490_v24, %v2287_v55  ;;  %v2521_v12 = vadd.f32 %v10168_v22, %v2510_v23  ;;  %v10174_v55 = vld [vmem:[%s14778_s9 + $0x38] sm:$0xff] }
 0xcad   :  { %11061 = vmatprep.subr.mxu1 %v10174_v55 }
 0xcae   :  { %v2529_v25 = vsel %vm621_vm0, %v2521_v12, 0.0  ;;  %v2520_v26 = vadd.f32 %v10168_v22, %v2509_v16  ;;  %11062 = vmatpush3.msra.mxu1 %v10174_v55 }
 0xcaf   :  { %2530 = vadd.xlane.f32.xlu0 %v2529_v25  ;;  %11063 = vmatprep.subr.mxu1 %v10173_v56 }
 0xcb0   :  { %v2526_v27 = vsel %vm621_vm0, %v2520_v26, 0.0  ;;  %11064 = vmatpush3.msra.mxu1 %v10173_v56  ;;  %v13690_v56 = vld [vmem:[%s14783_s25 + $0x18] sm:$0xff] }
 0xcb1   :  { %2527 = vadd.xlane.f32.xlu1 %v2526_v27  ;;  %11065 = vmatprep.subr.mxu1 %v10172_v57  ;;  %v10175_v27 = vld [vmem:[#allocation7 + $0x1] ss:$0 sm:$0xff] }
 0xcb2   :  { %11066 = vmatpush3.msra.mxu1 %v10172_v57 }
 0xcb3   :  { %11067 = vmatprep.subr.mxu1 %v10171_v8 }
 0xcb4   :  { %11068 = vmatpush3.msra.mxu1 %v10171_v8 }
 0xcb7   :  { %v11060_v28 = vpop.f32.mrf.mxu0 }
 0xcb8   :  { %v2512_v30 = vadd.f32 %v11060_v28, %v2290_v0 }
 0xcb9   :  { %v2500_v32 = vpop.f32.mrf.mxu0 }
 0xcba   :  { %v2511_v31 = vadd.f32 %v2500_v32, %v2289_v61  ;;  %v2523_v37 = vadd.f32 %v10168_v22, %v2512_v30 }
 0xcbc   :  { %v2535_v33 = vsel %vm621_vm0, %v2523_v37, 0.0  ;;  %v2522_v39 = vadd.f32 %v10168_v22, %v2511_v31 }
 0xcbd   :  { %2536 = vadd.xlane.f32.xlu0 %v2535_v33 }
 0xcbe   :  { %v2532_v34 = vsel %vm621_vm0, %v2522_v39, 0.0 }
 0xcbf   :  { %2533 = vadd.xlane.f32.xlu1 %v2532_v34 }
 0xd38   :  { %v2531_v35 = vpop.xlane.xlu0 %2530 }
 0xd39   :  { %v2539_v36 = vmul.f32 0.03125, %v2531_v35 }
 0xd3a   :  { %v2528_v38 = vpop.xlane.xlu1 %2527 }
 0xd3b   :  { %v2543_v29 = vsub.f32 %v2521_v12, %v2539_v36  ;;  %v2538_v14 = vmul.f32 0.03125, %v2528_v38 }
 0xd3d   :  { %v2542_v40 = vsub.f32 %v2520_v26, %v2538_v14  ;;  %v2547_v41 = vmul.f32 %v2543_v29, %v2543_v29 }
 0xd3f   :  { %v2553_v42 = vsel %vm621_vm0, %v2547_v41, 0.0  ;;  %v2546_v43 = vmul.f32 %v2542_v40, %v2542_v40 }
 0xd40   :  { %2554 = vadd.xlane.f32.xlu0 %v2553_v42 }
 0xd41   :  { %v2550_v44 = vsel %vm621_vm0, %v2546_v43, 0.0 }
 0xd42   :  { %2551 = vadd.xlane.f32.xlu1 %v2550_v44 }
 0xd46   :  { %v2537_v45 = vpop.xlane.xlu0 %2536 }
 0xd47   :  { %v2541_v46 = vmul.f32 0.03125, %v2537_v45 }
 0xd48   :  { %v2534_v47 = vpop.xlane.xlu1 %2533 }
 0xd49   :  { %v2545_v48 = vsub.f32 %v2523_v37, %v2541_v46  ;;  %v2540_v49 = vmul.f32 0.03125, %v2534_v47  ;;  %v13677_v46 = vld [vmem:[%s14783_s25 + $0x8] sm:$0xff] }
 0xd4b   :  { %v2544_v50 = vsub.f32 %v2522_v39, %v2540_v49  ;;  %v2549_v51 = vmul.f32 %v2545_v48, %v2545_v48 }
 0xd4d   :  { %v2559_v52 = vsel %vm621_vm0, %v2549_v51, 0.0  ;;  %v2548_v53 = vmul.f32 %v2544_v50, %v2544_v50 }
 0xd4e   :  { %2560 = vadd.xlane.f32.xlu0 %v2559_v52 }
 0xd4f   :  { %v2556_v54 = vsel %vm621_vm0, %v2548_v53, 0.0 }
 0xd50   :  { %2557 = vadd.xlane.f32.xlu1 %v2556_v54  ;;  %v13686_v54 = vld [vmem:[%s14783_s25 + $0x10] sm:$0xff] }
 0xdc9   :  { %v2555_v58 = vpop.xlane.xlu0 %2554 }
 0xdca   :  { %v2563_v59 = vmul.f32 0.03125, %v2555_v58 }
 0xdcb   :  { %v2552_v61 = vpop.xlane.xlu1 %2551 }
 0xdcc   :  { %v2567_v62 = vadd.f32 1e-05, %v2563_v59  ;;  %v2562_v63 = vmul.f32 0.03125, %v2552_v61 }
 0xdce   :  { %11918 = vrsqrt.f32 %v2567_v62  ;;  %v2566_v0 = vadd.f32 1e-05, %v2562_v63 }
 0xdd0   :  { %11920 = vrsqrt.f32 %v2566_v0 }
 0xdd7   :  { %v2561_v1 = vpop.xlane.xlu0 %2560 }
 0xdd8   :  { %v2565_v2 = vmul.f32 0.03125, %v2561_v1 }
 0xdd9   :  { %v2558_v3 = vpop.xlane.xlu1 %2557 }
 0xdda   :  { %v2569_v4 = vadd.f32 1e-05, %v2565_v2  ;;  %v2564_v5 = vmul.f32 0.03125, %v2558_v3 }
 0xddb   :  { %v11919_v7 = vpop.eup %11918 }
 0xddc   :  { %v2575_v9 = vmul.f32 %v11919_v7, %v2543_v29  ;;  %11922 = vrsqrt.f32 %v2569_v4  ;;  %v2568_v13 = vadd.f32 1e-05, %v2564_v5 }
 0xddd   :  { %v11921_v10 = vpop.eup %11920 }
 0xdde   :  { %11924 = vrsqrt.f32 %v2568_v13  ;;  %v2574_v15 = vmul.f32 %v11921_v10, %v2542_v40  ;;  %v2585_v6 = vmul.f32 %v10169_v60, %v2575_v9 }
 0xde0   :  { %v2584_v18 = vmul.f32 %v10169_v60, %v2574_v15  ;;  %v13602_v19 = vadd.f32 %v10170_v17, %v2585_v6 }
 0xde2   :  { %v13600_v11 = vadd.f32 %v10170_v17, %v2584_v18 }
 0xde4   :  { %11069 = vmatprep.mubr.msk.f32.mxu1 %vm621_vm0, %v13600_v11 }
 0xde5   :  { %11070 = vmatmul.mubr.msk.f32.vlgmr.msra.gmra.mxu1 %vm621_vm0, %v13602_v19 }
 0xde9   :  { %v11923_v20 = vpop.eup %11922 }
 0xdea   :  { %v2577_v21 = vmul.f32 %v11923_v20, %v2545_v48  ;;  %v13680_v48 = vld [vmem:[%s14783_s25] sm:$0xff] }
 0xdeb   :  { %v11925_v22 = vpop.eup %11924 }
 0xdec   :  { %v2576_v23 = vmul.f32 %v11925_v22, %v2544_v50  ;;  %v2587_v24 = vmul.f32 %v10169_v60, %v2577_v21 }
 0xdee   :  { %v2586_v16 = vmul.f32 %v10169_v60, %v2576_v23  ;;  %v13610_v25 = vadd.f32 %v10170_v17, %v2587_v24 }
 0xdf0   :  { %v13608_v12 = vadd.f32 %v10170_v17, %v2586_v16 }
 0xdf2   :  { %11072 = vmatprep.mubr.msk.f32.mxu1 %vm621_vm0, %v13608_v12 }
 0xdf3   :  { %11073 = vmatmul.mubr.msk.f32.gmra.mxu1 %vm621_vm0, %v13610_v25 }
 0xea5   :  { %v11071_v26 = vpop.f32.mrf.mxu1 }
 0xea6   :  { %v13626_v39 = vadd.f32 %v11071_v26, %v10175_v27 }
 0xea7   :  { %v2689_v28 = vpop.f32.mrf.mxu1 }
 0xea8   :  { %v13616_v30 = vadd.f32 %v10175_v27, %v2689_v28 }
 0xeaa   :  { %11083 = vmatprep.mubr.msk.f32.mxu1 %vm743_vm1, %v13616_v30 }
 0xeb3   :  { %v11074_v32 = vpop.f32.mrf.mxu1 }
 0xeb4   :  { %v13620_v31 = vadd.f32 %v11074_v32, %v10175_v27 }
 0xeb5   :  { %v2699_v37 = vpop.f32.mrf.mxu1 }
 0xeb6   :  { %v13622_v33 = vadd.f32 %v10175_v27, %v2699_v37  ;;  %2732 = vrot.lane.b32.xlu1 %v13620_v31, %s12840_s18 }
 0xeb8   :  { %2730 = vrot.lane.b32.xlu0 %v13622_v33, %s12840_s18 }
 0xeba   :  { %2728 = vrot.lane.b32.xlu1 %v13626_v39, %s12840_s18 }
 0xebc   :  { %3103 = vrot.lane.b32.xlu0 %v13620_v31, %s12841_s2 }
 0xebe   :  { %2726 = vrot.lane.b32.xlu1 %v13616_v30, %s12840_s18 }
 0xec0   :  { %3099 = vrot.lane.b32.xlu0 %v13626_v39, %s12841_s2 }
 0xec2   :  { %3101 = vrot.lane.b32.xlu1 %v13622_v33, %s12841_s2 }
 0xec4   :  { %3089 = vrot.lane.b32.xlu0 %v13616_v30, %s12842_s8 }
 0xec6   :  { %3097 = vrot.lane.b32.xlu1 %v13616_v30, %s12841_s2 }
 0xec8   :  { %3093 = vrot.lane.b32.xlu0 %v13622_v33, %s12842_s8 }
 0xeca   :  { %3091 = vrot.lane.b32.xlu1 %v13626_v39, %s12842_s8 }
 0xece   :  { %3095 = vrot.lane.b32.xlu1 %v13620_v31, %s12842_s8 }
 0xf28   :  { %v2733_v34 = vpop.permute.xlu1 %2732 }
 0xf29   :  { %11075 = vmatprep.subr.msk.mxu1 %vm743_vm1, %v2733_v34 }
 0xf2a   :  { %11076 = vmatpush3.xpose.msk.msra.mxu1 %vm743_vm1, %v2733_v34  ;;  %v2731_v35 = vpop.permute.xlu0 %2730 }
 0xf2b   :  { %11077 = vmatprep.subr.msk.mxu1 %vm743_vm1, %v2731_v35 }
 0xf2c   :  { %v2729_v36 = vpop.permute.xlu1 %2728 }
 0xf2e   :  { %11078 = vmatpush3.xpose.msk.msra.mxu1 %vm743_vm1, %v2731_v35  ;;  %v3104_v38 = vpop.permute.xlu0 %3103 }
 0xf2f   :  { %11079 = vmatprep.subr.msk.mxu1 %vm743_vm1, %v2729_v36 }
 0xf30   :  { %v2727_v29 = vpop.permute.xlu1 %2726 }
 0xf32   :  { %11080 = vmatpush3.xpose.msk.msra.mxu1 %vm743_vm1, %v2729_v36  ;;  %v3100_v14 = vpop.permute.xlu0 %3099 }
 0xf33   :  { %11081 = vmatprep.subr.msk.mxu1 %vm743_vm1, %v2727_v29 }
 0xf34   :  { %v3102_v40 = vpop.permute.xlu1 %3101 }
 0xf36   :  { %11082 = vmatpush3.xpose.msk.msra.mxu1 %vm743_vm1, %v2727_v29  ;;  %v3090_v41 = vpop.permute.xlu0 %3089 }
 0xf37   :  { %11111 = vmatprep.subr.msk.mxu1 %vm743_vm1, %v3104_v38 }
 0xf38   :  { %v3098_v42 = vpop.permute.xlu1 %3097 }
 0xf39   :  { %11084 = vmatmul.mubr.msk.f32.vlgmr.msra.gmra.mxu1 %vm743_vm1, %v13626_v39 }
 0xf3a   :  { %11086 = vmatprep.mubr.msk.f32.mxu1 %vm743_vm1, %v13622_v33  ;;  %11112 = vmatpush3.xpose.msk.msra.mxu1 %vm743_vm1, %v3104_v38  ;;  %v3094_v44 = vpop.permute.xlu0 %3093 }
 0xf3b   :  { %11113 = vmatprep.subr.msk.mxu1 %vm743_vm1, %v3102_v40 }
 0xf3c   :  { %v3092_v43 = vpop.permute.xlu1 %3091 }
 0xf3d   :  { %11087 = vmatmul.mubr.msk.f32.gmra.mxu1 %vm743_vm1, %v13620_v31 }
 0xf3e   :  { %11114 = vmatpush3.xpose.msk.msra.mxu1 %vm743_vm1, %v3102_v40  ;;  %11119 = vmatprep.mubr.msk.f32.mxu1 %vm743_vm1, %v3090_v41 }
 0xf3f   :  { %11115 = vmatprep.subr.msk.mxu1 %vm743_vm1, %v3100_v14 }
 0xf40   :  { %v3096_v45 = vpop.permute.xlu1 %3095 }
 0xf42   :  { %11116 = vmatpush3.xpose.msk.msra.mxu1 %vm743_vm1, %v3100_v14 }
 0xf43   :  { %11117 = vmatprep.subr.msk.mxu1 %vm743_vm1, %v3098_v42 }
 0xf46   :  { %11118 = vmatpush3.xpose.msk.msra.mxu1 %vm743_vm1, %v3098_v42 }
 0xf49   :  { %11120 = vmatmul.mubr.msk.f32.vlgmr.msra.gmra.mxu1 %vm743_vm1, %v3092_v43 }
 0xf4a   :  { %11122 = vmatprep.mubr.msk.f32.mxu1 %vm743_vm1, %v3094_v44 }
 0xf4d   :  { %11123 = vmatmul.mubr.msk.f32.gmra.mxu1 %vm743_vm1, %v3096_v45 }
 0xff9   :  { %v11085_v47 = vpop.f32.mrf.mxu1 }
 0xffa   :  { %v2822_v49 = vadd.f32 %v11085_v47, %v13677_v46 }
 0xffb   :  { %v2816_v50 = vpop.f32.mrf.mxu1 }
 0xffc   :  { %v2817_v51 = vadd.f32 %v2816_v50, %v13680_v48  ;;  %v2838_v52 = vsel %vm621_vm0, %v2822_v49, -inf }
 0xffd   :  { %2839 = vmax.xlane.f32.xlu1 %v2838_v52  ;;  %v11088_v53 = vpop.f32.mrf.mxu1 }
 0xffe   :  { %v2835_v55 = vsel %vm621_vm0, %v2817_v51, -inf  ;;  %v2832_v58 = vadd.f32 %v11088_v53, %v13690_v56 }
 0xfff   :  { %v2826_v57 = vpop.f32.mrf.mxu1  ;;  %2836 = vmax.xlane.f32.xlu0 %v2835_v55  ;;  %v10180_v55 = vld [vmem:[%s14780_s13 + $0x20] sm:$0xff] }
0x1000   :  { %v2827_v8 = vadd.f32 %v2826_v57, %v13686_v54  ;;  %v2844_v61 = vsel %vm621_vm0, %v2832_v58, -inf }
0x1002   :  { %v2841_v59 = vsel %vm621_vm0, %v2827_v8, -inf }
0x1003   :  { %2842 = vmax.xlane.f32.xlu0 %v2841_v59 }
0x1007   :  { %2845 = vmax.xlane.f32.xlu0 %v2844_v61 }
0x1009   :  { %v11121_v24 = vpop.f32.mrf.mxu1 }
0x100a   :  { %v13749_v38 = vadd.f32 %v11121_v24, %v13677_v46 }
0x100b   :  { %v3187_v16 = vpop.f32.mrf.mxu1 }
0x100c   :  { %v13726_v27 = vadd.f32 %v3187_v16, %v13680_v48  ;;  %v3209_v29 = vsel %vm621_vm0, %v13749_v38, -inf }
0x100d   :  { %v11124_v26 = vpop.f32.mrf.mxu1 }
0x100e   :  { %2885 = vrot.lane.b32.xlu1 %v13620_v31, %s12843_s14  ;;  %v3206_v37 = vsel %vm621_vm0, %v13726_v27, -inf  ;;  %v13738_v34 = vadd.f32 %v11124_v26, %v13690_v56 }
0x100f   :  { %v3197_v28 = vpop.f32.mrf.mxu1 }
0x1010   :  { %v13731_v32 = vadd.f32 %v3197_v28, %v13686_v54  ;;  %v3215_v36 = vsel %vm621_vm0, %v13738_v34, -inf }
0x1012   :  { %v3212_v35 = vsel %vm621_vm0, %v13731_v32, -inf }
0x1086   :  { %v2840_v62 = vpop.xlane.xlu1 %2839 }
0x1087   :  { %v2848_v63 = vsub.f32 %v2822_v49, %v2840_v62 }
0x1088   :  { %v2837_v0 = vpop.xlane.xlu0 %2836 }
0x1089   :  { %v2853_v1 = vmul.f32 1.442695, %v2848_v63  ;;  %v2847_v2 = vsub.f32 %v2817_v51, %v2837_v0 }
0x108a   :  { %v2886_v3 = vpop.permute.xlu1 %2885 }
0x108b   :  { %11926 = vpow2.f32 %v2853_v1  ;;  %v2851_v4 = vmul.f32 1.442695, %v2847_v2  ;;  %11089 = vmatprep.subr.mxu0 %v2886_v3 }
0x108c   :  { %11090 = vmatpush3.msra.mxu0 %v2886_v3  ;;  %v2843_v5 = vpop.xlane.xlu0 %2842 }
0x108d   :  { %11928 = vpow2.f32 %v2851_v4  ;;  %v2849_v20 = vsub.f32 %v2827_v8, %v2843_v5 }
0x108f   :  { %v2855_v21 = vmul.f32 1.442695, %v2849_v20 }
0x1090   :  { %v2846_v7 = vpop.xlane.xlu0 %2845 }
0x1091   :  { %v2850_v9 = vsub.f32 %v2832_v58, %v2846_v7 }
0x1093   :  { %v2857_v13 = vmul.f32 1.442695, %v2850_v9 }
0x1095   :  { %11930 = vpow2.f32 %v2857_v13 }
0x1096   :  { %11932 = vpow2.f32 %v2855_v21 }
0x1098   :  { %v13698_v60 = vpop.eup %11926 }
0x1099   :  { %v2862_v10 = vsel %vm621_vm0, %v13698_v60, 0.0 }
0x109a   :  { %v11929_v15 = vpop.eup %11928  ;;  %2863 = vadd.xlane.f32.xlu0 %v2862_v10 }
0x109b   :  { %v2859_v6 = vsel %vm621_vm0, %v11929_v15, 0.0 }
0x109c   :  { %2860 = vadd.xlane.f32.xlu1 %v2859_v6 }
0x10a2   :  { %v13703_v17 = vpop.eup %11930 }
0x10a3   :  { %v2868_v18 = vsel %vm621_vm0, %v13703_v17, 0.0  ;;  %v13719_v22 = vpop.eup %11932 }
0x10a4   :  { %2869 = vadd.xlane.f32.xlu0 %v2868_v18  ;;  %v2865_v23 = vsel %vm621_vm0, %v13719_v22, 0.0 }
0x10ad   :  { %2881 = vrot.lane.b32.xlu1 %v13626_v39, %s12843_s14 }
0x10ba   :  { %2883 = vrot.lane.b32.xlu0 %v13622_v33, %s12843_s14 }
0x10be   :  { %3474 = vrot.lane.b32.xlu0 %v13620_v31, %s12844_s7 }
0x10c2   :  { %3470 = vrot.lane.b32.xlu0 %v13626_v39, %s12844_s7 }
0x10c6   :  { %3460 = vrot.lane.b32.xlu0 %v13616_v30, %s12845_s10 }
0x10ca   :  { %3464 = vrot.lane.b32.xlu0 %v13622_v33, %s12845_s10 }
0x10d1   :  { %2866 = vadd.xlane.f32.xlu1 %v2865_v23 }
0x10e2   :  { %2879 = vrot.lane.b32.xlu1 %v13616_v30, %s12843_s14 }
0x10e6   :  { %3472 = vrot.lane.b32.xlu1 %v13622_v33, %s12844_s7 }
0x10e9   :  { %3207 = vmax.xlane.f32.xlu0 %v3206_v37 }
0x10ea   :  { %3468 = vrot.lane.b32.xlu1 %v13616_v30, %s12844_s7 }
0x10ed   :  { %3213 = vmax.xlane.f32.xlu0 %v3212_v35 }
0x10ee   :  { %3462 = vrot.lane.b32.xlu1 %v13626_v39, %s12845_s10 }
0x10f1   :  { %3216 = vmax.xlane.f32.xlu0 %v3215_v36 }
0x10f2   :  { %3466 = vrot.lane.b32.xlu1 %v13620_v31, %s12845_s10 }
0x1116   :  { %3210 = vmax.xlane.f32.xlu1 %v3209_v29 }
0x1123   :  { %v2864_v40 = vpop.xlane.xlu0 %2863 }
0x1125   :  { %v2861_v14 = vpop.xlane.xlu1 %2860 }
0x1126   :  { %11934 = vrcp.f32 %v2861_v14 }
0x1127   :  { %3256 = vrot.lane.b32.xlu1 %v13620_v31, %s12846_s5  ;;  %11936 = vrcp.f32 %v2864_v40 }
0x1129   :  { %v2882_v44 = vpop.permute.xlu1 %2881 }
0x112d   :  { %v2870_v41 = vpop.xlane.xlu0 %2869 }
0x112e   :  { %11938 = vrcp.f32 %v2870_v41 }
0x1131   :  { %v2884_v42 = vpop.permute.xlu0 %2883 }
0x1132   :  { %11091 = vmatprep.subr.mxu0 %v2884_v42 }
0x1133   :  { %v11935_v43 = vpop.eup %11934  ;;  %11092 = vmatpush3.msra.mxu0 %v2884_v42 }
0x1134   :  { %11093 = vmatprep.subr.mxu0 %v2882_v44  ;;  %v2875_v45 = vmul.f32 %v11935_v43, %v11929_v15  ;;  %v11937_v52 = vpop.eup %11936 }
0x1135   :  { %11094 = vmatpush3.msra.mxu0 %v2882_v44  ;;  %v3475_v47 = vpop.permute.xlu0 %3474  ;;  %v2876_v57 = vmul.f32 %v11937_v52, %v13698_v60 }
0x1136   :  { %11097 = vmatprep.mubr.msk.f32.mxu0 %vm621_vm0, %v2875_v45  ;;  %11147 = vmatprep.subr.msk.mxu1 %vm743_vm1, %v3475_v47 }
0x1137   :  { %11148 = vmatpush3.xpose.msk.msra.mxu1 %vm743_vm1, %v3475_v47 }
0x1139   :  { %v3471_v49 = vpop.permute.xlu0 %3470 }
0x113b   :  { %v11939_v59 = vpop.eup %11938 }
0x113c   :  { %v2878_v63 = vmul.f32 %v11939_v59, %v13703_v17 }
0x113d   :  { %v3461_v50 = vpop.permute.xlu0 %3460 }
0x113e   :  { %11155 = vmatprep.mubr.msk.f32.mxu1 %vm743_vm1, %v3461_v50 }
0x1141   :  { %v3465_v1 = vpop.permute.xlu0 %3464 }
0x115a   :  { %v2867_v51 = vpop.xlane.xlu1 %2866 }
0x115b   :  { %11940 = vrcp.f32 %v2867_v51 }
0x115e   :  { %v2880_v53 = vpop.permute.xlu1 %2879 }
0x115f   :  { %11095 = vmatprep.subr.mxu0 %v2880_v53 }
0x1160   :  { %11096 = vmatpush3.msra.mxu0 %v2880_v53 }
0x1161   :  { %11098 = vmatmul.mubr.msk.f32.vlgmr.msra.gmra.mxu0 %vm621_vm0, %v2876_v57  ;;  %11103 = vmatprep.subr.mxu0 %v10180_v55 }
0x1162   :  { %v3473_v8 = vpop.permute.xlu1 %3472  ;;  %11104 = vmatpush3.msra.mxu0 %v10180_v55 }
0x1163   :  { %11149 = vmatprep.subr.msk.mxu1 %vm743_vm1, %v3473_v8 }
0x1164   :  { %11150 = vmatpush3.xpose.msk.msra.mxu1 %vm743_vm1, %v3473_v8 }
0x1165   :  { %11151 = vmatprep.subr.msk.mxu1 %vm743_vm1, %v3471_v49 }
0x1166   :  { %v3469_v58 = vpop.permute.xlu1 %3468 }
0x1168   :  { %v11941_v61 = vpop.eup %11940  ;;  %11152 = vmatpush3.xpose.msk.msra.mxu1 %vm743_vm1, %v3471_v49 }
0x1169   :  { %11153 = vmatprep.subr.msk.mxu1 %vm743_vm1, %v3469_v58  ;;  %v2877_v62 = vmul.f32 %v11941_v61, %v13719_v22 }
0x116a   :  { %v3463_v0 = vpop.permute.xlu1 %3462 }
0x116b   :  { %11100 = vmatprep.mubr.msk.f32.mxu0 %vm621_vm0, %v2877_v62  ;;  %v10181_v62 = vld [vmem:[%s14780_s13 + $0x28] sm:$0xff] }
0x116c   :  { %11101 = vmatmul.mubr.msk.f32.gmra.mxu0 %vm621_vm0, %v2878_v63  ;;  %11154 = vmatpush3.xpose.msk.msra.mxu1 %vm743_vm1, %v3469_v58 }
0x116e   :  { %v3467_v2 = vpop.permute.xlu1 %3466 }
0x116f   :  { %11156 = vmatmul.mubr.msk.f32.vlgmr.msra.gmra.mxu1 %vm743_vm1, %v3463_v0 }
0x1170   :  { %11158 = vmatprep.mubr.msk.f32.mxu1 %vm743_vm1, %v3465_v1 }
0x1172   :  { %v3208_v3 = vpop.xlane.xlu0 %3207 }
0x1173   :  { %v3218_v4 = vsub.f32 %v13726_v27, %v3208_v3  ;;  %11159 = vmatmul.mubr.msk.f32.gmra.mxu1 %vm743_vm1, %v3467_v2 }
0x1175   :  { %v3222_v5 = vmul.f32 1.442695, %v3218_v4 }
0x1176   :  { %v3214_v13 = vpop.xlane.xlu0 %3213 }
0x1177   :  { %11942 = vpow2.f32 %v3222_v5  ;;  %v3220_v17 = vsub.f32 %v13731_v32, %v3214_v13 }
0x1179   :  { %v3226_v22 = vmul.f32 1.442695, %v3220_v17 }
0x117a   :  { %v3217_v60 = vpop.xlane.xlu0 %3216 }
0x117b   :  { %v3221_v10 = vsub.f32 %v13738_v34, %v3217_v60 }
0x117d   :  { %v3228_v18 = vmul.f32 1.442695, %v3221_v10 }
0x1184   :  { %v11943_v7 = vpop.eup %11942 }
0x1185   :  { %v3230_v9 = vsel %vm621_vm0, %v11943_v7, 0.0 }
0x1186   :  { %3231 = vadd.xlane.f32.xlu1 %v3230_v9 }
0x1197   :  { %3252 = vrot.lane.b32.xlu1 %v13626_v39, %s12846_s5 }
0x119f   :  { %v3211_v15 = vpop.xlane.xlu1 %3210 }
0x11a0   :  { %v3219_v6 = vsub.f32 %v13749_v38, %v3211_v15 }
0x11a2   :  { %v3224_v20 = vmul.f32 1.442695, %v3219_v6 }
0x11a3   :  { %v3257_v21 = vpop.permute.xlu1 %3256 }
0x11a4   :  { %11944 = vpow2.f32 %v3224_v20  ;;  %11125 = vmatprep.subr.mxu0 %v3257_v21 }
0x11a5   :  { %11946 = vpow2.f32 %v3228_v18 }
0x11a6   :  { %11948 = vpow2.f32 %v3226_v22 }
0x11b1   :  { %v13782_v23 = vpop.eup %11944 }
0x11b2   :  { %v3233_v24 = vsel %vm621_vm0, %v13782_v23, 0.0  ;;  %v13786_v16 = vpop.eup %11946 }
0x11b3   :  { %3234 = vadd.xlane.f32.xlu0 %v3233_v24  ;;  %v3239_v26 = vsel %vm621_vm0, %v13786_v16, 0.0  ;;  %v13790_v27 = vpop.eup %11948 }
0x11b4   :  { %v3236_v28 = vsel %vm621_vm0, %v13790_v27, 0.0 }
0x11b7   :  { %3240 = vadd.xlane.f32.xlu0 %v3239_v26 }
0x11bb   :  { %3237 = vadd.xlane.f32.xlu1 %v3236_v28 }
0x11cc   :  { %3250 = vrot.lane.b32.xlu1 %v13616_v30, %s12846_s5 }
0x11cd   :  { %3254 = vrot.lane.b32.xlu0 %v13622_v33, %s12846_s5 }
0x11d0   :  { %3843 = vrot.lane.b32.xlu1 %v13622_v33, %s12847_s20 }
0x11d1   :  { %3845 = vrot.lane.b32.xlu0 %v13620_v31, %s12847_s20 }
0x11d4   :  { %3839 = vrot.lane.b32.xlu1 %v13616_v30, %s12847_s20 }
0x11d5   :  { %3841 = vrot.lane.b32.xlu0 %v13626_v39, %s12847_s20 }
0x11d8   :  { %3833 = vrot.lane.b32.xlu1 %v13626_v39, %s12848_s4 }
0x11d9   :  { %3831 = vrot.lane.b32.xlu0 %v13616_v30, %s12848_s4 }
0x11dc   :  { %3837 = vrot.lane.b32.xlu1 %v13620_v31, %s12848_s4 }
0x11dd   :  { %3835 = vrot.lane.b32.xlu0 %v13622_v33, %s12848_s4 }
0x120f   :  { %v3232_v32 = vpop.xlane.xlu1 %3231 }
0x1210   :  { %11950 = vrcp.f32 %v3232_v32 }
0x1213   :  { %v3253_v55 = vpop.permute.xlu1 %3252 }
0x121d   :  { %v11951_v35 = vpop.eup %11950 }
0x121e   :  { %v3246_v14 = vmul.f32 %v11951_v35, %v11943_v7 }
0x1221   :  { %v11099_v37 = vpop.f32.mrf.mxu0 }
0x1223   :  { %v2969_v34 = vpop.f32.mrf.mxu0 }
0x1224   :  { %11105 = vmatprep.mubr.msk.f32.mxu0 %vm743_vm1, %v2969_v34 }
0x1225   :  { %11106 = vmatmul.mubr.msk.f32.vlgmr.msra.gmra.mxu0 %vm743_vm1, %v11099_v37 }
0x1226   :  { %11126 = vmatpush3.msra.mxu0 %v3257_v21 }
0x122c   :  { %v11102_v36 = vpop.f32.mrf.mxu0 }
0x122e   :  { %v2979_v38 = vpop.f32.mrf.mxu0 }
0x122f   :  { %11108 = vmatprep.mubr.msk.f32.mxu0 %vm743_vm1, %v2979_v38  ;;  %v11157_v29 = vpop.f32.mrf.mxu1 }
0x1230   :  { %v13818_v40 = vadd.f32 %v11157_v29, %v13677_v46  ;;  %11109 = vmatmul.mubr.msk.f32.gmra.mxu0 %vm743_vm1, %v11102_v36 }
0x1231   :  { %11133 = vmatprep.mubr.msk.f32.mxu0 %vm621_vm0, %v3246_v14  ;;  %v3558_v41 = vpop.f32.mrf.mxu1 }
0x1232   :  { %v13823_v42 = vadd.f32 %v3558_v41, %v13680_v48  ;;  %v3580_v43 = vsel %vm621_vm0, %v13818_v40, -inf }
0x1233   :  { %v11160_v44 = vpop.f32.mrf.mxu1  ;;  %3581 = vmax.xlane.f32.xlu1 %v3580_v43 }
0x1234   :  { %v3577_v45 = vsel %vm621_vm0, %v13823_v42, -inf  ;;  %v13833_v50 = vadd.f32 %v11160_v44, %v13690_v56 }
0x1235   :  { %v3568_v47 = vpop.f32.mrf.mxu1  ;;  %3578 = vmax.xlane.f32.xlu0 %v3577_v45 }
0x1236   :  { %v13830_v49 = vadd.f32 %v3568_v47, %v13686_v54  ;;  %v3586_v53 = vsel %vm621_vm0, %v13833_v50, -inf }
0x1238   :  { %v3583_v51 = vsel %vm621_vm0, %v13830_v49, -inf }
0x1239   :  { %3584 = vmax.xlane.f32.xlu0 %v3583_v51 }
0x123c   :  { %v3235_v52 = vpop.xlane.xlu0 %3234 }
0x123d   :  { %11952 = vrcp.f32 %v3235_v52  ;;  %3587 = vmax.xlane.f32.xlu0 %v3586_v53 }
0x1240   :  { %v3241_v57 = vpop.xlane.xlu0 %3240 }
0x1241   :  { %11954 = vrcp.f32 %v3241_v57 }
0x1244   :  { %3627 = vrot.lane.b32.xlu1 %v13620_v31, %s12849_s11  ;;  %v3238_v8 = vpop.xlane.xlu1 %3237  ;;  %v3255_v58 = vpop.permute.xlu0 %3254 }
0x1245   :  { %11956 = vrcp.f32 %v3238_v8  ;;  %11127 = vmatprep.subr.mxu0 %v3255_v58 }
0x1246   :  { %11128 = vmatpush3.msra.mxu0 %v3255_v58 }
0x1247   :  { %11129 = vmatprep.subr.mxu0 %v3253_v55 }
0x1248   :  { %v3251_v59 = vpop.permute.xlu1 %3250  ;;  %11130 = vmatpush3.msra.mxu0 %v3253_v55  ;;  %v3846_v61 = vpop.permute.xlu0 %3845 }
0x1249   :  { %11131 = vmatprep.subr.mxu0 %v3251_v59  ;;  %11183 = vmatprep.subr.msk.mxu1 %vm743_vm1, %v3846_v61 }
0x124a   :  { %v11953_v63 = vpop.eup %11952  ;;  %11132 = vmatpush3.msra.mxu0 %v3251_v59  ;;  %11184 = vmatpush3.xpose.msk.msra.mxu1 %vm743_vm1, %v3846_v61 }
0x124b   :  { %v3247_v0 = vmul.f32 %v11953_v63, %v13782_v23  ;;  %11139 = vmatprep.subr.mxu0 %v10181_v62 }
0x124c   :  { %v3844_v1 = vpop.permute.xlu1 %3843  ;;  %v3842_v2 = vpop.permute.xlu0 %3841 }
0x124d   :  { %11134 = vmatmul.mubr.msk.f32.vlgmr.msra.gmra.mxu0 %vm621_vm0, %v3247_v0  ;;  %11185 = vmatprep.subr.msk.mxu1 %vm743_vm1, %v3844_v1 }
0x124e   :  { %11186 = vmatpush3.xpose.msk.msra.mxu1 %vm743_vm1, %v3844_v1  ;;  %11140 = vmatpush3.msra.mxu0 %v10181_v62  ;;  %v11955_v5 = vpop.eup %11954 }
0x124f   :  { %11187 = vmatprep.subr.msk.mxu1 %vm743_vm1, %v3842_v2  ;;  %v3249_v13 = vmul.f32 %v11955_v5, %v13786_v16 }
0x1250   :  { %v3840_v3 = vpop.permute.xlu1 %3839  ;;  %v3832_v4 = vpop.permute.xlu0 %3831 }
0x1251   :  { %11191 = vmatprep.mubr.msk.f32.mxu1 %vm743_vm1, %v3832_v4 }
0x1252   :  { %v11957_v7 = vpop.eup %11956  ;;  %11188 = vmatpush3.xpose.msk.msra.mxu1 %vm743_vm1, %v3842_v2 }
0x1253   :  { %11189 = vmatprep.subr.msk.mxu1 %vm743_vm1, %v3840_v3  ;;  %v3248_v9 = vmul.f32 %v11957_v7, %v13790_v27  ;;  %v10182_v7 = vld [vmem:[%s14780_s13 + $0x30] sm:$0xff] }
0x1254   :  { %v3834_v60 = vpop.permute.xlu1 %3833  ;;  %v3836_v10 = vpop.permute.xlu0 %3835 }
0x1255   :  { %11136 = vmatprep.mubr.msk.f32.mxu0 %vm621_vm0, %v3248_v9 }
0x1256   :  { %11137 = vmatmul.mubr.msk.f32.gmra.mxu0 %vm621_vm0, %v3249_v13  ;;  %11190 = vmatpush3.xpose.msk.msra.mxu1 %vm743_vm1, %v3840_v3 }
0x1258   :  { %v3838_v15 = vpop.permute.xlu1 %3837 }
0x1259   :  { %11192 = vmatmul.mubr.msk.f32.vlgmr.msra.gmra.mxu1 %vm743_vm1, %v3834_v60 }
0x125a   :  { %11194 = vmatprep.mubr.msk.f32.mxu1 %vm743_vm1, %v3836_v10 }
0x125d   :  { %11195 = vmatmul.mubr.msk.f32.gmra.mxu1 %vm743_vm1, %v3838_v15 }
0x12bc   :  { %v3582_v6 = vpop.xlane.xlu1 %3581 }
0x12bd   :  { %v3590_v17 = vsub.f32 %v13818_v40, %v3582_v6 }
0x12be   :  { %v3579_v18 = vpop.xlane.xlu0 %3578 }
0x12bf   :  { %v3595_v20 = vmul.f32 1.442695, %v3590_v17  ;;  %v3589_v21 = vsub.f32 %v13823_v42, %v3579_v18 }
0x12c0   :  { %v3628_v22 = vpop.permute.xlu1 %3627 }
0x12c1   :  { %11958 = vpow2.f32 %v3595_v20  ;;  %v3593_v23 = vmul.f32 1.442695, %v3589_v21  ;;  %11161 = vmatprep.subr.mxu0 %v3628_v22 }
0x12c2   :  { %v3585_v24 = vpop.xlane.xlu0 %3584 }
0x12c3   :  { %11960 = vpow2.f32 %v3593_v23  ;;  %v3591_v38 = vsub.f32 %v13830_v49, %v3585_v24 }
0x12c5   :  { %v3597_v29 = vmul.f32 1.442695, %v3591_v38 }
0x12c6   :  { %v3588_v16 = vpop.xlane.xlu0 %3587 }
0x12c7   :  { %v3592_v26 = vsub.f32 %v13833_v50, %v3588_v16 }
0x12c9   :  { %v3599_v27 = vmul.f32 1.442695, %v3592_v26 }
0x12cb   :  { %11962 = vpow2.f32 %v3599_v27 }
0x12cc   :  { %11964 = vpow2.f32 %v3597_v29 }
0x12ce   :  { %v13863_v28 = vpop.eup %11958 }
0x12cf   :  { %v3604_v32 = vsel %vm621_vm0, %v13863_v28, 0.0 }
0x12d0   :  { %v11961_v37 = vpop.eup %11960  ;;  %3605 = vadd.xlane.f32.xlu0 %v3604_v32 }
0x12d1   :  { %v3601_v34 = vsel %vm621_vm0, %v11961_v37, 0.0 }
0x12d2   :  { %3602 = vadd.xlane.f32.xlu1 %v3601_v34 }
0x12d8   :  { %v13868_v35 = vpop.eup %11962 }
0x12d9   :  { %v3610_v36 = vsel %vm621_vm0, %v13868_v35, 0.0  ;;  %v11965_v40 = vpop.eup %11964 }
0x12da   :  { %3611 = vadd.xlane.f32.xlu0 %v3610_v36  ;;  %v3607_v42 = vsel %vm621_vm0, %v11965_v40, 0.0 }
0x12e3   :  { %3623 = vrot.lane.b32.xlu1 %v13626_v39, %s12849_s11 }
0x12e5   :  { %v13877_v14 = vpop.f32.mrf.mxu0 }
0x12e7   :  { %v13879_v41 = vpop.f32.mrf.mxu0 }
0x12f0   :  { %3625 = vrot.lane.b32.xlu0 %v13622_v33, %s12849_s11  ;;  %v13882_v43 = vpop.f32.mrf.mxu0 }
0x12f2   :  { %v13884_v44 = vpop.f32.mrf.mxu0 }
0x1307   :  { %3608 = vadd.xlane.f32.xlu1 %v3607_v42 }
0x130d   :  { %v11135_v45 = vpop.f32.mrf.mxu0 }
0x130f   :  { %v3340_v47 = vpop.f32.mrf.mxu0 }
0x1310   :  { %11141 = vmatprep.mubr.msk.f32.mxu0 %vm743_vm1, %v3340_v47 }
0x1311   :  { %11142 = vmatmul.mubr.msk.f32.vlgmr.msra.gmra.mxu0 %vm743_vm1, %v11135_v45 }
0x1312   :  { %11162 = vmatpush3.msra.mxu0 %v3628_v22 }
0x1316   :  { %v11138_v49 = vpop.f32.mrf.mxu0 }
0x1318   :  { %v3350_v50 = vpop.f32.mrf.mxu0  ;;  %3621 = vrot.lane.b32.xlu1 %v13616_v30, %s12849_s11 }
0x1319   :  { %11144 = vmatprep.mubr.msk.f32.mxu0 %vm743_vm1, %v3350_v50  ;;  %v11193_v51 = vpop.f32.mrf.mxu1 }
0x131a   :  { %11145 = vmatmul.mubr.msk.f32.gmra.mxu0 %vm743_vm1, %v11138_v49  ;;  %v3935_v63 = vadd.f32 %v11193_v51, %v13677_v46 }
0x131b   :  { %v3929_v52 = vpop.f32.mrf.mxu1 }
0x131c   :  { %v3930_v53 = vadd.f32 %v3929_v52, %v13680_v48  ;;  %v3951_v48 = vsel %vm621_vm0, %v3935_v63, -inf }
0x131d   :  { %v11196_v55 = vpop.f32.mrf.mxu1 }
0x131e   :  { %v3948_v57 = vsel %vm621_vm0, %v3930_v53, -inf  ;;  %v3945_v59 = vadd.f32 %v11196_v55, %v13690_v56 }
0x131f   :  { %v3939_v8 = vpop.f32.mrf.mxu1  ;;  %3949 = vmax.xlane.f32.xlu0 %v3948_v57 }
0x1320   :  { %v13895_v58 = vadd.f32 %v3939_v8, %v13686_v54  ;;  %v3957_v62 = vsel %vm621_vm0, %v3945_v59, -inf }
0x1322   :  { %v3954_v61 = vsel %vm621_vm0, %v13895_v58, -inf }
0x1323   :  { %3955 = vmax.xlane.f32.xlu0 %v3954_v61 }
0x1327   :  { %3958 = vmax.xlane.f32.xlu0 %v3957_v62 }
0x133c   :  { %3952 = vmax.xlane.f32.xlu1 %v3951_v48 }
0x134d   :  { %3998 = vrot.lane.b32.xlu1 %v13620_v31, %s12850_s15 }
0x1359   :  { %v3606_v54 = vpop.xlane.xlu0 %3605 }
0x135b   :  { %v3603_v0 = vpop.xlane.xlu1 %3602 }
0x135c   :  { %11966 = vrcp.f32 %v3603_v0 }
0x135d   :  { %11968 = vrcp.f32 %v3606_v54 }
0x135f   :  { %v3624_v3 = vpop.permute.xlu1 %3623 }
0x1363   :  { %v3612_v1 = vpop.xlane.xlu0 %3611 }
0x1364   :  { %11970 = vrcp.f32 %v3612_v1 }
0x1367   :  { %v3626_v56 = vpop.permute.xlu0 %3625 }
0x1368   :  { %11163 = vmatprep.subr.mxu0 %v3626_v56 }
0x1369   :  { %v11967_v2 = vpop.eup %11966  ;;  %11164 = vmatpush3.msra.mxu0 %v3626_v56 }
0x136a   :  { %11165 = vmatprep.subr.mxu0 %v3624_v3  ;;  %v3617_v4 = vmul.f32 %v11967_v2, %v11961_v37  ;;  %v11969_v31 = vpop.eup %11968  ;;  %v13913_v37 = vld [vmem:[#allocation8 + $0x1] ss:$0 sm:$0xff] }
0x136b   :  { %11166 = vmatpush3.msra.mxu0 %v3624_v3  ;;  %v3618_v9 = vmul.f32 %v11969_v31, %v13863_v28  ;;  %v3086_v34 = vadd.f32 %v13877_v14, %v13913_v37  ;;  %v3085_v36 = vadd.f32 %v13913_v37, %v13879_v41  ;;  %v10183_v31 = vld [vmem:[%s14780_s13 + $0x38] sm:$0xff] }
0x136c   :  { %11169 = vmatprep.mubr.msk.f32.mxu0 %vm621_vm0, %v3617_v4 }
0x1371   :  { %v11971_v13 = vpop.eup %11970 }
0x1372   :  { %v3620_v15 = vmul.f32 %v11971_v13, %v13868_v35 }
0x1390   :  { %v3609_v46 = vpop.xlane.xlu1 %3608 }
0x1391   :  { %11972 = vrcp.f32 %v3609_v46 }
0x1394   :  { %v3622_v5 = vpop.permute.xlu1 %3621 }
0x1395   :  { %11167 = vmatprep.subr.mxu0 %v3622_v5 }
0x1396   :  { %11168 = vmatpush3.msra.mxu0 %v3622_v5 }
0x1397   :  { %11170 = vmatmul.mubr.msk.f32.vlgmr.msra.gmra.mxu0 %vm621_vm0, %v3618_v9  ;;  %11175 = vmatprep.subr.mxu0 %v10182_v7 }
0x1398   :  { %11176 = vmatpush3.msra.mxu0 %v10182_v7 }
0x139e   :  { %v11973_v60 = vpop.eup %11972 }
0x139f   :  { %v3619_v10 = vmul.f32 %v11973_v60, %v11965_v40  ;;  %v3087_v60 = vadd.f32 %v13913_v37, %v13884_v44 }
0x13a1   :  { %11172 = vmatprep.mubr.msk.f32.mxu0 %vm621_vm0, %v3619_v10 }
0x13a2   :  { %11173 = vmatmul.mubr.msk.f32.gmra.mxu0 %vm621_vm0, %v3620_v15 }
0x13a8   :  { %v3950_v6 = vpop.xlane.xlu0 %3949 }
0x13a9   :  { %v3960_v17 = vsub.f32 %v3930_v53, %v3950_v6 }
0x13ab   :  { %v3964_v18 = vmul.f32 1.442695, %v3960_v17 }
0x13ac   :  { %v3956_v21 = vpop.xlane.xlu0 %3955 }
0x13ad   :  { %11974 = vpow2.f32 %v3964_v18  ;;  %v3962_v45 = vsub.f32 %v13895_v58, %v3956_v21 }
0x13af   :  { %v3968_v51 = vmul.f32 1.442695, %v3962_v45 }
0x13b0   :  { %v3959_v23 = vpop.xlane.xlu0 %3958 }
0x13b1   :  { %v3963_v24 = vsub.f32 %v3945_v59, %v3959_v23 }
0x13b3   :  { %v3970_v27 = vmul.f32 1.442695, %v3963_v24 }
0x13ba   :  { %v11975_v20 = vpop.eup %11974 }
0x13bb   :  { %v3972_v22 = vsel %vm621_vm0, %v11975_v20, 0.0 }
0x13bc   :  { %3973 = vadd.xlane.f32.xlu1 %v3972_v22 }
0x13c5   :  { %v3953_v16 = vpop.xlane.xlu1 %3952 }
0x13c6   :  { %v3961_v26 = vsub.f32 %v3935_v63, %v3953_v16 }
0x13c8   :  { %v3966_v28 = vmul.f32 1.442695, %v3961_v26 }
0x13c9   :  { %v3999_v32 = vpop.permute.xlu1 %3998 }
0x13ca   :  { %11976 = vpow2.f32 %v3966_v28  ;;  %11197 = vmatprep.subr.mxu0 %v3999_v32 }
0x13cb   :  { %11978 = vpow2.f32 %v3970_v27 }
0x13cc   :  { %11980 = vpow2.f32 %v3968_v51 }
0x13cd   :  { %3994 = vrot.lane.b32.xlu1 %v13626_v39, %s12850_s15  ;;  %v3088_v39 = vadd.f32 %v13882_v43, %v13913_v37 }
0x13d1   :  { %v11143_v35 = vpop.f32.mrf.mxu0 }
0x13d2   :  { %v13921_v38 = vadd.f32 %v11143_v35, %v3086_v34 }
0x13d3   :  { %v3437_v29 = vpop.f32.mrf.mxu0 }
0x13d4   :  { %v13923_v40 = vadd.f32 %v3437_v29, %v3085_v36 }
0x13d7   :  { %v11977_v42 = vpop.eup %11976 }
0x13d8   :  { %v3975_v47 = vsel %vm621_vm0, %v11977_v42, 0.0  ;;  %v11979_v49 = vpop.eup %11978 }
0x13d9   :  { %3976 = vadd.xlane.f32.xlu0 %v3975_v47  ;;  %v3981_v41 = vsel %vm621_vm0, %v11979_v49, 0.0  ;;  %v11981_v52 = vpop.eup %11980 }
0x13da   :  { %v11146_v14 = vpop.f32.mrf.mxu0  ;;  %v3978_v53 = vsel %vm621_vm0, %v11981_v52, 0.0 }
0x13db   :  { %v3459_v50 = vadd.f32 %v11146_v14, %v3088_v39 }
0x13dc   :  { %v3447_v43 = vpop.f32.mrf.mxu0 }
0x13dd   :  { %3982 = vadd.xlane.f32.xlu0 %v3981_v41  ;;  %v3458_v15 = vadd.f32 %v3447_v43, %v3087_v60 }
0x13f1   :  { %3979 = vadd.xlane.f32.xlu1 %v3978_v53 }
0x13f3   :  { %3996 = vrot.lane.b32.xlu0 %v13622_v33, %s12850_s15 }
0x1402   :  { %3992 = vrot.lane.b32.xlu1 %v13616_v30, %s12850_s15 }
0x1445   :  { %v3974_v55 = vpop.xlane.xlu1 %3973 }
0x1446   :  { %11982 = vrcp.f32 %v3974_v55 }
0x1449   :  { %v3995_v48 = vpop.permute.xlu1 %3994 }
0x1453   :  { %v11983_v58 = vpop.eup %11982 }
0x1454   :  { %v3988_v33 = vmul.f32 %v11983_v58, %v11975_v20 }
0x1457   :  { %v11171_v57 = vpop.f32.mrf.mxu0 }
0x1459   :  { %v3711_v8 = vpop.f32.mrf.mxu0 }
0x145a   :  { %11177 = vmatprep.mubr.msk.f32.mxu0 %vm743_vm1, %v3711_v8 }
0x145b   :  { %11178 = vmatmul.mubr.msk.f32.vlgmr.msra.gmra.mxu0 %vm743_vm1, %v11171_v57 }
0x145c   :  { %11198 = vmatpush3.msra.mxu0 %v3999_v32 }
0x1462   :  { %v11174_v59 = vpop.f32.mrf.mxu0  ;;  %v3977_v61 = vpop.xlane.xlu0 %3976 }
0x1463   :  { %11984 = vrcp.f32 %v3977_v61 }
0x1464   :  { %v3721_v62 = vpop.f32.mrf.mxu0 }
0x1465   :  { %11180 = vmatprep.mubr.msk.f32.mxu0 %vm743_vm1, %v3721_v62  ;;  %v10254_v62 = vld [vmem:[%s14781_s27 + $0x38] sm:$0xff] }
0x1466   :  { %11181 = vmatmul.mubr.msk.f32.gmra.mxu0 %vm743_vm1, %v11174_v59  ;;  %v3983_v30 = vpop.xlane.xlu0 %3982  ;;  %11219 = vmatprep.subr.mxu1 %v10254_v62 }
0x1467   :  { %11205 = vmatprep.mubr.msk.f32.mxu0 %vm621_vm0, %v3988_v33  ;;  %11986 = vrcp.f32 %v3983_v30  ;;  %11220 = vmatpush3.msra.mxu1 %v10254_v62  ;;  %v10253_v33 = vld [vmem:[%s14781_s27 + $0x30] sm:$0xff]  ;;  %v10252_v30 = vld [vmem:[%s14781_s27 + $0x28] sm:$0xff] }
0x1468   :  { %11221 = vmatprep.subr.mxu1 %v10253_v33 }
0x1469   :  { %11222 = vmatpush3.msra.mxu1 %v10253_v33 }
0x146a   :  { %v3997_v63 = vpop.permute.xlu0 %3996  ;;  %11223 = vmatprep.subr.mxu1 %v10252_v30 }
0x146b   :  { %11199 = vmatprep.subr.mxu0 %v3997_v63  ;;  %11224 = vmatpush3.msra.mxu1 %v10252_v30 }
0x146c   :  { %11200 = vmatpush3.msra.mxu0 %v3997_v63  ;;  %v10251_v63 = vld [vmem:[%s14781_s27 + $0x20] sm:$0xff] }
0x146d   :  { %11201 = vmatprep.subr.mxu0 %v3995_v48  ;;  %11225 = vmatprep.subr.mxu1 %v10251_v63 }
0x146e   :  { %11202 = vmatpush3.msra.mxu0 %v3995_v48  ;;  %11226 = vmatpush3.msra.mxu1 %v10251_v63  ;;  %v10267_v48 = vld [vmem:[%s14782_s6 + $0x78] sm:$0xff] }
0x1470   :  { %v11985_v54 = vpop.eup %11984 }
0x1471   :  { %v3989_v56 = vmul.f32 %v11985_v54, %v11977_v42  ;;  %v10265_v54 = vld [vmem:[%s14782_s6 + $0x68] sm:$0xff] }
0x1474   :  { %v11987_v2 = vpop.eup %11986 }
0x1475   :  { %v3991_v46 = vmul.f32 %v11987_v2, %v11979_v49 }
0x147a   :  { %v3980_v0 = vpop.xlane.xlu1 %3979 }
0x147b   :  { %11988 = vrcp.f32 %v3980_v0  ;;  %v10266_v0 = vld [vmem:[%s14782_s6 + $0x70] sm:$0xff] }
0x147e   :  { %v3993_v1 = vpop.permute.xlu1 %3992 }
0x147f   :  { %11203 = vmatprep.subr.mxu0 %v3993_v1 }
0x1480   :  { %11204 = vmatpush3.msra.mxu0 %v3993_v1  ;;  %v10264_v1 = vld [vmem:[%s14782_s6 + $0x60] sm:$0xff] }
0x1481   :  { %11206 = vmatmul.mubr.msk.f32.vlgmr.msra.gmra.mxu0 %vm621_vm0, %v3989_v56  ;;  %11211 = vmatprep.subr.mxu0 %v10183_v31 }
0x1482   :  { %11212 = vmatpush3.msra.mxu0 %v10183_v31 }
0x1483   :  { %11233 = vmatprep.subr.mxu0 %v10267_v48 }
0x1488   :  { %v11989_v3 = vpop.eup %11988 }
0x1489   :  { %v3990_v4 = vmul.f32 %v11989_v3, %v11981_v52 }
0x148b   :  { %11208 = vmatprep.mubr.msk.f32.mxu0 %vm621_vm0, %v3990_v4 }
0x148c   :  { %11209 = vmatmul.mubr.msk.f32.gmra.mxu0 %vm621_vm0, %v3991_v46 }
0x151b   :  { %v11179_v5 = vpop.f32.mrf.mxu0 }
0x151c   :  { %v3828_v7 = vadd.f32 %v11179_v5, %v13921_v38 }
0x151d   :  { %v3808_v9 = vpop.f32.mrf.mxu0 }
0x151e   :  { %v3827_v13 = vadd.f32 %v3808_v9, %v13923_v40 }
0x1526   :  { %v11182_v10 = vpop.f32.mrf.mxu0 }
0x1527   :  { %v3830_v6 = vadd.f32 %v11182_v10, %v3459_v50 }
0x1528   :  { %v3818_v17 = vpop.f32.mrf.mxu0 }
0x1529   :  { %v3829_v18 = vadd.f32 %v3818_v17, %v3458_v15 }
0x1541   :  { %v11207_v20 = vpop.f32.mrf.mxu0 }
0x1543   :  { %v4082_v21 = vpop.f32.mrf.mxu0 }
0x1544   :  { %11213 = vmatprep.mubr.msk.f32.mxu0 %vm743_vm1, %v4082_v21 }
0x1545   :  { %11214 = vmatmul.mubr.msk.f32.vlgmr.msra.gmra.mxu0 %vm743_vm1, %v11207_v20 }
0x1546   :  { %11234 = vmatpush3.msra.mxu0 %v10267_v48 }
0x1547   :  { %11235 = vmatprep.subr.mxu0 %v10266_v0 }
0x1548   :  { %11236 = vmatpush3.msra.mxu0 %v10266_v0 }
0x1549   :  { %11237 = vmatprep.subr.mxu0 %v10265_v54 }
0x154a   :  { %11238 = vmatpush3.msra.mxu0 %v10265_v54 }
0x154b   :  { %11239 = vmatprep.subr.mxu0 %v10264_v1 }
0x154c   :  { %v11210_v22 = vpop.f32.mrf.mxu0  ;;  %11240 = vmatpush3.msra.mxu0 %v10264_v1 }
0x154e   :  { %v4092_v23 = vpop.f32.mrf.mxu0 }
0x154f   :  { %11216 = vmatprep.mubr.msk.f32.mxu0 %vm743_vm1, %v4092_v23 }
0x1550   :  { %11217 = vmatmul.mubr.msk.f32.gmra.mxu0 %vm743_vm1, %v11210_v22  ;;  %v10250_v22 = vld [vmem:[#allocation11 + $0x1] ss:$0 sm:$0xff] }
0x1605   :  { %v11215_v24 = vpop.f32.mrf.mxu0 }
0x1606   :  { %v4199_v16 = vadd.f32 %v11215_v24, %v3828_v7 }
0x1607   :  { %v4179_v44 = vpop.f32.mrf.mxu0 }
0x1608   :  { %v4203_v26 = vadd.f32 %v4199_v16, %v13602_v19  ;;  %v4198_v27 = vadd.f32 %v4179_v44, %v3827_v13 }
0x160a   :  { %v4202_v28 = vadd.f32 %v4198_v27, %v13600_v11  ;;  %v4213_v32 = vsel %vm621_vm0, %v4203_v26, 0.0 }
0x160b   :  { %4214 = vadd.xlane.f32.xlu1 %v4213_v32 }
0x160c   :  { %v4210_v37 = vsel %vm621_vm0, %v4202_v28, 0.0 }
0x160d   :  { %4211 = vadd.xlane.f32.xlu0 %v4210_v37 }
0x1610   :  { %v11218_v34 = vpop.f32.mrf.mxu0 }
0x1611   :  { %v4201_v36 = vadd.f32 %v11218_v34, %v3830_v6  ;;  %v10249_v6 = vld [vmem:[#allocation10 + $0x1] ss:$0 sm:$0xff] }
0x1612   :  { %v4189_v35 = vpop.f32.mrf.mxu0 }
0x1613   :  { %v4200_v38 = vadd.f32 %v4189_v35, %v3829_v18  ;;  %v4205_v40 = vadd.f32 %v4201_v36, %v13610_v25  ;;  %v10263_v36 = vld [vmem:[%s14782_s6 + $0x58] sm:$0xff] }
0x1614   :  { %11241 = vmatprep.subr.mxu0 %v10263_v36 }
0x1615   :  { %v4204_v29 = vadd.f32 %v4200_v38, %v13608_v12  ;;  %v4219_v19 = vsel %vm621_vm0, %v4205_v40, 0.0  ;;  %11242 = vmatpush3.msra.mxu0 %v10263_v36  ;;  %v10262_v38 = vld [vmem:[%s14782_s6 + $0x50] sm:$0xff] }
0x1616   :  { %11243 = vmatprep.subr.mxu0 %v10262_v38 }
0x1617   :  { %v4216_v42 = vsel %vm621_vm0, %v4204_v29, 0.0  ;;  %11244 = vmatpush3.msra.mxu0 %v10262_v38 }
0x1618   :  { %4217 = vadd.xlane.f32.xlu0 %v4216_v42  ;;  %v10255_v42 = vld [vmem:[#allocation13 + $0x1] ss:$0 sm:$0xff] }
0x161c   :  { %4220 = vadd.xlane.f32.xlu0 %v4219_v19 }
0x1694   :  { %v4215_v11 = vpop.xlane.xlu1 %4214 }
0x1695   :  { %v4223_v45 = vmul.f32 0.03125, %v4215_v11 }
0x1696   :  { %v4212_v47 = vpop.xlane.xlu0 %4211 }
0x1697   :  { %v4227_v49 = vsub.f32 %v4203_v26, %v4223_v45  ;;  %v4222_v39 = vmul.f32 0.03125, %v4212_v47 }
0x1699   :  { %v4226_v14 = vsub.f32 %v4202_v28, %v4222_v39  ;;  %v4231_v50 = vmul.f32 %v4227_v49, %v4227_v49 }
0x169b   :  { %v4237_v51 = vsel %vm621_vm0, %v4231_v50, 0.0  ;;  %v4230_v41 = vmul.f32 %v4226_v14, %v4226_v14 }
0x169c   :  { %4238 = vadd.xlane.f32.xlu0 %v4237_v51 }
0x169d   :  { %v4234_v12 = vsel %vm621_vm0, %v4230_v41, 0.0 }
0x169e   :  { %4235 = vadd.xlane.f32.xlu1 %v4234_v12 }
0x16a1   :  { %v4218_v25 = vpop.xlane.xlu0 %4217 }
0x16a2   :  { %v4224_v52 = vmul.f32 0.03125, %v4218_v25 }
0x16a4   :  { %v13962_v53 = vsub.f32 %v4204_v29, %v4224_v52  ;;  %v10261_v29 = vld [vmem:[%s14782_s6 + $0x48] sm:$0xff] }
0x16a5   :  { %v4221_v55 = vpop.xlane.xlu0 %4220  ;;  %11245 = vmatprep.subr.mxu0 %v10261_v29 }
0x16a6   :  { %v4225_v43 = vmul.f32 0.03125, %v4221_v55  ;;  %v4232_v57 = vmul.f32 %v13962_v53, %v13962_v53  ;;  %11246 = vmatpush3.msra.mxu0 %v10261_v29 }
0x16a8   :  { %v13966_v8 = vsub.f32 %v4205_v40, %v4225_v43  ;;  %v4240_v58 = vsel %vm621_vm0, %v4232_v57, 0.0  ;;  %v10260_v40 = vld [vmem:[%s14782_s6 + $0x40] sm:$0xff] }
0x16a9   :  { %4241 = vadd.xlane.f32.xlu1 %v4240_v58  ;;  %11247 = vmatprep.subr.mxu0 %v10260_v40 }
0x16aa   :  { %v4233_v59 = vmul.f32 %v13966_v8, %v13966_v8  ;;  %11248 = vmatpush3.msra.mxu0 %v10260_v40 }
0x16ac   :  { %v4243_v61 = vsel %vm621_vm0, %v4233_v59, 0.0 }
0x16ad   :  { %4244 = vadd.xlane.f32.xlu0 %v4243_v61 }
0x1725   :  { %v4239_v56 = vpop.xlane.xlu0 %4238 }
0x1726   :  { %v4247_v2 = vmul.f32 0.03125, %v4239_v56 }
0x1727   :  { %v4236_v3 = vpop.xlane.xlu1 %4235 }
0x1728   :  { %v4251_v4 = vadd.f32 1e-05, %v4247_v2  ;;  %v4246_v46 = vmul.f32 0.03125, %v4236_v3 }
0x172a   :  { %11990 = vrsqrt.f32 %v4251_v4  ;;  %v4250_v31 = vadd.f32 1e-05, %v4246_v46 }
0x172c   :  { %11992 = vrsqrt.f32 %v4250_v31 }
0x1732   :  { %v4242_v5 = vpop.xlane.xlu1 %4241 }
0x1733   :  { %v4248_v7 = vmul.f32 0.03125, %v4242_v5 }
0x1735   :  { %v4252_v9 = vadd.f32 1e-05, %v4248_v7 }
0x1736   :  { %v4245_v13 = vpop.xlane.xlu0 %4244 }
0x1737   :  { %v11991_v60 = vpop.eup %11990  ;;  %11994 = vrsqrt.f32 %v4252_v9  ;;  %v4249_v10 = vmul.f32 0.03125, %v4245_v13 }
0x1738   :  { %v4259_v15 = vmul.f32 %v11991_v60, %v4227_v49 }
0x1739   :  { %v11993_v17 = vpop.eup %11992  ;;  %v4253_v18 = vadd.f32 1e-05, %v4249_v10 }
0x173a   :  { %v4258_v20 = vmul.f32 %v11993_v17, %v4226_v14  ;;  %v4269_v21 = vmul.f32 %v10249_v6, %v4259_v15  ;;  %v12851_v15 = vmov 0.0   ;;  %v4585_v17 = vld [vmem:[%s14784_s22 + $0x10] sm:$0xff] }
0x173b   :  { %11996 = vrsqrt.f32 %v4253_v18  ;;  %11255 = vmatprep.subr.mxu1 %v12851_v15  ;;  %11283 = vmatprep.subr.mxu0 %v12851_v15  ;;  %v4584_v18 = vld [vmem:[%s14784_s22 + $0x8] sm:$0xff] }
0x173c   :  { %v4268_v23 = vmul.f32 %v10249_v6, %v4258_v20  ;;  %v4279_v16 = vadd.f32 %v10250_v22, %v4269_v21  ;;  %v4583_v20 = vld [vmem:[%s14784_s22] sm:$0xff]  ;;  %v4770_v21 = vld [vmem:[#allocation22 + $0x18] sm:$0xff] }
0x173e   :  { %v4278_v24 = vadd.f32 %v10250_v22, %v4268_v23  ;;  %v14025_v23 = vld [vmem:[%s14786_s30] sm:$0xff] }
0x1740   :  { %11227 = vmatprep.mubr.msk.f32.mxu1 %vm621_vm0, %v4278_v24 }
0x1741   :  { %11228 = vmatmul.mubr.msk.f32.vlgmr.msra.gmra.mxu1 %vm621_vm0, %v4279_v16 }
0x1744   :  { %v11995_v44 = vpop.eup %11994 }
0x1745   :  { %v4260_v26 = vmul.f32 %v11995_v44, %v13962_v53  ;;  %v10272_v53 = vld [vmem:[#allocation14 + $0x1] ss:$0 sm:$0xff] }
0x1746   :  { %v4769_v44 = vld [vmem:[#allocation22 + $0x10] sm:$0xff] }
0x1747   :  { %v4270_v27 = vmul.f32 %v10249_v6, %v4260_v26  ;;  %v4768_v26 = vld [vmem:[#allocation22 + $0x8] sm:$0xff] }
0x1748   :  { %v11997_v28 = vpop.eup %11996 }
0x1749   :  { %v4280_v32 = vadd.f32 %v10250_v22, %v4270_v27  ;;  %v4261_v37 = vmul.f32 %v11997_v28, %v13966_v8  ;;  %v4669_v27 = vld [vmem:[%s14787_s17 + $0x10] sm:$0xff]  ;;  %v4767_v28 = vld [vmem:[#allocation22] sm:$0xff] }
0x174b   :  { %11230 = vmatprep.mubr.msk.f32.mxu1 %vm621_vm0, %v4280_v32  ;;  %v4271_v34 = vmul.f32 %v10249_v6, %v4261_v37  ;;  %v4586_v6 = vld [vmem:[%s14784_s22 + $0x18] sm:$0xff]  ;;  %v4667_v37 = vld [vmem:[%s14787_s17] sm:$0xff] }
0x174c   :  { %11256 = vmatpush3.msra.mxu1 %v4586_v6 }
0x174d   :  { %v4281_v35 = vadd.f32 %v10250_v22, %v4271_v34  ;;  %11257 = vmatprep.subr.mxu1 %v12851_v15  ;;  %v14022_v22 = vld [vmem:[%s14785_s12] sm:$0xff] }
0x174e   :  { %11258 = vmatpush3.msra.mxu1 %v4585_v17 }
0x174f   :  { %11231 = vmatmul.mubr.msk.f32.gmra.mxu1 %vm621_vm0, %v4281_v35  ;;  %11259 = vmatprep.subr.mxu1 %v12851_v15 }
0x1750   :  { %11260 = vmatpush3.msra.mxu1 %v4584_v18  ;;  %11263 = vmatprep.mubr.msk.f32.mxu1 %vm12852_vm3, %v12851_v15 }
0x1751   :  { %11261 = vmatprep.subr.mxu1 %v12851_v15 }
0x1752   :  { %11262 = vmatpush3.msra.mxu1 %v4583_v20 }
0x1753   :  { %11266 = vmatprep.subr.mxu1 %v12851_v15 }
0x1801   :  { %v11229_v19 = vpop.f32.mrf.mxu1 }
0x1802   :  { %v4379_v11 = vadd.f32 %v11229_v19, %v10255_v42 }
0x1803   :  { %v4373_v45 = vpop.f32.mrf.mxu1 }
0x1804   :  { %v4374_v47 = vadd.f32 %v10255_v42, %v4373_v45  ;;  %v4393_v39 = vmax.f32 %v4379_v11, 0.0 }
0x1806   :  { %v4392_v49 = vmax.f32 %v4374_v47, 0.0 }
0x1808   :  { %11249 = vmatprep.mubr.msk.f32.mxu0 %vm2411_vm2, %v4392_v49 }
0x1809   :  { %11250 = vmatmul.mubr.msk.f32.vlgmr.msra.gmra.mxu0 %vm2411_vm2, %v4393_v39  ;;  %v10273_v39 = vld [vmem:[#allocation16 + $0x1] ss:$0 sm:$0xff] }
0x180a   :  { %11284 = vmatpush3.msra.mxu0 %v4770_v21 }
0x180b   :  { %11285 = vmatprep.subr.mxu0 %v12851_v15 }
0x180c   :  { %11286 = vmatpush3.msra.mxu0 %v4769_v44 }
0x180d   :  { %11287 = vmatprep.subr.mxu0 %v12851_v15 }
0x180e   :  { %11288 = vmatpush3.msra.mxu0 %v4768_v26 }
0x180f   :  { %v11232_v14 = vpop.f32.mrf.mxu1  ;;  %11289 = vmatprep.subr.mxu0 %v12851_v15 }
0x1810   :  { %v4389_v50 = vadd.f32 %v11232_v14, %v10255_v42  ;;  %11290 = vmatpush3.msra.mxu0 %v4767_v28 }
0x1811   :  { %v4383_v51 = vpop.f32.mrf.mxu1  ;;  %11332 = vmatprep.subr.mxu0 %v12851_v15 }
0x1812   :  { %v4384_v41 = vadd.f32 %v10255_v42, %v4383_v51  ;;  %v4395_v25 = vmax.f32 %v4389_v50, 0.0 }
0x1814   :  { %v4394_v12 = vmax.f32 %v4384_v41, 0.0  ;;  %v10274_v41 = vld [vmem:[#allocation17 + $0x1] ss:$0 sm:$0xff] }
0x1816   :  { %11252 = vmatprep.mubr.msk.f32.mxu0 %vm2411_vm2, %v4394_v12 }
0x1817   :  { %11253 = vmatmul.mubr.msk.f32.gmra.mxu0 %vm2411_vm2, %v4395_v25  ;;  %v4576_v25 = vld [vmem:[#allocation5] sm:$0xff] }
0x1818   :  { %11291 = vmatprep.mubr.msk.f32.mxu0 %vm12852_vm3, %v12851_v15 }
0x18c9   :  { %v11251_v52 = vpop.f32.mrf.mxu0 }
0x18ca   :  { %v4502_v55 = vadd.f32 %v11251_v52, %v4279_v16  ;;  %v4670_v16 = vld [vmem:[%s14787_s17 + $0x18] sm:$0xff] }
0x18cb   :  { %v4483_v43 = vpop.f32.mrf.mxu0 }
0x18cc   :  { %v4513_v57 = vadd.f32 %v10272_v53, %v4502_v55  ;;  %v4501_v8 = vadd.f32 %v4483_v43, %v4278_v24  ;;  %v4582_v24 = vadd.f32 %v14025_v23, %v14022_v22 }
0x18ce   :  { %v4512_v58 = vadd.f32 %v10272_v53, %v4501_v8  ;;  %v4522_v59 = vsel %vm621_vm0, %v4513_v57, 0.0  ;;  %11264 = vmatmul.mubr.msk.f32.vlgmr.msra.gmra.mxu1 %vm621_vm0, %v4582_v24 }
0x18cf   :  { %4523 = vadd.xlane.f32.xlu0 %v4522_v59  ;;  %11267 = vmatpush3.msra.mxu1 %v4670_v16 }
0x18d0   :  { %v4519_v61 = vsel %vm621_vm0, %v4512_v58, 0.0  ;;  %11268 = vmatprep.subr.mxu1 %v12851_v15  ;;  %11274 = vmatprep.mubr.msk.f32.mxu1 %vm12852_vm3, %v12851_v15 }
0x18d1   :  { %4520 = vadd.xlane.f32.xlu1 %v4519_v61  ;;  %11269 = vmatpush3.msra.mxu1 %v4669_v27 }
0x18d2   :  { %11270 = vmatprep.subr.mxu1 %v12851_v15 }
0x18d7   :  { %v11254_v62 = vpop.f32.mrf.mxu0 }
0x18d9   :  { %v4493_v33 = vpop.f32.mrf.mxu0 }
0x18da   :  { %v4503_v30 = vadd.f32 %v4493_v33, %v4280_v32  ;;  %v4668_v32 = vld [vmem:[%s14787_s17 + $0x8] sm:$0xff] }
0x18db   :  { %11271 = vmatpush3.msra.mxu1 %v4668_v32 }
0x18dc   :  { %v4514_v63 = vadd.f32 %v10272_v53, %v4503_v30  ;;  %11272 = vmatprep.subr.mxu1 %v12851_v15 }
0x18dd   :  { %11273 = vmatpush3.msra.mxu1 %v4667_v37 }
0x18de   :  { %v4525_v48 = vsel %vm621_vm0, %v4514_v63, 0.0  ;;  %11300 = vmatprep.subr.mxu1 %v12851_v15 }
0x18df   :  { %4526 = vadd.xlane.f32.xlu1 %v4525_v48 }
0x1958   :  { %v4524_v0 = vpop.xlane.xlu0 %4523 }
0x1959   :  { %v4529_v54 = vmul.f32 0.03125, %v4524_v0 }
0x195a   :  { %v4521_v1 = vpop.xlane.xlu1 %4520 }
0x195b   :  { %v13997_v56 = vsub.f32 %v4513_v57, %v4529_v54  ;;  %v4528_v2 = vmul.f32 0.03125, %v4521_v1 }
0x195d   :  { %v13999_v3 = vsub.f32 %v4512_v58, %v4528_v2  ;;  %v4535_v4 = vmul.f32 %v13997_v56, %v13997_v56 }
0x195f   :  { %v4540_v46 = vsel %vm621_vm0, %v4535_v4, 0.0  ;;  %v4534_v31 = vmul.f32 %v13999_v3, %v13999_v3 }
0x1960   :  { %4541 = vadd.xlane.f32.xlu1 %v4540_v46 }
0x1961   :  { %v4537_v5 = vsel %vm621_vm0, %v4534_v31, 0.0 }
0x1962   :  { %4538 = vadd.xlane.f32.xlu0 %v4537_v5 }
0x1968   :  { %v4527_v7 = vpop.xlane.xlu1 %4526 }
0x1969   :  { %v4530_v9 = vmul.f32 0.03125, %v4527_v7 }
0x196b   :  { %v14007_v13 = vsub.f32 %v4514_v63, %v4530_v9  ;;  %v10275_v9 = vld [vmem:[#allocation19] ss:$0 sm:$0xff] }
0x196d   :  { %v4536_v60 = vmul.f32 %v14007_v13, %v14007_v13 }
0x196f   :  { %v4543_v10 = vsel %vm621_vm0, %v4536_v60, 0.0 }
0x1970   :  { %4544 = vadd.xlane.f32.xlu0 %v4543_v10  ;;  %v10281_v10 = vld [vmem:[#allocation23] ss:$0 sm:$0xff] }
0x198e   :  { %v4663_v61 = vpop.f32.mrf.mxu1 }
0x198f   :  { %v14105_v60 = vadd.f32 %v10275_v9, %v4663_v61 }
0x1990   :  { %v11265_v62 = vpop.f32.mrf.mxu1 }
0x19e9   :  { %v4542_v34 = vpop.xlane.xlu1 %4541 }
0x19ea   :  { %v4547_v35 = vmul.f32 0.03125, %v4542_v34 }
0x19eb   :  { %v4539_v36 = vpop.xlane.xlu0 %4538 }
0x19ec   :  { %v4550_v38 = vadd.f32 1e-05, %v4547_v35  ;;  %v4546_v29 = vmul.f32 0.03125, %v4539_v36  ;;  %v4867_v35 = vld [vmem:[#allocation25] sm:$0xff] }
0x19ee   :  { %11998 = vrsqrt.f32 %v4550_v38  ;;  %v4549_v40 = vadd.f32 1e-05, %v4546_v29 }
0x19f0   :  { %12000 = vrsqrt.f32 %v4549_v40 }
0x19f9   :  { %v4545_v42 = vpop.xlane.xlu0 %4544 }
0x19fa   :  { %v4548_v19 = vmul.f32 0.03125, %v4545_v42 }
0x19fb   :  { %v11999_v11 = vpop.eup %11998 }
0x19fc   :  { %v4551_v45 = vadd.f32 1e-05, %v4548_v19  ;;  %v4556_v47 = vmul.f32 %v11999_v11, %v13997_v56 }
0x19fd   :  { %v12001_v49 = vpop.eup %12000 }
0x19fe   :  { %v4555_v14 = vmul.f32 %v12001_v49, %v13999_v3  ;;  %12002 = vrsqrt.f32 %v4551_v45  ;;  %v4565_v51 = vmul.f32 %v10273_v39, %v4556_v47  ;;  %v10277_v3 = vld [vmem:[#allocation20] ss:$0 sm:$0xff] }
0x1a00   :  { %v4564_v50 = vmul.f32 %v10273_v39, %v4555_v14  ;;  %v14058_v53 = vadd.f32 %v10274_v41, %v4565_v51 }
0x1a02   :  { %v14051_v12 = vadd.f32 %v10274_v41, %v4564_v50  ;;  %v14069_v55 = vadd.f32 %v4576_v25, %v14058_v53 }
0x1a04   :  { %11292 = vmatmul.mubr.msk.f32.vlgmr.msra.gmra.mxu0 %vm621_vm0, %v14051_v12  ;;  %v14056_v52 = vadd.f32 %v4576_v25, %v14051_v12 }
0x1a05   :  { %11294 = vmatprep.mubr.msk.f32.mxu0 %vm12852_vm3, %v12851_v15 }
0x1a06   :  { %11275 = vmatmul.mubr.msk.f32.vlgmr.msra.gmra.mxu1 %vm621_vm0, %v14056_v52 }
0x1a07   :  { %11277 = vmatprep.mubr.msk.f32.mxu1 %vm12852_vm3, %v12851_v15 }
0x1a08   :  { %11295 = vmatmul.mubr.msk.f32.gmra.mxu0 %vm621_vm0, %v14058_v53 }
0x1a09   :  { %11297 = vmatprep.mubr.msk.f32.mxu0 %vm12852_vm3, %v12851_v15 }
0x1a0a   :  { %11278 = vmatmul.mubr.msk.f32.gmra.mxu1 %vm621_vm0, %v14069_v55 }
0x1a0b   :  { %v12003_v43 = vpop.eup %12002  ;;  %11280 = vmatprep.mubr.msk.f32.mxu1 %vm12852_vm3, %v12851_v15 }
0x1a0c   :  { %v4557_v57 = vmul.f32 %v12003_v43, %v14007_v13 }
0x1a0e   :  { %v4566_v8 = vmul.f32 %v10273_v39, %v4557_v57 }
0x1a10   :  { %v14078_v58 = vadd.f32 %v10274_v41, %v4566_v8 }
0x1a12   :  { %11298 = vmatmul.mubr.msk.f32.gmra.mxu0 %vm621_vm0, %v14078_v58  ;;  %v14083_v59 = vadd.f32 %v4576_v25, %v14078_v58 }
0x1a13   :  { %11338 = vmatprep.mubr.msk.f32.mxu0 %vm12852_vm3, %v12851_v15 }
0x1a14   :  { %11281 = vmatmul.mubr.msk.f32.gmra.mxu1 %vm621_vm0, %v14083_v59 }
0x1a15   :  { %11306 = vmatprep.mubr.msk.f32.mxu1 %vm12852_vm3, %v12851_v15 }
0x1ac4   :  { %v4853_v33 = vpop.f32.mrf.mxu0 }
0x1ac5   :  { %v14118_v18 = vadd.f32 %v10281_v10, %v4853_v33 }
0x1ac6   :  { %v4753_v30 = vpop.f32.mrf.mxu1  ;;  %v11293_v63 = vpop.f32.mrf.mxu0 }
0x1ac7   :  { %v14101_v13 = vadd.f32 %v10277_v3, %v4753_v30  ;;  %v4868_v30 = vld [vmem:[#allocation25 + $0x8] sm:$0xff] }
0x1ac8   :  { %v11276_v48 = vpop.f32.mrf.mxu1  ;;  %v4858_v0 = vpop.f32.mrf.mxu0 }
0x1ac9   :  { %v14112_v17 = vadd.f32 %v10281_v10, %v4858_v0 }
0x1aca   :  { %v4758_v54 = vpop.f32.mrf.mxu1  ;;  %v11296_v1 = vpop.f32.mrf.mxu0 }
0x1acb   :  { %v14096_v7 = vadd.f32 %v10277_v3, %v4758_v54 }
0x1acc   :  { %v11279_v56 = vpop.f32.mrf.mxu1 }
0x1ad2   :  { %v4863_v2 = vpop.f32.mrf.mxu0 }
0x1ad3   :  { %v14108_v6 = vadd.f32 %v10281_v10, %v4863_v2  ;;  %v10285_v2 = vld [vmem:[#allocation26] ss:$0 sm:$0xff] }
0x1ad4   :  { %v4763_v4 = vpop.f32.mrf.mxu1  ;;  %v11299_v46 = vpop.f32.mrf.mxu0 }
0x1ad5   :  { %v14091_v31 = vadd.f32 %v10277_v3, %v4763_v4 }
0x1ad6   :  { %v11282_v5 = vpop.f32.mrf.mxu1 }
0x1ad7   :  { %11301 = vmatpush3.xpose.msk.msra.mxu1 %vm743_vm1, %v14091_v31 }
0x1ad8   :  { %11302 = vmatprep.subr.mxu1 %v12851_v15 }
0x1adb   :  { %11303 = vmatpush3.xpose.msk.msra.mxu1 %vm743_vm1, %v14096_v7 }
0x1adc   :  { %11304 = vmatprep.subr.mxu1 %v12851_v15 }
0x1adf   :  { %11305 = vmatpush3.xpose.msk.msra.mxu1 %vm743_vm1, %v14101_v13 }
0x1ae0   :  { %11309 = vmatprep.subr.mxu1 %v12851_v15 }
0x1ae2   :  { %11307 = vmatmul.mubr.msk.f32.vlgmr.msra.gmra.mxu1 %vm743_vm1, %v14105_v60 }
0x1ae3   :  { %11310 = vmatpush3.msra.mxu1 %v14108_v6  ;;  %11315 = vmatprep.mubr.msk.f32.mxu1 %vm12852_vm3, %v12851_v15 }
0x1ae4   :  { %11311 = vmatprep.subr.mxu1 %v12851_v15 }
0x1ae5   :  { %11312 = vmatpush3.msra.mxu1 %v14112_v17 }
0x1ae6   :  { %11313 = vmatprep.subr.mxu1 %v12851_v15 }
0x1ae7   :  { %11314 = vmatpush3.msra.mxu1 %v14118_v18 }
0x1ae8   :  { %11318 = vmatprep.subr.mxu1 %v12851_v15 }
0x1ba2   :  { %v4957_v20 = vpop.f32.mrf.mxu1 }
0x1ba3   :  { %v4962_v21 = vsel %vm4961_vm4, %v4957_v20, -inf }
0x1ba4   :  { %4963 = vmax.xlane.f32.xlu1 %v4962_v21  ;;  %v11308_v24 = vpop.f32.mrf.mxu1 }
0x1bb5   :  { %5126 = vrot.lane.b32.xlu1 %v14091_v31, %s12842_s8 }
0x1bb9   :  { %5122 = vrot.lane.b32.xlu1 %v14101_v13, %s12842_s8 }
0x1bbd   :  { %5120 = vrot.lane.b32.xlu1 %v14105_v60, %s12842_s8 }
0x1c2d   :  { %v4964_v16 = vpop.xlane.xlu1 %4963 }
0x1c2e   :  { %v4965_v44 = vsub.f32 %v4957_v20, %v4964_v16 }
0x1c30   :  { %v4966_v26 = vmul.f32 1.442695, %v4965_v44 }
0x1c31   :  { %v5127_v36 = vpop.permute.xlu1 %5126 }
0x1c32   :  { %12004 = vpow2.f32 %v4966_v26 }
0x1c35   :  { %v5123_v42 = vpop.permute.xlu1 %5122 }
0x1c39   :  { %v5121_v19 = vpop.permute.xlu1 %5120 }
0x1c3f   :  { %v12005_v27 = vpop.eup %12004 }
0x1c40   :  { %v4968_v28 = vsel %vm4961_vm4, %v12005_v27, 0.0 }
0x1c41   :  { %4969 = vadd.xlane.f32.xlu0 %v4968_v28 }
0x1c57   :  { %5124 = vrot.lane.b32.xlu0 %v14096_v7, %s12842_s8 }
0x1cca   :  { %v4970_v32 = vpop.xlane.xlu0 %4969 }
0x1ccb   :  { %12006 = vrcp.f32 %v4970_v32 }
0x1cce   :  { %v5125_v40 = vpop.permute.xlu0 %5124 }
0x1cd8   :  { %v12007_v37 = vpop.eup %12006 }
0x1cd9   :  { %v4972_v34 = vmul.f32 %v12007_v37, %v12005_v27 }
0x1cdb   :  { %11316 = vmatmul.mubr.msk.f32.vlgmr.msra.gmra.mxu1 %vm4961_vm4, %v4972_v34 }
0x1cdc   :  { %11319 = vmatpush3.msra.mxu1 %v4867_v35  ;;  %11320 = vmatprep.mubr.msk.f32.mxu1 %vm12852_vm3, %v12851_v15 }
0x1cdd   :  { %11323 = vmatprep.subr.mxu1 %v12851_v15 }
0x1d9b   :  { %v5042_v38 = vpop.f32.mrf.mxu1 }
0x1d9c   :  { %11321 = vmatmul.mubr.msk.f32.vlgmr.msra.gmra.mxu1 %vm743_vm1, %v5042_v38 }
0x1d9d   :  { %11324 = vmatpush3.xpose.msk.msra.mxu1 %vm743_vm1, %v5127_v36  ;;  %v11317_v29 = vpop.f32.mrf.mxu1  ;;  %11329 = vmatprep.mubr.msk.f32.mxu1 %vm12852_vm3, %v12851_v15 }
0x1d9e   :  { %11325 = vmatprep.subr.mxu1 %v12851_v15 }
0x1da1   :  { %11326 = vmatpush3.xpose.msk.msra.mxu1 %vm743_vm1, %v5125_v40 }
0x1da2   :  { %11327 = vmatprep.subr.mxu1 %v12851_v15 }
0x1da5   :  { %11328 = vmatpush3.xpose.msk.msra.mxu1 %vm743_vm1, %v5123_v42 }
0x1da6   :  { %11355 = vmatprep.subr.mxu1 %v12851_v15 }
0x1da8   :  { %11330 = vmatmul.mubr.msk.f32.vlgmr.msra.gmra.mxu1 %vm743_vm1, %v5121_v19 }
0x1da9   :  { %11361 = vmatprep.mubr.msk.f32.mxu1 %vm12852_vm3, %v12851_v15 }
0x1e5c   :  { %v5115_v11 = vpop.f32.mrf.mxu1 }
0x1e5d   :  { %v5119_v3 = vadd.f32 %v10285_v2, %v5115_v11 }
0x1e5e   :  { %v11322_v45 = vpop.f32.mrf.mxu1 }
0x1e68   :  { %v5202_v47 = vpop.f32.mrf.mxu1 }
0x1e69   :  { %v5206_v49 = vsel %vm4961_vm4, %v5202_v47, -inf }
0x1e6a   :  { %5207 = vmax.xlane.f32.xlu0 %v5206_v49  ;;  %v11331_v39 = vpop.f32.mrf.mxu1 }
0x1e80   :  { %5224 = vrot.lane.b32.xlu0 %v14108_v6, %s12842_s8 }
0x1e84   :  { %5220 = vrot.lane.b32.xlu0 %v14118_v18, %s12842_s8 }
0x1e88   :  { %5380 = vrot.lane.b32.xlu0 %v14096_v7, %s12845_s10 }
0x1e8c   :  { %5376 = vrot.lane.b32.xlu0 %v14105_v60, %s12845_s10 }
0x1ef3   :  { %v5208_v14 = vpop.xlane.xlu0 %5207 }
0x1ef4   :  { %v5209_v50 = vsub.f32 %v5202_v47, %v5208_v14 }
0x1ef6   :  { %v5210_v51 = vmul.f32 1.442695, %v5209_v50 }
0x1ef7   :  { %v5225_v41 = vpop.permute.xlu0 %5224 }
0x1ef8   :  { %12008 = vpow2.f32 %v5210_v51  ;;  %11333 = vmatpush3.msra.mxu0 %v5225_v41 }
0x1ef9   :  { %11334 = vmatprep.subr.mxu0 %v12851_v15 }
0x1efb   :  { %v5221_v61 = vpop.permute.xlu0 %5220 }
0x1eff   :  { %v5381_v54 = vpop.permute.xlu0 %5380 }
0x1f03   :  { %v5377_v56 = vpop.permute.xlu0 %5376 }
0x1f05   :  { %v12009_v25 = vpop.eup %12008 }
0x1f06   :  { %v5212_v43 = vsel %vm4961_vm4, %v12009_v25, 0.0 }
0x1f07   :  { %5213 = vadd.xlane.f32.xlu1 %v5212_v43 }
0x1f18   :  { %5222 = vrot.lane.b32.xlu1 %v14112_v17, %s12842_s8 }
0x1f1c   :  { %5382 = vrot.lane.b32.xlu1 %v14091_v31, %s12845_s10 }
0x1f20   :  { %5378 = vrot.lane.b32.xlu1 %v14101_v13, %s12845_s10 }
0x1f90   :  { %v5214_v57 = vpop.xlane.xlu1 %5213 }
0x1f91   :  { %12010 = vrcp.f32 %v5214_v57 }
0x1f94   :  { %v5223_v8 = vpop.permute.xlu1 %5222 }
0x1f95   :  { %11335 = vmatpush3.msra.mxu0 %v5223_v8  ;;  %v4870_v8 = vld [vmem:[#allocation25 + $0x18] sm:$0xff] }
0x1f96   :  { %11336 = vmatprep.subr.mxu0 %v12851_v15 }
0x1f97   :  { %11337 = vmatpush3.msra.mxu0 %v5221_v61 }
0x1f98   :  { %11341 = vmatprep.subr.mxu0 %v12851_v15  ;;  %v5383_v48 = vpop.permute.xlu1 %5382 }
0x1f9c   :  { %v5379_v1 = vpop.permute.xlu1 %5378 }
0x1f9e   :  { %v12011_v62 = vpop.eup %12010 }
0x1f9f   :  { %v5216_v33 = vmul.f32 %v12011_v62, %v12009_v25 }
0x1fa1   :  { %11339 = vmatmul.mubr.msk.f32.vlgmr.msra.gmra.mxu0 %vm4961_vm4, %v5216_v33 }
0x1fa2   :  { %11342 = vmatpush3.msra.mxu0 %v4868_v30  ;;  %11343 = vmatprep.mubr.msk.f32.mxu0 %vm12852_vm3, %v12851_v15 }
0x1fa3   :  { %11346 = vmatprep.subr.mxu0 %v12851_v15 }
0x2061   :  { %v5298_v63 = vpop.f32.mrf.mxu0 }
0x2062   :  { %11344 = vmatmul.mubr.msk.f32.vlgmr.msra.gmra.mxu0 %vm743_vm1, %v5298_v63 }
0x2063   :  { %11347 = vmatpush3.xpose.msk.msra.mxu0 %vm743_vm1, %v5383_v48  ;;  %v11340_v0 = vpop.f32.mrf.mxu0  ;;  %11352 = vmatprep.mubr.msk.f32.mxu0 %vm12852_vm3, %v12851_v15 }
0x2064   :  { %11348 = vmatprep.subr.mxu0 %v12851_v15 }
0x2067   :  { %11349 = vmatpush3.xpose.msk.msra.mxu0 %vm743_vm1, %v5381_v54 }
0x2068   :  { %11350 = vmatprep.subr.mxu0 %v12851_v15 }
0x206b   :  { %11351 = vmatpush3.xpose.msk.msra.mxu0 %vm743_vm1, %v5379_v1 }
0x206c   :  { %11378 = vmatprep.subr.mxu0 %v12851_v15 }
0x206e   :  { %11353 = vmatmul.mubr.msk.f32.vlgmr.msra.gmra.mxu0 %vm743_vm1, %v5377_v56 }
0x206f   :  { %11384 = vmatprep.mubr.msk.f32.mxu0 %vm12852_vm3, %v12851_v15 }
0x2122   :  { %v5371_v4 = vpop.f32.mrf.mxu0 }
0x2123   :  { %v5375_v46 = vadd.f32 %v5371_v4, %v5119_v3  ;;  %v6000_v3 = vld [vmem:[#allocation32 + $0x18] sm:$0xff] }
0x2124   :  { %v11345_v5 = vpop.f32.mrf.mxu0  ;;  %v5916_v4 = vld [vmem:[%s14788_s23 + $0x18] sm:$0xff] }
0x2125   :  { %v5915_v5 = vld [vmem:[%s14788_s23 + $0x10] sm:$0xff] }
0x212e   :  { %v5458_v9 = vpop.f32.mrf.mxu0 }
0x212f   :  { %v5462_v10 = vsel %vm4961_vm4, %v5458_v9, -inf }
0x2130   :  { %5463 = vmax.xlane.f32.xlu1 %v5462_v10  ;;  %v11354_v20 = vpop.f32.mrf.mxu0  ;;  %v5997_v10 = vld [vmem:[#allocation32] sm:$0xff] }
0x2131   :  { %v5913_v20 = vld [vmem:[%s14788_s23] sm:$0xff] }
0x2141   :  { %5475 = vrot.lane.b32.xlu1 %v14112_v17, %s12845_s10 }
0x2145   :  { %5473 = vrot.lane.b32.xlu1 %v14118_v18, %s12845_s10 }
0x2149   :  { %5633 = vrot.lane.b32.xlu1 %v14096_v7, %s12848_s4 }
0x214d   :  { %5629 = vrot.lane.b32.xlu1 %v14105_v60, %s12848_s4 }
0x21b9   :  { %v5464_v21 = vpop.xlane.xlu1 %5463 }
0x21ba   :  { %v5465_v24 = vsub.f32 %v5458_v9, %v5464_v21  ;;  %v5914_v9 = vld [vmem:[%s14788_s23 + $0x8] sm:$0xff] }
0x21bc   :  { %v5466_v16 = vmul.f32 1.442695, %v5465_v24 }
0x21bd   :  { %v5476_v60 = vpop.permute.xlu1 %5475 }
0x21be   :  { %12012 = vpow2.f32 %v5466_v16 }
0x21c1   :  { %v5474_v28 = vpop.permute.xlu1 %5473 }
0x21c5   :  { %v5634_v36 = vpop.permute.xlu1 %5633 }
0x21c9   :  { %v5630_v29 = vpop.permute.xlu1 %5629 }
0x21cb   :  { %v12013_v44 = vpop.eup %12012 }
0x21cc   :  { %v5468_v26 = vsel %vm4961_vm4, %v12013_v44, 0.0 }
0x21cd   :  { %5469 = vadd.xlane.f32.xlu0 %v5468_v26  ;;  %v10310_v26 = vld [vmem:[#allocation28] ss:$0 sm:$0xff] }
0x21e3   :  { %5477 = vrot.lane.b32.xlu0 %v14108_v6, %s12845_s10 }
0x21e7   :  { %5635 = vrot.lane.b32.xlu0 %v14091_v31, %s12848_s4  ;;  %v4869_v31 = vld [vmem:[#allocation25 + $0x10] sm:$0xff] }
0x21eb   :  { %5631 = vrot.lane.b32.xlu0 %v14101_v13, %s12848_s4 }
0x2256   :  { %v5470_v7 = vpop.xlane.xlu0 %5469 }
0x2257   :  { %12014 = vrcp.f32 %v5470_v7 }
0x225a   :  { %v5478_v27 = vpop.permute.xlu0 %5477 }
0x225b   :  { %11356 = vmatpush3.msra.mxu1 %v5478_v27 }
0x225c   :  { %11357 = vmatprep.subr.mxu1 %v12851_v15 }
0x225d   :  { %11358 = vmatpush3.msra.mxu1 %v5476_v60  ;;  %v10311_v60 = vld [vmem:[#allocation29] ss:$0 sm:$0xff] }
0x225e   :  { %11359 = vmatprep.subr.mxu1 %v12851_v15  ;;  %v5636_v34 = vpop.permute.xlu0 %5635 }
0x225f   :  { %11360 = vmatpush3.msra.mxu1 %v5474_v28 }
0x2260   :  { %11364 = vmatprep.subr.mxu1 %v12851_v15 }
0x2262   :  { %v5632_v38 = vpop.permute.xlu0 %5631 }
0x2264   :  { %v12015_v32 = vpop.eup %12014 }
0x2265   :  { %v5472_v37 = vmul.f32 %v12015_v32, %v12013_v44 }
0x2267   :  { %11362 = vmatmul.mubr.msk.f32.vlgmr.msra.gmra.mxu1 %vm4961_vm4, %v5472_v37  ;;  %v10314_v37 = vld [vmem:[#allocation34] ss:$0 sm:$0xff] }
0x2268   :  { %11365 = vmatpush3.msra.mxu1 %v4869_v31  ;;  %11366 = vmatprep.mubr.msk.f32.mxu1 %vm12852_vm3, %v12851_v15 }
0x2269   :  { %11369 = vmatprep.subr.mxu1 %v12851_v15 }
0x2327   :  { %v5551_v13 = vpop.f32.mrf.mxu1 }
0x2328   :  { %11367 = vmatmul.mubr.msk.f32.vlgmr.msra.gmra.mxu1 %vm743_vm1, %v5551_v13  ;;  %v10312_v13 = vld [vmem:[#allocation31] ss:$0 sm:$0xff] }
0x2329   :  { %11370 = vmatpush3.xpose.msk.msra.mxu1 %vm743_vm1, %v5636_v34  ;;  %v11363_v35 = vpop.f32.mrf.mxu1  ;;  %11375 = vmatprep.mubr.msk.f32.mxu1 %vm12852_vm3, %v12851_v15 }
0x232a   :  { %11371 = vmatprep.subr.mxu1 %v12851_v15 }
0x232d   :  { %11372 = vmatpush3.xpose.msk.msra.mxu1 %vm743_vm1, %v5634_v36 }
0x232e   :  { %11373 = vmatprep.subr.mxu1 %v12851_v15 }
0x2331   :  { %11374 = vmatpush3.xpose.msk.msra.mxu1 %vm743_vm1, %v5632_v38 }
0x2332   :  { %11403 = vmatprep.subr.mxu1 %v12851_v15 }
0x2334   :  { %11376 = vmatmul.mubr.msk.f32.vlgmr.msra.gmra.mxu1 %vm743_vm1, %v5630_v29 }
0x2335   :  { %11411 = vmatprep.mubr.msk.f32.mxu1 %vm12852_vm3, %v12851_v15  ;;  %11404 = vmatpush3.msra.mxu1 %v6000_v3 }
0x2336   :  { %11405 = vmatprep.subr.mxu1 %v12851_v15 }
0x23e8   :  { %v5624_v40 = vpop.f32.mrf.mxu1 }
0x23e9   :  { %v5628_v42 = vadd.f32 %v5624_v40, %v5375_v46  ;;  %v5999_v46 = vld [vmem:[#allocation32 + $0x10] sm:$0xff] }
0x23ea   :  { %v11368_v19 = vpop.f32.mrf.mxu1  ;;  %11406 = vmatpush3.msra.mxu1 %v5999_v46  ;;  %v6082_v46 = vld [vmem:[#allocation35 + $0x8] sm:$0xff] }
0x23eb   :  { %11407 = vmatprep.subr.mxu1 %v12851_v15 }
0x23f4   :  { %v5711_v11 = vpop.f32.mrf.mxu1 }
0x23f5   :  { %v5715_v45 = vsel %vm4961_vm4, %v5711_v11, -inf }
0x23f6   :  { %5716 = vmax.xlane.f32.xlu0 %v5715_v45  ;;  %v11377_v47 = vpop.f32.mrf.mxu1 }
0x240c   :  { %5730 = vrot.lane.b32.xlu0 %v14108_v6, %s12848_s4 }
0x2410   :  { %5726 = vrot.lane.b32.xlu0 %v14118_v18, %s12848_s4 }
0x247f   :  { %v5717_v49 = vpop.xlane.xlu0 %5716 }
0x2480   :  { %v5718_v39 = vsub.f32 %v5711_v11, %v5717_v49 }
0x2482   :  { %v5719_v14 = vmul.f32 1.442695, %v5718_v39 }
0x2483   :  { %v5731_v50 = vpop.permute.xlu0 %5730 }
0x2484   :  { %12016 = vpow2.f32 %v5719_v14  ;;  %11379 = vmatpush3.msra.mxu0 %v5731_v50 }
0x2485   :  { %11380 = vmatprep.subr.mxu0 %v12851_v15 }
0x2487   :  { %v5727_v18 = vpop.permute.xlu0 %5726 }
0x2491   :  { %v12017_v51 = vpop.eup %12016 }
0x2492   :  { %v5721_v41 = vsel %vm4961_vm4, %v12017_v51, 0.0 }
0x2493   :  { %5722 = vadd.xlane.f32.xlu1 %v5721_v41 }
0x24a4   :  { %5728 = vrot.lane.b32.xlu1 %v14112_v17, %s12848_s4 }
0x251c   :  { %v5723_v25 = vpop.xlane.xlu1 %5722 }
0x251d   :  { %12018 = vrcp.f32 %v5723_v25 }
0x2520   :  { %v5729_v6 = vpop.permute.xlu1 %5728 }
0x2521   :  { %11381 = vmatpush3.msra.mxu0 %v5729_v6  ;;  %v6081_v6 = vld [vmem:[#allocation35] sm:$0xff] }
0x2522   :  { %11382 = vmatprep.subr.mxu0 %v12851_v15 }
0x2523   :  { %11383 = vmatpush3.msra.mxu0 %v5727_v18 }
0x2524   :  { %11387 = vmatprep.subr.mxu0 %v12851_v15 }
0x252a   :  { %v12019_v43 = vpop.eup %12018 }
0x252b   :  { %v5725_v57 = vmul.f32 %v12019_v43, %v12017_v51 }
0x252d   :  { %11385 = vmatmul.mubr.msk.f32.vlgmr.msra.gmra.mxu0 %vm4961_vm4, %v5725_v57 }
0x252e   :  { %11388 = vmatpush3.msra.mxu0 %v4870_v8  ;;  %11389 = vmatprep.mubr.msk.f32.mxu0 %vm12852_vm3, %v12851_v15 }
0x252f   :  { %11392 = vmatprep.subr.mxu0 %v12851_v15 }
0x25ed   :  { %v5804_v17 = vpop.f32.mrf.mxu0 }
0x25ee   :  { %11390 = vmatmul.mubr.msk.f32.vlgmr.msra.gmra.mxu0 %vm743_vm1, %v5804_v17 }
0x25ef   :  { %v11386_v61 = vpop.f32.mrf.mxu0  ;;  %11400 = vmatprep.mubr.msk.f32.mxu0 %vm12852_vm3, %v12851_v15  ;;  %11393 = vmatpush3.msra.mxu0 %v5916_v4 }
0x25f0   :  { %11394 = vmatprep.subr.mxu0 %v12851_v15 }
0x25f1   :  { %11395 = vmatpush3.msra.mxu0 %v5915_v5 }
0x25f2   :  { %11396 = vmatprep.subr.mxu0 %v12851_v15 }
0x25f3   :  { %11397 = vmatpush3.msra.mxu0 %v5914_v9 }
0x25f4   :  { %11398 = vmatprep.subr.mxu0 %v12851_v15 }
0x25f5   :  { %11399 = vmatpush3.msra.mxu0 %v5913_v20 }
0x25f6   :  { %11414 = vmatprep.subr.mxu0 %v12851_v15 }
0x26ae   :  { %v5877_v62 = vpop.f32.mrf.mxu0 }
0x26af   :  { %v5881_v33 = vadd.f32 %v5877_v62, %v5628_v42 }
0x26b0   :  { %v11391_v30 = vpop.f32.mrf.mxu0 }
0x26b1   :  { %v5882_v63 = vadd.f32 %v5881_v33, %v14022_v22  ;;  %v5998_v22 = vld [vmem:[#allocation32 + $0x8] sm:$0xff] }
0x26b2   :  { %11408 = vmatpush3.msra.mxu1 %v5998_v22 }
0x26b3   :  { %v5885_v48 = vsel %vm621_vm0, %v5882_v63, 0.0  ;;  %11409 = vmatprep.subr.mxu1 %v12851_v15 }
0x26b4   :  { %5886 = vadd.xlane.f32.xlu1 %v5885_v48  ;;  %11410 = vmatpush3.msra.mxu1 %v5997_v10 }
0x26b5   :  { %11419 = vmatprep.subr.mxu1 %v12851_v15 }
0x273d   :  { %v5887_v0 = vpop.xlane.xlu1 %5886 }
0x273e   :  { %v5888_v54 = vmul.f32 0.03125, %v5887_v0 }
0x2740   :  { %v5889_v1 = vsub.f32 %v5882_v63, %v5888_v54 }
0x2742   :  { %v5890_v56 = vmul.f32 %v5889_v1, %v5889_v1 }
0x2744   :  { %v5891_v2 = vsel %vm621_vm0, %v5890_v56, 0.0 }
0x2745   :  { %5892 = vadd.xlane.f32.xlu0 %v5891_v2 }
0x27ce   :  { %v5893_v21 = vpop.xlane.xlu0 %5892 }
0x27cf   :  { %v5894_v24 = vmul.f32 0.03125, %v5893_v21 }
0x27d1   :  { %v5895_v16 = vadd.f32 1e-05, %v5894_v24 }
0x27d3   :  { %12020 = vrsqrt.f32 %v5895_v16 }
0x27e0   :  { %v12021_v44 = vpop.eup %12020 }
0x27e1   :  { %v5897_v7 = vmul.f32 %v12021_v44, %v5889_v1 }
0x27e3   :  { %v5904_v27 = vmul.f32 %v10310_v26, %v5897_v7  ;;  %v10316_v7 = vld [vmem:[#allocation37] ss:$0 sm:$0xff] }
0x27e5   :  { %v14253_v28 = vadd.f32 %v10311_v60, %v5904_v27 }
0x27e7   :  { %11412 = vmatmul.mubr.msk.f32.vlgmr.msra.gmra.mxu1 %vm621_vm0, %v14253_v28  ;;  %v5912_v32 = vadd.f32 %v14253_v28, %v14025_v23 }
0x27e8   :  { %11421 = vmatprep.mubr.msk.f32.mxu1 %vm12852_vm3, %v12851_v15 }
0x27e9   :  { %11401 = vmatmul.mubr.msk.f32.vlgmr.msra.gmra.mxu0 %vm621_vm0, %v5912_v32 }
0x27ea   :  { %11416 = vmatprep.mubr.msk.f32.mxu0 %vm12852_vm3, %v12851_v15 }
0x28a7   :  { %v6077_v31 = vpop.f32.mrf.mxu1 }
0x28a8   :  { %v14264_v34 = vadd.f32 %v10314_v37, %v6077_v31 }
0x28a9   :  { %v5993_v35 = vpop.f32.mrf.mxu0  ;;  %v11413_v36 = vpop.f32.mrf.mxu1 }
0x28aa   :  { %v14266_v38 = vadd.f32 %v10312_v13, %v5993_v35  ;;  %11420 = vmatpush3.msra.mxu1 %v14264_v34 }
0x28ab   :  { %v11402_v23 = vpop.f32.mrf.mxu0  ;;  %11429 = vmatprep.subr.mxu1 %v12851_v15 }
0x28ac   :  { %6094 = vrot.lane.b32.xlu0 %v14266_v38, %s12840_s18 }
0x28b0   :  { %6328 = vrot.lane.b32.xlu0 %v14266_v38, %s12842_s8 }
0x291e   :  { %v6095_v29 = vpop.permute.xlu0 %6094 }
0x291f   :  { %11415 = vmatpush3.xpose.msk.msra.mxu0 %vm743_vm1, %v6095_v29  ;;  %v6083_v29 = vld [vmem:[#allocation35 + $0x10] sm:$0xff] }
0x2920   :  { %11424 = vmatprep.subr.mxu0 %v12851_v15 }
0x2922   :  { %11417 = vmatmul.mubr.msk.f32.vlgmr.msra.gmra.mxu0 %vm743_vm1, %v14266_v38  ;;  %v6329_v25 = vpop.permute.xlu0 %6328 }
0x2923   :  { %11426 = vmatprep.mubr.msk.f32.mxu0 %vm12852_vm3, %v12851_v15  ;;  %11425 = vmatpush3.msra.mxu0 %v6081_v6 }
0x2924   :  { %11434 = vmatprep.subr.mxu0 %v12851_v15 }
0x29e2   :  { %v6166_v40 = vpop.f32.mrf.mxu0 }
0x29e3   :  { %v6170_v42 = vsel %vm743_vm1, %v6166_v40, -inf }
0x29e4   :  { %6171 = vmax.xlane.f32.xlu1 %v6170_v42  ;;  %v11418_v19 = vpop.f32.mrf.mxu0 }
0x2a6d   :  { %v6172_v11 = vpop.xlane.xlu1 %6171 }
0x2a6e   :  { %v6173_v45 = vsub.f32 %v6166_v40, %v6172_v11 }
0x2a70   :  { %v6174_v47 = vmul.f32 1.442695, %v6173_v45 }
0x2a72   :  { %12022 = vpow2.f32 %v6174_v47 }
0x2a7f   :  { %v12023_v49 = vpop.eup %12022 }
0x2a80   :  { %v6176_v39 = vsel %vm743_vm1, %v12023_v49, 0.0 }
0x2a81   :  { %6177 = vadd.xlane.f32.xlu1 %v6176_v39 }
0x2a92   :  { %6330 = vrot.lane.b32.xlu1 %v14266_v38, %s12841_s2 }
0x2b0a   :  { %v6178_v14 = vpop.xlane.xlu1 %6177 }
0x2b0b   :  { %12024 = vrcp.f32 %v6178_v14 }
0x2b0e   :  { %v6331_v41 = vpop.permute.xlu1 %6330 }
0x2b18   :  { %v12025_v50 = vpop.eup %12024 }
0x2b19   :  { %v6180_v51 = vmul.f32 %v12025_v50, %v12023_v49 }
0x2b1b   :  { %11422 = vmatmul.mubr.msk.f32.vlgmr.msra.gmra.mxu1 %vm743_vm1, %v6180_v51 }
0x2b1c   :  { %11430 = vmatpush3.xpose.msk.msra.mxu1 %vm743_vm1, %v6331_v41  ;;  %11431 = vmatprep.mubr.msk.f32.mxu1 %vm12852_vm3, %v12851_v15  ;;  %v6084_v41 = vld [vmem:[#allocation35 + $0x18] sm:$0xff] }
0x2b1d   :  { %11439 = vmatprep.subr.mxu1 %v12851_v15 }
0x2b1f   :  { %11432 = vmatmul.mubr.msk.f32.vlgmr.msra.gmra.mxu1 %vm743_vm1, %v6329_v25 }
0x2b20   :  { %11441 = vmatprep.mubr.msk.f32.mxu1 %vm12852_vm3, %v12851_v15  ;;  %11440 = vmatpush3.msra.mxu1 %v6082_v46  ;;  %v7168_v46 = vld [vmem:[%s14789_s21 + $0x38] sm:$0xff] }
0x2b21   :  { %11449 = vmatprep.subr.mxu1 %v12851_v15 }
0x2bdb   :  { %v6250_v18 = vpop.f32.mrf.mxu1 }
0x2bdc   :  { %11427 = vmatmul.mubr.msk.f32.vlgmr.msra.gmra.mxu0 %vm743_vm1, %v6250_v18 }
0x2bdd   :  { %v11423_v43 = vpop.f32.mrf.mxu1  ;;  %11436 = vmatprep.mubr.msk.f32.mxu0 %vm12852_vm3, %v12851_v15 }
0x2bdf   :  { %v6402_v57 = vpop.f32.mrf.mxu1 }
0x2be0   :  { %v6406_v8 = vsel %vm743_vm1, %v6402_v57, -inf }
0x2be1   :  { %6407 = vmax.xlane.f32.xlu0 %v6406_v8  ;;  %v11433_v17 = vpop.f32.mrf.mxu1 }
0x2bf7   :  { %6418 = vrot.lane.b32.xlu0 %v14264_v34, %s12842_s8 }
0x2bfb   :  { %6568 = vrot.lane.b32.xlu0 %v14266_v38, %s12845_s10 }
0x2c6a   :  { %v6408_v61 = vpop.xlane.xlu0 %6407 }
0x2c6b   :  { %v6409_v62 = vsub.f32 %v6402_v57, %v6408_v61 }
0x2c6d   :  { %v6410_v33 = vmul.f32 1.442695, %v6409_v62 }
0x2c6e   :  { %v6419_v30 = vpop.permute.xlu0 %6418 }
0x2c6f   :  { %12026 = vpow2.f32 %v6410_v33  ;;  %11435 = vmatpush3.msra.mxu0 %v6419_v30 }
0x2c70   :  { %11444 = vmatprep.subr.mxu0 %v12851_v15 }
0x2c72   :  { %v6569_v4 = vpop.permute.xlu0 %6568 }
0x2c7c   :  { %v12027_v63 = vpop.eup %12026 }
0x2c7d   :  { %v6412_v48 = vsel %vm743_vm1, %v12027_v63, 0.0 }
0x2c7e   :  { %6413 = vadd.xlane.f32.xlu1 %v6412_v48 }
0x2c8f   :  { %6570 = vrot.lane.b32.xlu1 %v14266_v38, %s12844_s7 }
0x2c9c   :  { %v6323_v0 = vpop.f32.mrf.mxu0 }
0x2c9d   :  { %v6327_v60 = vadd.f32 %v10316_v7, %v6323_v0 }
0x2c9e   :  { %v11428_v54 = vpop.f32.mrf.mxu0 }
0x2d07   :  { %v6414_v1 = vpop.xlane.xlu1 %6413 }
0x2d08   :  { %12028 = vrcp.f32 %v6414_v1 }
0x2d0b   :  { %v6571_v3 = vpop.permute.xlu1 %6570 }
0x2d15   :  { %v12029_v56 = vpop.eup %12028 }
0x2d16   :  { %v6416_v2 = vmul.f32 %v12029_v56, %v12027_v63 }
0x2d18   :  { %11437 = vmatmul.mubr.msk.f32.vlgmr.msra.gmra.mxu0 %vm743_vm1, %v6416_v2  ;;  %v7079_v2 = vld [vmem:[#allocation41 + $0x18] sm:$0xff] }
0x2d19   :  { %11445 = vmatpush3.xpose.msk.msra.mxu0 %vm743_vm1, %v6571_v3  ;;  %11446 = vmatprep.mubr.msk.f32.mxu0 %vm12852_vm3, %v12851_v15  ;;  %v7078_v3 = vld [vmem:[#allocation41 + $0x10] sm:$0xff] }
0x2d1a   :  { %11454 = vmatprep.subr.mxu0 %v12851_v15 }
0x2d1c   :  { %11447 = vmatmul.mubr.msk.f32.vlgmr.msra.gmra.mxu0 %vm743_vm1, %v6569_v4  ;;  %v7076_v4 = vld [vmem:[#allocation41] sm:$0xff] }
0x2d1d   :  { %11456 = vmatprep.mubr.msk.f32.mxu0 %vm12852_vm3, %v12851_v15  ;;  %11455 = vmatpush3.msra.mxu0 %v6083_v29  ;;  %v7464_v29 = vld [vmem:[#allocation22 + $0x38] sm:$0xff] }
0x2d1e   :  { %11464 = vmatprep.subr.mxu0 %v12851_v15 }
0x2dd8   :  { %v6490_v5 = vpop.f32.mrf.mxu0 }
0x2dd9   :  { %11442 = vmatmul.mubr.msk.f32.vlgmr.msra.gmra.mxu1 %vm743_vm1, %v6490_v5  ;;  %v7167_v5 = vld [vmem:[%s14789_s21 + $0x30] sm:$0xff] }
0x2dda   :  { %v11438_v22 = vpop.f32.mrf.mxu0  ;;  %11451 = vmatprep.mubr.msk.f32.mxu1 %vm12852_vm3, %v12851_v15 }
0x2ddb   :  { %v7166_v22 = vld [vmem:[%s14789_s21 + $0x28] sm:$0xff] }
0x2ddc   :  { %v6642_v9 = vpop.f32.mrf.mxu0 }
0x2ddd   :  { %v6646_v10 = vsel %vm743_vm1, %v6642_v9, -inf }
0x2dde   :  { %6647 = vmax.xlane.f32.xlu1 %v6646_v10  ;;  %v11448_v20 = vpop.f32.mrf.mxu0  ;;  %v7164_v10 = vld [vmem:[%s14789_s21 + $0x18] sm:$0xff] }
0x2ddf   :  { %v7163_v20 = vld [vmem:[%s14789_s21 + $0x10] sm:$0xff] }
0x2def   :  { %6809 = vrot.lane.b32.xlu1 %v14266_v38, %s12847_s20 }
0x2df3   :  { %6807 = vrot.lane.b32.xlu1 %v14266_v38, %s12848_s4 }
0x2e67   :  { %v6648_v21 = vpop.xlane.xlu1 %6647 }
0x2e68   :  { %v6649_v24 = vsub.f32 %v6642_v9, %v6648_v21  ;;  %v7165_v9 = vld [vmem:[%s14789_s21 + $0x20] sm:$0xff] }
0x2e6a   :  { %v6650_v16 = vmul.f32 1.442695, %v6649_v24 }
0x2e6b   :  { %v6810_v36 = vpop.permute.xlu1 %6809 }
0x2e6c   :  { %12030 = vpow2.f32 %v6650_v16 }
0x2e6f   :  { %v6808_v23 = vpop.permute.xlu1 %6807 }
0x2e79   :  { %v12031_v44 = vpop.eup %12030 }
0x2e7a   :  { %v6652_v26 = vsel %vm743_vm1, %v12031_v44, 0.0 }
0x2e7b   :  { %6653 = vadd.xlane.f32.xlu0 %v6652_v26  ;;  %v10333_v26 = vld [vmem:[#allocation38] ss:$0 sm:$0xff] }
0x2e91   :  { %6657 = vrot.lane.b32.xlu0 %v14264_v34, %s12845_s10 }
0x2e99   :  { %v6563_v27 = vpop.f32.mrf.mxu1 }
0x2e9a   :  { %v6567_v32 = vadd.f32 %v6563_v27, %v6327_v60  ;;  %v10334_v60 = vld [vmem:[#allocation40] ss:$0 sm:$0xff] }
0x2e9b   :  { %v11443_v37 = vpop.f32.mrf.mxu1 }
0x2e9c   :  { %v7162_v37 = vld [vmem:[%s14789_s21 + $0x8] sm:$0xff] }
0x2f04   :  { %v6654_v31 = vpop.xlane.xlu0 %6653 }
0x2f05   :  { %12032 = vrcp.f32 %v6654_v31  ;;  %v7161_v31 = vld [vmem:[%s14789_s21] sm:$0xff] }
0x2f08   :  { %v6658_v13 = vpop.permute.xlu0 %6657 }
0x2f09   :  { %11450 = vmatpush3.msra.mxu1 %v6658_v13  ;;  %v10335_v13 = vld [vmem:[#allocation43] ss:$0 sm:$0xff] }
0x2f0a   :  { %11459 = vmatprep.subr.mxu1 %v12851_v15 }
0x2f12   :  { %v12033_v35 = vpop.eup %12032 }
0x2f13   :  { %v6656_v38 = vmul.f32 %v12033_v35, %v12031_v44 }
0x2f15   :  { %11452 = vmatmul.mubr.msk.f32.vlgmr.msra.gmra.mxu1 %vm743_vm1, %v6656_v38 }
0x2f16   :  { %11460 = vmatpush3.xpose.msk.msra.mxu1 %vm743_vm1, %v6810_v36  ;;  %11461 = vmatprep.mubr.msk.f32.mxu1 %vm12852_vm3, %v12851_v15 }
0x2f17   :  { %11469 = vmatprep.subr.mxu1 %v12851_v15 }
0x2f19   :  { %11462 = vmatmul.mubr.msk.f32.vlgmr.msra.gmra.mxu1 %vm743_vm1, %v6808_v23 }
0x2f1a   :  { %11471 = vmatprep.mubr.msk.f32.mxu1 %vm12852_vm3, %v12851_v15  ;;  %11470 = vmatpush3.msra.mxu1 %v6084_v41  ;;  %v10355_v41 = vld [vmem:[#allocation23 + $0x1] ss:$0 sm:$0xff] }
0x2f1b   :  { %11485 = vmatprep.subr.mxu1 %v12851_v15 }
0x2fd5   :  { %v6729_v40 = vpop.f32.mrf.mxu1 }
0x2fd6   :  { %11457 = vmatmul.mubr.msk.f32.vlgmr.msra.gmra.mxu0 %vm743_vm1, %v6729_v40  ;;  %v7463_v40 = vld [vmem:[#allocation22 + $0x30] sm:$0xff] }
0x2fd7   :  { %v11453_v42 = vpop.f32.mrf.mxu1  ;;  %11466 = vmatprep.mubr.msk.f32.mxu0 %vm12852_vm3, %v12851_v15 }
0x2fd8   :  { %v7462_v42 = vld [vmem:[#allocation22 + $0x28] sm:$0xff] }
0x2fd9   :  { %v6881_v19 = vpop.f32.mrf.mxu1 }
0x2fda   :  { %v6885_v11 = vsel %vm743_vm1, %v6881_v19, -inf }
0x2fdb   :  { %6886 = vmax.xlane.f32.xlu0 %v6885_v11  ;;  %v11463_v45 = vpop.f32.mrf.mxu1 }
0x2fdc   :  { %v10338_v45 = vld [vmem:[#allocation44] ss:$0 sm:$0xff] }
0x2ff1   :  { %6896 = vrot.lane.b32.xlu0 %v14264_v34, %s12848_s4 }
0x3064   :  { %v6887_v47 = vpop.xlane.xlu0 %6886 }
0x3065   :  { %v6888_v49 = vsub.f32 %v6881_v19, %v6887_v47  ;;  %v7461_v19 = vld [vmem:[#allocation22 + $0x20] sm:$0xff] }
0x3067   :  { %v6889_v39 = vmul.f32 1.442695, %v6888_v49 }
0x3068   :  { %v6897_v14 = vpop.permute.xlu0 %6896 }
0x3069   :  { %12034 = vpow2.f32 %v6889_v39  ;;  %11465 = vmatpush3.msra.mxu0 %v6897_v14 }
0x306a   :  { %11474 = vmatprep.subr.mxu0 %v12851_v15 }
0x3076   :  { %v12035_v50 = vpop.eup %12034 }
0x3077   :  { %v6891_v51 = vsel %vm743_vm1, %v12035_v50, 0.0 }
0x3078   :  { %6892 = vadd.xlane.f32.xlu1 %v6891_v51 }
0x3096   :  { %v6802_v25 = vpop.f32.mrf.mxu0 }
0x3097   :  { %v6806_v6 = vadd.f32 %v6802_v25, %v6567_v32 }
0x3098   :  { %v11458_v18 = vpop.f32.mrf.mxu0 }
0x3101   :  { %v6893_v34 = vpop.xlane.xlu1 %6892 }
0x3102   :  { %12036 = vrcp.f32 %v6893_v34 }
0x310f   :  { %v12037_v43 = vpop.eup %12036 }
0x3110   :  { %v6895_v57 = vmul.f32 %v12037_v43, %v12035_v50 }
0x3112   :  { %11467 = vmatmul.mubr.msk.f32.vlgmr.msra.gmra.mxu0 %vm743_vm1, %v6895_v57 }
0x3113   :  { %11482 = vmatprep.mubr.msk.f32.mxu0 %vm12852_vm3, %v12851_v15  ;;  %11475 = vmatpush3.msra.mxu0 %v7079_v2 }
0x3114   :  { %11476 = vmatprep.subr.mxu0 %v12851_v15 }
0x3115   :  { %11477 = vmatpush3.msra.mxu0 %v7078_v3  ;;  %v10340_v3 = vld [vmem:[#allocation47] ss:$0 sm:$0xff] }
0x3116   :  { %11478 = vmatprep.subr.mxu0 %v12851_v15 }
0x31d2   :  { %v6968_v8 = vpop.f32.mrf.mxu0 }
0x31d3   :  { %11472 = vmatmul.mubr.msk.f32.vlgmr.msra.gmra.mxu1 %vm743_vm1, %v6968_v8 }
0x31d4   :  { %v11468_v17 = vpop.f32.mrf.mxu0  ;;  %11501 = vmatprep.mubr.msk.f32.mxu1 %vm12852_vm3, %v12851_v15  ;;  %11486 = vmatpush3.msra.mxu1 %v7168_v46  ;;  %v14420_v46 = vld [vmem:[%s14786_s30] sm:$0xff] }
0x31d5   :  { %11487 = vmatprep.subr.mxu1 %v12851_v15 }
0x31d6   :  { %11488 = vmatpush3.msra.mxu1 %v7167_v5 }
0x31d7   :  { %11489 = vmatprep.subr.mxu1 %v12851_v15 }
0x31d8   :  { %11490 = vmatpush3.msra.mxu1 %v7166_v22  ;;  %v10350_v22 = vld [vmem:[%s14787_s17 + $0x38] sm:$0xff] }
0x31d9   :  { %11491 = vmatprep.subr.mxu1 %v12851_v15 }
0x31da   :  { %11492 = vmatpush3.msra.mxu1 %v7165_v9  ;;  %v10349_v9 = vld [vmem:[%s14787_s17 + $0x30] sm:$0xff] }
0x31db   :  { %11493 = vmatprep.subr.mxu1 %v12851_v15 }
0x31dc   :  { %11494 = vmatpush3.msra.mxu1 %v7164_v10  ;;  %v10348_v10 = vld [vmem:[%s14787_s17 + $0x28] sm:$0xff] }
0x31dd   :  { %11495 = vmatprep.subr.mxu1 %v12851_v15 }
0x31de   :  { %11496 = vmatpush3.msra.mxu1 %v7163_v20  ;;  %v10347_v20 = vld [vmem:[%s14787_s17 + $0x20] sm:$0xff] }
0x31df   :  { %11497 = vmatprep.subr.mxu1 %v12851_v15 }
0x31e0   :  { %11498 = vmatpush3.msra.mxu1 %v7162_v37 }
0x31e1   :  { %11499 = vmatprep.subr.mxu1 %v12851_v15 }
0x31e2   :  { %11500 = vmatpush3.msra.mxu1 %v7161_v31 }
0x31e3   :  { %11532 = vmatprep.subr.mxu1 %v12851_v15 }
0x3293   :  { %v7041_v61 = vpop.f32.mrf.mxu1 }
0x3294   :  { %v7045_v62 = vadd.f32 %v7041_v61, %v6806_v6 }
0x3295   :  { %v11473_v33 = vpop.f32.mrf.mxu1 }
0x3296   :  { %v7046_v30 = vadd.f32 %v7045_v62, %v14253_v28  ;;  %v7077_v28 = vld [vmem:[#allocation41 + $0x8] sm:$0xff] }
0x3297   :  { %11479 = vmatpush3.msra.mxu0 %v7077_v28  ;;  %v10344_v62 = vld [vmem:[%s14784_s22 + $0x38] sm:$0xff]  ;;  %v10343_v33 = vld [vmem:[%s14784_s22 + $0x30] sm:$0xff] }
0x3298   :  { %v7049_v63 = vsel %vm621_vm0, %v7046_v30, 0.0  ;;  %11480 = vmatprep.subr.mxu0 %v12851_v15 }
0x3299   :  { %7050 = vadd.xlane.f32.xlu1 %v7049_v63  ;;  %11481 = vmatpush3.msra.mxu0 %v7076_v4  ;;  %v10341_v63 = vld [vmem:[%s14784_s22 + $0x20] sm:$0xff] }
0x329a   :  { %11504 = vmatprep.subr.mxu0 %v12851_v15 }
0x3322   :  { %v7051_v48 = vpop.xlane.xlu1 %7050 }
0x3323   :  { %v7052_v0 = vmul.f32 0.03125, %v7051_v48 }
0x3325   :  { %v7053_v54 = vsub.f32 %v7046_v30, %v7052_v0  ;;  %v10342_v30 = vld [vmem:[%s14784_s22 + $0x28] sm:$0xff] }
0x3327   :  { %v7054_v1 = vmul.f32 %v7053_v54, %v7053_v54 }
0x3329   :  { %v7055_v56 = vsel %vm621_vm0, %v7054_v1, 0.0 }
0x332a   :  { %7056 = vadd.xlane.f32.xlu1 %v7055_v56  ;;  %v10339_v56 = vld [vmem:[#allocation46] ss:$0 sm:$0xff] }
0x33b3   :  { %v7057_v21 = vpop.xlane.xlu1 %7056 }
0x33b4   :  { %v7058_v24 = vmul.f32 0.03125, %v7057_v21 }
0x33b6   :  { %v7059_v16 = vadd.f32 1e-05, %v7058_v24 }
0x33b8   :  { %12038 = vrsqrt.f32 %v7059_v16 }
0x33c5   :  { %v12039_v44 = vpop.eup %12038 }
0x33c6   :  { %v7061_v7 = vmul.f32 %v12039_v44, %v7053_v54 }
0x33c8   :  { %v7068_v27 = vmul.f32 %v10333_v26, %v7061_v7  ;;  %v10351_v7 = vld [vmem:[#allocation20 + $0x1] ss:$0 sm:$0xff] }
0x33ca   :  { %v7075_v32 = vadd.f32 %v10334_v60, %v7068_v27 }
0x33cc   :  { %11483 = vmatmul.mubr.msk.f32.vlgmr.msra.gmra.mxu0 %vm621_vm0, %v7075_v32 }
0x33cd   :  { %11512 = vmatprep.mubr.msk.f32.mxu0 %vm12852_vm3, %v12851_v15  ;;  %11505 = vmatpush3.msra.mxu0 %v10344_v62 }
0x33ce   :  { %11506 = vmatprep.subr.mxu0 %v12851_v15 }
0x33cf   :  { %11507 = vmatpush3.msra.mxu0 %v10343_v33 }
0x33d0   :  { %11508 = vmatprep.subr.mxu0 %v12851_v15 }
0x33d1   :  { %11509 = vmatpush3.msra.mxu0 %v10342_v30 }
0x33d2   :  { %11510 = vmatprep.subr.mxu0 %v12851_v15 }
0x33d3   :  { %11511 = vmatpush3.msra.mxu0 %v10341_v63 }
0x33d4   :  { %11515 = vmatprep.subr.mxu0 %v12851_v15 }
0x348c   :  { %v7156_v35 = vpop.f32.mrf.mxu0 }
0x348d   :  { %v7157_v36 = vadd.f32 %v10335_v13, %v7156_v35 }
0x348e   :  { %v11484_v38 = vpop.f32.mrf.mxu0 }
0x348f   :  { %v7160_v23 = vmax.f32 %v7157_v36, 0.0 }
0x3491   :  { %11502 = vmatmul.mubr.msk.f32.vlgmr.msra.gmra.mxu1 %vm2411_vm2, %v7160_v23 }
0x3492   :  { %11533 = vmatpush3.msra.mxu1 %v7464_v29  ;;  %11540 = vmatprep.mubr.msk.f32.mxu1 %vm12852_vm3, %v12851_v15 }
0x3493   :  { %11534 = vmatprep.subr.mxu1 %v12851_v15 }
0x3494   :  { %11535 = vmatpush3.msra.mxu1 %v7463_v40 }
0x3495   :  { %11536 = vmatprep.subr.mxu1 %v12851_v15 }
0x3496   :  { %11537 = vmatpush3.msra.mxu1 %v7462_v42 }
0x3497   :  { %11538 = vmatprep.subr.mxu1 %v12851_v15 }
0x3498   :  { %11539 = vmatpush3.msra.mxu1 %v7461_v19 }
0x3499   :  { %11541 = vmatmul.mubr.msk.f32.vlgmr.msra.gmra.mxu1 %vm621_vm0, %v14051_v12  ;;  %11558 = vmatprep.subr.mxu1 %v12851_v15 }
0x349a   :  { %11543 = vmatprep.mubr.msk.f32.mxu1 %vm12852_vm3, %v12851_v15 }
0x349d   :  { %11544 = vmatmul.mubr.msk.f32.gmra.mxu1 %vm621_vm0, %v14058_v53 }
0x349e   :  { %11546 = vmatprep.mubr.msk.f32.mxu1 %vm12852_vm3, %v12851_v15 }
0x34a1   :  { %11547 = vmatmul.mubr.msk.f32.gmra.mxu1 %vm621_vm0, %v14078_v58 }
0x34a2   :  { %11564 = vmatprep.mubr.msk.f32.mxu1 %vm12852_vm3, %v12851_v15 }
0x3551   :  { %v7238_v11 = vpop.f32.mrf.mxu1 }
0x3552   :  { %v7242_v12 = vadd.f32 %v7238_v11, %v7075_v32  ;;  %v10345_v32 = vld [vmem:[#allocation19 + $0x1] ss:$0 sm:$0xff] }
0x3553   :  { %v11503_v47 = vpop.f32.mrf.mxu1 }
0x3554   :  { %v7250_v49 = vadd.f32 %v10338_v45, %v7242_v12 }
0x3556   :  { %v7253_v39 = vsel %vm621_vm0, %v7250_v49, 0.0 }
0x3557   :  { %7254 = vadd.xlane.f32.xlu1 %v7253_v39 }
0x3559   :  { %v7539_v14 = vpop.f32.mrf.mxu1 }
0x355a   :  { %v14402_v34 = vadd.f32 %v10355_v41, %v7539_v14 }
0x355b   :  { %v11542_v50 = vpop.f32.mrf.mxu1 }
0x355d   :  { %v7544_v53 = vpop.f32.mrf.mxu1 }
0x355e   :  { %v14398_v18 = vadd.f32 %v10355_v41, %v7544_v53 }
0x355f   :  { %v11545_v51 = vpop.f32.mrf.mxu1 }
0x3561   :  { %v7549_v25 = vpop.f32.mrf.mxu1 }
0x3562   :  { %v14396_v6 = vadd.f32 %v10355_v41, %v7549_v25  ;;  %v7554_v41 = vld [vmem:[#allocation25 + $0x20] sm:$0xff] }
0x3563   :  { %v11548_v58 = vpop.f32.mrf.mxu1 }
0x3564   :  { %11559 = vmatpush3.msra.mxu1 %v14396_v6 }
0x3565   :  { %11560 = vmatprep.subr.mxu1 %v12851_v15 }
0x3566   :  { %11561 = vmatpush3.msra.mxu1 %v14398_v18 }
0x3567   :  { %11562 = vmatprep.subr.mxu1 %v12851_v15 }
0x3568   :  { %11563 = vmatpush3.msra.mxu1 %v14402_v34 }
0x3569   :  { %11572 = vmatprep.subr.mxu1 %v12851_v15 }
0x35e0   :  { %v7255_v43 = vpop.xlane.xlu1 %7254 }
0x35e1   :  { %v7256_v57 = vmul.f32 0.03125, %v7255_v43 }
0x35e3   :  { %v7257_v8 = vsub.f32 %v7250_v49, %v7256_v57 }
0x35e5   :  { %v7258_v17 = vmul.f32 %v7257_v8, %v7257_v8 }
0x35e7   :  { %v7259_v61 = vsel %vm621_vm0, %v7258_v17, 0.0 }
0x35e8   :  { %7260 = vadd.xlane.f32.xlu1 %v7259_v61 }
0x3671   :  { %v7261_v48 = vpop.xlane.xlu1 %7260 }
0x3672   :  { %v7262_v0 = vmul.f32 0.03125, %v7261_v48 }
0x3674   :  { %v7263_v54 = vadd.f32 1e-05, %v7262_v0 }
0x3676   :  { %12040 = vrsqrt.f32 %v7263_v54 }
0x3683   :  { %v12041_v1 = vpop.eup %12040 }
0x3684   :  { %v7265_v2 = vmul.f32 %v12041_v1, %v7257_v8 }
0x3686   :  { %v7272_v28 = vmul.f32 %v10339_v56, %v7265_v2 }
0x3688   :  { %v14417_v4 = vadd.f32 %v10340_v3, %v7272_v28 }
0x368a   :  { %v7280_v5 = vadd.f32 %v14420_v46, %v14417_v4 }
0x368c   :  { %11513 = vmatmul.mubr.msk.f32.vlgmr.msra.gmra.mxu0 %vm621_vm0, %v7280_v5 }
0x368d   :  { %11516 = vmatpush3.msra.mxu0 %v10350_v22  ;;  %11523 = vmatprep.mubr.msk.f32.mxu0 %vm12852_vm3, %v12851_v15 }
0x368e   :  { %11517 = vmatprep.subr.mxu0 %v12851_v15 }
0x368f   :  { %11518 = vmatpush3.msra.mxu0 %v10349_v9 }
0x3690   :  { %11519 = vmatprep.subr.mxu0 %v12851_v15 }
0x3691   :  { %11520 = vmatpush3.msra.mxu0 %v10348_v10 }
0x3692   :  { %11521 = vmatprep.subr.mxu0 %v12851_v15 }
0x3693   :  { %11522 = vmatpush3.msra.mxu0 %v10347_v20 }
0x3694   :  { %11524 = vmatmul.mubr.msk.f32.vlgmr.msra.gmra.mxu0 %vm621_vm0, %v14056_v52  ;;  %11549 = vmatprep.subr.mxu0 %v12851_v15 }
0x3695   :  { %11526 = vmatprep.mubr.msk.f32.mxu0 %vm12852_vm3, %v12851_v15 }
0x3698   :  { %11527 = vmatmul.mubr.msk.f32.gmra.mxu0 %vm621_vm0, %v14069_v55 }
0x3699   :  { %11529 = vmatprep.mubr.msk.f32.mxu0 %vm12852_vm3, %v12851_v15 }
0x369c   :  { %11530 = vmatmul.mubr.msk.f32.gmra.mxu0 %vm621_vm0, %v14083_v59 }
0x369d   :  { %11555 = vmatprep.mubr.msk.f32.mxu0 %vm12852_vm3, %v12851_v15 }
0x374c   :  { %v7363_v21 = vpop.f32.mrf.mxu0 }
0x374d   :  { %v14461_v31 = vadd.f32 %v10345_v32, %v7363_v21  ;;  %v7556_v32 = vld [vmem:[#allocation25 + $0x30] sm:$0xff] }
0x374e   :  { %v11514_v24 = vpop.f32.mrf.mxu0 }
0x3754   :  { %v7446_v52 = vpop.f32.mrf.mxu0 }
0x3755   :  { %v14457_v37 = vadd.f32 %v10351_v7, %v7446_v52  ;;  %v7555_v52 = vld [vmem:[#allocation25 + $0x28] sm:$0xff] }
0x3756   :  { %v11525_v16 = vpop.f32.mrf.mxu0 }
0x3758   :  { %v7451_v44 = vpop.f32.mrf.mxu0 }
0x3759   :  { %v14452_v59 = vadd.f32 %v10351_v7, %v7451_v44 }
0x375a   :  { %v11528_v26 = vpop.f32.mrf.mxu0 }
0x375c   :  { %v7456_v60 = vpop.f32.mrf.mxu0 }
0x375d   :  { %v14447_v27 = vadd.f32 %v10351_v7, %v7456_v60 }
0x375e   :  { %v11531_v55 = vpop.f32.mrf.mxu0 }
0x375f   :  { %11550 = vmatpush3.xpose.msk.msra.mxu0 %vm743_vm1, %v14447_v27 }
0x3760   :  { %11551 = vmatprep.subr.mxu0 %v12851_v15 }
0x3763   :  { %11552 = vmatpush3.xpose.msk.msra.mxu0 %vm743_vm1, %v14452_v59 }
0x3764   :  { %11553 = vmatprep.subr.mxu0 %v12851_v15 }
0x3767   :  { %11554 = vmatpush3.xpose.msk.msra.mxu0 %vm743_vm1, %v14457_v37 }
0x3768   :  { %11567 = vmatprep.subr.mxu0 %v12851_v15 }
0x376a   :  { %11556 = vmatmul.mubr.msk.f32.vlgmr.msra.gmra.mxu0 %vm743_vm1, %v14461_v31 }
0x376b   :  { %11569 = vmatprep.mubr.msk.f32.mxu0 %vm12852_vm3, %v12851_v15  ;;  %11568 = vmatpush3.msra.mxu0 %v7554_v41 }
0x376c   :  { %11581 = vmatprep.subr.mxu0 %v12851_v15 }
0x382a   :  { %v7645_v13 = vpop.f32.mrf.mxu0 }
0x382b   :  { %v7649_v35 = vsel %vm4961_vm4, %v7645_v13, -inf }
0x382c   :  { %7650 = vmax.xlane.f32.xlu1 %v7649_v35  ;;  %v11557_v36 = vpop.f32.mrf.mxu0 }
0x383d   :  { %7813 = vrot.lane.b32.xlu1 %v14447_v27, %s12842_s8 }
0x3841   :  { %7811 = vrot.lane.b32.xlu1 %v14452_v59, %s12842_s8 }
0x3845   :  { %7809 = vrot.lane.b32.xlu1 %v14457_v37, %s12842_s8 }
0x3849   :  { %7807 = vrot.lane.b32.xlu1 %v14461_v31, %s12842_s8 }
0x384d   :  { %8067 = vrot.lane.b32.xlu1 %v14452_v59, %s12845_s10 }
0x3851   :  { %8065 = vrot.lane.b32.xlu1 %v14457_v37, %s12845_s10 }
0x3855   :  { %8063 = vrot.lane.b32.xlu1 %v14461_v31, %s12845_s10 }
0x38b5   :  { %v7651_v38 = vpop.xlane.xlu1 %7650 }
0x38b6   :  { %v7652_v23 = vsub.f32 %v7645_v13, %v7651_v38 }
0x38b8   :  { %v7653_v29 = vmul.f32 1.442695, %v7652_v23 }
0x38b9   :  { %v7814_v11 = vpop.permute.xlu1 %7813 }
0x38ba   :  { %12042 = vpow2.f32 %v7653_v29 }
0x38bd   :  { %v7812_v45 = vpop.permute.xlu1 %7811 }
0x38c1   :  { %v7810_v49 = vpop.permute.xlu1 %7809 }
0x38c5   :  { %v7808_v39 = vpop.permute.xlu1 %7807 }
0x38c7   :  { %v12043_v40 = vpop.eup %12042 }
0x38c8   :  { %v7655_v42 = vsel %vm4961_vm4, %v12043_v40, 0.0 }
0x38c9   :  { %7656 = vadd.xlane.f32.xlu0 %v7655_v42  ;;  %v8068_v14 = vpop.permute.xlu1 %8067 }
0x38cd   :  { %v8066_v53 = vpop.permute.xlu1 %8065 }
0x38d1   :  { %v8064_v51 = vpop.permute.xlu1 %8063 }
0x38df   :  { %8069 = vrot.lane.b32.xlu0 %v14447_v27, %s12845_s10 }
0x3952   :  { %v7657_v19 = vpop.xlane.xlu0 %7656 }
0x3953   :  { %12044 = vrcp.f32 %v7657_v19 }
0x3956   :  { %v8070_v50 = vpop.permute.xlu0 %8069 }
0x3960   :  { %v12045_v12 = vpop.eup %12044 }
0x3961   :  { %v7659_v47 = vmul.f32 %v12045_v12, %v12043_v40 }
0x3963   :  { %11565 = vmatmul.mubr.msk.f32.vlgmr.msra.gmra.mxu1 %vm4961_vm4, %v7659_v47 }
0x3964   :  { %11573 = vmatpush3.xpose.msk.msra.mxu1 %vm743_vm1, %v7814_v11  ;;  %11578 = vmatprep.mubr.msk.f32.mxu1 %vm12852_vm3, %v12851_v15 }
0x3965   :  { %11574 = vmatprep.subr.mxu1 %v12851_v15 }
0x3968   :  { %11575 = vmatpush3.xpose.msk.msra.mxu1 %vm743_vm1, %v7812_v45 }
0x3969   :  { %11576 = vmatprep.subr.mxu1 %v12851_v15 }
0x396c   :  { %11577 = vmatpush3.xpose.msk.msra.mxu1 %vm743_vm1, %v7810_v49 }
0x396d   :  { %11595 = vmatprep.subr.mxu1 %v12851_v15 }
0x396f   :  { %11579 = vmatmul.mubr.msk.f32.vlgmr.msra.gmra.mxu1 %vm743_vm1, %v7808_v39 }
0x3970   :  { %11596 = vmatpush3.xpose.msk.msra.mxu1 %vm743_vm1, %v8070_v50  ;;  %11601 = vmatprep.mubr.msk.f32.mxu1 %vm12852_vm3, %v12851_v15 }
0x3971   :  { %11597 = vmatprep.subr.mxu1 %v12851_v15 }
0x3974   :  { %11598 = vmatpush3.xpose.msk.msra.mxu1 %vm743_vm1, %v8068_v14 }
0x3975   :  { %11599 = vmatprep.subr.mxu1 %v12851_v15 }
0x3978   :  { %11600 = vmatpush3.xpose.msk.msra.mxu1 %vm743_vm1, %v8066_v53 }
0x3979   :  { %11627 = vmatprep.subr.mxu1 %v12851_v15 }
0x397b   :  { %11602 = vmatmul.mubr.msk.f32.vlgmr.msra.gmra.mxu1 %vm743_vm1, %v8064_v51 }
0x397c   :  { %11633 = vmatprep.mubr.msk.f32.mxu1 %vm12852_vm3, %v12851_v15 }
0x3a23   :  { %v7729_v25 = vpop.f32.mrf.mxu1 }
0x3a24   :  { %11570 = vmatmul.mubr.msk.f32.vlgmr.msra.gmra.mxu0 %vm743_vm1, %v7729_v25 }
0x3a25   :  { %v11566_v58 = vpop.f32.mrf.mxu1  ;;  %11587 = vmatprep.mubr.msk.f32.mxu0 %vm12852_vm3, %v12851_v15 }
0x3a2f   :  { %v7889_v43 = vpop.f32.mrf.mxu1 }
0x3a30   :  { %v7893_v57 = vsel %vm4961_vm4, %v7889_v43, -inf }
0x3a31   :  { %7894 = vmax.xlane.f32.xlu1 %v7893_v57  ;;  %v11580_v8 = vpop.f32.mrf.mxu1 }
0x3a32   :  { %v7557_v8 = vld [vmem:[#allocation25 + $0x38] sm:$0xff] }
0x3a3b   :  { %v8145_v17 = vpop.f32.mrf.mxu1 }
0x3a3c   :  { %v8149_v62 = vsel %vm4961_vm4, %v8145_v17, -inf }
0x3a3d   :  { %v11603_v61 = vpop.f32.mrf.mxu1 }
0x3a42   :  { %7911 = vrot.lane.b32.xlu1 %v14396_v6, %s12842_s8 }
0x3a46   :  { %7907 = vrot.lane.b32.xlu1 %v14402_v34, %s12842_s8 }
0x3a6a   :  { %8150 = vmax.xlane.f32.xlu1 %v8149_v62 }
0x3a7b   :  { %8162 = vrot.lane.b32.xlu1 %v14398_v18, %s12845_s10 }
0x3a7f   :  { %8160 = vrot.lane.b32.xlu1 %v14402_v34, %s12845_s10 }
0x3a83   :  { %8322 = vrot.lane.b32.xlu1 %v14447_v27, %s12848_s4 }
0x3a87   :  { %8318 = vrot.lane.b32.xlu1 %v14457_v37, %s12848_s4  ;;  %v10359_v37 = vld [vmem:[#allocation26 + $0x1] ss:$0 sm:$0xff] }
0x3aba   :  { %v7895_v33 = vpop.xlane.xlu1 %7894 }
0x3abb   :  { %v7896_v30 = vsub.f32 %v7889_v43, %v7895_v33 }
0x3abd   :  { %v7897_v63 = vmul.f32 1.442695, %v7896_v30 }
0x3abe   :  { %v7912_v48 = vpop.permute.xlu1 %7911 }
0x3abf   :  { %12046 = vpow2.f32 %v7897_v63  ;;  %11582 = vmatpush3.msra.mxu0 %v7912_v48 }
0x3ac0   :  { %11583 = vmatprep.subr.mxu0 %v12851_v15 }
0x3ac2   :  { %v7908_v2 = vpop.permute.xlu1 %7907 }
0x3acc   :  { %v12047_v0 = vpop.eup %12046 }
0x3acd   :  { %v7899_v54 = vsel %vm4961_vm4, %v12047_v0, 0.0 }
0x3ace   :  { %7900 = vadd.xlane.f32.xlu0 %v7899_v54 }
0x3ae4   :  { %7909 = vrot.lane.b32.xlu0 %v14398_v18, %s12842_s8  ;;  %v7802_v1 = vpop.f32.mrf.mxu0 }
0x3ae6   :  { %v11571_v56 = vpop.f32.mrf.mxu0 }
0x3af3   :  { %v8151_v3 = vpop.xlane.xlu1 %8150 }
0x3af4   :  { %v8152_v28 = vsub.f32 %v8145_v17, %v8151_v3  ;;  %v10389_v3 = vld [vmem:[%s14788_s23 + $0x38] sm:$0xff] }
0x3af6   :  { %v8153_v5 = vmul.f32 1.442695, %v8152_v28  ;;  %v8691_v28 = vld [vmem:[#allocation32 + $0x30] sm:$0xff] }
0x3af7   :  { %v8163_v44 = vpop.permute.xlu1 %8162 }
0x3af8   :  { %12048 = vpow2.f32 %v8153_v5  ;;  %v8690_v5 = vld [vmem:[#allocation32 + $0x28] sm:$0xff] }
0x3afb   :  { %v8161_v55 = vpop.permute.xlu1 %8160 }
0x3aff   :  { %v8323_v23 = vpop.permute.xlu1 %8322 }
0x3b03   :  { %v8319_v42 = vpop.permute.xlu1 %8318 }
0x3b05   :  { %v12049_v22 = vpop.eup %12048 }
0x3b06   :  { %v8155_v9 = vsel %vm4961_vm4, %v12049_v22, 0.0 }
0x3b07   :  { %8156 = vadd.xlane.f32.xlu0 %v8155_v9  ;;  %v8689_v9 = vld [vmem:[#allocation32 + $0x20] sm:$0xff] }
0x3b1d   :  { %8164 = vrot.lane.b32.xlu0 %v14396_v6, %s12845_s10 }
0x3b21   :  { %8320 = vrot.lane.b32.xlu0 %v14452_v59, %s12848_s4 }
0x3b25   :  { %8316 = vrot.lane.b32.xlu0 %v14461_v31, %s12848_s4  ;;  %v7806_v31 = vadd.f32 %v10359_v37, %v7802_v1 }
0x3b57   :  { %v7901_v10 = vpop.xlane.xlu0 %7900 }
0x3b58   :  { %12050 = vrcp.f32 %v7901_v10  ;;  %v10386_v10 = vld [vmem:[%s14788_s23 + $0x20] sm:$0xff] }
0x3b5b   :  { %v7910_v20 = vpop.permute.xlu0 %7909 }
0x3b5c   :  { %11584 = vmatpush3.msra.mxu0 %v7910_v20 }
0x3b5d   :  { %11585 = vmatprep.subr.mxu0 %v12851_v15 }
0x3b5e   :  { %11586 = vmatpush3.msra.mxu0 %v7908_v2  ;;  %v8692_v2 = vld [vmem:[#allocation32 + $0x38] sm:$0xff] }
0x3b5f   :  { %11590 = vmatprep.subr.mxu0 %v12851_v15 }
0x3b65   :  { %v12051_v21 = vpop.eup %12050 }
0x3b66   :  { %v7903_v24 = vmul.f32 %v12051_v21, %v12047_v0 }
0x3b68   :  { %11588 = vmatmul.mubr.msk.f32.vlgmr.msra.gmra.mxu0 %vm4961_vm4, %v7903_v24 }
0x3b69   :  { %11591 = vmatpush3.msra.mxu0 %v7555_v52  ;;  %11592 = vmatprep.mubr.msk.f32.mxu0 %vm12852_vm3, %v12851_v15 }
0x3b6a   :  { %11604 = vmatprep.subr.mxu0 %v12851_v15 }
0x3b90   :  { %v8157_v16 = vpop.xlane.xlu0 %8156 }
0x3b91   :  { %12052 = vrcp.f32 %v8157_v16  ;;  %v10384_v16 = vld [vmem:[#allocation28 + $0x1] ss:$0 sm:$0xff] }
0x3b94   :  { %v8165_v7 = vpop.permute.xlu0 %8164 }
0x3b98   :  { %v8321_v40 = vpop.permute.xlu0 %8320 }
0x3b9c   :  { %v8317_v19 = vpop.permute.xlu0 %8316 }
0x3b9e   :  { %v12053_v60 = vpop.eup %12052 }
0x3b9f   :  { %v8159_v59 = vmul.f32 %v12053_v60, %v12049_v22  ;;  %v10387_v22 = vld [vmem:[%s14788_s23 + $0x28] sm:$0xff] }
0x3c28   :  { %v7985_v26 = vpop.f32.mrf.mxu0 }
0x3c29   :  { %11593 = vmatmul.mubr.msk.f32.vlgmr.msra.gmra.mxu0 %vm743_vm1, %v7985_v26  ;;  %v10385_v26 = vld [vmem:[#allocation29 + $0x1] ss:$0 sm:$0xff] }
0x3c2a   :  { %11605 = vmatpush3.msra.mxu0 %v8165_v7  ;;  %v11589_v27 = vpop.f32.mrf.mxu0  ;;  %11610 = vmatprep.mubr.msk.f32.mxu0 %vm12852_vm3, %v12851_v15 }
0x3c2b   :  { %11606 = vmatprep.subr.mxu0 %v12851_v15 }
0x3c2c   :  { %11607 = vmatpush3.msra.mxu0 %v8163_v44 }
0x3c2d   :  { %11608 = vmatprep.subr.mxu0 %v12851_v15 }
0x3c2e   :  { %11609 = vmatpush3.msra.mxu0 %v8161_v55  ;;  %v10392_v55 = vld [vmem:[#allocation34 + $0x1] ss:$0 sm:$0xff] }
0x3c2f   :  { %11611 = vmatmul.mubr.msk.f32.vlgmr.msra.gmra.mxu0 %vm4961_vm4, %v8159_v59  ;;  %11613 = vmatprep.subr.mxu0 %v12851_v15 }
0x3c30   :  { %11615 = vmatprep.mubr.msk.f32.mxu0 %vm12852_vm3, %v12851_v15  ;;  %11614 = vmatpush3.msra.mxu0 %v7556_v32  ;;  %v10390_v32 = vld [vmem:[#allocation31 + $0x1] ss:$0 sm:$0xff] }
0x3c31   :  { %11618 = vmatprep.subr.mxu0 %v12851_v15 }
0x3ce9   :  { %v8058_v13 = vpop.f32.mrf.mxu0 }
0x3cea   :  { %v8062_v35 = vadd.f32 %v8058_v13, %v7806_v31 }
0x3ceb   :  { %v11594_v36 = vpop.f32.mrf.mxu0 }
0x3cef   :  { %v8238_v38 = vpop.f32.mrf.mxu0 }
0x3cf0   :  { %11616 = vmatmul.mubr.msk.f32.vlgmr.msra.gmra.mxu0 %vm743_vm1, %v8238_v38 }
0x3cf1   :  { %11619 = vmatpush3.xpose.msk.msra.mxu0 %vm743_vm1, %v8323_v23  ;;  %v11612_v29 = vpop.f32.mrf.mxu0  ;;  %11624 = vmatprep.mubr.msk.f32.mxu0 %vm12852_vm3, %v12851_v15 }
0x3cf2   :  { %11620 = vmatprep.subr.mxu0 %v12851_v15 }
0x3cf5   :  { %11621 = vmatpush3.xpose.msk.msra.mxu0 %vm743_vm1, %v8321_v40 }
0x3cf6   :  { %11622 = vmatprep.subr.mxu0 %v12851_v15 }
0x3cf9   :  { %11623 = vmatpush3.xpose.msk.msra.mxu0 %vm743_vm1, %v8319_v42 }
0x3cfa   :  { %11652 = vmatprep.subr.mxu0 %v12851_v15 }
0x3cfc   :  { %11625 = vmatmul.mubr.msk.f32.vlgmr.msra.gmra.mxu0 %vm743_vm1, %v8317_v19 }
0x3cfd   :  { %11660 = vmatprep.mubr.msk.f32.mxu0 %vm12852_vm3, %v12851_v15  ;;  %11653 = vmatpush3.msra.mxu0 %v8692_v2 }
0x3cfe   :  { %11654 = vmatprep.subr.mxu0 %v12851_v15 }
0x3cff   :  { %11655 = vmatpush3.msra.mxu0 %v8691_v28 }
0x3d00   :  { %11656 = vmatprep.subr.mxu0 %v12851_v15 }
0x3d01   :  { %11657 = vmatpush3.msra.mxu0 %v8690_v5 }
0x3d02   :  { %11658 = vmatprep.subr.mxu0 %v12851_v15 }
0x3d03   :  { %11659 = vmatpush3.msra.mxu0 %v8689_v9 }
0x3d04   :  { %11668 = vmatprep.subr.mxu0 %v12851_v15 }
0x3db0   :  { %v8311_v11 = vpop.f32.mrf.mxu0 }
0x3db1   :  { %v8315_v45 = vadd.f32 %v8311_v11, %v8062_v35 }
0x3db2   :  { %v11617_v12 = vpop.f32.mrf.mxu0 }
0x3dbc   :  { %v8398_v47 = vpop.f32.mrf.mxu0 }
0x3dbd   :  { %v8402_v49 = vsel %vm4961_vm4, %v8398_v47, -inf }
0x3dbe   :  { %8403 = vmax.xlane.f32.xlu1 %v8402_v49  ;;  %v11626_v39 = vpop.f32.mrf.mxu0 }
0x3dcf   :  { %8415 = vrot.lane.b32.xlu1 %v14398_v18, %s12848_s4 }
0x3dd3   :  { %8413 = vrot.lane.b32.xlu1 %v14402_v34, %s12848_s4 }
0x3e47   :  { %v8404_v14 = vpop.xlane.xlu1 %8403 }
0x3e48   :  { %v8405_v50 = vsub.f32 %v8398_v47, %v8404_v14 }
0x3e4a   :  { %v8406_v53 = vmul.f32 1.442695, %v8405_v50  ;;  %v8775_v50 = vld [vmem:[#allocation35 + $0x20] sm:$0xff] }
0x3e4b   :  { %v8416_v58 = vpop.permute.xlu1 %8415 }
0x3e4c   :  { %12054 = vpow2.f32 %v8406_v53 }
0x3e4f   :  { %v8414_v18 = vpop.permute.xlu1 %8413 }
0x3e59   :  { %v12055_v51 = vpop.eup %12054 }
0x3e5a   :  { %v8408_v41 = vsel %vm4961_vm4, %v12055_v51, 0.0 }
0x3e5b   :  { %8409 = vadd.xlane.f32.xlu0 %v8408_v41 }
0x3e71   :  { %8417 = vrot.lane.b32.xlu0 %v14396_v6, %s12848_s4 }
0x3ee4   :  { %v8410_v25 = vpop.xlane.xlu0 %8409 }
0x3ee5   :  { %12056 = vrcp.f32 %v8410_v25 }
0x3ee8   :  { %v8418_v43 = vpop.permute.xlu0 %8417 }
0x3ee9   :  { %11628 = vmatpush3.msra.mxu1 %v8418_v43 }
0x3eea   :  { %11629 = vmatprep.subr.mxu1 %v12851_v15 }
0x3eeb   :  { %11630 = vmatpush3.msra.mxu1 %v8416_v58 }
0x3eec   :  { %11631 = vmatprep.subr.mxu1 %v12851_v15 }
0x3eed   :  { %11632 = vmatpush3.msra.mxu1 %v8414_v18 }
0x3eee   :  { %11636 = vmatprep.subr.mxu1 %v12851_v15 }
0x3ef2   :  { %v12057_v34 = vpop.eup %12056 }
0x3ef3   :  { %v8412_v57 = vmul.f32 %v12057_v34, %v12055_v51 }
0x3ef5   :  { %11634 = vmatmul.mubr.msk.f32.vlgmr.msra.gmra.mxu1 %vm4961_vm4, %v8412_v57 }
0x3ef6   :  { %11637 = vmatpush3.msra.mxu1 %v7557_v8  ;;  %11638 = vmatprep.mubr.msk.f32.mxu1 %vm12852_vm3, %v12851_v15 }
0x3ef7   :  { %11641 = vmatprep.subr.mxu1 %v12851_v15 }
0x3fb5   :  { %v8491_v6 = vpop.f32.mrf.mxu1 }
0x3fb6   :  { %11639 = vmatmul.mubr.msk.f32.vlgmr.msra.gmra.mxu1 %vm743_vm1, %v8491_v6 }
0x3fb7   :  { %v11635_v17 = vpop.f32.mrf.mxu1  ;;  %11649 = vmatprep.mubr.msk.f32.mxu1 %vm12852_vm3, %v12851_v15  ;;  %11642 = vmatpush3.msra.mxu1 %v10389_v3 }
0x3fb8   :  { %11643 = vmatprep.subr.mxu1 %v12851_v15 }
0x4076   :  { %v8564_v61 = vpop.f32.mrf.mxu1 }
0x4077   :  { %v8568_v62 = vadd.f32 %v8564_v61, %v8315_v45 }
0x4078   :  { %v11640_v33 = vpop.f32.mrf.mxu1 }
0x4079   :  { %v8569_v30 = vadd.f32 %v8568_v62, %v14417_v4  ;;  %v10388_v4 = vld [vmem:[%s14788_s23 + $0x30] sm:$0xff] }
0x407a   :  { %11644 = vmatpush3.msra.mxu1 %v10388_v4 }
0x407b   :  { %v8574_v63 = vsel %vm621_vm0, %v8569_v30, 0.0  ;;  %11645 = vmatprep.subr.mxu1 %v12851_v15 }
0x407c   :  { %8575 = vadd.xlane.f32.xlu0 %v8574_v63  ;;  %11646 = vmatpush3.msra.mxu1 %v10387_v22 }
0x407d   :  { %11647 = vmatprep.subr.mxu1 %v12851_v15 }
0x407e   :  { %11648 = vmatpush3.msra.mxu1 %v10386_v10 }
0x407f   :  { %11663 = vmatprep.subr.mxu1 %v12851_v15 }
0x4105   :  { %v8576_v48 = vpop.xlane.xlu0 %8575 }
0x4106   :  { %v8577_v0 = vmul.f32 0.03125, %v8576_v48 }
0x4108   :  { %v8578_v54 = vsub.f32 %v8569_v30, %v8577_v0  ;;  %v8776_v0 = vld [vmem:[#allocation35 + $0x28] sm:$0xff] }
0x410a   :  { %v8579_v1 = vmul.f32 %v8578_v54, %v8578_v54 }
0x410c   :  { %v8580_v56 = vsel %vm621_vm0, %v8579_v1, 0.0 }
0x410d   :  { %8581 = vadd.xlane.f32.xlu1 %v8580_v56 }
0x4196   :  { %v8582_v20 = vpop.xlane.xlu1 %8581 }
0x4197   :  { %v8583_v21 = vmul.f32 0.03125, %v8582_v20  ;;  %v10394_v20 = vld [vmem:[#allocation37 + $0x1] ss:$0 sm:$0xff] }
0x4199   :  { %v8584_v24 = vadd.f32 1e-05, %v8583_v21 }
0x419b   :  { %12058 = vrsqrt.f32 %v8584_v24 }
0x41a8   :  { %v12059_v52 = vpop.eup %12058 }
0x41a9   :  { %v8586_v44 = vmul.f32 %v12059_v52, %v8578_v54 }
0x41ab   :  { %v8593_v7 = vmul.f32 %v10384_v16, %v8586_v44 }
0x41ad   :  { %v14597_v60 = vadd.f32 %v10385_v26, %v8593_v7 }
0x41af   :  { %11661 = vmatmul.mubr.msk.f32.vlgmr.msra.gmra.mxu0 %vm621_vm0, %v14597_v60  ;;  %v8601_v27 = vadd.f32 %v14420_v46, %v14597_v60 }
0x41b0   :  { %11670 = vmatprep.mubr.msk.f32.mxu0 %vm12852_vm3, %v12851_v15 }
0x41b1   :  { %11650 = vmatmul.mubr.msk.f32.vlgmr.msra.gmra.mxu1 %vm621_vm0, %v8601_v27 }
0x41b2   :  { %11665 = vmatprep.mubr.msk.f32.mxu1 %vm12852_vm3, %v12851_v15 }
0x426f   :  { %v8770_v59 = vpop.f32.mrf.mxu0 }
0x4270   :  { %v14608_v37 = vadd.f32 %v10392_v55, %v8770_v59  ;;  %v8777_v59 = vld [vmem:[#allocation35 + $0x30] sm:$0xff] }
0x4271   :  { %v8684_v31 = vpop.f32.mrf.mxu1  ;;  %v11662_v13 = vpop.f32.mrf.mxu0 }
0x4272   :  { %v14610_v35 = vadd.f32 %v10390_v32, %v8684_v31  ;;  %11669 = vmatpush3.msra.mxu0 %v14608_v37 }
0x4273   :  { %v11651_v46 = vpop.f32.mrf.mxu1  ;;  %11678 = vmatprep.subr.mxu0 %v12851_v15 }
0x4274   :  { %8789 = vrot.lane.b32.xlu0 %v14610_v35, %s12840_s18 }
0x4278   :  { %9023 = vrot.lane.b32.xlu0 %v14610_v35, %s12842_s8 }
0x42e6   :  { %v8790_v36 = vpop.permute.xlu0 %8789 }
0x42e7   :  { %11664 = vmatpush3.xpose.msk.msra.mxu1 %vm743_vm1, %v8790_v36 }
0x42e8   :  { %11673 = vmatprep.subr.mxu1 %v12851_v15 }
0x42ea   :  { %11666 = vmatmul.mubr.msk.f32.vlgmr.msra.gmra.mxu1 %vm743_vm1, %v14610_v35  ;;  %v9024_v14 = vpop.permute.xlu0 %9023 }
0x42eb   :  { %11675 = vmatprep.mubr.msk.f32.mxu1 %vm12852_vm3, %v12851_v15  ;;  %11674 = vmatpush3.msra.mxu1 %v8775_v50 }
0x42ec   :  { %11683 = vmatprep.subr.mxu1 %v12851_v15 }
0x43aa   :  { %v8861_v38 = vpop.f32.mrf.mxu1 }
0x43ab   :  { %v8865_v23 = vsel %vm743_vm1, %v8861_v38, -inf }
0x43ac   :  { %8866 = vmax.xlane.f32.xlu1 %v8865_v23  ;;  %v11667_v29 = vpop.f32.mrf.mxu1 }
0x4435   :  { %v8867_v40 = vpop.xlane.xlu1 %8866 }
0x4436   :  { %v8868_v42 = vsub.f32 %v8861_v38, %v8867_v40 }
0x4438   :  { %v8869_v19 = vmul.f32 1.442695, %v8868_v42  ;;  %v8778_v42 = vld [vmem:[#allocation35 + $0x38] sm:$0xff] }
0x443a   :  { %12060 = vpow2.f32 %v8869_v19 }
0x4447   :  { %v12061_v11 = vpop.eup %12060 }
0x4448   :  { %v8871_v45 = vsel %vm743_vm1, %v12061_v11, 0.0 }
0x4449   :  { %8872 = vadd.xlane.f32.xlu1 %v8871_v45 }
0x445a   :  { %9025 = vrot.lane.b32.xlu1 %v14610_v35, %s12841_s2 }
0x44d2   :  { %v8873_v12 = vpop.xlane.xlu1 %8872 }
0x44d3   :  { %12062 = vrcp.f32 %v8873_v12 }
0x44d6   :  { %v9026_v39 = vpop.permute.xlu1 %9025 }
0x44e0   :  { %v12063_v47 = vpop.eup %12062 }
0x44e1   :  { %v8875_v49 = vmul.f32 %v12063_v47, %v12061_v11 }
0x44e3   :  { %11671 = vmatmul.mubr.msk.f32.vlgmr.msra.gmra.mxu0 %vm743_vm1, %v8875_v49 }
0x44e4   :  { %11679 = vmatpush3.xpose.msk.msra.mxu0 %vm743_vm1, %v9026_v39  ;;  %11680 = vmatprep.mubr.msk.f32.mxu0 %vm12852_vm3, %v12851_v15 }
0x44e5   :  { %11688 = vmatprep.subr.mxu0 %v12851_v15 }
0x44e7   :  { %11681 = vmatmul.mubr.msk.f32.vlgmr.msra.gmra.mxu0 %vm743_vm1, %v9024_v14 }
0x44e8   :  { %11690 = vmatprep.mubr.msk.f32.mxu0 %vm12852_vm3, %v12851_v15  ;;  %11689 = vmatpush3.msra.mxu0 %v8776_v0 }
0x44e9   :  { %11698 = vmatprep.subr.mxu0 %v12851_v15 }
0x45a3   :  { %v8945_v53 = vpop.f32.mrf.mxu0 }
0x45a4   :  { %11676 = vmatmul.mubr.msk.f32.vlgmr.msra.gmra.mxu1 %vm743_vm1, %v8945_v53 }
0x45a5   :  { %v11672_v51 = vpop.f32.mrf.mxu0  ;;  %11685 = vmatprep.mubr.msk.f32.mxu1 %vm12852_vm3, %v12851_v15 }
0x45a7   :  { %v9097_v41 = vpop.f32.mrf.mxu0 }
0x45a8   :  { %v9101_v25 = vsel %vm743_vm1, %v9097_v41, -inf }
0x45a9   :  { %9102 = vmax.xlane.f32.xlu0 %v9101_v25  ;;  %v11682_v58 = vpop.f32.mrf.mxu0 }
0x45bf   :  { %9113 = vrot.lane.b32.xlu0 %v14608_v37, %s12842_s8 }
0x45c3   :  { %9263 = vrot.lane.b32.xlu0 %v14610_v35, %s12845_s10 }
0x4632   :  { %v9103_v43 = vpop.xlane.xlu0 %9102 }
0x4633   :  { %v9104_v18 = vsub.f32 %v9097_v41, %v9103_v43 }
0x4635   :  { %v9105_v34 = vmul.f32 1.442695, %v9104_v18 }
0x4636   :  { %v9114_v57 = vpop.permute.xlu0 %9113 }
0x4637   :  { %12064 = vpow2.f32 %v9105_v34  ;;  %11684 = vmatpush3.msra.mxu1 %v9114_v57 }
0x4638   :  { %11693 = vmatprep.subr.mxu1 %v12851_v15 }
0x463a   :  { %v9264_v48 = vpop.permute.xlu0 %9263 }
0x4644   :  { %v12065_v8 = vpop.eup %12064 }
0x4645   :  { %v9107_v6 = vsel %vm743_vm1, %v12065_v8, 0.0 }
0x4646   :  { %9108 = vadd.xlane.f32.xlu1 %v9107_v6  ;;  %v9776_v6 = vld [vmem:[#allocation41 + $0x30] sm:$0xff] }
0x4657   :  { %9265 = vrot.lane.b32.xlu1 %v14610_v35, %s12844_s7 }
0x4664   :  { %v9018_v17 = vpop.f32.mrf.mxu1 }
0x4665   :  { %v9022_v21 = vadd.f32 %v10394_v20, %v9018_v17  ;;  %v9774_v17 = vld [vmem:[#allocation41 + $0x20] sm:$0xff] }
0x4666   :  { %v11677_v61 = vpop.f32.mrf.mxu1 }
0x4667   :  { %v10422_v61 = vld [vmem:[%s14789_s21 + $0x78] sm:$0xff] }
0x46cf   :  { %v9109_v62 = vpop.xlane.xlu1 %9108 }
0x46d0   :  { %12066 = vrcp.f32 %v9109_v62  ;;  %v10421_v62 = vld [vmem:[%s14789_s21 + $0x70] sm:$0xff] }
0x46d3   :  { %v9266_v63 = vpop.permute.xlu1 %9265 }
0x46dd   :  { %v12067_v33 = vpop.eup %12066 }
0x46de   :  { %v9111_v30 = vmul.f32 %v12067_v33, %v12065_v8  ;;  %v9777_v8 = vld [vmem:[#allocation41 + $0x38] sm:$0xff] }
0x46df   :  { %v10420_v33 = vld [vmem:[%s14789_s21 + $0x68] sm:$0xff] }
0x46e0   :  { %11686 = vmatmul.mubr.msk.f32.vlgmr.msra.gmra.mxu1 %vm743_vm1, %v9111_v30  ;;  %v10419_v30 = vld [vmem:[%s14789_s21 + $0x60] sm:$0xff] }
0x46e1   :  { %11694 = vmatpush3.xpose.msk.msra.mxu1 %vm743_vm1, %v9266_v63  ;;  %11695 = vmatprep.mubr.msk.f32.mxu1 %vm12852_vm3, %v12851_v15  ;;  %v10418_v63 = vld [vmem:[%s14789_s21 + $0x58] sm:$0xff] }
0x46e2   :  { %11703 = vmatprep.subr.mxu1 %v12851_v15 }
0x46e4   :  { %11696 = vmatmul.mubr.msk.f32.vlgmr.msra.gmra.mxu1 %vm743_vm1, %v9264_v48 }
0x46e5   :  { %11705 = vmatprep.mubr.msk.f32.mxu1 %vm12852_vm3, %v12851_v15  ;;  %11704 = vmatpush3.msra.mxu1 %v8777_v59 }
0x46e6   :  { %11713 = vmatprep.subr.mxu1 %v12851_v15 }
0x47a0   :  { %v9185_v54 = vpop.f32.mrf.mxu1 }
0x47a1   :  { %11691 = vmatmul.mubr.msk.f32.vlgmr.msra.gmra.mxu0 %vm743_vm1, %v9185_v54 }
0x47a2   :  { %v11687_v1 = vpop.f32.mrf.mxu1  ;;  %11700 = vmatprep.mubr.msk.f32.mxu0 %vm12852_vm3, %v12851_v15 }
0x47a4   :  { %v9337_v56 = vpop.f32.mrf.mxu1 }
0x47a5   :  { %v9341_v2 = vsel %vm743_vm1, %v9337_v56, -inf }
0x47a6   :  { %9342 = vmax.xlane.f32.xlu0 %v9341_v2  ;;  %v11697_v3 = vpop.f32.mrf.mxu1 }
0x47a7   :  { %v10412_v3 = vld [vmem:[#allocation40 + $0x1] ss:$0 sm:$0xff] }
0x47bc   :  { %9352 = vrot.lane.b32.xlu0 %v14608_v37, %s12845_s10 }
0x47c0   :  { %9502 = vrot.lane.b32.xlu0 %v14610_v35, %s12848_s4 }
0x482f   :  { %v9343_v28 = vpop.xlane.xlu0 %9342 }
0x4830   :  { %v9344_v4 = vsub.f32 %v9337_v56, %v9343_v28  ;;  %v10411_v56 = vld [vmem:[#allocation38 + $0x1] ss:$0 sm:$0xff] }
0x4832   :  { %v9345_v5 = vmul.f32 1.442695, %v9344_v4 }
0x4833   :  { %v9353_v22 = vpop.permute.xlu0 %9352 }
0x4834   :  { %12068 = vpow2.f32 %v9345_v5  ;;  %11699 = vmatpush3.msra.mxu0 %v9353_v22  ;;  %v10417_v5 = vld [vmem:[%s14789_s21 + $0x50] sm:$0xff]  ;;  %v10416_v22 = vld [vmem:[%s14789_s21 + $0x48] sm:$0xff] }
0x4835   :  { %11708 = vmatprep.subr.mxu0 %v12851_v15 }
0x4837   :  { %v9503_v55 = vpop.permute.xlu0 %9502 }
0x4841   :  { %v12069_v9 = vpop.eup %12068 }
0x4842   :  { %v9347_v10 = vsel %vm743_vm1, %v12069_v9, 0.0 }
0x4843   :  { %9348 = vadd.xlane.f32.xlu1 %v9347_v10  ;;  %v10413_v10 = vld [vmem:[#allocation43 + $0x1] ss:$0 sm:$0xff] }
0x4854   :  { %9504 = vrot.lane.b32.xlu1 %v14610_v35, %s12847_s20 }
0x4861   :  { %v9258_v24 = vpop.f32.mrf.mxu0 }
0x4862   :  { %v9262_v52 = vadd.f32 %v9258_v24, %v9022_v21 }
0x4863   :  { %v11692_v16 = vpop.f32.mrf.mxu0 }
0x48cc   :  { %v9349_v44 = vpop.xlane.xlu1 %9348 }
0x48cd   :  { %12070 = vrcp.f32 %v9349_v44  ;;  %v10424_v44 = vld [vmem:[#allocation44 + $0x1] ss:$0 sm:$0xff] }
0x48d0   :  { %v9505_v27 = vpop.permute.xlu1 %9504 }
0x48da   :  { %v12071_v26 = vpop.eup %12070 }
0x48db   :  { %v9351_v7 = vmul.f32 %v12071_v26, %v12069_v9  ;;  %v10415_v9 = vld [vmem:[%s14789_s21 + $0x40] sm:$0xff] }
0x48dd   :  { %11701 = vmatmul.mubr.msk.f32.vlgmr.msra.gmra.mxu0 %vm743_vm1, %v9351_v7 }
0x48de   :  { %11709 = vmatpush3.xpose.msk.msra.mxu0 %vm743_vm1, %v9505_v27  ;;  %11710 = vmatprep.mubr.msk.f32.mxu0 %vm12852_vm3, %v12851_v15 }
0x48df   :  { %11718 = vmatprep.subr.mxu0 %v12851_v15 }
0x48e1   :  { %11711 = vmatmul.mubr.msk.f32.vlgmr.msra.gmra.mxu0 %vm743_vm1, %v9503_v55 }
0x48e2   :  { %11720 = vmatprep.mubr.msk.f32.mxu0 %vm12852_vm3, %v12851_v15  ;;  %11719 = vmatpush3.msra.mxu0 %v8778_v42 }
0x48e3   :  { %11734 = vmatprep.subr.mxu0 %v12851_v15 }
0x499d   :  { %v9424_v32 = vpop.f32.mrf.mxu0 }
0x499e   :  { %11706 = vmatmul.mubr.msk.f32.vlgmr.msra.gmra.mxu1 %vm743_vm1, %v9424_v32 }
0x499f   :  { %v11702_v31 = vpop.f32.mrf.mxu0  ;;  %11715 = vmatprep.mubr.msk.f32.mxu1 %vm12852_vm3, %v12851_v15 }
0x49a1   :  { %v9576_v13 = vpop.f32.mrf.mxu0 }
0x49a2   :  { %v9580_v35 = vsel %vm743_vm1, %v9576_v13, -inf }
0x49a3   :  { %9581 = vmax.xlane.f32.xlu1 %v9580_v35  ;;  %v11712_v46 = vpop.f32.mrf.mxu0 }
0x4a2c   :  { %v9582_v36 = vpop.xlane.xlu1 %9581 }
0x4a2d   :  { %v9583_v38 = vsub.f32 %v9576_v13, %v9582_v36 }
0x4a2f   :  { %v9584_v23 = vmul.f32 1.442695, %v9583_v38 }
0x4a31   :  { %12072 = vpow2.f32 %v9584_v23  ;;  %v10425_v23 = vld [vmem:[#allocation46 + $0x1] ss:$0 sm:$0xff] }
0x4a3e   :  { %v12073_v29 = vpop.eup %12072 }
0x4a3f   :  { %v9586_v40 = vsel %vm743_vm1, %v12073_v29, 0.0 }
0x4a40   :  { %9587 = vadd.xlane.f32.xlu0 %v9586_v40  ;;  %v10426_v40 = vld [vmem:[#allocation47 + $0x1] ss:$0 sm:$0xff] }
0x4a56   :  { %9591 = vrot.lane.b32.xlu0 %v14608_v37, %s12848_s4 }
0x4a5e   :  { %v9497_v19 = vpop.f32.mrf.mxu1 }
0x4a5f   :  { %v9501_v11 = vadd.f32 %v9497_v19, %v9262_v52 }
0x4a60   :  { %v11707_v45 = vpop.f32.mrf.mxu1 }
0x4ac9   :  { %v9588_v12 = vpop.xlane.xlu0 %9587 }
0x4aca   :  { %12074 = vrcp.f32 %v9588_v12 }
0x4acd   :  { %v9592_v47 = vpop.permute.xlu0 %9591 }
0x4ace   :  { %11714 = vmatpush3.msra.mxu1 %v9592_v47 }
0x4acf   :  { %11723 = vmatprep.subr.mxu1 %v12851_v15 }
0x4ad7   :  { %v12075_v49 = vpop.eup %12074 }
0x4ad8   :  { %v9590_v39 = vmul.f32 %v12075_v49, %v12073_v29 }
0x4ada   :  { %11716 = vmatmul.mubr.msk.f32.vlgmr.msra.gmra.mxu1 %vm743_vm1, %v9590_v39 }
0x4adb   :  { %11731 = vmatprep.mubr.msk.f32.mxu1 %vm12852_vm3, %v12851_v15  ;;  %11724 = vmatpush3.msra.mxu1 %v9777_v8 }
0x4adc   :  { %11725 = vmatprep.subr.mxu1 %v12851_v15 }
0x4add   :  { %11726 = vmatpush3.msra.mxu1 %v9776_v6 }
0x4ade   :  { %11727 = vmatprep.subr.mxu1 %v12851_v15 }
0x4b9a   :  { %v9663_v37 = vpop.f32.mrf.mxu1 }
0x4b9b   :  { %11721 = vmatmul.mubr.msk.f32.vlgmr.msra.gmra.mxu0 %vm743_vm1, %v9663_v37 }
0x4b9c   :  { %v11717_v14 = vpop.f32.mrf.mxu1  ;;  %11750 = vmatprep.mubr.msk.f32.mxu0 %vm12852_vm3, %v12851_v15  ;;  %11735 = vmatpush3.msra.mxu0 %v10422_v61 }
0x4b9d   :  { %11736 = vmatprep.subr.mxu0 %v12851_v15 }
0x4b9e   :  { %11737 = vmatpush3.msra.mxu0 %v10421_v62 }
0x4b9f   :  { %11738 = vmatprep.subr.mxu0 %v12851_v15 }
0x4ba0   :  { %11739 = vmatpush3.msra.mxu0 %v10420_v33 }
0x4ba1   :  { %11740 = vmatprep.subr.mxu0 %v12851_v15 }
0x4ba2   :  { %11741 = vmatpush3.msra.mxu0 %v10419_v30 }
0x4ba3   :  { %11742 = vmatprep.subr.mxu0 %v12851_v15 }
0x4ba4   :  { %11743 = vmatpush3.msra.mxu0 %v10418_v63 }
0x4ba5   :  { %11744 = vmatprep.subr.mxu0 %v12851_v15 }
0x4ba6   :  { %11745 = vmatpush3.msra.mxu0 %v10417_v5 }
0x4ba7   :  { %11746 = vmatprep.subr.mxu0 %v12851_v15 }
0x4ba8   :  { %11747 = vmatpush3.msra.mxu0 %v10416_v22 }
0x4ba9   :  { %11748 = vmatprep.subr.mxu0 %v12851_v15 }
0x4baa   :  { %11749 = vmatpush3.msra.mxu0 %v10415_v9 }
0x4c5b   :  { %v9736_v50 = vpop.f32.mrf.mxu0 }
0x4c5c   :  { %v9740_v53 = vadd.f32 %v9736_v50, %v9501_v11 }
0x4c5d   :  { %v11722_v51 = vpop.f32.mrf.mxu0 }
0x4c5e   :  { %v9741_v41 = vadd.f32 %v9740_v53, %v14597_v60  ;;  %v9775_v60 = vld [vmem:[#allocation41 + $0x28] sm:$0xff]  ;;  %v10427_v51 = vld [vmem:[%s13072_s19] ss:$0 sm:$0xff] }
0x4c5f   :  { %11728 = vmatpush3.msra.mxu1 %v9775_v60 }
0x4c60   :  { %v9746_v25 = vsel %vm621_vm0, %v9741_v41, 0.0  ;;  %11729 = vmatprep.subr.mxu1 %v12851_v15 }
0x4c61   :  { %9747 = vadd.xlane.f32.xlu1 %v9746_v25  ;;  %11730 = vmatpush3.msra.mxu1 %v9774_v17  ;;  %v10428_v25 = vld [vmem:[#allocation49] ss:$0 sm:$0xff] }
0x4cea   :  { %v9748_v58 = vpop.xlane.xlu1 %9747 }
0x4ceb   :  { %v9749_v43 = vmul.f32 0.03125, %v9748_v58 }
0x4ced   :  { %v9750_v18 = vsub.f32 %v9741_v41, %v9749_v43 }
0x4cef   :  { %v9751_v34 = vmul.f32 %v9750_v18, %v9750_v18 }
0x4cf1   :  { %v9752_v57 = vsel %vm621_vm0, %v9751_v34, 0.0 }
0x4cf2   :  { %9753 = vadd.xlane.f32.xlu1 %v9752_v57 }
0x4d7b   :  { %v9754_v48 = vpop.xlane.xlu1 %9753 }
0x4d7c   :  { %v9755_v0 = vmul.f32 0.03125, %v9754_v48 }
0x4d7e   :  { %v9756_v54 = vadd.f32 1e-05, %v9755_v0 }
0x4d80   :  { %12076 = vrsqrt.f32 %v9756_v54 }
0x4d8d   :  { %v12077_v1 = vpop.eup %12076 }
0x4d8e   :  { %v9758_v2 = vmul.f32 %v12077_v1, %v9750_v18 }
0x4d90   :  { %v9765_v28 = vmul.f32 %v10411_v56, %v9758_v2 }
0x4d92   :  { %v9772_v4 = vadd.f32 %v10412_v3, %v9765_v28 }
0x4d94   :  { %11732 = vmatmul.mubr.msk.f32.vlgmr.msra.gmra.mxu1 %vm621_vm0, %v9772_v4 }
0x4e54   :  { %v9855_v20 = vpop.f32.mrf.mxu1 }
0x4e55   :  { %v9856_v21 = vadd.f32 %v10413_v10, %v9855_v20 }
0x4e56   :  { %v11733_v24 = vpop.f32.mrf.mxu1 }
0x4e57   :  { %v9859_v52 = vmax.f32 %v9856_v21, 0.0 }
0x4e59   :  { %11751 = vmatmul.mubr.msk.f32.vlgmr.msra.gmra.mxu0 %vm2411_vm2, %v9859_v52 }
0x4f19   :  { %v9938_v16 = vpop.f32.mrf.mxu0 }
0x4f1a   :  { %v9942_v26 = vadd.f32 %v9938_v16, %v9772_v4 }
0x4f1b   :  { %v11752_v7 = vpop.f32.mrf.mxu0 }
0x4f1c   :  { %v9951_v27 = vadd.f32 %v10424_v44, %v9942_v26 }
0x4f1e   :  { %v9956_v55 = vsel %vm621_vm0, %v9951_v27, 0.0 }
0x4f1f   :  { %9957 = vadd.xlane.f32.xlu1 %v9956_v55 }
0x4fa8   :  { %v9958_v59 = vpop.xlane.xlu1 %9957 }
0x4fa9   :  { %v9959_v32 = vmul.f32 0.03125, %v9958_v59 }
0x4fab   :  { %v9960_v31 = vsub.f32 %v9951_v27, %v9959_v32 }
0x4fad   :  { %v9961_v15 = vmul.f32 %v9960_v31, %v9960_v31 }
0x4faf   :  { %v9962_v13 = vsel %vm621_vm0, %v9961_v15, 0.0 }
0x4fb0   :  { %9963 = vadd.xlane.f32.xlu1 %v9962_v13 }
0x5039   :  { %v9964_v35 = vpop.xlane.xlu1 %9963 }
0x503a   :  { %v9965_v46 = vmul.f32 0.03125, %v9964_v35 }
0x503c   :  { %v9966_v36 = vadd.f32 1e-05, %v9965_v46 }
0x503e   :  { %12078 = vrsqrt.f32 %v9966_v36 }
0x504b   :  { %v12079_v38 = vpop.eup %12078 }
0x504c   :  { %v9968_v29 = vmul.f32 %v12079_v38, %v9960_v31 }
0x504e   :  { %v9975_v42 = vmul.f32 %v10425_v23, %v9968_v29 }
0x5050   :  { %v9982_v19 = vadd.f32 %v10426_v40, %v9975_v42 }
0x5052   :  { %v9985_v11 = vsel %vm621_vm0, %v9982_v19, 0.0 }
0x5053   :  { %9986 = vadd.xlane.f32.xlu1 %v9985_v11 }
0x50dc   :  { %v9987_v45 = vpop.xlane.xlu1 %9986 }
0x50dd   :  { %v9988_v12 = vmul.f32 0.03125, %v9987_v45 }
0x50df   :  { %v9989_v47 = vsub.f32 %v9982_v19, %v9988_v12 }
0x50e1   :  { %v9990_v49 = vmul.f32 %v9989_v47, %v9989_v47 }
0x50e3   :  { %v9991_v39 = vsel %vm621_vm0, %v9990_v49, 0.0 }
0x50e4   :  { %9992 = vadd.xlane.f32.xlu0 %v9991_v39 }
0x516d   :  { %v9993_v37 = vpop.xlane.xlu0 %9992 }
0x516e   :  { %v9994_v14 = vmul.f32 0.03125, %v9993_v37 }
0x5170   :  { %v9995_v50 = vadd.f32 1e-05, %v9994_v14 }
0x5172   :  { %12080 = vrsqrt.f32 %v9995_v50 }
0x517f   :  { %v12081_v53 = vpop.eup %12080 }
0x5180   :  { %v9997_v41 = vmul.f32 %v12081_v53, %v9989_v47 }
0x5182   :  { %v10004_v58 = vmul.f32 %v10427_v51, %v9997_v41 }
0x5184   :  { %v10011_v43 = vadd.f32 %v10428_v25, %v10004_v58 }
0x5186   :  { %10012 = vst.msk [vmem:[#allocation50] sm:$0xff] %vm621_vm0, %v10011_v43 }
0x5187   :  { %12718 = shalt.err (!%p12715_p5)
}
0x5188   :  { %10022 = dma.vmem_to_hbm [thread:$0]  %s10020_s28, 128, %s13082_s3, [#allocation4]  }
0x5189   :  { %12759 = dma.done.wait [#allocation4], 128  }
0x518a   :  { %12760 = vsyncadd [#allocation4], 4294967168 }
0x518b   :  { %10026 = vsyncpa [#allocation3], 1 }
0x518c   :  { %10027 = vsyncpa [#allocation6], 1 }
0x518d   :  { %10028 = vsyncpa [#allocation9], 1 }
0x518e   :  { %10029 = vsyncpa [#allocation12], 1 }
0x518f   :  { %10030 = vsyncpa [#allocation15], 1 }
0x5190   :  { %10031 = vsyncpa [#allocation18], 1 }
0x5191   :  { %10032 = vsyncpa [#allocation21], 1 }
0x5192   :  { %10033 = vsyncpa [#allocation24], 1 }
0x5193   :  { %10034 = vsyncpa [#allocation27], 1 }
0x5194   :  { %10035 = vsyncpa [#allocation30], 1 }
0x5195   :  { %10036 = vsyncpa [#allocation33], 1 }
0x5196   :  { %10037 = vsyncpa [#allocation36], 1 }
0x5197   :  { %10038 = vsyncpa [#allocation39], 1 }
0x5198   :  { %10039 = vsyncpa [#allocation42], 1 }
0x5199   :  { %10040 = vsyncpa [#allocation45], 1 }
0x519a   :  { %10041 = vsyncpa [#allocation48], 1 }
0x519b   :  { %10042 = vsyncpa [#allocation4], 1 }

</bundles_post_ra>
